<compile_context>
chip_gen: v5e
topology: v5e:2x2
jax: 0.10.0
libtpu: 0.0.40
codegen_flags: <defaults>
</compile_context>

<pallas_src>
import functools

import jax
import jax.numpy as jnp
from jax.experimental import pallas as pl
from jax.experimental.pallas import tpu as pltpu

EPS = 1e-5        # PyTorch BatchNorm2d default
LANES = 128       # TPU lane width


def _rup(x, m=LANES):
    return ((x + m - 1) // m) * m


def _pad_last(a, size):
    if a.shape[-1] == size:
        return a
    return jnp.pad(a, [(0, 0)] * (a.ndim - 1) + [(0, size - a.shape[-1])])


def _vmem_limit_bytes():
    """Per-generation scoped-VMEM budget: ~48 MiB on v7x (64 MiB physical),
    ~96 MiB on v5e/v6e (128 MiB physical).  Falls back to 48 MiB (safe everywhere)."""
    try:
        cap = getattr(pltpu.get_tpu_info(), "vmem_capacity_bytes", None)
        if cap:
            return int(max(min(cap * 3 // 4, 100 * 1024 * 1024), 32 * 1024 * 1024))
    except Exception:
        pass
    return 48 * 1024 * 1024


def _cparams(vmem_limit):
    # Batch is the only grid axis; image blocks are independent -> "parallel"
    # (shards across both TensorCores on v7x; harmless on v5e/v6e).
    return pltpu.CompilerParams(
        dimension_semantics=("parallel",),
        vmem_limit_bytes=int(vmem_limit),
    )


# ----------------------------- fused 3x3 conv block ------------------------------- #

def _conv_block(x, w, *, stride, ho, wo, scale_in=None, shift_in=None,
                w_proj=None, b_proj=None, vmem_limit):
    """3x3 conv (padding=1, stride `stride`) as 9 accumulating MXU GEMMs on a
    zero-initialized, spatially+channel padded VMEM scratch.

      x         : (N, Hi, Wi, C)   activation, native (unpadded) channel count
      w         : (3, 3, Ck, Co_p) bf16 weights, Ck/Co_p padded to 128 multiples
      scale_in/shift_in : optional (1, C) f32 -> input mapped through
                  relu(x*scale + shift) first (fused bn1+relu for conv2)
      w_proj/b_proj     : optional (Ck, Co_p) bf16 / (1, Co_p) f32 -> also emit the
                  1x1-conv skip projection of the (strided) raw input

    Returns y (N, Ho*Wo, Co_p) bf16 raw conv output, s1/s2 (N, 1, Co_p) f32 per-image
    BN partial sums, and (if w_proj) skip (N, Ho*Wo, Co_p) bf16.
    """
    n, hi, wi, c = x.shape
    ck, cout_p = int(w.shape[2]), int(w.shape[3])
    assert ck >= c and ck % LANES == 0 and cout_p % LANES == 0
    has_bn_in = scale_in is not None
    has_proj = w_proj is not None
    assert not (has_bn_in and has_proj)

    m = ho * wo
    hpad = hi + 2          # 1-row halo top/bottom (leading, untiled dim)
    wpad = wi + 16         # 8-col left halo (sublane aligned) + >=1 col right slack

    def kernel(*refs):
        it = iter(refs)
        x_ref = next(it)
        w_ref = next(it)
        sc_ref = next(it) if has_bn_in else None
        sh_ref = next(it) if has_bn_in else None
        wproj_ref = next(it) if has_proj else None
        bproj_ref = next(it) if has_proj else None
        y_ref = next(it)
        s1_ref = next(it)
        s2_ref = next(it)
        skip_ref = next(it) if has_proj else None
        xp_ref = next(it)      # (hpad, wpad, ck) bf16 padded-activation scratch
        acc_ref = next(it)     # (m, cout_p) f32 accumulator scratch

        # Zero the padded scratch every step: the halo and the channel padding must
        # be zero, and the scratch persists across grid steps (and per TensorCore).
        xp_ref[...] = jnp.zeros_like(xp_ref)

        xin = x_ref[0]                                   # (hi, wi, c)
        if has_bn_in:
            # Fused bn1 + relu on the raw conv1 output; exact batch stats were folded
            # into scale/shift by the wrapper.
            xin = jnp.maximum(
                xin.astype(jnp.float32) * sc_ref[...] + sh_ref[...], 0.0)
        xin = xin.astype(xp_ref.dtype)
        # Interior at rows [1, hi], cols [8, 8+wi): sublane-aligned, unmasked store.
        xp_ref[1:1 + hi, 8:8 + wi, 0:c] = xin

        # 9 accumulating MXU GEMMs over the 3x3 taps (K already zero-padded to ck).
        acc_ref[...] = jnp.zeros_like(acc_ref)
        for kh in range(3):
            for kw in range(3):
                if stride == 1:
                    win = xp_ref[kh:kh + ho, 7 + kw:7 + kw + wo, :]
                else:
                    win = xp_ref[pl.ds(kh, ho, stride), pl.ds(7 + kw, wo, stride), :]
                acc_ref[...] += jnp.dot(win.reshape(m, ck), w_ref[kh, kw],
                                        preferred_element_type=jnp.float32)

        acc = acc_ref[...]
        # Raw conv output in bf16 (halves HBM traffic); BN statistics come from the
        # f32 accumulator so batch stats stay exact under the bf16 storage.
        y_ref[0] = acc.astype(y_ref.dtype)
        s1_ref[0] = jnp.sum(acc, axis=0, keepdims=True)
        s2_ref[0] = jnp.sum(acc * acc, axis=0, keepdims=True)

        if has_proj:
            # Fused 1x1 skip projection: the (strided) raw input is already resident
            # in the padded scratch; write the skip tensor once, in bf16.
            if stride == 1:
                xs = xp_ref[1:1 + ho, 8:8 + wo, :]
            else:
                xs = xp_ref[pl.ds(1, ho, stride), pl.ds(8, wo, stride), :]
            sk = jnp.dot(xs.reshape(m, ck), wproj_ref[...],
                         preferred_element_type=jnp.float32) + bproj_ref[...]
            skip_ref[0] = sk.astype(skip_ref.dtype)

    operands = [x, w]
    in_specs = [
        pl.BlockSpec((1, hi, wi, c), lambda i: (i, 0, 0, 0)),
        # Grid-invariant weights: constant index_map keeps them resident in VMEM.
        pl.BlockSpec((3, 3, ck, cout_p), lambda i: (0, 0, 0, 0)),
    ]
    if has_bn_in:
        operands += [scale_in, shift_in]
        in_specs += [pl.BlockSpec((1, c), lambda i: (0, 0)),
                     pl.BlockSpec((1, c), lambda i: (0, 0))]
    if has_proj:
        operands += [w_proj, b_proj]
        in_specs += [pl.BlockSpec((ck, cout_p), lambda i: (0, 0)),
                     pl.BlockSpec((1, cout_p), lambda i: (0, 0))]

    out_shape = [jax.ShapeDtypeStruct((n, m, cout_p), jnp.bfloat16),
                 jax.ShapeDtypeStruct((n, 1, cout_p), jnp.float32),
                 jax.ShapeDtypeStruct((n, 1, cout_p), jnp.float32)]
    out_specs = [pl.BlockSpec((1, m, cout_p), lambda i: (i, 0, 0)),
                 pl.BlockSpec((1, 1, cout_p), lambda i: (i, 0, 0)),
                 pl.BlockSpec((1, 1, cout_p), lambda i: (i, 0, 0))]
    if has_proj:
        out_shape.append(jax.ShapeDtypeStruct((n, m, cout_p), jnp.bfloat16))
        out_specs.append(pl.BlockSpec((1, m, cout_p), lambda i: (i, 0, 0)))

    return pl.pallas_call(
        kernel,
        grid=(n,),
        in_specs=in_specs,
        out_specs=out_specs,
        out_shape=tuple(out_shape),
        scratch_shapes=[pltpu.VMEM((hpad, wpad, ck), jnp.bfloat16),
                        pltpu.VMEM((m, cout_p), jnp.float32)],
        compiler_params=_cparams(vmem_limit),
    )(*operands)


# --------------------------- final fused elementwise pass -------------------------- #

def _bn_add_relu_kernel(y_ref, sc_ref, sh_ref, skip_ref, o_ref):
    """out = relu(y*scale + shift + skip)  (bn2 folded into scale/shift)."""
    z = y_ref[0].astype(jnp.float32) * sc_ref[...] + sh_ref[...]
    o_ref[0] = jnp.maximum(z + skip_ref[0].astype(jnp.float32), 0.0).astype(o_ref.dtype)


def _bn_add_relu(y, scale, shift, skip, vmem_limit):
    n, m, cp = y.shape
    return pl.pallas_call(
        _bn_add_relu_kernel,
        grid=(n,),
        in_specs=[pl.BlockSpec((1, m, cp), lambda i: (i, 0, 0)),
                  pl.BlockSpec((1, cp), lambda i: (0, 0)),
                  pl.BlockSpec((1, cp), lambda i: (0, 0)),
                  pl.BlockSpec((1, m, cp), lambda i: (i, 0, 0))],
        out_specs=pl.BlockSpec((1, m, cp), lambda i: (i, 0, 0)),
        out_shape=jax.ShapeDtypeStruct((n, m, cp), jnp.float32),
        compiler_params=_cparams(vmem_limit),
    )(y, scale, shift, skip)


def _bn_add_identity_relu_kernel(y_ref, sc_ref, sh_ref, x_ref, o_ref):
    """bn2 + identity-skip add + relu; reads the original x directly (no skip copy)."""
    cin = x_ref.shape[-1]
    z = y_ref[0].astype(jnp.float32) * sc_ref[...] + sh_ref[...]
    xv = x_ref[0].astype(jnp.float32).reshape(-1, cin)
    o_ref[0] = jnp.maximum(z[:, :cin] + xv, 0.0).astype(o_ref.dtype)


def _bn_add_identity_relu(y, scale, shift, x, cout, vmem_limit):
    n, m, cp = y.shape
    _, hi, wi, cin = x.shape
    return pl.pallas_call(
        _bn_add_identity_relu_kernel,
        grid=(n,),
        in_specs=[pl.BlockSpec((1, m, cp), lambda i: (i, 0, 0)),
                  pl.BlockSpec((1, cp), lambda i: (0, 0)),
                  pl.BlockSpec((1, cp), lambda i: (0, 0)),
                  pl.BlockSpec((1, hi, wi, cin), lambda i: (i, 0, 0, 0))],
        out_specs=pl.BlockSpec((1, m, cout), lambda i: (i, 0, 0)),
        out_shape=jax.ShapeDtypeStruct((n, m, cout), jnp.float32),
        compiler_params=_cparams(vmem_limit),
    )(y, scale, shift, x)


# ------------------------------- BN statistics folding ----------------------------- #

def _fold_bn(s1, s2, gamma_p, beta_p, m_total):
    """Exact batch stats from per-image partial sums; fold BN into scale/shift.
    Variance uses E[x^2]-E[x]^2 in f32 (fine at these scales; clamp guards roundoff)."""
    tot1 = jnp.sum(s1, axis=(0, 1))                       # (Cout_p,)
    tot2 = jnp.sum(s2, axis=(0, 1))
    mean = tot1 / m_total
    var = jnp.maximum(tot2 / m_total - mean * mean, 0.0)  # biased var (training mode)
    scale = gamma_p * jax.lax.rsqrt(var + EPS)
    shift = beta_p - mean * scale
    return (scale.reshape(1, -1).astype(jnp.float32),
            shift.reshape(1, -1).astype(jnp.float32))


# ------------------------------------- forward ------------------------------------- #

def residual_forward(x_nhwc, params, *, strides=1, use_1x1conv=False):
    """Residual block forward.  x_nhwc: (N, H, W, Cin) f32 -> (N, Ho, Wo, Cout) f32."""
    n, h, w, cin = x_nhwc.shape
    cout = params["w1"].shape[0]
    if not use_1x1conv:
        assert cin == cout and strides == 1, \
            "identity skip requires Cin == Cout and strides == 1"

    cin_k = _rup(cin)          # GEMM K for conv1 / the 1x1 projection (VMEM-side only)
    cout_p = _rup(cout)        # GEMM N (and K for conv2)
    ho = (h + 2 - 3) // strides + 1
    wo = (w + 2 - 3) // strides + 1
    m_total = n * ho * wo
    vmem_limit = _vmem_limit_bytes()

    # ---- operand prep (weights are tiny; padded/cast in the wrapper) ----
    def prep_w3x3(w_oihw, k_pad):                # (O, I, 3, 3) -> (3, 3, K_p, O_p) bf16
        wt = jnp.transpose(w_oihw, (2, 3, 1, 0))
        wt = jnp.pad(wt, ((0, 0), (0, 0),
                          (0, k_pad - wt.shape[2]), (0, cout_p - wt.shape[3])))
        return wt.astype(jnp.bfloat16)

    w1p = prep_w3x3(params["w1"], cin_k)
    w2p = prep_w3x3(params["w2"], cout_p)
    g1p = _pad_last(params["g1"].astype(jnp.float32), cout_p)
    be1p = _pad_last(params["be1"].astype(jnp.float32), cout_p)
    g2p = _pad_last(params["g2"].astype(jnp.float32), cout_p)
    be2p = _pad_last(params["be2"].astype(jnp.float32), cout_p)

    # ---- conv1 (+ fused 1x1 skip projection).  Conv biases b1/b2 are dropped:
    #      BatchNorm's mean subtraction cancels a per-channel constant exactly. ----
    if use_1x1conv:
        w3p = jnp.pad(params["w3"][:, :, 0, 0].T,
                      ((0, cin_k - cin), (0, cout_p - cout))).astype(jnp.bfloat16)
        b3p = _pad_last(params["b3"].astype(jnp.float32), cout_p).reshape(1, -1)
        y1, s1a, s2a, skip = _conv_block(
            x_nhwc, w1p, stride=strides, ho=ho, wo=wo,
            w_proj=w3p, b_proj=b3p, vmem_limit=vmem_limit)
    else:
        y1, s1a, s2a = _conv_block(
            x_nhwc, w1p, stride=strides, ho=ho, wo=wo, vmem_limit=vmem_limit)
        skip = None
    sc1, sh1 = _fold_bn(s1a, s2a, g1p, be1p, m_total)

    # ---- conv2 with bn1 + relu fused into its input stage (reads the raw bf16 y1) ----
    y1_img = y1.reshape(n, ho, wo, cout_p)       # free row-major reshape, no copy
    y2, s1b, s2b = _conv_block(
        y1_img, w2p, stride=1, ho=ho, wo=wo,
        scale_in=sc1, shift_in=sh1, vmem_limit=vmem_limit)
    sc2, sh2 = _fold_bn(s1b, s2b, g2p, be2p, m_total)

    # ---- bn2 + skip add + relu in one lane-dense elementwise pass ----
    if use_1x1conv:
        out = _bn_add_relu(y2, sc2, sh2, skip, vmem_limit)
        return out.reshape(n, ho, wo, cout_p)[:, :, :, :cout]
    out = _bn_add_identity_relu(y2, sc2, sh2, x_nhwc, cout, vmem_limit)
    return out.reshape(n, ho, wo, cout)


# --------------------------------- pure-JAX reference ------------------------------ #

def residual_reference(x_nhwc, params, *, strides=1, use_1x1conv=False):
    def conv(x, w_oihw, b, stride, pad):
        w_hwio = jnp.transpose(w_oihw, (2, 3, 1, 0))
        y = jax.lax.conv_general_dilated(
            x, w_hwio, (stride, stride), [(pad, pad), (pad, pad)],
            dimension_numbers=("NHWC", "HWIO", "NHWC"))
        return y + b.reshape(1, 1, 1, -1)

    def bn(x, g, b):
        mean = jnp.mean(x, axis=(0, 1, 2), keepdims=True)
        var = jnp.mean((x - mean) ** 2, axis=(0, 1, 2), keepdims=True)
        return (x - mean) * jax.lax.rsqrt(var + EPS) * g.reshape(1, 1, 1, -1) \
            + b.reshape(1, 1, 1, -1)

    y = jax.nn.relu(bn(conv(x_nhwc, params["w1"], params["b1"], strides, 1),
                       params["g1"], params["be1"]))
    y = bn(conv(y, params["w2"], params["b2"], 1, 1), params["g2"], params["be2"])
    if use_1x1conv:
        x_nhwc = conv(x_nhwc, params["w3"], params["b3"], strides, 0)
    return jax.nn.relu(y + x_nhwc)


# ---------------------------------------- main ------------------------------------- #

if __name__ == "__main__":
    key = jax.random.PRNGKey(0)
    N, Cin, H, W = 2, 4, 16, 16
    Cout = 8
    strides = 1
    use_1x1conv = True  # channel count changes, so the 1x1 projection is needed

    ks = jax.random.split(key, 11)
    params = {
        "w1": 0.1 * jax.random.normal(ks[0], (Cout, Cin, 3, 3), jnp.float32),
        "b1": 0.1 * jax.random.normal(ks[1], (Cout,), jnp.float32),
        "w2": 0.1 * jax.random.normal(ks[2], (Cout, Cout, 3, 3), jnp.float32),
        "b2": 0.1 * jax.random.normal(ks[3], (Cout,), jnp.float32),
        "w3": 0.1 * jax.random.normal(ks[4], (Cout, Cin, 1, 1), jnp.float32),
        "b3": 0.1 * jax.random.normal(ks[5], (Cout,), jnp.float32),
        "g1": 1.0 + 0.1 * jax.random.normal(ks[6], (Cout,), jnp.float32),
        "be1": 0.1 * jax.random.normal(ks[7], (Cout,), jnp.float32),
        "g2": 1.0 + 0.1 * jax.random.normal(ks[8], (Cout,), jnp.float32),
        "be2": 0.1 * jax.random.normal(ks[9], (Cout,), jnp.float32),
    }

    # PyTorch-style NCHW input, transposed to NHWC for the TPU kernels.
    x_nchw = jax.random.normal(ks[10], (N, Cin, H, W), jnp.float32)
    x_nhwc = jnp.transpose(x_nchw, (0, 2, 3, 1))

    fwd = jax.jit(functools.partial(residual_forward, strides=strides,
                                    use_1x1conv=use_1x1conv))
    out = jax.block_until_ready(fwd(x_nhwc, params))

    ref = jax.block_until_ready(
        residual_reference(x_nhwc, params, strides=strides, use_1x1conv=use_1x1conv))

    assert out.shape == ref.shape, (out.shape, ref.shape)
    err = float(jnp.max(jnp.abs(out - ref)))
    # Tolerance sized for bf16 MXU operands AND bf16 storage of y1/y2/skip
    # (accumulation and all BN-statistics math remain f32).
    assert jnp.allclose(out, ref, atol=5e-2, rtol=5e-2), f"max abs err {err}"

    print("KERNEL_OK")
</pallas_src>

<mosaic_0001>
module attributes {stable_mosaic.version = 11 : i64} {
  func.func @kernel(%arg0: i32, %arg1: memref<1x16x16x128xbf16, #tpu.memory_space<vmem>>, %arg2: memref<3x3x128x128xbf16, #tpu.memory_space<vmem>>, %arg3: memref<1x128xf32, #tpu.memory_space<vmem>>, %arg4: memref<1x128xf32, #tpu.memory_space<vmem>>, %arg5: memref<1x256x128xbf16, #tpu.memory_space<vmem>>, %arg6: memref<1x1x128xf32, #tpu.memory_space<vmem>>, %arg7: memref<1x1x128xf32, #tpu.memory_space<vmem>>, %arg8: memref<18x32x128xbf16, #tpu.memory_space<vmem>>, %arg9: memref<256x128xf32, #tpu.memory_space<vmem>>) attributes {dimension_semantics = [#tpu.dimension_semantics<parallel>], iteration_bounds = array<i64: 2>, scalar_prefetch = 0 : i64, scratch_operands = 2 : i64, tpu.core_type = #tpu.core_type<tc>, window_params = [{transform_indices = @transform_0, window_bounds = array<i64: 1, 16, 16, 128>}, {pipeline_mode = #tpu.pipeline_mode<synchronous>, transform_indices = @transform_1, window_bounds = array<i64: 3, 3, 128, 128>}, {pipeline_mode = #tpu.pipeline_mode<synchronous>, transform_indices = @transform_2, window_bounds = array<i64: 1, 128>}, {pipeline_mode = #tpu.pipeline_mode<synchronous>, transform_indices = @transform_3, window_bounds = array<i64: 1, 128>}, {transform_indices = @transform_4, window_bounds = array<i64: 1, 256, 128>}, {transform_indices = @transform_5, window_bounds = array<i64: 1, 1, 128>}, {transform_indices = @transform_6, window_bounds = array<i64: 1, 1, 128>}]} {
    %cst = arith.constant 0.000000e+00 : bf16
    %0 = vector.broadcast %cst : bf16 to vector<18x32x128xbf16>
    %c0 = arith.constant 0 : index
    %c0_0 = arith.constant 0 : index
    %c0_1 = arith.constant 0 : index
    %1 = vector.load %arg8[%c0, %c0_0, %c0_1] : memref<18x32x128xbf16, #tpu.memory_space<vmem>>, vector<18x32x128xbf16>
    tpu.vector_store %arg8[%c0, %c0_0, %c0_1], %0 {strides = array<i32>} : memref<18x32x128xbf16, #tpu.memory_space<vmem>>, vector<18x32x128xbf16>,
    %c0_2 = arith.constant 0 : index
    %c0_3 = arith.constant 0 : index
    %c0_4 = arith.constant 0 : index
    %c0_5 = arith.constant 0 : index
    %2 = vector.load %arg1[%c0_2, %c0_3, %c0_4, %c0_5] : memref<1x16x16x128xbf16, #tpu.memory_space<vmem>>, vector<1x16x16x128xbf16>
    %3 = vector.shape_cast %2 : vector<1x16x16x128xbf16> to vector<16x16x128xbf16>
    %4 = arith.extf %3 : vector<16x16x128xbf16> to vector<16x16x128xf32>
    %c0_6 = arith.constant 0 : index
    %c0_7 = arith.constant 0 : index
    %5 = vector.load %arg3[%c0_6, %c0_7] : memref<1x128xf32, #tpu.memory_space<vmem>>, vector<1x128xf32>
    %6 = vector.shape_cast %5 : vector<1x128xf32> to vector<1x1x128xf32>
    %7 = vector.broadcast %6 : vector<1x1x128xf32> to vector<16x16x128xf32>
    %8 = arith.mulf %4, %7 : vector<16x16x128xf32>
    %c0_8 = arith.constant 0 : index
    %c0_9 = arith.constant 0 : index
    %9 = vector.load %arg4[%c0_8, %c0_9] : memref<1x128xf32, #tpu.memory_space<vmem>>, vector<1x128xf32>
    %10 = vector.shape_cast %9 : vector<1x128xf32> to vector<1x1x128xf32>
    %11 = vector.broadcast %10 : vector<1x1x128xf32> to vector<16x16x128xf32>
    %12 = arith.addf %8, %11 : vector<16x16x128xf32>
    %cst_10 = arith.constant 0.000000e+00 : f32
    %13 = vector.broadcast %cst_10 : f32 to vector<16x16x128xf32>
    %14 = arith.maximumf %12, %13 : vector<16x16x128xf32>
    %15 = arith.truncf %14 : vector<16x16x128xf32> to vector<16x16x128xbf16>
    %c1 = arith.constant 1 : index
    %c8 = arith.constant 8 : index
    %c0_11 = arith.constant 0 : index
    %16 = vector.load %arg8[%c1, %c8, %c0_11] : memref<18x32x128xbf16, #tpu.memory_space<vmem>>, vector<16x16x128xbf16>
    tpu.vector_store %arg8[%c1, %c8, %c0_11], %15 {strides = array<i32>} : memref<18x32x128xbf16, #tpu.memory_space<vmem>>, vector<16x16x128xbf16>,
    %cst_12 = arith.constant 0.000000e+00 : f32
    %17 = vector.broadcast %cst_12 : f32 to vector<256x128xf32>
    %c0_13 = arith.constant 0 : index
    %c0_14 = arith.constant 0 : index
    %18 = vector.load %arg9[%c0_13, %c0_14] : memref<256x128xf32, #tpu.memory_space<vmem>>, vector<256x128xf32>
    tpu.vector_store %arg9[%c0_13, %c0_14], %17 {strides = array<i32>} : memref<256x128xf32, #tpu.memory_space<vmem>>, vector<256x128xf32>,
    %c0_15 = arith.constant 0 : index
    %c7 = arith.constant 7 : index
    %c0_16 = arith.constant 0 : index
    %19 = vector.load %arg8[%c0_15, %c7, %c0_16] : memref<18x32x128xbf16, #tpu.memory_space<vmem>>, vector<16x16x128xbf16>
    %c0_17 = arith.constant 0 : index
    %c0_18 = arith.constant 0 : index
    %20 = vector.load %arg9[%c0_17, %c0_18] : memref<256x128xf32, #tpu.memory_space<vmem>>, vector<256x128xf32>
    %21 = vector.shape_cast %19 : vector<16x16x128xbf16> to vector<256x128xbf16>
    %c0_19 = arith.constant 0 : index
    %c0_20 = arith.constant 0 : index
    %c0_21 = arith.constant 0 : index
    %c0_22 = arith.constant 0 : index
    %22 = vector.load %arg2[%c0_19, %c0_20, %c0_21, %c0_22] : memref<3x3x128x128xbf16, #tpu.memory_space<vmem>>, vector<1x1x128x128xbf16>
    %23 = vector.shape_cast %22 : vector<1x1x128x128xbf16> to vector<128x128xbf16>
    %cst_23 = arith.constant dense<0.000000e+00> : vector<256x128xf32>
    %24 = tpu.matmul %21, %23, %cst_23 {dimension_numbers = #tpu.dot_dimension_numbers<[1], [0], [0], [1], [0, 0, 1, 1], [], []>} : vector<256x128xbf16>, vector<128x128xbf16>, vector<256x128xf32> -> vector<256x128xf32>
    %25 = arith.addf %20, %24 : vector<256x128xf32>
    %c0_24 = arith.constant 0 : index
    %c0_25 = arith.constant 0 : index
    %26 = vector.load %arg9[%c0_24, %c0_25] : memref<256x128xf32, #tpu.memory_space<vmem>>, vector<256x128xf32>
    tpu.vector_store %arg9[%c0_24, %c0_25], %25 {strides = array<i32>} : memref<256x128xf32, #tpu.memory_space<vmem>>, vector<256x128xf32>,
    %c0_26 = arith.constant 0 : index
    %c8_27 = arith.constant 8 : index
    %c0_28 = arith.constant 0 : index
    %27 = vector.load %arg8[%c0_26, %c8_27, %c0_28] : memref<18x32x128xbf16, #tpu.memory_space<vmem>>, vector<16x16x128xbf16>
    %c0_29 = arith.constant 0 : index
    %c0_30 = arith.constant 0 : index
    %28 = vector.load %arg9[%c0_29, %c0_30] : memref<256x128xf32, #tpu.memory_space<vmem>>, vector<256x128xf32>
    %29 = vector.shape_cast %27 : vector<16x16x128xbf16> to vector<256x128xbf16>
    %c0_31 = arith.constant 0 : index
    %c1_32 = arith.constant 1 : index
    %c0_33 = arith.constant 0 : index
    %c0_34 = arith.constant 0 : index
    %30 = vector.load %arg2[%c0_31, %c1_32, %c0_33, %c0_34] : memref<3x3x128x128xbf16, #tpu.memory_space<vmem>>, vector<1x1x128x128xbf16>
    %31 = vector.shape_cast %30 : vector<1x1x128x128xbf16> to vector<128x128xbf16>
    %cst_35 = arith.constant dense<0.000000e+00> : vector<256x128xf32>
    %32 = tpu.matmul %29, %31, %cst_35 {dimension_numbers = #tpu.dot_dimension_numbers<[1], [0], [0], [1], [0, 0, 1, 1], [], []>} : vector<256x128xbf16>, vector<128x128xbf16>, vector<256x128xf32> -> vector<256x128xf32>
    %33 = arith.addf %28, %32 : vector<256x128xf32>
    %c0_36 = arith.constant 0 : index
    %c0_37 = arith.constant 0 : index
    %34 = vector.load %arg9[%c0_36, %c0_37] : memref<256x128xf32, #tpu.memory_space<vmem>>, vector<256x128xf32>
    tpu.vector_store %arg9[%c0_36, %c0_37], %33 {strides = array<i32>} : memref<256x128xf32, #tpu.memory_space<vmem>>, vector<256x128xf32>,
    %c0_38 = arith.constant 0 : index
    %c9 = arith.constant 9 : index
    %c0_39 = arith.constant 0 : index
    %35 = vector.load %arg8[%c0_38, %c9, %c0_39] : memref<18x32x128xbf16, #tpu.memory_space<vmem>>, vector<16x16x128xbf16>
    %c0_40 = arith.constant 0 : index
    %c0_41 = arith.constant 0 : index
    %36 = vector.load %arg9[%c0_40, %c0_41] : memref<256x128xf32, #tpu.memory_space<vmem>>, vector<256x128xf32>
    %37 = vector.shape_cast %35 : vector<16x16x128xbf16> to vector<256x128xbf16>
    %c0_42 = arith.constant 0 : index
    %c2 = arith.constant 2 : index
    %c0_43 = arith.constant 0 : index
    %c0_44 = arith.constant 0 : index
    %38 = vector.load %arg2[%c0_42, %c2, %c0_43, %c0_44] : memref<3x3x128x128xbf16, #tpu.memory_space<vmem>>, vector<1x1x128x128xbf16>
    %39 = vector.shape_cast %38 : vector<1x1x128x128xbf16> to vector<128x128xbf16>
    %cst_45 = arith.constant dense<0.000000e+00> : vector<256x128xf32>
    %40 = tpu.matmul %37, %39, %cst_45 {dimension_numbers = #tpu.dot_dimension_numbers<[1], [0], [0], [1], [0, 0, 1, 1], [], []>} : vector<256x128xbf16>, vector<128x128xbf16>, vector<256x128xf32> -> vector<256x128xf32>
    %41 = arith.addf %36, %40 : vector<256x128xf32>
    %c0_46 = arith.constant 0 : index
    %c0_47 = arith.constant 0 : index
    %42 = vector.load %arg9[%c0_46, %c0_47] : memref<256x128xf32, #tpu.memory_space<vmem>>, vector<256x128xf32>
    tpu.vector_store %arg9[%c0_46, %c0_47], %41 {strides = array<i32>} : memref<256x128xf32, #tpu.memory_space<vmem>>, vector<256x128xf32>,
    %c1_48 = arith.constant 1 : index
    %c7_49 = arith.constant 7 : index
    %c0_50 = arith.constant 0 : index
    %43 = vector.load %arg8[%c1_48, %c7_49, %c0_50] : memref<18x32x128xbf16, #tpu.memory_space<vmem>>, vector<16x16x128xbf16>
    %c0_51 = arith.constant 0 : index
    %c0_52 = arith.constant 0 : index
    %44 = vector.load %arg9[%c0_51, %c0_52] : memref<256x128xf32, #tpu.memory_space<vmem>>, vector<256x128xf32>
    %45 = vector.shape_cast %43 : vector<16x16x128xbf16> to vector<256x128xbf16>
    %c1_53 = arith.constant 1 : index
    %c0_54 = arith.constant 0 : index
    %c0_55 = arith.constant 0 : index
    %c0_56 = arith.constant 0 : index
    %46 = vector.load %arg2[%c1_53, %c0_54, %c0_55, %c0_56] : memref<3x3x128x128xbf16, #tpu.memory_space<vmem>>, vector<1x1x128x128xbf16>
    %47 = vector.shape_cast %46 : vector<1x1x128x128xbf16> to vector<128x128xbf16>
    %cst_57 = arith.constant dense<0.000000e+00> : vector<256x128xf32>
    %48 = tpu.matmul %45, %47, %cst_57 {dimension_numbers = #tpu.dot_dimension_numbers<[1], [0], [0], [1], [0, 0, 1, 1], [], []>} : vector<256x128xbf16>, vector<128x128xbf16>, vector<256x128xf32> -> vector<256x128xf32>
    %49 = arith.addf %44, %48 : vector<256x128xf32>
    %c0_58 = arith.constant 0 : index
    %c0_59 = arith.constant 0 : index
    %50 = vector.load %arg9[%c0_58, %c0_59] : memref<256x128xf32, #tpu.memory_space<vmem>>, vector<256x128xf32>
    tpu.vector_store %arg9[%c0_58, %c0_59], %49 {strides = array<i32>} : memref<256x128xf32, #tpu.memory_space<vmem>>, vector<256x128xf32>,
    %c1_60 = arith.constant 1 : index
    %c8_61 = arith.constant 8 : index
    %c0_62 = arith.constant 0 : index
    %51 = vector.load %arg8[%c1_60, %c8_61, %c0_62] : memref<18x32x128xbf16, #tpu.memory_space<vmem>>, vector<16x16x128xbf16>
    %c0_63 = arith.constant 0 : index
    %c0_64 = arith.constant 0 : index
    %52 = vector.load %arg9[%c0_63, %c0_64] : memref<256x128xf32, #tpu.memory_space<vmem>>, vector<256x128xf32>
    %53 = vector.shape_cast %51 : vector<16x16x128xbf16> to vector<256x128xbf16>
    %c1_65 = arith.constant 1 : index
    %c1_66 = arith.constant 1 : index
    %c0_67 = arith.constant 0 : index
    %c0_68 = arith.constant 0 : index
    %54 = vector.load %arg2[%c1_65, %c1_66, %c0_67, %c0_68] : memref<3x3x128x128xbf16, #tpu.memory_space<vmem>>, vector<1x1x128x128xbf16>
    %55 = vector.shape_cast %54 : vector<1x1x128x128xbf16> to vector<128x128xbf16>
    %cst_69 = arith.constant dense<0.000000e+00> : vector<256x128xf32>
    %56 = tpu.matmul %53, %55, %cst_69 {dimension_numbers = #tpu.dot_dimension_numbers<[1], [0], [0], [1], [0, 0, 1, 1], [], []>} : vector<256x128xbf16>, vector<128x128xbf16>, vector<256x128xf32> -> vector<256x128xf32>
    %57 = arith.addf %52, %56 : vector<256x128xf32>
    %c0_70 = arith.constant 0 : index
    %c0_71 = arith.constant 0 : index
    %58 = vector.load %arg9[%c0_70, %c0_71] : memref<256x128xf32, #tpu.memory_space<vmem>>, vector<256x128xf32>
    tpu.vector_store %arg9[%c0_70, %c0_71], %57 {strides = array<i32>} : memref<256x128xf32, #tpu.memory_space<vmem>>, vector<256x128xf32>,
    %c1_72 = arith.constant 1 : index
    %c9_73 = arith.constant 9 : index
    %c0_74 = arith.constant 0 : index
    %59 = vector.load %arg8[%c1_72, %c9_73, %c0_74] : memref<18x32x128xbf16, #tpu.memory_space<vmem>>, vector<16x16x128xbf16>
    %c0_75 = arith.constant 0 : index
    %c0_76 = arith.constant 0 : index
    %60 = vector.load %arg9[%c0_75, %c0_76] : memref<256x128xf32, #tpu.memory_space<vmem>>, vector<256x128xf32>
    %61 = vector.shape_cast %59 : vector<16x16x128xbf16> to vector<256x128xbf16>
    %c1_77 = arith.constant 1 : index
    %c2_78 = arith.constant 2 : index
    %c0_79 = arith.constant 0 : index
    %c0_80 = arith.constant 0 : index
    %62 = vector.load %arg2[%c1_77, %c2_78, %c0_79, %c0_80] : memref<3x3x128x128xbf16, #tpu.memory_space<vmem>>, vector<1x1x128x128xbf16>
    %63 = vector.shape_cast %62 : vector<1x1x128x128xbf16> to vector<128x128xbf16>
    %cst_81 = arith.constant dense<0.000000e+00> : vector<256x128xf32>
    %64 = tpu.matmul %61, %63, %cst_81 {dimension_numbers = #tpu.dot_dimension_numbers<[1], [0], [0], [1], [0, 0, 1, 1], [], []>} : vector<256x128xbf16>, vector<128x128xbf16>, vector<256x128xf32> -> vector<256x128xf32>
    %65 = arith.addf %60, %64 : vector<256x128xf32>
    %c0_82 = arith.constant 0 : index
    %c0_83 = arith.constant 0 : index
    %66 = vector.load %arg9[%c0_82, %c0_83] : memref<256x128xf32, #tpu.memory_space<vmem>>, vector<256x128xf32>
    tpu.vector_store %arg9[%c0_82, %c0_83], %65 {strides = array<i32>} : memref<256x128xf32, #tpu.memory_space<vmem>>, vector<256x128xf32>,
    %c2_84 = arith.constant 2 : index
    %c7_85 = arith.constant 7 : index
    %c0_86 = arith.constant 0 : index
    %67 = vector.load %arg8[%c2_84, %c7_85, %c0_86] : memref<18x32x128xbf16, #tpu.memory_space<vmem>>, vector<16x16x128xbf16>
    %c0_87 = arith.constant 0 : index
    %c0_88 = arith.constant 0 : index
    %68 = vector.load %arg9[%c0_87, %c0_88] : memref<256x128xf32, #tpu.memory_space<vmem>>, vector<256x128xf32>
    %69 = vector.shape_cast %67 : vector<16x16x128xbf16> to vector<256x128xbf16>
    %c2_89 = arith.constant 2 : index
    %c0_90 = arith.constant 0 : index
    %c0_91 = arith.constant 0 : index
    %c0_92 = arith.constant 0 : index
    %70 = vector.load %arg2[%c2_89, %c0_90, %c0_91, %c0_92] : memref<3x3x128x128xbf16, #tpu.memory_space<vmem>>, vector<1x1x128x128xbf16>
    %71 = vector.shape_cast %70 : vector<1x1x128x128xbf16> to vector<128x128xbf16>
    %cst_93 = arith.constant dense<0.000000e+00> : vector<256x128xf32>
    %72 = tpu.matmul %69, %71, %cst_93 {dimension_numbers = #tpu.dot_dimension_numbers<[1], [0], [0], [1], [0, 0, 1, 1], [], []>} : vector<256x128xbf16>, vector<128x128xbf16>, vector<256x128xf32> -> vector<256x128xf32>
    %73 = arith.addf %68, %72 : vector<256x128xf32>
    %c0_94 = arith.constant 0 : index
    %c0_95 = arith.constant 0 : index
    %74 = vector.load %arg9[%c0_94, %c0_95] : memref<256x128xf32, #tpu.memory_space<vmem>>, vector<256x128xf32>
    tpu.vector_store %arg9[%c0_94, %c0_95], %73 {strides = array<i32>} : memref<256x128xf32, #tpu.memory_space<vmem>>, vector<256x128xf32>,
    %c2_96 = arith.constant 2 : index
    %c8_97 = arith.constant 8 : index
    %c0_98 = arith.constant 0 : index
    %75 = vector.load %arg8[%c2_96, %c8_97, %c0_98] : memref<18x32x128xbf16, #tpu.memory_space<vmem>>, vector<16x16x128xbf16>
    %c0_99 = arith.constant 0 : index
    %c0_100 = arith.constant 0 : index
    %76 = vector.load %arg9[%c0_99, %c0_100] : memref<256x128xf32, #tpu.memory_space<vmem>>, vector<256x128xf32>
    %77 = vector.shape_cast %75 : vector<16x16x128xbf16> to vector<256x128xbf16>
    %c2_101 = arith.constant 2 : index
    %c1_102 = arith.constant 1 : index
    %c0_103 = arith.constant 0 : index
    %c0_104 = arith.constant 0 : index
    %78 = vector.load %arg2[%c2_101, %c1_102, %c0_103, %c0_104] : memref<3x3x128x128xbf16, #tpu.memory_space<vmem>>, vector<1x1x128x128xbf16>
    %79 = vector.shape_cast %78 : vector<1x1x128x128xbf16> to vector<128x128xbf16>
    %cst_105 = arith.constant dense<0.000000e+00> : vector<256x128xf32>
    %80 = tpu.matmul %77, %79, %cst_105 {dimension_numbers = #tpu.dot_dimension_numbers<[1], [0], [0], [1], [0, 0, 1, 1], [], []>} : vector<256x128xbf16>, vector<128x128xbf16>, vector<256x128xf32> -> vector<256x128xf32>
    %81 = arith.addf %76, %80 : vector<256x128xf32>
    %c0_106 = arith.constant 0 : index
    %c0_107 = arith.constant 0 : index
    %82 = vector.load %arg9[%c0_106, %c0_107] : memref<256x128xf32, #tpu.memory_space<vmem>>, vector<256x128xf32>
    tpu.vector_store %arg9[%c0_106, %c0_107], %81 {strides = array<i32>} : memref<256x128xf32, #tpu.memory_space<vmem>>, vector<256x128xf32>,
    %c2_108 = arith.constant 2 : index
    %c9_109 = arith.constant 9 : index
    %c0_110 = arith.constant 0 : index
    %83 = vector.load %arg8[%c2_108, %c9_109, %c0_110] : memref<18x32x128xbf16, #tpu.memory_space<vmem>>, vector<16x16x128xbf16>
    %c0_111 = arith.constant 0 : index
    %c0_112 = arith.constant 0 : index
    %84 = vector.load %arg9[%c0_111, %c0_112] : memref<256x128xf32, #tpu.memory_space<vmem>>, vector<256x128xf32>
    %85 = vector.shape_cast %83 : vector<16x16x128xbf16> to vector<256x128xbf16>
    %c2_113 = arith.constant 2 : index
    %c2_114 = arith.constant 2 : index
    %c0_115 = arith.constant 0 : index
    %c0_116 = arith.constant 0 : index
    %86 = vector.load %arg2[%c2_113, %c2_114, %c0_115, %c0_116] : memref<3x3x128x128xbf16, #tpu.memory_space<vmem>>, vector<1x1x128x128xbf16>
    %87 = vector.shape_cast %86 : vector<1x1x128x128xbf16> to vector<128x128xbf16>
    %cst_117 = arith.constant dense<0.000000e+00> : vector<256x128xf32>
    %88 = tpu.matmul %85, %87, %cst_117 {dimension_numbers = #tpu.dot_dimension_numbers<[1], [0], [0], [1], [0, 0, 1, 1], [], []>} : vector<256x128xbf16>, vector<128x128xbf16>, vector<256x128xf32> -> vector<256x128xf32>
    %89 = arith.addf %84, %88 : vector<256x128xf32>
    %c0_118 = arith.constant 0 : index
    %c0_119 = arith.constant 0 : index
    %90 = vector.load %arg9[%c0_118, %c0_119] : memref<256x128xf32, #tpu.memory_space<vmem>>, vector<256x128xf32>
    tpu.vector_store %arg9[%c0_118, %c0_119], %89 {strides = array<i32>} : memref<256x128xf32, #tpu.memory_space<vmem>>, vector<256x128xf32>,
    %c0_120 = arith.constant 0 : index
    %c0_121 = arith.constant 0 : index
    %91 = vector.load %arg9[%c0_120, %c0_121] : memref<256x128xf32, #tpu.memory_space<vmem>>, vector<256x128xf32>
    %92 = arith.truncf %91 : vector<256x128xf32> to vector<256x128xbf16>
    %c0_122 = arith.constant 0 : index
    %c0_123 = arith.constant 0 : index
    %c0_124 = arith.constant 0 : index
    %93 = vector.load %arg5[%c0_122, %c0_123, %c0_124] : memref<1x256x128xbf16, #tpu.memory_space<vmem>>, vector<1x256x128xbf16>
    %94 = vector.shape_cast %93 : vector<1x256x128xbf16> to vector<256x128xbf16>
    %95 = vector.shape_cast %92 : vector<256x128xbf16> to vector<1x256x128xbf16>
    tpu.vector_store %arg5[%c0_122, %c0_123, %c0_124], %95 {strides = array<i32>} : memref<1x256x128xbf16, #tpu.memory_space<vmem>>, vector<1x256x128xbf16>,
    %cst_125 = arith.constant dense<0.000000e+00> : vector<128xf32>
    %96 = vector.multi_reduction <add>, %91, %cst_125 [0] : vector<256x128xf32> to vector<128xf32>
    %97 = vector.shape_cast %96 : vector<128xf32> to vector<1x128xf32>
    %c0_126 = arith.constant 0 : index
    %c0_127 = arith.constant 0 : index
    %c0_128 = arith.constant 0 : index
    %98 = vector.load %arg6[%c0_126, %c0_127, %c0_128] : memref<1x1x128xf32, #tpu.memory_space<vmem>>, vector<1x1x128xf32>
    %99 = vector.shape_cast %98 : vector<1x1x128xf32> to vector<1x128xf32>
    %100 = vector.shape_cast %97 : vector<1x128xf32> to vector<1x1x128xf32>
    tpu.vector_store %arg6[%c0_126, %c0_127, %c0_128], %100 {strides = array<i32>} : memref<1x1x128xf32, #tpu.memory_space<vmem>>, vector<1x1x128xf32>,
    %101 = arith.mulf %91, %91 : vector<256x128xf32>
    %cst_129 = arith.constant dense<0.000000e+00> : vector<128xf32>
    %102 = vector.multi_reduction <add>, %101, %cst_129 [0] : vector<256x128xf32> to vector<128xf32>
    %103 = vector.shape_cast %102 : vector<128xf32> to vector<1x128xf32>
    %c0_130 = arith.constant 0 : index
    %c0_131 = arith.constant 0 : index
    %c0_132 = arith.constant 0 : index
    %104 = vector.load %arg7[%c0_130, %c0_131, %c0_132] : memref<1x1x128xf32, #tpu.memory_space<vmem>>, vector<1x1x128xf32>
    %105 = vector.shape_cast %104 : vector<1x1x128xf32> to vector<1x128xf32>
    %106 = vector.shape_cast %103 : vector<1x128xf32> to vector<1x1x128xf32>
    tpu.vector_store %arg7[%c0_130, %c0_131, %c0_132], %106 {strides = array<i32>} : memref<1x1x128xf32, #tpu.memory_space<vmem>>, vector<1x1x128xf32>,
    return
  }
  func.func @transform_0(%arg0: i32) -> (i32, i32, i32, i32) {
    %c0_i32 = arith.constant 0 : i32
    %c0_i32_0 = arith.constant 0 : i32
    %c0_i32_1 = arith.constant 0 : i32
    %c0_i32_2 = arith.constant 0 : i32
    return %arg0, %c0_i32, %c0_i32_0, %c0_i32_1 : i32, i32, i32, i32
  }
  func.func @transform_1(%arg0: i32) -> (i32, i32, i32, i32) {
    %c0_i32 = arith.constant 0 : i32
    %c0_i32_0 = arith.constant 0 : i32
    %c0_i32_1 = arith.constant 0 : i32
    %c0_i32_2 = arith.constant 0 : i32
    %c0_i32_3 = arith.constant 0 : i32
    return %c0_i32, %c0_i32_0, %c0_i32_1, %c0_i32_2 : i32, i32, i32, i32
  }
  func.func @transform_2(%arg0: i32) -> (i32, i32) {
    %c0_i32 = arith.constant 0 : i32
    %c0_i32_0 = arith.constant 0 : i32
    %c0_i32_1 = arith.constant 0 : i32
    return %c0_i32, %c0_i32_0 : i32, i32
  }
  func.func @transform_3(%arg0: i32) -> (i32, i32) {
    %c0_i32 = arith.constant 0 : i32
    %c0_i32_0 = arith.constant 0 : i32
    %c0_i32_1 = arith.constant 0 : i32
    return %c0_i32, %c0_i32_0 : i32, i32
  }
  func.func @transform_4(%arg0: i32) -> (i32, i32, i32) {
    %c0_i32 = arith.constant 0 : i32
    %c0_i32_0 = arith.constant 0 : i32
    %c0_i32_1 = arith.constant 0 : i32
    return %arg0, %c0_i32, %c0_i32_0 : i32, i32, i32
  }
  func.func @transform_5(%arg0: i32) -> (i32, i32, i32) {
    %c0_i32 = arith.constant 0 : i32
    %c0_i32_0 = arith.constant 0 : i32
    %c0_i32_1 = arith.constant 0 : i32
    return %arg0, %c0_i32, %c0_i32_0 : i32, i32, i32
  }
  func.func @transform_6(%arg0: i32) -> (i32, i32, i32) {
    %c0_i32 = arith.constant 0 : i32
    %c0_i32_0 = arith.constant 0 : i32
    %c0_i32_1 = arith.constant 0 : i32
    return %arg0, %c0_i32, %c0_i32_0 : i32, i32, i32
  }
}

module attributes {stable_mosaic.version = 11 : i64} {
  func.func @kernel(%arg0: i32, %arg1: memref<1x16x16x4xf32, #tpu.memory_space<vmem>>, %arg2: memref<3x3x128x128xbf16, #tpu.memory_space<vmem>>, %arg3: memref<128x128xbf16, #tpu.memory_space<vmem>>, %arg4: memref<1x128xf32, #tpu.memory_space<vmem>>, %arg5: memref<1x256x128xbf16, #tpu.memory_space<vmem>>, %arg6: memref<1x1x128xf32, #tpu.memory_space<vmem>>, %arg7: memref<1x1x128xf32, #tpu.memory_space<vmem>>, %arg8: memref<1x256x128xbf16, #tpu.memory_space<vmem>>, %arg9: memref<18x32x128xbf16, #tpu.memory_space<vmem>>, %arg10: memref<256x128xf32, #tpu.memory_space<vmem>>) attributes {dimension_semantics = [#tpu.dimension_semantics<parallel>], iteration_bounds = array<i64: 2>, scalar_prefetch = 0 : i64, scratch_operands = 2 : i64, tpu.core_type = #tpu.core_type<tc>, window_params = [{transform_indices = @transform_0, window_bounds = array<i64: 1, 16, 16, 4>}, {pipeline_mode = #tpu.pipeline_mode<synchronous>, transform_indices = @transform_1, window_bounds = array<i64: 3, 3, 128, 128>}, {pipeline_mode = #tpu.pipeline_mode<synchronous>, transform_indices = @transform_2, window_bounds = array<i64: 128, 128>}, {pipeline_mode = #tpu.pipeline_mode<synchronous>, transform_indices = @transform_3, window_bounds = array<i64: 1, 128>}, {transform_indices = @transform_4, window_bounds = array<i64: 1, 256, 128>}, {transform_indices = @transform_5, window_bounds = array<i64: 1, 1, 128>}, {transform_indices = @transform_6, window_bounds = array<i64: 1, 1, 128>}, {transform_indices = @transform_7, window_bounds = array<i64: 1, 256, 128>}]} {
    %cst = arith.constant 0.000000e+00 : bf16
    %0 = vector.broadcast %cst : bf16 to vector<18x32x128xbf16>
    %c0 = arith.constant 0 : index
    %c0_0 = arith.constant 0 : index
    %c0_1 = arith.constant 0 : index
    %1 = vector.load %arg9[%c0, %c0_0, %c0_1] : memref<18x32x128xbf16, #tpu.memory_space<vmem>>, vector<18x32x128xbf16>
    tpu.vector_store %arg9[%c0, %c0_0, %c0_1], %0 {strides = array<i32>} : memref<18x32x128xbf16, #tpu.memory_space<vmem>>, vector<18x32x128xbf16>,
    %c0_2 = arith.constant 0 : index
    %c0_3 = arith.constant 0 : index
    %c0_4 = arith.constant 0 : index
    %c0_5 = arith.constant 0 : index
    %2 = vector.load %arg1[%c0_2, %c0_3, %c0_4, %c0_5] : memref<1x16x16x4xf32, #tpu.memory_space<vmem>>, vector<1x16x16x4xf32>
    %3 = vector.shape_cast %2 : vector<1x16x16x4xf32> to vector<16x16x4xf32>
    %4 = arith.truncf %3 : vector<16x16x4xf32> to vector<16x16x4xbf16>
    %c1 = arith.constant 1 : index
    %c8 = arith.constant 8 : index
    %c0_6 = arith.constant 0 : index
    %5 = vector.load %arg9[%c1, %c8, %c0_6] : memref<18x32x128xbf16, #tpu.memory_space<vmem>>, vector<16x16x4xbf16>
    tpu.vector_store %arg9[%c1, %c8, %c0_6], %4 {strides = array<i32>} : memref<18x32x128xbf16, #tpu.memory_space<vmem>>, vector<16x16x4xbf16>,
    %cst_7 = arith.constant 0.000000e+00 : f32
    %6 = vector.broadcast %cst_7 : f32 to vector<256x128xf32>
    %c0_8 = arith.constant 0 : index
    %c0_9 = arith.constant 0 : index
    %7 = vector.load %arg10[%c0_8, %c0_9] : memref<256x128xf32, #tpu.memory_space<vmem>>, vector<256x128xf32>
    tpu.vector_store %arg10[%c0_8, %c0_9], %6 {strides = array<i32>} : memref<256x128xf32, #tpu.memory_space<vmem>>, vector<256x128xf32>,
    %c0_10 = arith.constant 0 : index
    %c7 = arith.constant 7 : index
    %c0_11 = arith.constant 0 : index
    %8 = vector.load %arg9[%c0_10, %c7, %c0_11] : memref<18x32x128xbf16, #tpu.memory_space<vmem>>, vector<16x16x128xbf16>
    %c0_12 = arith.constant 0 : index
    %c0_13 = arith.constant 0 : index
    %9 = vector.load %arg10[%c0_12, %c0_13] : memref<256x128xf32, #tpu.memory_space<vmem>>, vector<256x128xf32>
    %10 = vector.shape_cast %8 : vector<16x16x128xbf16> to vector<256x128xbf16>
    %c0_14 = arith.constant 0 : index
    %c0_15 = arith.constant 0 : index
    %c0_16 = arith.constant 0 : index
    %c0_17 = arith.constant 0 : index
    %11 = vector.load %arg2[%c0_14, %c0_15, %c0_16, %c0_17] : memref<3x3x128x128xbf16, #tpu.memory_space<vmem>>, vector<1x1x128x128xbf16>
    %12 = vector.shape_cast %11 : vector<1x1x128x128xbf16> to vector<128x128xbf16>
    %cst_18 = arith.constant dense<0.000000e+00> : vector<256x128xf32>
    %13 = tpu.matmul %10, %12, %cst_18 {dimension_numbers = #tpu.dot_dimension_numbers<[1], [0], [0], [1], [0, 0, 1, 1], [], []>} : vector<256x128xbf16>, vector<128x128xbf16>, vector<256x128xf32> -> vector<256x128xf32>
    %14 = arith.addf %9, %13 : vector<256x128xf32>
    %c0_19 = arith.constant 0 : index
    %c0_20 = arith.constant 0 : index
    %15 = vector.load %arg10[%c0_19, %c0_20] : memref<256x128xf32, #tpu.memory_space<vmem>>, vector<256x128xf32>
    tpu.vector_store %arg10[%c0_19, %c0_20], %14 {strides = array<i32>} : memref<256x128xf32, #tpu.memory_space<vmem>>, vector<256x128xf32>,
    %c0_21 = arith.constant 0 : index
    %c8_22 = arith.constant 8 : index
    %c0_23 = arith.constant 0 : index
    %16 = vector.load %arg9[%c0_21, %c8_22, %c0_23] : memref<18x32x128xbf16, #tpu.memory_space<vmem>>, vector<16x16x128xbf16>
    %c0_24 = arith.constant 0 : index
    %c0_25 = arith.constant 0 : index
    %17 = vector.load %arg10[%c0_24, %c0_25] : memref<256x128xf32, #tpu.memory_space<vmem>>, vector<256x128xf32>
    %18 = vector.shape_cast %16 : vector<16x16x128xbf16> to vector<256x128xbf16>
    %c0_26 = arith.constant 0 : index
    %c1_27 = arith.constant 1 : index
    %c0_28 = arith.constant 0 : index
    %c0_29 = arith.constant 0 : index
    %19 = vector.load %arg2[%c0_26, %c1_27, %c0_28, %c0_29] : memref<3x3x128x128xbf16, #tpu.memory_space<vmem>>, vector<1x1x128x128xbf16>
    %20 = vector.shape_cast %19 : vector<1x1x128x128xbf16> to vector<128x128xbf16>
    %cst_30 = arith.constant dense<0.000000e+00> : vector<256x128xf32>
    %21 = tpu.matmul %18, %20, %cst_30 {dimension_numbers = #tpu.dot_dimension_numbers<[1], [0], [0], [1], [0, 0, 1, 1], [], []>} : vector<256x128xbf16>, vector<128x128xbf16>, vector<256x128xf32> -> vector<256x128xf32>
    %22 = arith.addf %17, %21 : vector<256x128xf32>
    %c0_31 = arith.constant 0 : index
    %c0_32 = arith.constant 0 : index
    %23 = vector.load %arg10[%c0_31, %c0_32] : memref<256x128xf32, #tpu.memory_space<vmem>>, vector<256x128xf32>
    tpu.vector_store %arg10[%c0_31, %c0_32], %22 {strides = array<i32>} : memref<256x128xf32, #tpu.memory_space<vmem>>, vector<256x128xf32>,
    %c0_33 = arith.constant 0 : index
    %c9 = arith.constant 9 : index
    %c0_34 = arith.constant 0 : index
    %24 = vector.load %arg9[%c0_33, %c9, %c0_34] : memref<18x32x128xbf16, #tpu.memory_space<vmem>>, vector<16x16x128xbf16>
    %c0_35 = arith.constant 0 : index
    %c0_36 = arith.constant 0 : index
    %25 = vector.load %arg10[%c0_35, %c0_36] : memref<256x128xf32, #tpu.memory_space<vmem>>, vector<256x128xf32>
    %26 = vector.shape_cast %24 : vector<16x16x128xbf16> to vector<256x128xbf16>
    %c0_37 = arith.constant 0 : index
    %c2 = arith.constant 2 : index
    %c0_38 = arith.constant 0 : index
    %c0_39 = arith.constant 0 : index
    %27 = vector.load %arg2[%c0_37, %c2, %c0_38, %c0_39] : memref<3x3x128x128xbf16, #tpu.memory_space<vmem>>, vector<1x1x128x128xbf16>
    %28 = vector.shape_cast %27 : vector<1x1x128x128xbf16> to vector<128x128xbf16>
    %cst_40 = arith.constant dense<0.000000e+00> : vector<256x128xf32>
    %29 = tpu.matmul %26, %28, %cst_40 {dimension_numbers = #tpu.dot_dimension_numbers<[1], [0], [0], [1], [0, 0, 1, 1], [], []>} : vector<256x128xbf16>, vector<128x128xbf16>, vector<256x128xf32> -> vector<256x128xf32>
    %30 = arith.addf %25, %29 : vector<256x128xf32>
    %c0_41 = arith.constant 0 : index
    %c0_42 = arith.constant 0 : index
    %31 = vector.load %arg10[%c0_41, %c0_42] : memref<256x128xf32, #tpu.memory_space<vmem>>, vector<256x128xf32>
    tpu.vector_store %arg10[%c0_41, %c0_42], %30 {strides = array<i32>} : memref<256x128xf32, #tpu.memory_space<vmem>>, vector<256x128xf32>,
    %c1_43 = arith.constant 1 : index
    %c7_44 = arith.constant 7 : index
    %c0_45 = arith.constant 0 : index
    %32 = vector.load %arg9[%c1_43, %c7_44, %c0_45] : memref<18x32x128xbf16, #tpu.memory_space<vmem>>, vector<16x16x128xbf16>
    %c0_46 = arith.constant 0 : index
    %c0_47 = arith.constant 0 : index
    %33 = vector.load %arg10[%c0_46, %c0_47] : memref<256x128xf32, #tpu.memory_space<vmem>>, vector<256x128xf32>
    %34 = vector.shape_cast %32 : vector<16x16x128xbf16> to vector<256x128xbf16>
    %c1_48 = arith.constant 1 : index
    %c0_49 = arith.constant 0 : index
    %c0_50 = arith.constant 0 : index
    %c0_51 = arith.constant 0 : index
    %35 = vector.load %arg2[%c1_48, %c0_49, %c0_50, %c0_51] : memref<3x3x128x128xbf16, #tpu.memory_space<vmem>>, vector<1x1x128x128xbf16>
    %36 = vector.shape_cast %35 : vector<1x1x128x128xbf16> to vector<128x128xbf16>
    %cst_52 = arith.constant dense<0.000000e+00> : vector<256x128xf32>
    %37 = tpu.matmul %34, %36, %cst_52 {dimension_numbers = #tpu.dot_dimension_numbers<[1], [0], [0], [1], [0, 0, 1, 1], [], []>} : vector<256x128xbf16>, vector<128x128xbf16>, vector<256x128xf32> -> vector<256x128xf32>
    %38 = arith.addf %33, %37 : vector<256x128xf32>
    %c0_53 = arith.constant 0 : index
    %c0_54 = arith.constant 0 : index
    %39 = vector.load %arg10[%c0_53, %c0_54] : memref<256x128xf32, #tpu.memory_space<vmem>>, vector<256x128xf32>
    tpu.vector_store %arg10[%c0_53, %c0_54], %38 {strides = array<i32>} : memref<256x128xf32, #tpu.memory_space<vmem>>, vector<256x128xf32>,
    %c1_55 = arith.constant 1 : index
    %c8_56 = arith.constant 8 : index
    %c0_57 = arith.constant 0 : index
    %40 = vector.load %arg9[%c1_55, %c8_56, %c0_57] : memref<18x32x128xbf16, #tpu.memory_space<vmem>>, vector<16x16x128xbf16>
    %c0_58 = arith.constant 0 : index
    %c0_59 = arith.constant 0 : index
    %41 = vector.load %arg10[%c0_58, %c0_59] : memref<256x128xf32, #tpu.memory_space<vmem>>, vector<256x128xf32>
    %42 = vector.shape_cast %40 : vector<16x16x128xbf16> to vector<256x128xbf16>
    %c1_60 = arith.constant 1 : index
    %c1_61 = arith.constant 1 : index
    %c0_62 = arith.constant 0 : index
    %c0_63 = arith.constant 0 : index
    %43 = vector.load %arg2[%c1_60, %c1_61, %c0_62, %c0_63] : memref<3x3x128x128xbf16, #tpu.memory_space<vmem>>, vector<1x1x128x128xbf16>
    %44 = vector.shape_cast %43 : vector<1x1x128x128xbf16> to vector<128x128xbf16>
    %cst_64 = arith.constant dense<0.000000e+00> : vector<256x128xf32>
    %45 = tpu.matmul %42, %44, %cst_64 {dimension_numbers = #tpu.dot_dimension_numbers<[1], [0], [0], [1], [0, 0, 1, 1], [], []>} : vector<256x128xbf16>, vector<128x128xbf16>, vector<256x128xf32> -> vector<256x128xf32>
    %46 = arith.addf %41, %45 : vector<256x128xf32>
    %c0_65 = arith.constant 0 : index
    %c0_66 = arith.constant 0 : index
    %47 = vector.load %arg10[%c0_65, %c0_66] : memref<256x128xf32, #tpu.memory_space<vmem>>, vector<256x128xf32>
    tpu.vector_store %arg10[%c0_65, %c0_66], %46 {strides = array<i32>} : memref<256x128xf32, #tpu.memory_space<vmem>>, vector<256x128xf32>,
    %c1_67 = arith.constant 1 : index
    %c9_68 = arith.constant 9 : index
    %c0_69 = arith.constant 0 : index
    %48 = vector.load %arg9[%c1_67, %c9_68, %c0_69] : memref<18x32x128xbf16, #tpu.memory_space<vmem>>, vector<16x16x128xbf16>
    %c0_70 = arith.constant 0 : index
    %c0_71 = arith.constant 0 : index
    %49 = vector.load %arg10[%c0_70, %c0_71] : memref<256x128xf32, #tpu.memory_space<vmem>>, vector<256x128xf32>
    %50 = vector.shape_cast %48 : vector<16x16x128xbf16> to vector<256x128xbf16>
    %c1_72 = arith.constant 1 : index
    %c2_73 = arith.constant 2 : index
    %c0_74 = arith.constant 0 : index
    %c0_75 = arith.constant 0 : index
    %51 = vector.load %arg2[%c1_72, %c2_73, %c0_74, %c0_75] : memref<3x3x128x128xbf16, #tpu.memory_space<vmem>>, vector<1x1x128x128xbf16>
    %52 = vector.shape_cast %51 : vector<1x1x128x128xbf16> to vector<128x128xbf16>
    %cst_76 = arith.constant dense<0.000000e+00> : vector<256x128xf32>
    %53 = tpu.matmul %50, %52, %cst_76 {dimension_numbers = #tpu.dot_dimension_numbers<[1], [0], [0], [1], [0, 0, 1, 1], [], []>} : vector<256x128xbf16>, vector<128x128xbf16>, vector<256x128xf32> -> vector<256x128xf32>
    %54 = arith.addf %49, %53 : vector<256x128xf32>
    %c0_77 = arith.constant 0 : index
    %c0_78 = arith.constant 0 : index
    %55 = vector.load %arg10[%c0_77, %c0_78] : memref<256x128xf32, #tpu.memory_space<vmem>>, vector<256x128xf32>
    tpu.vector_store %arg10[%c0_77, %c0_78], %54 {strides = array<i32>} : memref<256x128xf32, #tpu.memory_space<vmem>>, vector<256x128xf32>,
    %c2_79 = arith.constant 2 : index
    %c7_80 = arith.constant 7 : index
    %c0_81 = arith.constant 0 : index
    %56 = vector.load %arg9[%c2_79, %c7_80, %c0_81] : memref<18x32x128xbf16, #tpu.memory_space<vmem>>, vector<16x16x128xbf16>
    %c0_82 = arith.constant 0 : index
    %c0_83 = arith.constant 0 : index
    %57 = vector.load %arg10[%c0_82, %c0_83] : memref<256x128xf32, #tpu.memory_space<vmem>>, vector<256x128xf32>
    %58 = vector.shape_cast %56 : vector<16x16x128xbf16> to vector<256x128xbf16>
    %c2_84 = arith.constant 2 : index
    %c0_85 = arith.constant 0 : index
    %c0_86 = arith.constant 0 : index
    %c0_87 = arith.constant 0 : index
    %59 = vector.load %arg2[%c2_84, %c0_85, %c0_86, %c0_87] : memref<3x3x128x128xbf16, #tpu.memory_space<vmem>>, vector<1x1x128x128xbf16>
    %60 = vector.shape_cast %59 : vector<1x1x128x128xbf16> to vector<128x128xbf16>
    %cst_88 = arith.constant dense<0.000000e+00> : vector<256x128xf32>
    %61 = tpu.matmul %58, %60, %cst_88 {dimension_numbers = #tpu.dot_dimension_numbers<[1], [0], [0], [1], [0, 0, 1, 1], [], []>} : vector<256x128xbf16>, vector<128x128xbf16>, vector<256x128xf32> -> vector<256x128xf32>
    %62 = arith.addf %57, %61 : vector<256x128xf32>
    %c0_89 = arith.constant 0 : index
    %c0_90 = arith.constant 0 : index
    %63 = vector.load %arg10[%c0_89, %c0_90] : memref<256x128xf32, #tpu.memory_space<vmem>>, vector<256x128xf32>
    tpu.vector_store %arg10[%c0_89, %c0_90], %62 {strides = array<i32>} : memref<256x128xf32, #tpu.memory_space<vmem>>, vector<256x128xf32>,
    %c2_91 = arith.constant 2 : index
    %c8_92 = arith.constant 8 : index
    %c0_93 = arith.constant 0 : index
    %64 = vector.load %arg9[%c2_91, %c8_92, %c0_93] : memref<18x32x128xbf16, #tpu.memory_space<vmem>>, vector<16x16x128xbf16>
    %c0_94 = arith.constant 0 : index
    %c0_95 = arith.constant 0 : index
    %65 = vector.load %arg10[%c0_94, %c0_95] : memref<256x128xf32, #tpu.memory_space<vmem>>, vector<256x128xf32>
    %66 = vector.shape_cast %64 : vector<16x16x128xbf16> to vector<256x128xbf16>
    %c2_96 = arith.constant 2 : index
    %c1_97 = arith.constant 1 : index
    %c0_98 = arith.constant 0 : index
    %c0_99 = arith.constant 0 : index
    %67 = vector.load %arg2[%c2_96, %c1_97, %c0_98, %c0_99] : memref<3x3x128x128xbf16, #tpu.memory_space<vmem>>, vector<1x1x128x128xbf16>
    %68 = vector.shape_cast %67 : vector<1x1x128x128xbf16> to vector<128x128xbf16>
    %cst_100 = arith.constant dense<0.000000e+00> : vector<256x128xf32>
    %69 = tpu.matmul %66, %68, %cst_100 {dimension_numbers = #tpu.dot_dimension_numbers<[1], [0], [0], [1], [0, 0, 1, 1], [], []>} : vector<256x128xbf16>, vector<128x128xbf16>, vector<256x128xf32> -> vector<256x128xf32>
    %70 = arith.addf %65, %69 : vector<256x128xf32>
    %c0_101 = arith.constant 0 : index
    %c0_102 = arith.constant 0 : index
    %71 = vector.load %arg10[%c0_101, %c0_102] : memref<256x128xf32, #tpu.memory_space<vmem>>, vector<256x128xf32>
    tpu.vector_store %arg10[%c0_101, %c0_102], %70 {strides = array<i32>} : memref<256x128xf32, #tpu.memory_space<vmem>>, vector<256x128xf32>,
    %c2_103 = arith.constant 2 : index
    %c9_104 = arith.constant 9 : index
    %c0_105 = arith.constant 0 : index
    %72 = vector.load %arg9[%c2_103, %c9_104, %c0_105] : memref<18x32x128xbf16, #tpu.memory_space<vmem>>, vector<16x16x128xbf16>
    %c0_106 = arith.constant 0 : index
    %c0_107 = arith.constant 0 : index
    %73 = vector.load %arg10[%c0_106, %c0_107] : memref<256x128xf32, #tpu.memory_space<vmem>>, vector<256x128xf32>
    %74 = vector.shape_cast %72 : vector<16x16x128xbf16> to vector<256x128xbf16>
    %c2_108 = arith.constant 2 : index
    %c2_109 = arith.constant 2 : index
    %c0_110 = arith.constant 0 : index
    %c0_111 = arith.constant 0 : index
    %75 = vector.load %arg2[%c2_108, %c2_109, %c0_110, %c0_111] : memref<3x3x128x128xbf16, #tpu.memory_space<vmem>>, vector<1x1x128x128xbf16>
    %76 = vector.shape_cast %75 : vector<1x1x128x128xbf16> to vector<128x128xbf16>
    %cst_112 = arith.constant dense<0.000000e+00> : vector<256x128xf32>
    %77 = tpu.matmul %74, %76, %cst_112 {dimension_numbers = #tpu.dot_dimension_numbers<[1], [0], [0], [1], [0, 0, 1, 1], [], []>} : vector<256x128xbf16>, vector<128x128xbf16>, vector<256x128xf32> -> vector<256x128xf32>
    %78 = arith.addf %73, %77 : vector<256x128xf32>
    %c0_113 = arith.constant 0 : index
    %c0_114 = arith.constant 0 : index
    %79 = vector.load %arg10[%c0_113, %c0_114] : memref<256x128xf32, #tpu.memory_space<vmem>>, vector<256x128xf32>
    tpu.vector_store %arg10[%c0_113, %c0_114], %78 {strides = array<i32>} : memref<256x128xf32, #tpu.memory_space<vmem>>, vector<256x128xf32>,
    %c0_115 = arith.constant 0 : index
    %c0_116 = arith.constant 0 : index
    %80 = vector.load %arg10[%c0_115, %c0_116] : memref<256x128xf32, #tpu.memory_space<vmem>>, vector<256x128xf32>
    %81 = arith.truncf %80 : vector<256x128xf32> to vector<256x128xbf16>
    %c0_117 = arith.constant 0 : index
    %c0_118 = arith.constant 0 : index
    %c0_119 = arith.constant 0 : index
    %82 = vector.load %arg5[%c0_117, %c0_118, %c0_119] : memref<1x256x128xbf16, #tpu.memory_space<vmem>>, vector<1x256x128xbf16>
    %83 = vector.shape_cast %82 : vector<1x256x128xbf16> to vector<256x128xbf16>
    %84 = vector.shape_cast %81 : vector<256x128xbf16> to vector<1x256x128xbf16>
    tpu.vector_store %arg5[%c0_117, %c0_118, %c0_119], %84 {strides = array<i32>} : memref<1x256x128xbf16, #tpu.memory_space<vmem>>, vector<1x256x128xbf16>,
    %cst_120 = arith.constant dense<0.000000e+00> : vector<128xf32>
    %85 = vector.multi_reduction <add>, %80, %cst_120 [0] : vector<256x128xf32> to vector<128xf32>
    %86 = vector.shape_cast %85 : vector<128xf32> to vector<1x128xf32>
    %c0_121 = arith.constant 0 : index
    %c0_122 = arith.constant 0 : index
    %c0_123 = arith.constant 0 : index
    %87 = vector.load %arg6[%c0_121, %c0_122, %c0_123] : memref<1x1x128xf32, #tpu.memory_space<vmem>>, vector<1x1x128xf32>
    %88 = vector.shape_cast %87 : vector<1x1x128xf32> to vector<1x128xf32>
    %89 = vector.shape_cast %86 : vector<1x128xf32> to vector<1x1x128xf32>
    tpu.vector_store %arg6[%c0_121, %c0_122, %c0_123], %89 {strides = array<i32>} : memref<1x1x128xf32, #tpu.memory_space<vmem>>, vector<1x1x128xf32>,
    %90 = arith.mulf %80, %80 : vector<256x128xf32>
    %cst_124 = arith.constant dense<0.000000e+00> : vector<128xf32>
    %91 = vector.multi_reduction <add>, %90, %cst_124 [0] : vector<256x128xf32> to vector<128xf32>
    %92 = vector.shape_cast %91 : vector<128xf32> to vector<1x128xf32>
    %c0_125 = arith.constant 0 : index
    %c0_126 = arith.constant 0 : index
    %c0_127 = arith.constant 0 : index
    %93 = vector.load %arg7[%c0_125, %c0_126, %c0_127] : memref<1x1x128xf32, #tpu.memory_space<vmem>>, vector<1x1x128xf32>
    %94 = vector.shape_cast %93 : vector<1x1x128xf32> to vector<1x128xf32>
    %95 = vector.shape_cast %92 : vector<1x128xf32> to vector<1x1x128xf32>
    tpu.vector_store %arg7[%c0_125, %c0_126, %c0_127], %95 {strides = array<i32>} : memref<1x1x128xf32, #tpu.memory_space<vmem>>, vector<1x1x128xf32>,
    %c1_128 = arith.constant 1 : index
    %c8_129 = arith.constant 8 : index
    %c0_130 = arith.constant 0 : index
    %96 = vector.load %arg9[%c1_128, %c8_129, %c0_130] : memref<18x32x128xbf16, #tpu.memory_space<vmem>>, vector<16x16x128xbf16>
    %97 = vector.shape_cast %96 : vector<16x16x128xbf16> to vector<256x128xbf16>
    %c0_131 = arith.constant 0 : index
    %c0_132 = arith.constant 0 : index
    %98 = vector.load %arg3[%c0_131, %c0_132] : memref<128x128xbf16, #tpu.memory_space<vmem>>, vector<128x128xbf16>
    %cst_133 = arith.constant dense<0.000000e+00> : vector<256x128xf32>
    %99 = tpu.matmul %97, %98, %cst_133 {dimension_numbers = #tpu.dot_dimension_numbers<[1], [0], [0], [1], [0, 0, 1, 1], [], []>} : vector<256x128xbf16>, vector<128x128xbf16>, vector<256x128xf32> -> vector<256x128xf32>
    %c0_134 = arith.constant 0 : index
    %c0_135 = arith.constant 0 : index
    %100 = vector.load %arg4[%c0_134, %c0_135] : memref<1x128xf32, #tpu.memory_space<vmem>>, vector<1x128xf32>
    %101 = vector.broadcast %100 : vector<1x128xf32> to vector<256x128xf32>
    %102 = arith.addf %99, %101 : vector<256x128xf32>
    %103 = arith.truncf %102 : vector<256x128xf32> to vector<256x128xbf16>
    %c0_136 = arith.constant 0 : index
    %c0_137 = arith.constant 0 : index
    %c0_138 = arith.constant 0 : index
    %104 = vector.load %arg8[%c0_136, %c0_137, %c0_138] : memref<1x256x128xbf16, #tpu.memory_space<vmem>>, vector<1x256x128xbf16>
    %105 = vector.shape_cast %104 : vector<1x256x128xbf16> to vector<256x128xbf16>
    %106 = vector.shape_cast %103 : vector<256x128xbf16> to vector<1x256x128xbf16>
    tpu.vector_store %arg8[%c0_136, %c0_137, %c0_138], %106 {strides = array<i32>} : memref<1x256x128xbf16, #tpu.memory_space<vmem>>, vector<1x256x128xbf16>,
    return
  }
  func.func @transform_0(%arg0: i32) -> (i32, i32, i32, i32) {
    %c0_i32 = arith.constant 0 : i32
    %c0_i32_0 = arith.constant 0 : i32
    %c0_i32_1 = arith.constant 0 : i32
    %c0_i32_2 = arith.constant 0 : i32
    return %arg0, %c0_i32, %c0_i32_0, %c0_i32_1 : i32, i32, i32, i32
  }
  func.func @transform_1(%arg0: i32) -> (i32, i32, i32, i32) {
    %c0_i32 = arith.constant 0 : i32
    %c0_i32_0 = arith.constant 0 : i32
    %c0_i32_1 = arith.constant 0 : i32
    %c0_i32_2 = arith.constant 0 : i32
    %c0_i32_3 = arith.constant 0 : i32
    return %c0_i32, %c0_i32_0, %c0_i32_1, %c0_i32_2 : i32, i32, i32, i32
  }
  func.func @transform_2(%arg0: i32) -> (i32, i32) {
    %c0_i32 = arith.constant 0 : i32
    %c0_i32_0 = arith.constant 0 : i32
    %c0_i32_1 = arith.constant 0 : i32
    return %c0_i32, %c0_i32_0 : i32, i32
  }
  func.func @transform_3(%arg0: i32) -> (i32, i32) {
    %c0_i32 = arith.constant 0 : i32
    %c0_i32_0 = arith.constant 0 : i32
    %c0_i32_1 = arith.constant 0 : i32
    return %c0_i32, %c0_i32_0 : i32, i32
  }
  func.func @transform_4(%arg0: i32) -> (i32, i32, i32) {
    %c0_i32 = arith.constant 0 : i32
    %c0_i32_0 = arith.constant 0 : i32
    %c0_i32_1 = arith.constant 0 : i32
    return %arg0, %c0_i32, %c0_i32_0 : i32, i32, i32
  }
  func.func @transform_5(%arg0: i32) -> (i32, i32, i32) {
    %c0_i32 = arith.constant 0 : i32
    %c0_i32_0 = arith.constant 0 : i32
    %c0_i32_1 = arith.constant 0 : i32
    return %arg0, %c0_i32, %c0_i32_0 : i32, i32, i32
  }
  func.func @transform_6(%arg0: i32) -> (i32, i32, i32) {
    %c0_i32 = arith.constant 0 : i32
    %c0_i32_0 = arith.constant 0 : i32
    %c0_i32_1 = arith.constant 0 : i32
    return %arg0, %c0_i32, %c0_i32_0 : i32, i32, i32
  }
  func.func @transform_7(%arg0: i32) -> (i32, i32, i32) {
    %c0_i32 = arith.constant 0 : i32
    %c0_i32_0 = arith.constant 0 : i32
    %c0_i32_1 = arith.constant 0 : i32
    return %arg0, %c0_i32, %c0_i32_0 : i32, i32, i32
  }
}

module attributes {stable_mosaic.version = 11 : i64} {
  func.func @_bn_add_relu_kernel(%arg0: i32, %arg1: memref<1x256x128xbf16, #tpu.memory_space<vmem>>, %arg2: memref<1x128xf32, #tpu.memory_space<vmem>>, %arg3: memref<1x128xf32, #tpu.memory_space<vmem>>, %arg4: memref<1x256x128xbf16, #tpu.memory_space<vmem>>, %arg5: memref<1x256x128xf32, #tpu.memory_space<vmem>>) attributes {dimension_semantics = [#tpu.dimension_semantics<parallel>], iteration_bounds = array<i64: 2>, scalar_prefetch = 0 : i64, scratch_operands = 0 : i64, tpu.core_type = #tpu.core_type<tc>, window_params = [{transform_indices = @transform_0, window_bounds = array<i64: 1, 256, 128>}, {pipeline_mode = #tpu.pipeline_mode<synchronous>, transform_indices = @transform_1, window_bounds = array<i64: 1, 128>}, {pipeline_mode = #tpu.pipeline_mode<synchronous>, transform_indices = @transform_2, window_bounds = array<i64: 1, 128>}, {transform_indices = @transform_3, window_bounds = array<i64: 1, 256, 128>}, {transform_indices = @transform_4, window_bounds = array<i64: 1, 256, 128>}]} {
    %c0 = arith.constant 0 : index
    %c0_0 = arith.constant 0 : index
    %c0_1 = arith.constant 0 : index
    %0 = vector.load %arg1[%c0, %c0_0, %c0_1] : memref<1x256x128xbf16, #tpu.memory_space<vmem>>, vector<1x256x128xbf16>
    %1 = vector.shape_cast %0 : vector<1x256x128xbf16> to vector<256x128xbf16>
    %2 = arith.extf %1 : vector<256x128xbf16> to vector<256x128xf32>
    %c0_2 = arith.constant 0 : index
    %c0_3 = arith.constant 0 : index
    %3 = vector.load %arg2[%c0_2, %c0_3] : memref<1x128xf32, #tpu.memory_space<vmem>>, vector<1x128xf32>
    %4 = vector.broadcast %3 : vector<1x128xf32> to vector<256x128xf32>
    %5 = arith.mulf %2, %4 : vector<256x128xf32>
    %c0_4 = arith.constant 0 : index
    %c0_5 = arith.constant 0 : index
    %6 = vector.load %arg3[%c0_4, %c0_5] : memref<1x128xf32, #tpu.memory_space<vmem>>, vector<1x128xf32>
    %7 = vector.broadcast %6 : vector<1x128xf32> to vector<256x128xf32>
    %8 = arith.addf %5, %7 : vector<256x128xf32>
    %c0_6 = arith.constant 0 : index
    %c0_7 = arith.constant 0 : index
    %c0_8 = arith.constant 0 : index
    %9 = vector.load %arg4[%c0_6, %c0_7, %c0_8] : memref<1x256x128xbf16, #tpu.memory_space<vmem>>, vector<1x256x128xbf16>
    %10 = vector.shape_cast %9 : vector<1x256x128xbf16> to vector<256x128xbf16>
    %11 = arith.extf %10 : vector<256x128xbf16> to vector<256x128xf32>
    %12 = arith.addf %8, %11 : vector<256x128xf32>
    %cst = arith.constant 0.000000e+00 : f32
    %13 = vector.broadcast %cst : f32 to vector<256x128xf32>
    %14 = arith.maximumf %12, %13 : vector<256x128xf32>
    %c0_9 = arith.constant 0 : index
    %c0_10 = arith.constant 0 : index
    %c0_11 = arith.constant 0 : index
    %15 = vector.load %arg5[%c0_9, %c0_10, %c0_11] : memref<1x256x128xf32, #tpu.memory_space<vmem>>, vector<1x256x128xf32>
    %16 = vector.shape_cast %15 : vector<1x256x128xf32> to vector<256x128xf32>
    %17 = vector.shape_cast %14 : vector<256x128xf32> to vector<1x256x128xf32>
    tpu.vector_store %arg5[%c0_9, %c0_10, %c0_11], %17 {strides = array<i32>} : memref<1x256x128xf32, #tpu.memory_space<vmem>>, vector<1x256x128xf32>,
    return
  }
  func.func @transform_0(%arg0: i32) -> (i32, i32, i32) {
    %c0_i32 = arith.constant 0 : i32
    %c0_i32_0 = arith.constant 0 : i32
    %c0_i32_1 = arith.constant 0 : i32
    return %arg0, %c0_i32, %c0_i32_0 : i32, i32, i32
  }
  func.func @transform_1(%arg0: i32) -> (i32, i32) {
    %c0_i32 = arith.constant 0 : i32
    %c0_i32_0 = arith.constant 0 : i32
    %c0_i32_1 = arith.constant 0 : i32
    return %c0_i32, %c0_i32_0 : i32, i32
  }
  func.func @transform_2(%arg0: i32) -> (i32, i32) {
    %c0_i32 = arith.constant 0 : i32
    %c0_i32_0 = arith.constant 0 : i32
    %c0_i32_1 = arith.constant 0 : i32
    return %c0_i32, %c0_i32_0 : i32, i32
  }
  func.func @transform_3(%arg0: i32) -> (i32, i32, i32) {
    %c0_i32 = arith.constant 0 : i32
    %c0_i32_0 = arith.constant 0 : i32
    %c0_i32_1 = arith.constant 0 : i32
    return %arg0, %c0_i32, %c0_i32_0 : i32, i32, i32
  }
  func.func @transform_4(%arg0: i32) -> (i32, i32, i32) {
    %c0_i32 = arith.constant 0 : i32
    %c0_i32_0 = arith.constant 0 : i32
    %c0_i32_1 = arith.constant 0 : i32
    return %arg0, %c0_i32, %c0_i32_0 : i32, i32, i32
  }
}

</mosaic_0001>

<bundles_post_ra>
// kernel: residual_forward.5
= control target key start
LH: loop header
LB: loop body
LE: loop exit
PB: predicated region body
PF: predicated region fallthrough
CT: control target
= control target key end

     0   :  { %s798_s15 = smov 0   ;;  %s966_s0 = inlined_call_operand.vmem [shape: bf16[2,256,128], index: 0, kind: input, shape index: {}]   ;;  %s967_s1 = inlined_call_operand.vmem [shape: f32[1,128], index: 1, kind: input, shape index: {}]   ;;  %s968_s2 = inlined_call_operand.vmem [shape: f32[1,128], index: 2, kind: input, shape index: {}]   ;;  %s969_s3 = inlined_call_operand.vmem [shape: bf16[2,256,128], index: 3, kind: input, shape index: {}]   ;;  %s970_s4 = inlined_call_operand.vmem [shape: f32[2,256,128], index: 4, kind: output, shape index: {}]  }
   0x1 LB: > { %s581_s16 = sadd.s32 4294967295, %s771_s15   ;;  %p585_p0 = scmp.ge.s32.totalorder %s771_s15, 1  ;;  %s771_s15 = sphi %s798_s15, %s14_s15  }
   0x2   : > { %p172_p1 = scmp.lt.s32.totalorder %s771_s15, 3 }
   0x4   : > { %p173_p2 = pnand %p585_p0, %p172_p1 }
   0x5   : > { %p203_p3 = scmp.lt.s32.totalorder (!%p173_p2), %s581_s16, 1 }
   0x6   : > { %176 = sbr.rel (%p173_p2) target bundleno = 69 (0x45), region = 36 }
   0xb   : > { %s972_s16 = smov (!%p203_p3, %s581_s16), 1  ;;  %v822_v0 = vld [vmem:[%s967_s1] ss:$0 sm:$0xff] }
   0xc   : > { %s594_s17 = sshll.u32 %s972_s16, 7  ;;  %v827_v1 = vld [vmem:[%s968_s2] ss:$0 sm:$0xff]  ;;  %s596_s28 = sshll.u32 %s972_s16, 8 }
   0xd   : > { %s812_s20 = scalar_lea.vmem %s966_s0, %s594_s17  ;;  %s817_s23 = scalar_lea.vmem %s969_s3, %s594_s17 }
   0xe   : > { %v598_v2 = vld [vmem:[%s812_s20] sm:$0xff]   ;;  %v725_v4 = vld [vmem:[%s812_s20 + $0x8] sm:$0xff]   ;;  %v726_v10 = vld [vmem:[%s812_s20 + $0x10] sm:$0xff]   ;;  %s853_s5 = scalar_lea.vmem %s970_s4, %s596_s28 }
   0xf   : > { %v662_v3 = vld [vmem:[%s817_s23] sm:$0xff]   ;;  %v599_v5 = vunpack.c.l.bf16 %v598_v2  ;;  %v600_v7 = vunpack.c.h.bf16 %v598_v2  ;;  %v740_v9 = vld [vmem:[%s817_s23 + $0x8] sm:$0xff]   ;;  %v741_v11 = vld [vmem:[%s817_s23 + $0x10] sm:$0xff]   ;;  %v603_v12 = vunpack.c.l.bf16 %v725_v4  ;;  %v604_v14 = vunpack.c.h.bf16 %v725_v4 }
  0x10   : > { %v663_v6 = vunpack.c.l.bf16 %v662_v3  ;;  %v664_v8 = vunpack.c.h.bf16 %v662_v3  ;;  %v667_v13 = vunpack.c.l.bf16 %v740_v9  ;;  %v668_v15 = vunpack.c.h.bf16 %v740_v9  ;;  %v727_v16 = vld [vmem:[%s812_s20 + $0x18] sm:$0xff]   ;;  %v728_v42 = vld [vmem:[%s812_s20 + $0x20] sm:$0xff]   ;;  %v729_v52 = vld [vmem:[%s812_s20 + $0x28] sm:$0xff]  }
  0x11   : > { %v286_v17 = vmul.f32 %v822_v0, %v599_v5  ;;  %v287_v18 = vmul.f32 %v822_v0, %v600_v7  ;;  %v607_v19 = vunpack.c.l.bf16 %v726_v10  ;;  %v671_v20 = vunpack.c.l.bf16 %v741_v11  ;;  %v742_v21 = vld [vmem:[%s817_s23 + $0x18] sm:$0xff]   ;;  %v743_v47 = vld [vmem:[%s817_s23 + $0x20] sm:$0xff]   ;;  %v744_v57 = vld [vmem:[%s817_s23 + $0x28] sm:$0xff]  }
  0x12   : > { %v288_v22 = vmul.f32 %v822_v0, %v603_v12  ;;  %v289_v23 = vmul.f32 %v822_v0, %v604_v14  ;;  %v608_v24 = vunpack.c.h.bf16 %v726_v10  ;;  %v672_v25 = vunpack.c.h.bf16 %v741_v11  ;;  %v730_v62 = vld [vmem:[%s812_s20 + $0x30] sm:$0xff]   ;;  %v731_v14 = vld [vmem:[%s812_s20 + $0x38] sm:$0xff]  }
  0x13   : > { %v322_v26 = vadd.f32 %v827_v1, %v286_v17  ;;  %v323_v27 = vadd.f32 %v827_v1, %v287_v18  ;;  %v290_v28 = vmul.f32 %v822_v0, %v607_v19  ;;  %v611_v29 = vunpack.c.l.bf16 %v727_v16  ;;  %v745_v5 = vld [vmem:[%s817_s23 + $0x30] sm:$0xff]  }
  0x14   : > { %v324_v30 = vadd.f32 %v827_v1, %v288_v22  ;;  %v325_v31 = vadd.f32 %v827_v1, %v289_v23  ;;  %v291_v32 = vmul.f32 %v822_v0, %v608_v24  ;;  %v675_v33 = vunpack.c.l.bf16 %v742_v21  ;;  %v746_v23 = vld [vmem:[%s817_s23 + $0x38] sm:$0xff]  }
  0x15   : > { %v418_v34 = vadd.f32 %v663_v6, %v322_v26  ;;  %v419_v35 = vadd.f32 %v664_v8, %v323_v27  ;;  %v326_v36 = vadd.f32 %v827_v1, %v290_v28  ;;  %v292_v37 = vmul.f32 %v822_v0, %v611_v29 }
  0x16   : > { %v420_v38 = vadd.f32 %v667_v13, %v324_v30  ;;  %v421_v39 = vadd.f32 %v668_v15, %v325_v31  ;;  %v327_v40 = vadd.f32 %v827_v1, %v291_v32  ;;  %v612_v41 = vunpack.c.h.bf16 %v727_v16  ;;  %v732_v32 = vld [vmem:[%s812_s20 + $0x40] sm:$0xff]  }
  0x17   : > { %v450_v43 = vmax.f32 %v418_v34, 0.0  ;;  %v451_v44 = vmax.f32 %v419_v35, 0.0  ;;  %v422_v45 = vadd.f32 %v671_v20, %v326_v36  ;;  %v328_v46 = vadd.f32 %v827_v1, %v292_v37  ;;  %v747_v37 = vld [vmem:[%s817_s23 + $0x40] sm:$0xff]  }
  0x18   : > { %v452_v48 = vmax.f32 %v420_v38, 0.0  ;;  %v453_v49 = vmax.f32 %v421_v39, 0.0  ;;  %v423_v50 = vadd.f32 %v672_v25, %v327_v40  ;;  %v293_v51 = vmul.f32 %v822_v0, %v612_v41 }
  0x19   : > { %482 = vst [vmem:[%s853_s5] sm:$0xff] %v450_v43  ;;  %v454_v53 = vmax.f32 %v422_v45, 0.0  ;;  %v424_v54 = vadd.f32 %v675_v33, %v328_v46  ;;  %v676_v55 = vunpack.c.h.bf16 %v742_v21  ;;  %v615_v56 = vunpack.c.l.bf16 %v728_v42  ;;  %v733_v46 = vld [vmem:[%s812_s20 + $0x48] sm:$0xff]  }
  0x1a   : > { %483 = vst [vmem:[%s853_s5 + $0x8] sm:$0xff] %v451_v44  ;;  %v455_v58 = vmax.f32 %v423_v50, 0.0  ;;  %v329_v59 = vadd.f32 %v827_v1, %v293_v51  ;;  %v679_v60 = vunpack.c.l.bf16 %v743_v47  ;;  %v616_v61 = vunpack.c.h.bf16 %v728_v42 }
  0x1b   : > { %484 = vst [vmem:[%s853_s5 + $0x10] sm:$0xff] %v452_v48  ;;  %v456_v63 = vmax.f32 %v424_v54, 0.0  ;;  %v294_v2 = vmul.f32 %v822_v0, %v615_v56  ;;  %v680_v3 = vunpack.c.h.bf16 %v743_v47  ;;  %v619_v4 = vunpack.c.l.bf16 %v729_v52  ;;  %v748_v47 = vld [vmem:[%s817_s23 + $0x48] sm:$0xff]   ;;  %v734_v56 = vld [vmem:[%s812_s20 + $0x50] sm:$0xff]  }
  0x1c   : > { %485 = vst [vmem:[%s853_s5 + $0x18] sm:$0xff] %v453_v49  ;;  %v425_v6 = vadd.f32 %v676_v55, %v329_v59  ;;  %v295_v7 = vmul.f32 %v822_v0, %v616_v61  ;;  %v683_v8 = vunpack.c.l.bf16 %v744_v57  ;;  %v620_v9 = vunpack.c.h.bf16 %v729_v52  ;;  %v749_v61 = vld [vmem:[%s817_s23 + $0x50] sm:$0xff]  }
  0x1d   : > { %486 = vst [vmem:[%s853_s5 + $0x20] sm:$0xff] %v454_v53  ;;  %v330_v10 = vadd.f32 %v827_v1, %v294_v2  ;;  %v296_v11 = vmul.f32 %v822_v0, %v619_v4  ;;  %v684_v12 = vunpack.c.h.bf16 %v744_v57  ;;  %v623_v13 = vunpack.c.l.bf16 %v730_v62 }
  0x1e   : > { %487 = vst [vmem:[%s853_s5 + $0x28] sm:$0xff] %v455_v58  ;;  %v457_v15 = vmax.f32 %v425_v6, 0.0  ;;  %v331_v16 = vadd.f32 %v827_v1, %v295_v7  ;;  %v297_v17 = vmul.f32 %v822_v0, %v620_v9  ;;  %v687_v18 = vunpack.c.l.bf16 %v745_v5 }
  0x1f   : > { %488 = vst [vmem:[%s853_s5 + $0x30] sm:$0xff] %v456_v63  ;;  %v426_v19 = vadd.f32 %v679_v60, %v330_v10  ;;  %v332_v20 = vadd.f32 %v827_v1, %v296_v11  ;;  %v298_v21 = vmul.f32 %v822_v0, %v623_v13  ;;  %v624_v22 = vunpack.c.h.bf16 %v730_v62 }
  0x20   : > { %489 = vst [vmem:[%s853_s5 + $0x38] sm:$0xff] %v457_v15  ;;  %v427_v24 = vadd.f32 %v680_v3, %v331_v16  ;;  %v333_v25 = vadd.f32 %v827_v1, %v297_v17  ;;  %v688_v26 = vunpack.c.h.bf16 %v745_v5  ;;  %v627_v27 = vunpack.c.l.bf16 %v731_v14  ;;  %v750_v17 = vld [vmem:[%s817_s23 + $0x58] sm:$0xff]  }
  0x21   : > { %v458_v28 = vmax.f32 %v426_v19, 0.0  ;;  %v428_v29 = vadd.f32 %v683_v8, %v332_v20  ;;  %v334_v30 = vadd.f32 %v827_v1, %v298_v21  ;;  %v299_v31 = vmul.f32 %v822_v0, %v624_v22 }
  0x22   : > { %v459_v33 = vmax.f32 %v427_v24, 0.0  ;;  %v429_v34 = vadd.f32 %v684_v12, %v333_v25  ;;  %v300_v35 = vmul.f32 %v822_v0, %v627_v27  ;;  %v691_v36 = vunpack.c.l.bf16 %v746_v23  ;;  %v735_v12 = vld [vmem:[%s812_s20 + $0x58] sm:$0xff]  }
  0x23   : > { %490 = vst [vmem:[%s853_s5 + $0x40] sm:$0xff] %v458_v28  ;;  %v460_v38 = vmax.f32 %v428_v29, 0.0  ;;  %v430_v39 = vadd.f32 %v687_v18, %v334_v30  ;;  %v335_v40 = vadd.f32 %v827_v1, %v299_v31  ;;  %v628_v41 = vunpack.c.h.bf16 %v731_v14  ;;  %v751_v31 = vld [vmem:[%s817_s23 + $0x60] sm:$0xff]  }
  0x24   : > { %491 = vst [vmem:[%s853_s5 + $0x48] sm:$0xff] %v459_v33  ;;  %v461_v42 = vmax.f32 %v429_v34, 0.0  ;;  %v336_v43 = vadd.f32 %v827_v1, %v300_v35  ;;  %v692_v44 = vunpack.c.h.bf16 %v746_v23  ;;  %v631_v45 = vunpack.c.l.bf16 %v732_v32 }
  0x25   : > { %492 = vst [vmem:[%s853_s5 + $0x50] sm:$0xff] %v460_v38  ;;  %v462_v48 = vmax.f32 %v430_v39, 0.0  ;;  %v431_v49 = vadd.f32 %v688_v26, %v335_v40  ;;  %v301_v50 = vmul.f32 %v822_v0, %v628_v41  ;;  %v695_v51 = vunpack.c.l.bf16 %v747_v37  ;;  %v736_v26 = vld [vmem:[%s812_s20 + $0x60] sm:$0xff]   ;;  %v737_v40 = vld [vmem:[%s812_s20 + $0x68] sm:$0xff]  }
  0x26   : > { %493 = vst [vmem:[%s853_s5 + $0x58] sm:$0xff] %v461_v42  ;;  %v432_v52 = vadd.f32 %v691_v36, %v336_v43  ;;  %v302_v53 = vmul.f32 %v822_v0, %v631_v45  ;;  %v632_v54 = vunpack.c.h.bf16 %v732_v32  ;;  %v696_v55 = vunpack.c.h.bf16 %v747_v37  ;;  %v752_v41 = vld [vmem:[%s817_s23 + $0x68] sm:$0xff]  }
  0x27   : > { %494 = vst [vmem:[%s853_s5 + $0x60] sm:$0xff] %v462_v48  ;;  %v463_v57 = vmax.f32 %v431_v49, 0.0  ;;  %v337_v58 = vadd.f32 %v827_v1, %v301_v50  ;;  %v635_v59 = vunpack.c.l.bf16 %v733_v46  ;;  %v699_v60 = vunpack.c.l.bf16 %v748_v47  ;;  %v738_v50 = vld [vmem:[%s812_s20 + $0x70] sm:$0xff]  }
  0x28   : > { %v464_v62 = vmax.f32 %v432_v52, 0.0  ;;  %v338_v63 = vadd.f32 %v827_v1, %v302_v53  ;;  %v303_v2 = vmul.f32 %v822_v0, %v632_v54  ;;  %v636_v3 = vunpack.c.h.bf16 %v733_v46 }
  0x29   : > { %495 = vst [vmem:[%s853_s5 + $0x68] sm:$0xff] %v463_v57  ;;  %v433_v4 = vadd.f32 %v692_v44, %v337_v58  ;;  %v304_v5 = vmul.f32 %v822_v0, %v635_v59  ;;  %v700_v6 = vunpack.c.h.bf16 %v748_v47  ;;  %v639_v7 = vunpack.c.l.bf16 %v734_v56  ;;  %v753_v59 = vld [vmem:[%s817_s23 + $0x70] sm:$0xff]  }
  0x2a   : > { %496 = vst [vmem:[%s853_s5 + $0x70] sm:$0xff] %v464_v62  ;;  %v434_v8 = vadd.f32 %v695_v51, %v338_v63  ;;  %v339_v9 = vadd.f32 %v827_v1, %v303_v2  ;;  %v305_v10 = vmul.f32 %v822_v0, %v636_v3  ;;  %v703_v11 = vunpack.c.l.bf16 %v749_v61 }
  0x2b   : > { %v465_v13 = vmax.f32 %v433_v4, 0.0  ;;  %v340_v14 = vadd.f32 %v827_v1, %v304_v5  ;;  %v306_v15 = vmul.f32 %v822_v0, %v639_v7  ;;  %v640_v16 = vunpack.c.h.bf16 %v734_v56 }
  0x2c   : > { %v466_v18 = vmax.f32 %v434_v8, 0.0  ;;  %v435_v19 = vadd.f32 %v696_v55, %v339_v9  ;;  %v341_v20 = vadd.f32 %v827_v1, %v305_v10  ;;  %v704_v21 = vunpack.c.h.bf16 %v749_v61 }
  0x2d   : > { %497 = vst [vmem:[%s853_s5 + $0x78] sm:$0xff] %v465_v13  ;;  %v436_v22 = vadd.f32 %v699_v60, %v340_v14  ;;  %v342_v23 = vadd.f32 %v827_v1, %v306_v15  ;;  %v307_v24 = vmul.f32 %v822_v0, %v640_v16  ;;  %v643_v25 = vunpack.c.l.bf16 %v735_v12 }
  0x2e   : > { %498 = vst [vmem:[%s853_s5 + $0x80] sm:$0xff] %v466_v18  ;;  %v467_v27 = vmax.f32 %v435_v19, 0.0  ;;  %v437_v28 = vadd.f32 %v700_v6, %v341_v20  ;;  %v707_v29 = vunpack.c.l.bf16 %v750_v17  ;;  %v644_v30 = vunpack.c.h.bf16 %v735_v12  ;;  %v739_v6 = vld [vmem:[%s812_s20 + $0x78] sm:$0xff]  }
  0x2f   : > { %v468_v32 = vmax.f32 %v436_v22, 0.0  ;;  %v438_v33 = vadd.f32 %v703_v11, %v342_v23  ;;  %v343_v34 = vadd.f32 %v827_v1, %v307_v24  ;;  %v308_v35 = vmul.f32 %v822_v0, %v643_v25  ;;  %v754_v11 = vld [vmem:[%s817_s23 + $0x78] sm:$0xff]  }
  0x30   : > { %499 = vst [vmem:[%s853_s5 + $0x88] sm:$0xff] %v467_v27  ;;  %v469_v36 = vmax.f32 %v437_v28, 0.0  ;;  %v309_v37 = vmul.f32 %v822_v0, %v644_v30  ;;  %v708_v38 = vunpack.c.h.bf16 %v750_v17  ;;  %v647_v39 = vunpack.c.l.bf16 %v736_v26 }
  0x31   : > { %500 = vst [vmem:[%s853_s5 + $0x90] sm:$0xff] %v468_v32  ;;  %v470_v42 = vmax.f32 %v438_v33, 0.0  ;;  %v439_v43 = vadd.f32 %v704_v21, %v343_v34  ;;  %v344_v44 = vadd.f32 %v827_v1, %v308_v35  ;;  %v711_v45 = vunpack.c.l.bf16 %v751_v31 }
  0x32   : > { %501 = vst [vmem:[%s853_s5 + $0x98] sm:$0xff] %v469_v36  ;;  %v345_v46 = vadd.f32 %v827_v1, %v309_v37  ;;  %v310_v47 = vmul.f32 %v822_v0, %v647_v39  ;;  %v648_v48 = vunpack.c.h.bf16 %v736_v26  ;;  %v712_v49 = vunpack.c.h.bf16 %v751_v31 }
  0x33   : > { %502 = vst [vmem:[%s853_s5 + $0xa0] sm:$0xff] %v470_v42  ;;  %v471_v51 = vmax.f32 %v439_v43, 0.0  ;;  %v440_v52 = vadd.f32 %v707_v29, %v344_v44  ;;  %v651_v53 = vunpack.c.l.bf16 %v737_v40  ;;  %v715_v54 = vunpack.c.l.bf16 %v752_v41 }
  0x34   : > { %v441_v55 = vadd.f32 %v708_v38, %v345_v46  ;;  %v346_v56 = vadd.f32 %v827_v1, %v310_v47  ;;  %v311_v57 = vmul.f32 %v822_v0, %v648_v48  ;;  %v652_v58 = vunpack.c.h.bf16 %v737_v40 }
  0x35   : > { %503 = vst [vmem:[%s853_s5 + $0xa8] sm:$0xff] %v471_v51  ;;  %v472_v60 = vmax.f32 %v440_v52, 0.0  ;;  %v312_v61 = vmul.f32 %v822_v0, %v651_v53  ;;  %v716_v62 = vunpack.c.h.bf16 %v752_v41  ;;  %v655_v63 = vunpack.c.l.bf16 %v738_v50 }
  0x36   : > { %v473_v2 = vmax.f32 %v441_v55, 0.0  ;;  %v442_v3 = vadd.f32 %v711_v45, %v346_v56  ;;  %v347_v4 = vadd.f32 %v827_v1, %v311_v57  ;;  %v313_v5 = vmul.f32 %v822_v0, %v652_v58 }
  0x37   : > { %504 = vst [vmem:[%s853_s5 + $0xb0] sm:$0xff] %v472_v60  ;;  %v348_v7 = vadd.f32 %v827_v1, %v312_v61  ;;  %v314_v8 = vmul.f32 %v822_v0, %v655_v63  ;;  %v719_v9 = vunpack.c.l.bf16 %v753_v59  ;;  %v656_v10 = vunpack.c.h.bf16 %v738_v50 }
  0x38   : > { %505 = vst [vmem:[%s853_s5 + $0xb8] sm:$0xff] %v473_v2  ;;  %v474_v12 = vmax.f32 %v442_v3, 0.0  ;;  %v443_v13 = vadd.f32 %v712_v49, %v347_v4  ;;  %v349_v14 = vadd.f32 %v827_v1, %v313_v5  ;;  %v720_v15 = vunpack.c.h.bf16 %v753_v59 }
  0x39   : > { %v444_v16 = vadd.f32 %v715_v54, %v348_v7  ;;  %v350_v17 = vadd.f32 %v827_v1, %v314_v8  ;;  %v315_v18 = vmul.f32 %v822_v0, %v656_v10  ;;  %v659_v19 = vunpack.c.l.bf16 %v739_v6 }
  0x3a   : > { %506 = vst [vmem:[%s853_s5 + $0xc0] sm:$0xff] %v474_v12  ;;  %v475_v20 = vmax.f32 %v443_v13, 0.0  ;;  %v445_v21 = vadd.f32 %v716_v62, %v349_v14  ;;  %v723_v22 = vunpack.c.l.bf16 %v754_v11  ;;  %v660_v23 = vunpack.c.h.bf16 %v739_v6 }
  0x3b   : > { %v476_v24 = vmax.f32 %v444_v16, 0.0  ;;  %v446_v25 = vadd.f32 %v719_v9, %v350_v17  ;;  %v351_v26 = vadd.f32 %v827_v1, %v315_v18  ;;  %v316_v27 = vmul.f32 %v822_v0, %v659_v19 }
  0x3c   : > { %507 = vst [vmem:[%s853_s5 + $0xc8] sm:$0xff] %v475_v20  ;;  %v477_v28 = vmax.f32 %v445_v21, 0.0  ;;  %v317_v29 = vmul.f32 %v822_v0, %v660_v23  ;;  %v724_v30 = vunpack.c.h.bf16 %v754_v11 }
  0x3d   : > { %508 = vst [vmem:[%s853_s5 + $0xd0] sm:$0xff] %v476_v24  ;;  %v478_v31 = vmax.f32 %v446_v25, 0.0  ;;  %v447_v32 = vadd.f32 %v720_v15, %v351_v26  ;;  %v352_v33 = vadd.f32 %v827_v1, %v316_v27 }
  0x3e   : > { %509 = vst [vmem:[%s853_s5 + $0xd8] sm:$0xff] %v477_v28  ;;  %v353_v34 = vadd.f32 %v827_v1, %v317_v29 }
  0x3f   : > { %510 = vst [vmem:[%s853_s5 + $0xe0] sm:$0xff] %v478_v31  ;;  %v479_v35 = vmax.f32 %v447_v32, 0.0  ;;  %v448_v36 = vadd.f32 %v723_v22, %v352_v33 }
  0x40   : > { %v449_v37 = vadd.f32 %v724_v30, %v353_v34 }
  0x41   : > { %511 = vst [vmem:[%s853_s5 + $0xe8] sm:$0xff] %v479_v35  ;;  %v480_v38 = vmax.f32 %v448_v36, 0.0 }
  0x42   : > { %v481_v39 = vmax.f32 %v449_v37, 0.0 }
  0x43   : > { %512 = vst [vmem:[%s853_s5 + $0xf0] sm:$0xff] %v480_v38 }
  0x44   : > { %513 = vst [vmem:[%s853_s5 + $0xf8] sm:$0xff] %v481_v39 }
  0x45 PF: > { %s14_s15 = sadd.s32 1, %s771_s15  }
  0x46   : > { %p11_p4 = scmp.ge.s32.totalorder %s14_s15, 4  }
  0x48   :  { %13 = sbr.rel (!%p11_p4) target bundleno = 1 (0x1), region = 69 }

// kernel: residual_forward.3
= control target key start
LH: loop header
LB: loop body
LE: loop exit
PB: predicated region body
PF: predicated region fallthrough
CT: control target
= control target key end

     0   :  { %s7900_s24 = smov 0   ;;  %s9422_s0 = inlined_call_operand.vmem [shape: f32[2,16,16,4], index: 0, kind: input, shape index: {}]   ;;  %s9423_s1 = inlined_call_operand.vmem [shape: bf16[3,3,128,128], index: 1, kind: input, shape index: {}]   ;;  %s9424_s2 = inlined_call_operand.vmem [shape: bf16[128,128], index: 2, kind: input, shape index: {}]   ;;  %s9425_s3 = inlined_call_operand.vmem [shape: f32[1,128], index: 3, kind: input, shape index: {}]   ;;  %s9426_s4 = inlined_call_operand.vmem [shape: bf16[2,256,128], index: 4, kind: output, shape index: {0}]   ;;  %s9427_s5 = inlined_call_operand.vmem [shape: f32[2,1,128], index: 5, kind: output, shape index: {1}]   ;;  %s9428_s6 = inlined_call_operand.vmem [shape: f32[2,1,128], index: 6, kind: output, shape index: {2}]   ;;  %s9429_s7 = inlined_call_operand.vmem [shape: bf16[2,256,128], index: 7, kind: output, shape index: {3}]  }
   0x1 LB: > { %s6722_s25 = sadd.s32 4294967295, %s7857_s24   ;;  %p6726_p0 = scmp.ge.s32.totalorder %s7857_s24, 1  ;;  %s7857_s24 = sphi %s7900_s24, %s18_s24  }
   0x2   : > { %p244_p1 = scmp.lt.s32.totalorder %s7857_s24, 3 }
   0x4   : > { %p245_p2 = pnand %p6726_p0, %p244_p1 }
   0x6   : > { %248 = sbr.rel (%p245_p2) target bundleno = 877 (0x36d), region = 36 }
   0xb   : > { %v7497_v0 = vld [vmem:[%s9423_s1 + $0x38] sm:$0xff]  ;;  %p287_p3 = scmp.lt.s32.totalorder %s6722_s25, 1  ;;  %v7859_v2 = vmov 0   ;;  %v7496_v3 = vld [vmem:[%s9423_s1 + $0x30] sm:$0xff]  ;;  %v7495_v5 = vld [vmem:[%s9423_s1 + $0x28] sm:$0xff]  ;;  %vm446_vm0 = vcmask 27648  }
   0xc   : > { %v7521_v1 = vld [vmem:[%s9423_s1 + $0x78] sm:$0xff]  ;;  %341 = vst [vmem:[#allocation2 + $0x80] sm:$0xf] %v7859_v2  ;;  %7824 = vmatpush.bf16.msra.mxu2 %v7497_v0  ;;  %v7520_v4 = vld [vmem:[%s9423_s1 + $0x70] sm:$0xff]  ;;  %1074 = vmatpush.bf16.msra.mxu0 %v7497_v0  ;;  %v7519_v6 = vld [vmem:[%s9423_s1 + $0x68] sm:$0xff] }
   0xd   : > { %7832 = vmatpush.bf16.msra.mxu3 %v7521_v1  ;;  %s9476_s25 = smov (!%p287_p3, %s6722_s25), 1  ;;  %342 = vst [vmem:[#allocation2 + $0x84] sm:$0xf] %v7859_v2  ;;  %1452 = vmatpush.bf16.msra.mxu1 %v7521_v1  ;;  %v7494_v11 = vld [vmem:[%s9423_s1 + $0x20] sm:$0xff]  ;;  %v7493_v14 = vld [vmem:[%s9423_s1 + $0x18] sm:$0xff]  ;;  %v7492_v24 = vld [vmem:[%s9423_s1 + $0x10] sm:$0xff] }
   0xe   : > { %343 = vst [vmem:[#allocation2 + $0x88] sm:$0xf] %v7859_v2  ;;  %s7487_s11 = sshll.u32 %s9476_s25, 8  ;;  %v7518_v12 = vld [vmem:[%s9423_s1 + $0x60] sm:$0xff]  ;;  %vm591_vm1 = vsmask.f32 256  ;;  %s299_s19 = scalar_lea.vmem %s9427_s5, %s9476_s25 }
   0xf   : > { %s7932_s16 = scalar_lea.vmem %s9422_s0, %s7487_s11  ;;  %309 = vst [vmem:[#allocation2] sm:$0xf] %v7859_v2  ;;  %v7517_v16 = vld [vmem:[%s9423_s1 + $0x58] sm:$0xff]  ;;  %vm592_vm2 = vsmask.f32 4368  ;;  %v7516_v25 = vld [vmem:[%s9423_s1 + $0x50] sm:$0xff]  ;;  %s302_s22 = scalar_lea.vmem %s9428_s6, %s9476_s25 }
  0x10   : > { %7825 = vmatpush.bf16.msra.mxu2 %v7496_v3  ;;  %v395_v7 = vld [vmem:[%s7932_s16 + $0x70] sm:$0xff]  ;;  %v396_v8 = vld [vmem:[%s7932_s16 + $0x78] sm:$0xff]  ;;  %310 = vst [vmem:[#allocation2 + $0x4] sm:$0xf] %v7859_v2  ;;  %1075 = vmatpush.bf16.msra.mxu0 %v7496_v3  ;;  %vm7974_vm3 = vmor %vm591_vm1, %vm592_vm2  ;;  %vm1685_vm4 = vsmask.f32 3328 }
  0x11   : > { %7833 = vmatpush.bf16.msra.mxu3 %v7520_v4  ;;  %1453 = vmatpush.bf16.msra.mxu1 %v7520_v4  ;;  %v427_v9 = vpack.c.bf16 %v395_v7, %v395_v7  ;;  %v428_v10 = vpack.c.bf16 %v396_v8, %v396_v8  ;;  %311 = vst [vmem:[#allocation2 + $0x8] sm:$0xf] %v7859_v2  ;;  %v7491_v45 = vld [vmem:[%s9423_s1 + $0x8] sm:$0xff]  ;;  %v7490_v54 = vld [vmem:[%s9423_s1] sm:$0xff]  ;;  %v7529_v62 = vld [vmem:[%s9423_s1 + $0xb8] sm:$0xff]  ;;  %s7488_s30 = sshll.u32 %s9476_s25, 7 }
  0x12   : > { %312 = vst [vmem:[#allocation2 + $0xc] sm:$0xf] %v7859_v2  ;;  %v7515_v46 = vld [vmem:[%s9423_s1 + $0x48] sm:$0xff]  ;;  %v7514_v55 = vld [vmem:[%s9423_s1 + $0x40] sm:$0xff]  ;;  %v7537_v63 = vld [vmem:[%s9423_s1 + $0xf8] sm:$0xff]  ;;  %s9216_s10 = scalar_lea.vmem %s9429_s7, %s7488_s30  ;;  %s9244_s13 = scalar_lea.vmem %s9426_s4, %s7488_s30 }
  0x13   : > { %461 = vst.msk [vmem:[#allocation2 + $0x84] sm:$0xf] %vm446_vm0, %v427_v9  ;;  %v535_v13 = vld [vmem:[#allocation2 + $0x80] sm:$0x8]  ;;  %v7561_v0 = vld [vmem:[%s9423_s1 + $0x138] sm:$0xff]  ;;  %v7528_v1 = vld [vmem:[%s9423_s1 + $0xb0] sm:$0xff] }
  0x14   : > { %7826 = vmatpush.bf16.msra.mxu2 %v7495_v5  ;;  %462 = vst.msk [vmem:[#allocation2 + $0x88] sm:$0xf] %vm446_vm0, %v428_v10  ;;  %1076 = vmatpush.bf16.msra.mxu0 %v7495_v5  ;;  %v771_v17 = vshrl.u32 %v535_v13, 16  ;;  %v7536_v3 = vld [vmem:[%s9423_s1 + $0xf0] sm:$0xff]  ;;  %v7569_v4 = vld [vmem:[%s9423_s1 + $0x178] sm:$0xff]  ;;  %v398_v7 = vld [vmem:[%s7932_s16 + $0x88] sm:$0xff] }
  0x15   : > { %7834 = vmatpush.bf16.msra.mxu3 %v7519_v6  ;;  %1454 = vmatpush.bf16.msra.mxu1 %v7519_v6  ;;  %313 = vst [vmem:[#allocation2 + $0x10] sm:$0xf] %v7859_v2  ;;  %v7560_v5 = vld [vmem:[%s9423_s1 + $0x130] sm:$0xff]  ;;  %v397_v6 = vld [vmem:[%s7932_s16 + $0x80] sm:$0xff]  ;;  %v382_v10 = vld [vmem:[%s7932_s16 + $0x8] sm:$0xff] }
  0x16   : > { %314 = vst [vmem:[#allocation2 + $0x14] sm:$0xf] %v7859_v2  ;;  %v511_v15 = vld [vmem:[#allocation2] sm:$0x8]  ;;  %v6741_v32 = vrot.slane %v771_v17, 11  ;;  %v429_v9 = vpack.c.bf16 %v397_v6, %v397_v6 }
  0x17   : > { %315 = vst [vmem:[#allocation2 + $0x18] sm:$0xf] %v7859_v2  ;;  %v512_v18 = vld [vmem:[#allocation2 + $0x4] sm:$0xf]  ;;  %v595_v20 = vshrl.u32 %v511_v15, 16  ;;  %v400_v15 = vld [vmem:[%s7932_s16 + $0x98] sm:$0xff] }
  0x18   : > { %7827 = vmatpush.bf16.msra.mxu2 %v7494_v11  ;;  %316 = vst [vmem:[#allocation2 + $0x1c] sm:$0xf] %v7859_v2  ;;  %v513_v19 = vld [vmem:[#allocation2 + $0x8] sm:$0xf]  ;;  %v600_v21 = vshrl.u32 %v512_v18, 16  ;;  %1077 = vmatpush.bf16.msra.mxu0 %v7494_v11  ;;  %v603_v22 = vshll.u32 %v512_v18, 16  ;;  %v430_v11 = vpack.c.bf16 %v398_v7, %v398_v7 }
  0x19   : > { %7835 = vmatpush.bf16.msra.mxu3 %v7518_v12  ;;  %1455 = vmatpush.bf16.msra.mxu1 %v7518_v12  ;;  %317 = vst [vmem:[#allocation2 + $0x20] sm:$0xf] %v7859_v2  ;;  %v609_v23 = vshrl.u32 %v513_v19, 16  ;;  %v612_v28 = vshll.u32 %v513_v19, 16  ;;  %v6733_v35 = vrot.slane %v595_v20, 11  ;;  %v7498_v61 = vld [vmem:[#allocation2 + $0x4] sm:$0xff] }
  0x1a   : > { %v536_v26 = vld [vmem:[#allocation2 + $0x84] sm:$0xf]  ;;  %318 = vst [vmem:[#allocation2 + $0x24] sm:$0xf] %v7859_v2  ;;  %v602_v27 = vrot.slane %v600_v21, 7  ;;  %v399_v12 = vld [vmem:[%s7932_s16 + $0x90] sm:$0xff] }
  0x1b   : > { %v537_v29 = vld [vmem:[#allocation2 + $0x88] sm:$0xf]  ;;  %v776_v30 = vshrl.u32 %v536_v26, 16  ;;  %v779_v31 = vshll.u32 %v536_v26, 16  ;;  %319 = vst [vmem:[#allocation2 + $0x28] sm:$0xf] %v7859_v2  ;;  %v431_v19 = vpack.c.bf16 %v399_v12, %v399_v12 }
  0x1c   : > { %7828 = vmatpush.bf16.msra.mxu2 %v7493_v14  ;;  %v785_v33 = vshrl.u32 %v537_v29, 16  ;;  %v788_v34 = vshll.u32 %v537_v29, 16  ;;  %320 = vst [vmem:[#allocation2 + $0x2c] sm:$0xf] %v7859_v2  ;;  %1078 = vmatpush.bf16.msra.mxu0 %v7493_v14  ;;  %v605_v37 = vor.u32 %v603_v22, %v602_v27  ;;  %v607_v38 = vrot.slane %v602_v27, 4  ;;  %v7506_v59 = vld [vmem:[#allocation2 + $0x84] sm:$0xff] }
  0x1d   : > { %7836 = vmatpush.bf16.msra.mxu3 %v7517_v16  ;;  %1456 = vmatpush.bf16.msra.mxu1 %v7517_v16  ;;  %v778_v36 = vrot.slane %v776_v30, 7  ;;  %321 = vst [vmem:[#allocation2 + $0x30] sm:$0xf] %v7859_v2  ;;  %v611_v39 = vrot.slane %v609_v23, 7  ;;  %v381_v8 = vld [vmem:[%s7932_s16] sm:$0xff]  ;;  %v414_v16 = vpack.c.bf16 %v382_v10, %v382_v10  ;;  %v383_v18 = vld [vmem:[%s7932_s16 + $0x10] sm:$0xff]  ;;  %v432_v22 = vpack.c.bf16 %v400_v15, %v400_v15 }
  0x1e   : > { %v787_v41 = vrot.slane %v785_v33, 7  ;;  %322 = vst [vmem:[#allocation2 + $0x34] sm:$0xf] %v7859_v2  ;;  %v606_v49 = vsel %vm7974_vm3, %v6733_v35, %v605_v37  ;;  %v413_v14 = vpack.c.bf16 %v381_v8, %v381_v8  ;;  %v514_v17 = vld [vmem:[#allocation2 + $0x10] sm:$0x8]  ;;  %v384_v20 = vld [vmem:[%s7932_s16 + $0x18] sm:$0xff] }
  0x1f   : > { %v781_v42 = vor.u32 %v779_v31, %v778_v36  ;;  %v783_v43 = vrot.slane %v778_v36, 4  ;;  %323 = vst [vmem:[#allocation2 + $0x38] sm:$0xf] %v7859_v2  ;;  %v614_v44 = vor.u32 %v612_v28, %v611_v39  ;;  %v962_v56 = vunpack.c.l.b16 %v606_v49  ;;  %v7527_v26 = vld [vmem:[%s9423_s1 + $0xa8] sm:$0xff]  ;;  %v7568_v31 = vld [vmem:[%s9423_s1 + $0x170] sm:$0xff]  ;;  %v385_v35 = vld [vmem:[%s7932_s16 + $0x20] sm:$0xff] }
  0x20   : > { %7829 = vmatpush.bf16.msra.mxu2 %v7492_v24  ;;  %v790_v47 = vor.u32 %v788_v34, %v787_v41  ;;  %324 = vst [vmem:[#allocation2 + $0x3c] sm:$0xf] %v7859_v2  ;;  %1079 = vmatpush.bf16.msra.mxu0 %v7492_v24  ;;  %v617_v23 = vshrl.u32 %v514_v17, 16  ;;  %v415_v24 = vpack.c.bf16 %v383_v18, %v383_v18  ;;  %v7535_v30 = vld [vmem:[%s9423_s1 + $0xe8] sm:$0xff]  ;;  %v517_v12 = vld [vmem:[#allocation2 + $0x20] sm:$0x8] }
  0x21   : > { %7837 = vmatpush.bf16.msra.mxu3 %v7516_v25  ;;  %1457 = vmatpush.bf16.msra.mxu1 %v7516_v25  ;;  %v782_v48 = vsel %vm7974_vm3, %v6741_v32, %v781_v42  ;;  %325 = vst [vmem:[#allocation2 + $0x40] sm:$0xf] %v7859_v2  ;;  %v615_v50 = vsel %vm7974_vm3, %v607_v38, %v614_v44  ;;  %v401_v25 = vld [vmem:[%s7932_s16 + $0xa0] sm:$0xff]  ;;  %v7559_v32 = vld [vmem:[%s9423_s1 + $0x128] sm:$0xff]  ;;  %vm1686_vm5 = vsmask.f32 7440 }
  0x22   : > { %v791_v51 = vsel %vm7974_vm3, %v783_v43, %v790_v47  ;;  %326 = vst [vmem:[#allocation2 + $0x44] sm:$0xf] %v7859_v2  ;;  %v978_v52 = vunpack.c.l.b16 %v782_v48  ;;  %v963_v57 = vunpack.c.l.b16 %v615_v50  ;;  %v433_v28 = vpack.c.bf16 %v401_v25, %v401_v25  ;;  %v402_v34 = vld [vmem:[%s7932_s16 + $0xa8] sm:$0xff]  ;;  %vm8306_vm6 = vmor %vm1685_vm4, %vm1686_vm5 }
  0x23   : > { %v979_v53 = vunpack.c.l.b16 %v791_v51  ;;  %327 = vst [vmem:[#allocation2 + $0x48] sm:$0xf] %v7859_v2  ;;  %v8093_v29 = vrot.slane %v617_v23, 11  ;;  %v386_v41 = vld [vmem:[%s7932_s16 + $0x28] sm:$0xff]  ;;  %v434_v51 = vpack.c.bf16 %v402_v34, %v402_v34 }
  0x24   : > { %7830 = vmatpush.bf16.msra.mxu2 %v7491_v45  ;;  %328 = vst [vmem:[#allocation2 + $0x4c] sm:$0xf] %v7859_v2  ;;  %1080 = vmatpush.bf16.msra.mxu0 %v7491_v45  ;;  %v994_v60 = vpack.c.b16 %v963_v57, %v962_v56  ;;  %v417_v56 = vpack.c.bf16 %v385_v35, %v385_v35 }
  0x25   : > { %7838 = vmatpush.bf16.msra.mxu3 %v7515_v46  ;;  %1458 = vmatpush.bf16.msra.mxu1 %v7515_v46  ;;  %329 = vst [vmem:[#allocation2 + $0x50] sm:$0xf] %v7859_v2  ;;  %v1002_v58 = vpack.c.b16 %v979_v53, %v978_v52 }
  0x26   : > { %330 = vst [vmem:[#allocation2 + $0x54] sm:$0xf] %v7859_v2 }
  0x27   : > { %331 = vst [vmem:[#allocation2 + $0x58] sm:$0xf] %v7859_v2 }
  0x28   : > { %7831 = vmatpush.bf16.msra.mxu2 %v7490_v54  ;;  %332 = vst [vmem:[#allocation2 + $0x5c] sm:$0xf] %v7859_v2  ;;  %1081 = vmatpush.bf16.msra.mxu0 %v7490_v54 }
  0x29   : > { %7839 = vmatpush.bf16.msra.mxu3 %v7514_v55  ;;  %1459 = vmatpush.bf16.msra.mxu1 %v7514_v55  ;;  %333 = vst [vmem:[#allocation2 + $0x60] sm:$0xf] %v7859_v2 }
  0x2a   : > { %334 = vst [vmem:[#allocation2 + $0x64] sm:$0xf] %v7859_v2 }
  0x2b   : > { %1122 = vmatmul.bf16.vlgmr.msra.gmra.mxu2 %v1002_v58  ;;  %335 = vst [vmem:[#allocation2 + $0x68] sm:$0xf] %v7859_v2  ;;  %1082 = vmatmul.bf16.vlgmr.msra.gmra.mxu0 %v994_v60 }
  0x2c   : > { %1500 = vmatmul.bf16.vlgmr.msra.gmra.mxu3 %v7506_v59  ;;  %336 = vst [vmem:[#allocation2 + $0x6c] sm:$0xf] %v7859_v2  ;;  %1460 = vmatmul.bf16.vlgmr.msra.gmra.mxu1 %v7498_v61 }
  0x2d   : > { %337 = vst [vmem:[#allocation2 + $0x70] sm:$0xf] %v7859_v2  ;;  %2201 = vmatpush.bf16.msrb.mxu2 %v7529_v62  ;;  %2915 = vmatpush.bf16.msrb.mxu3 %v7537_v63 }
  0x2e   : > { %338 = vst [vmem:[#allocation2 + $0x74] sm:$0xf] %v7859_v2  ;;  %3293 = vmatpush.bf16.msrb.mxu0 %v7561_v0  ;;  %4039 = vmatpush.bf16.msrb.mxu1 %v7569_v4 }
  0x2f   : > { %339 = vst [vmem:[#allocation2 + $0x78] sm:$0xf] %v7859_v2 }
  0x30   : > { %340 = vst [vmem:[#allocation2 + $0x7c] sm:$0xf] %v7859_v2 }
  0x31   : > { %344 = vst [vmem:[#allocation2 + $0x8c] sm:$0xf] %v7859_v2  ;;  %2202 = vmatpush.bf16.msrb.mxu2 %v7528_v1  ;;  %2916 = vmatpush.bf16.msrb.mxu3 %v7536_v3  ;;  %v418_v1 = vpack.c.bf16 %v386_v41, %v386_v41 }
  0x32   : > { %345 = vst [vmem:[#allocation2 + $0x90] sm:$0xf] %v7859_v2  ;;  %3294 = vmatpush.bf16.msrb.mxu0 %v7560_v5  ;;  %4040 = vmatpush.bf16.msrb.mxu1 %v7568_v31  ;;  %v7526_v31 = vld [vmem:[%s9423_s1 + $0xa0] sm:$0xff] }
  0x33   : > { %346 = vst [vmem:[#allocation2 + $0x94] sm:$0xf] %v7859_v2 }
  0x34   : > { %347 = vst [vmem:[#allocation2 + $0x98] sm:$0xf] %v7859_v2 }
  0x35   : > { %348 = vst [vmem:[#allocation2 + $0x9c] sm:$0xf] %v7859_v2  ;;  %2203 = vmatpush.bf16.msrb.mxu2 %v7527_v26  ;;  %2917 = vmatpush.bf16.msrb.mxu3 %v7535_v30 }
  0x36   : > { %349 = vst [vmem:[#allocation2 + $0xa0] sm:$0xf] %v7859_v2  ;;  %3295 = vmatpush.bf16.msrb.mxu0 %v7559_v32 }
  0x37   : > { %350 = vst [vmem:[#allocation2 + $0xa4] sm:$0xf] %v7859_v2 }
  0x38   : > { %351 = vst [vmem:[#allocation2 + $0xa8] sm:$0xf] %v7859_v2 }
  0x39   : > { %352 = vst [vmem:[#allocation2 + $0xac] sm:$0xf] %v7859_v2  ;;  %v538_v13 = vld [vmem:[#allocation2 + $0x90] sm:$0x8]  ;;  %2204 = vmatpush.bf16.msrb.mxu2 %v7526_v31 }
  0x3a   : > { %353 = vst [vmem:[#allocation2 + $0xb0] sm:$0xf] %v7859_v2  ;;  %v793_v21 = vshrl.u32 %v538_v13, 16 }
  0x3b   : > { %354 = vst [vmem:[#allocation2 + $0xb4] sm:$0xf] %v7859_v2 }
  0x3c   : > { %355 = vst [vmem:[#allocation2 + $0xb8] sm:$0xf] %v7859_v2  ;;  %v6742_v27 = vrot.slane %v793_v21, 11 }
  0x3d   : > { %356 = vst [vmem:[#allocation2 + $0xbc] sm:$0xf] %v7859_v2  ;;  %v541_v45 = vld [vmem:[#allocation2 + $0xa0] sm:$0x8] }
  0x3e   : > { %357 = vst [vmem:[#allocation2 + $0xc0] sm:$0xf] %v7859_v2  ;;  %v815_v6 = vshrl.u32 %v541_v45, 16  ;;  %v7558_v45 = vld [vmem:[%s9423_s1 + $0x120] sm:$0xff] }
  0x3f   : > { %358 = vst [vmem:[#allocation2 + $0xc4] sm:$0xf] %v7859_v2  ;;  %3296 = vmatpush.bf16.msrb.mxu0 %v7558_v45 }
  0x40   : > { %359 = vst [vmem:[#allocation2 + $0xc8] sm:$0xf] %v7859_v2 }
  0x41   : > { %360 = vst [vmem:[#allocation2 + $0xcc] sm:$0xf] %v7859_v2 }
  0x42   : > { %361 = vst [vmem:[#allocation2 + $0xd0] sm:$0xf] %v7859_v2 }
  0x43   : > { %362 = vst [vmem:[#allocation2 + $0xd4] sm:$0xf] %v7859_v2 }
  0x44   : > { %363 = vst [vmem:[#allocation2 + $0xd8] sm:$0xf] %v7859_v2 }
  0x45   : > { %364 = vst [vmem:[#allocation2 + $0xdc] sm:$0xf] %v7859_v2 }
  0x46   : > { %365 = vst [vmem:[#allocation2 + $0xe0] sm:$0xf] %v7859_v2 }
  0x47   : > { %366 = vst [vmem:[#allocation2 + $0xe4] sm:$0xf] %v7859_v2 }
  0x48   : > { %367 = vst [vmem:[#allocation2 + $0xe8] sm:$0xf] %v7859_v2 }
  0x49   : > { %368 = vst [vmem:[#allocation2 + $0xec] sm:$0xf] %v7859_v2 }
  0x4a   : > { %369 = vst [vmem:[#allocation2 + $0xf0] sm:$0xf] %v7859_v2 }
  0x4b   : > { %370 = vst [vmem:[#allocation2 + $0xf4] sm:$0xf] %v7859_v2 }
  0x4c   : > { %371 = vst [vmem:[#allocation2 + $0xf8] sm:$0xf] %v7859_v2 }
  0x4d   : > { %372 = vst [vmem:[#allocation2 + $0xfc] sm:$0xf] %v7859_v2 }
  0x4e   : > { %373 = vst [vmem:[#allocation2 + $0x100] sm:$0xf] %v7859_v2 }
  0x4f   : > { %374 = vst [vmem:[#allocation2 + $0x104] sm:$0xf] %v7859_v2 }
  0x50   : > { %375 = vst [vmem:[#allocation2 + $0x108] sm:$0xf] %v7859_v2 }
  0x51   : > { %376 = vst [vmem:[#allocation2 + $0x10c] sm:$0xf] %v7859_v2 }
  0x52   : > { %377 = vst [vmem:[#allocation2 + $0x110] sm:$0xf] %v7859_v2 }
  0x53   : > { %378 = vst [vmem:[#allocation2 + $0x114] sm:$0xf] %v7859_v2 }
  0x54   : > { %379 = vst [vmem:[#allocation2 + $0x118] sm:$0xf] %v7859_v2 }
  0x55   : > { %380 = vst [vmem:[#allocation2 + $0x11c] sm:$0xf] %v7859_v2  ;;  %v416_v2 = vpack.c.bf16 %v384_v20, %v384_v20 }
  0x56   : > { %463 = vst.msk [vmem:[#allocation2 + $0x94] sm:$0xf] %vm446_vm0, %v429_v9 }
  0x57   : > { %464 = vst.msk [vmem:[#allocation2 + $0x98] sm:$0xf] %vm446_vm0, %v430_v11 }
  0x58   : > { %447 = vst.msk [vmem:[#allocation2 + $0x14] sm:$0xf] %vm446_vm0, %v413_v14 }
  0x59   : > { %448 = vst.msk [vmem:[#allocation2 + $0x18] sm:$0xf] %vm446_vm0, %v414_v16 }
  0x5a   : > { %465 = vst.msk [vmem:[#allocation2 + $0xa4] sm:$0xf] %vm446_vm0, %v431_v19 }
  0x5b   : > { %466 = vst.msk [vmem:[#allocation2 + $0xa8] sm:$0xf] %vm446_vm0, %v432_v22 }
  0x5c   : > { %449 = vst.msk [vmem:[#allocation2 + $0x24] sm:$0xf] %vm446_vm0, %v415_v24  ;;  %v639_v24 = vshrl.u32 %v517_v12, 16 }
  0x5d   : > { %v539_v33 = vld [vmem:[#allocation2 + $0x94] sm:$0xf]  ;;  %450 = vst.msk [vmem:[#allocation2 + $0x28] sm:$0xf] %vm446_vm0, %v416_v2 }
  0x5e   : > { %v540_v36 = vld [vmem:[#allocation2 + $0x98] sm:$0xf]  ;;  %v798_v37 = vshrl.u32 %v539_v33, 16  ;;  %v801_v38 = vshll.u32 %v539_v33, 16  ;;  %467 = vst.msk [vmem:[#allocation2 + $0xb4] sm:$0xf] %vm446_vm0, %v433_v28 }
  0x5f   : > { %v7507_v39 = vld [vmem:[#allocation2 + $0x94] sm:$0xff]  ;;  %v807_v42 = vshrl.u32 %v540_v36, 16  ;;  %v810_v43 = vshll.u32 %v540_v36, 16  ;;  %468 = vst.msk [vmem:[#allocation2 + $0xb8] sm:$0xf] %vm446_vm0, %v434_v51 }
  0x60   : > { %v515_v44 = vld [vmem:[#allocation2 + $0x14] sm:$0xf]  ;;  %v800_v46 = vrot.slane %v798_v37, 7  ;;  %1505 = vmatmul.bf16.gmra.mxu3 %v7507_v39  ;;  %v516_v47 = vld [vmem:[#allocation2 + $0x18] sm:$0xf]  ;;  %v7534_v37 = vld [vmem:[%s9423_s1 + $0xe0] sm:$0xff] }
  0x61   : > { %v622_v48 = vshrl.u32 %v515_v44, 16  ;;  %v625_v49 = vshll.u32 %v515_v44, 16  ;;  %v7499_v50 = vld [vmem:[#allocation2 + $0x14] sm:$0xff]  ;;  %v809_v52 = vrot.slane %v807_v42, 7  ;;  %v631_v53 = vshrl.u32 %v516_v47, 16  ;;  %v7567_v44 = vld [vmem:[%s9423_s1 + $0x168] sm:$0xff]  ;;  %2918 = vmatpush.bf16.msrb.mxu3 %v7534_v37 }
  0x62   : > { %v634_v54 = vshll.u32 %v516_v47, 16  ;;  %v542_v55 = vld [vmem:[#allocation2 + $0xa4] sm:$0xf]  ;;  %v803_v57 = vor.u32 %v801_v38, %v800_v46  ;;  %v805_v58 = vrot.slane %v800_v46, 4  ;;  %1465 = vmatmul.bf16.gmra.mxu1 %v7499_v50  ;;  %v543_v60 = vld [vmem:[#allocation2 + $0xa8] sm:$0xf] }
  0x63   : > { %v624_v59 = vrot.slane %v622_v48, 7  ;;  %v820_v61 = vshrl.u32 %v542_v55, 16  ;;  %v812_v62 = vor.u32 %v810_v43, %v809_v52  ;;  %v633_v63 = vrot.slane %v631_v53, 7  ;;  %v518_v7 = vld [vmem:[#allocation2 + $0x24] sm:$0xf]  ;;  %4041 = vmatpush.bf16.msrb.mxu1 %v7567_v44  ;;  %v404_v51 = vld [vmem:[%s7932_s16 + $0xb8] sm:$0xff] }
  0x64   : > { %v829_v0 = vshrl.u32 %v543_v60, 16  ;;  %v804_v3 = vsel %vm7974_vm3, %v6742_v27, %v803_v57  ;;  %v823_v11 = vshll.u32 %v542_v55, 16  ;;  %v519_v17 = vld [vmem:[#allocation2 + $0x28] sm:$0xf]  ;;  %451 = vst.msk [vmem:[#allocation2 + $0x34] sm:$0xf] %vm446_vm0, %v417_v56 }
  0x65   : > { %v627_v4 = vor.u32 %v625_v49, %v624_v59  ;;  %v629_v5 = vrot.slane %v624_v59, 4  ;;  %v813_v8 = vsel %vm7974_vm3, %v805_v58, %v812_v62  ;;  %v980_v9 = vunpack.c.l.b16 %v804_v3  ;;  %452 = vst.msk [vmem:[#allocation2 + $0x38] sm:$0xf] %vm446_vm0, %v418_v1  ;;  %v403_v27 = vld [vmem:[%s7932_s16 + $0xb0] sm:$0xff]  ;;  %v7508_v36 = vld [vmem:[#allocation2 + $0xa4] sm:$0xff]  ;;  %v388_v59 = vld [vmem:[%s7932_s16 + $0x38] sm:$0xff] }
  0x66   : > { %v636_v10 = vor.u32 %v634_v54, %v633_v63  ;;  %v981_v13 = vunpack.c.l.b16 %v813_v8  ;;  %v822_v15 = vrot.slane %v820_v61, 7  ;;  %v831_v16 = vrot.slane %v829_v0, 7  ;;  %v7500_v46 = vld [vmem:[#allocation2 + $0x24] sm:$0xff]  ;;  %v545_v47 = vld [vmem:[#allocation2 + $0xb4] sm:$0xf]  ;;  %v7533_v37 = vld [vmem:[%s9423_s1 + $0xd8] sm:$0xff] }
  0x67   : > { %v628_v14 = vsel %vm7974_vm3, %v8093_v29, %v627_v4  ;;  %v832_v20 = vshll.u32 %v543_v60, 16  ;;  %v644_v21 = vshrl.u32 %v518_v7, 16  ;;  %v647_v2 = vshll.u32 %v518_v7, 16  ;;  %v544_v50 = vld [vmem:[#allocation2 + $0xb0] sm:$0x8]  ;;  %2919 = vmatpush.bf16.msrb.mxu3 %v7533_v37 }
  0x68   : > { %v637_v18 = vsel %vm7974_vm3, %v629_v5, %v636_v10  ;;  %v964_v19 = vunpack.c.l.b16 %v628_v14  ;;  %v1003_v22 = vpack.c.b16 %v981_v13, %v980_v9  ;;  %v653_v26 = vshrl.u32 %v519_v17, 16  ;;  %v546_v52 = vld [vmem:[#allocation2 + $0xb8] sm:$0xf]  ;;  %v387_v54 = vld [vmem:[%s7932_s16 + $0x30] sm:$0xff]  ;;  %v405_v9 = vld [vmem:[%s7932_s16 + $0xc0] sm:$0xff] }
  0x69   : > { %v965_v23 = vunpack.c.l.b16 %v637_v18  ;;  %v646_v25 = vrot.slane %v644_v21, 7  ;;  %v6743_v29 = vrot.slane %v815_v6, 11  ;;  %v656_v30 = vshll.u32 %v519_v17, 16  ;;  %v520_v1 = vld [vmem:[#allocation2 + $0x30] sm:$0x8]  ;;  %v406_v10 = vld [vmem:[%s7932_s16 + $0xc8] sm:$0xff] }
  0x6a   : > { %1127 = vmatmul.bf16.gmra.mxu2 %v1003_v22  ;;  %v825_v32 = vor.u32 %v823_v11, %v822_v15  ;;  %v827_v33 = vrot.slane %v822_v15, 4  ;;  %v834_v34 = vor.u32 %v832_v20, %v831_v16  ;;  %v655_v35 = vrot.slane %v653_v26, 7  ;;  %v389_v18 = vld [vmem:[%s7932_s16 + $0x40] sm:$0xff] }
  0x6b   : > { %v995_v28 = vpack.c.b16 %v965_v23, %v964_v19  ;;  %v435_v38 = vpack.c.bf16 %v403_v27, %v403_v27  ;;  %v6735_v39 = vrot.slane %v639_v24, 11  ;;  %v649_v41 = vor.u32 %v647_v2, %v646_v25  ;;  %v521_v53 = vld [vmem:[#allocation2 + $0x34] sm:$0xf]  ;;  %v390_v19 = vld [vmem:[%s7932_s16 + $0x48] sm:$0xff]  ;;  %v7525_v27 = vld [vmem:[%s9423_s1 + $0x98] sm:$0xff] }
  0x6c   : > { %v651_v42 = vrot.slane %v646_v25, 4  ;;  %v658_v43 = vor.u32 %v656_v30, %v655_v35  ;;  %v826_v48 = vsel %vm7974_vm3, %v6743_v29, %v825_v32  ;;  %v835_v49 = vsel %vm7974_vm3, %v827_v33, %v834_v34  ;;  %v522_v58 = vld [vmem:[#allocation2 + $0x38] sm:$0xf]  ;;  %2205 = vmatpush.bf16.msrb.mxu2 %v7525_v27 }
  0x6d   : > { %1087 = vmatmul.bf16.gmra.mxu0 %v995_v28  ;;  %469 = vst.msk [vmem:[#allocation2 + $0xc4] sm:$0xf] %vm446_vm0, %v435_v38  ;;  %v650_v55 = vsel %vm7974_vm3, %v6735_v39, %v649_v41  ;;  %v842_v57 = vshrl.u32 %v545_v47, 16  ;;  %v982_v60 = vunpack.c.l.b16 %v826_v48  ;;  %v983_v61 = vunpack.c.l.b16 %v835_v49  ;;  %v7509_v32 = vld [vmem:[#allocation2 + $0xb4] sm:$0xff]  ;;  %v7566_v38 = vld [vmem:[%s9423_s1 + $0x160] sm:$0xff] }
  0x6e   : > { %v659_v56 = vsel %vm7974_vm3, %v651_v42, %v658_v43  ;;  %v436_v62 = vpack.c.bf16 %v404_v51, %v404_v51  ;;  %v837_v63 = vshrl.u32 %v544_v50, 16  ;;  %v851_v0 = vshrl.u32 %v546_v52, 16  ;;  %v7557_v39 = vld [vmem:[%s9423_s1 + $0x118] sm:$0xff]  ;;  %4042 = vmatpush.bf16.msrb.mxu1 %v7566_v38 }
  0x6f   : > { %v666_v3 = vshrl.u32 %v521_v53, 16  ;;  %v419_v4 = vpack.c.bf16 %v387_v54, %v387_v54  ;;  %v966_v5 = vunpack.c.l.b16 %v650_v55  ;;  %v967_v6 = vunpack.c.l.b16 %v659_v56  ;;  %v7501_v41 = vld [vmem:[#allocation2 + $0x34] sm:$0xff]  ;;  %3297 = vmatpush.bf16.msrb.mxu0 %v7557_v39  ;;  %v547_v54 = vld [vmem:[#allocation2 + $0xc0] sm:$0x8] }
  0x70   : > { %1510 = vmatmul.bf16.gmra.mxu3 %v7508_v36  ;;  %v675_v7 = vshrl.u32 %v522_v58, 16  ;;  %470 = vst.msk [vmem:[#allocation2 + $0xc8] sm:$0xf] %vm446_vm0, %v436_v62  ;;  %v420_v8 = vpack.c.bf16 %v388_v59, %v388_v59  ;;  %v844_v11 = vrot.slane %v842_v57, 7  ;;  %v845_v12 = vshll.u32 %v545_v47, 16 }
  0x71   : > { %453 = vst.msk [vmem:[#allocation2 + $0x44] sm:$0xf] %vm446_vm0, %v419_v4  ;;  %v437_v13 = vpack.c.bf16 %v405_v9, %v405_v9  ;;  %v438_v14 = vpack.c.bf16 %v406_v10, %v406_v10  ;;  %v1004_v15 = vpack.c.b16 %v983_v61, %v982_v60  ;;  %v854_v16 = vshll.u32 %v546_v52, 16  ;;  %v523_v57 = vld [vmem:[#allocation2 + $0x40] sm:$0x8]  ;;  %v407_v60 = vld [vmem:[%s7932_s16 + $0xd0] sm:$0xff] }
  0x72   : > { %1470 = vmatmul.bf16.gmra.mxu1 %v7500_v46  ;;  %v661_v17 = vshrl.u32 %v520_v1, 16  ;;  %454 = vst.msk [vmem:[#allocation2 + $0x48] sm:$0xf] %vm446_vm0, %v420_v8  ;;  %v853_v20 = vrot.slane %v851_v0, 7  ;;  %v668_v21 = vrot.slane %v666_v3, 7  ;;  %v669_v22 = vshll.u32 %v521_v53, 16 }
  0x73   : > { %471 = vst.msk [vmem:[#allocation2 + $0xd4] sm:$0xf] %vm446_vm0, %v437_v13  ;;  %v421_v23 = vpack.c.bf16 %v389_v18, %v389_v18  ;;  %v996_v24 = vpack.c.b16 %v967_v6, %v966_v5  ;;  %v677_v25 = vrot.slane %v675_v7, 7  ;;  %v678_v2 = vshll.u32 %v522_v58, 16  ;;  %v408_v1 = vld [vmem:[%s7932_s16 + $0xd8] sm:$0xff]  ;;  %v391_v3 = vld [vmem:[%s7932_s16 + $0x50] sm:$0xff] }
  0x74   : > { %472 = vst.msk [vmem:[#allocation2 + $0xd8] sm:$0xf] %vm446_vm0, %v438_v14  ;;  %v422_v26 = vpack.c.bf16 %v390_v19, %v390_v19  ;;  %v6744_v28 = vrot.slane %v837_v63, 11  ;;  %v847_v29 = vor.u32 %v845_v12, %v844_v11  ;;  %v849_v30 = vrot.slane %v844_v11, 4  ;;  %v548_v46 = vld [vmem:[#allocation2 + $0xc4] sm:$0xf] }
  0x75   : > { %455 = vst.msk [vmem:[#allocation2 + $0x54] sm:$0xf] %vm446_vm0, %v421_v23  ;;  %v856_v31 = vor.u32 %v854_v16, %v853_v20  ;;  %v6736_v33 = vrot.slane %v661_v17, 11  ;;  %v671_v34 = vor.u32 %v669_v22, %v668_v21  ;;  %v673_v35 = vrot.slane %v668_v21, 4  ;;  %v392_v4 = vld [vmem:[%s7932_s16 + $0x58] sm:$0xff]  ;;  %v7524_v18 = vld [vmem:[%s9423_s1 + $0x90] sm:$0xff] }
  0x76   : > { %456 = vst.msk [vmem:[#allocation2 + $0x58] sm:$0xf] %vm446_vm0, %v422_v26  ;;  %v680_v36 = vor.u32 %v678_v2, %v677_v25  ;;  %v848_v42 = vsel %vm7974_vm3, %v6744_v28, %v847_v29  ;;  %v864_v55 = vshrl.u32 %v548_v46, 16  ;;  %v859_v62 = vshrl.u32 %v547_v54, 16  ;;  %2206 = vmatpush.bf16.msrb.mxu2 %v7524_v18  ;;  %v7565_v25 = vld [vmem:[%s9423_s1 + $0x158] sm:$0xff]  ;;  %v7556_v2 = vld [vmem:[%s9423_s1 + $0x110] sm:$0xff] }
  0x77   : > { %v857_v43 = vsel %vm7974_vm3, %v849_v30, %v856_v31  ;;  %v672_v44 = vsel %vm7974_vm3, %v6736_v33, %v671_v34  ;;  %v549_v47 = vld [vmem:[#allocation2 + $0xc8] sm:$0xf]  ;;  %v984_v49 = vunpack.c.l.b16 %v848_v42  ;;  %v867_v63 = vshll.u32 %v548_v46, 16  ;;  %4043 = vmatpush.bf16.msrb.mxu1 %v7565_v25  ;;  %v550_v34 = vld [vmem:[#allocation2 + $0xd0] sm:$0x8]  ;;  %3298 = vmatpush.bf16.msrb.mxu0 %v7556_v2 }
  0x78   : > { %v681_v45 = vsel %vm7974_vm3, %v673_v35, %v680_v36  ;;  %v524_v48 = vld [vmem:[#allocation2 + $0x44] sm:$0xf]  ;;  %v985_v50 = vunpack.c.l.b16 %v857_v43  ;;  %v968_v52 = vunpack.c.l.b16 %v672_v44  ;;  %v873_v56 = vshrl.u32 %v549_v47, 16 }
  0x79   : > { %v525_v51 = vld [vmem:[#allocation2 + $0x48] sm:$0xf]  ;;  %v969_v53 = vunpack.c.l.b16 %v681_v45  ;;  %v688_v58 = vshrl.u32 %v524_v48, 16  ;;  %v683_v0 = vshrl.u32 %v523_v57, 16  ;;  %v866_v6 = vrot.slane %v864_v55, 7 }
  0x7a   : > { %1132 = vmatmul.bf16.gmra.mxu2 %v1004_v15  ;;  %v697_v59 = vshrl.u32 %v525_v51, 16  ;;  %v1005_v61 = vpack.c.b16 %v985_v50, %v984_v49  ;;  %v875_v7 = vrot.slane %v873_v56, 7  ;;  %v876_v8 = vshll.u32 %v549_v47, 16  ;;  %v7510_v22 = vld [vmem:[#allocation2 + $0xc4] sm:$0xff]  ;;  %v551_v23 = vld [vmem:[#allocation2 + $0xd4] sm:$0xf] }
  0x7b   : > { %v997_v5 = vpack.c.b16 %v969_v53, %v968_v52  ;;  %v690_v9 = vrot.slane %v688_v58, 7  ;;  %v691_v10 = vshll.u32 %v524_v48, 16  ;;  %v700_v11 = vshll.u32 %v525_v51, 16  ;;  %v552_v30 = vld [vmem:[#allocation2 + $0xd8] sm:$0xf]  ;;  %v7502_v31 = vld [vmem:[#allocation2 + $0x44] sm:$0xff] }
  0x7c   : > { %v439_v12 = vpack.c.bf16 %v407_v60, %v407_v60  ;;  %v699_v13 = vrot.slane %v697_v59, 7  ;;  %v440_v14 = vpack.c.bf16 %v408_v1, %v408_v1  ;;  %v423_v15 = vpack.c.bf16 %v391_v3, %v391_v3  ;;  %v527_v43 = vld [vmem:[#allocation2 + $0x54] sm:$0xf]  ;;  %v526_v51 = vld [vmem:[#allocation2 + $0x50] sm:$0x8]  ;;  %v409_v52 = vld [vmem:[%s7932_s16 + $0xe0] sm:$0xff] }
  0x7d   : > { %1092 = vmatmul.bf16.gmra.mxu0 %v996_v24  ;;  %v424_v16 = vpack.c.bf16 %v392_v4, %v392_v4  ;;  %v6745_v17 = vrot.slane %v859_v62, 11  ;;  %v869_v19 = vor.u32 %v867_v63, %v866_v6  ;;  %v871_v20 = vrot.slane %v866_v6, 4  ;;  %v7532_v24 = vld [vmem:[%s9423_s1 + $0xd0] sm:$0xff]  ;;  %v528_v44 = vld [vmem:[#allocation2 + $0x58] sm:$0xf]  ;;  %v410_v55 = vld [vmem:[%s7932_s16 + $0xe8] sm:$0xff] }
  0x7e   : > { %473 = vst.msk [vmem:[#allocation2 + $0xe4] sm:$0xf] %vm446_vm0, %v439_v12  ;;  %v878_v21 = vor.u32 %v876_v8, %v875_v7  ;;  %v6737_v26 = vrot.slane %v683_v0, 11  ;;  %v693_v27 = vor.u32 %v691_v10, %v690_v9  ;;  %v695_v28 = vrot.slane %v690_v9, 4  ;;  %2920 = vmatpush.bf16.msrb.mxu3 %v7532_v24  ;;  %v393_v59 = vld [vmem:[%s7932_s16 + $0x60] sm:$0xff]  ;;  %v394_v60 = vld [vmem:[%s7932_s16 + $0x68] sm:$0xff] }
  0x7f   : > { %474 = vst.msk [vmem:[#allocation2 + $0xe8] sm:$0xf] %vm446_vm0, %v440_v14  ;;  %v702_v29 = vor.u32 %v700_v11, %v699_v13  ;;  %v886_v35 = vshrl.u32 %v551_v23, 16  ;;  %v895_v36 = vshrl.u32 %v552_v30, 16  ;;  %v881_v42 = vshrl.u32 %v550_v34, 16  ;;  %v7523_v10 = vld [vmem:[%s9423_s1 + $0x88] sm:$0xff] }
  0x80   : > { %1515 = vmatmul.bf16.gmra.mxu3 %v7509_v32  ;;  %457 = vst.msk [vmem:[#allocation2 + $0x64] sm:$0xf] %vm446_vm0, %v423_v15  ;;  %v870_v32 = vsel %vm7974_vm3, %v6745_v17, %v869_v19  ;;  %v879_v33 = vsel %vm7974_vm3, %v871_v20, %v878_v21  ;;  %v694_v37 = vsel %vm7974_vm3, %v6737_v26, %v693_v27  ;;  %v889_v46 = vshll.u32 %v551_v23, 16  ;;  %v7511_v11 = vld [vmem:[#allocation2 + $0xd4] sm:$0xff]  ;;  %v7531_v14 = vld [vmem:[%s9423_s1 + $0xc8] sm:$0xff] }
  0x81   : > { %458 = vst.msk [vmem:[#allocation2 + $0x68] sm:$0xf] %vm446_vm0, %v424_v16  ;;  %v703_v38 = vsel %vm7974_vm3, %v695_v28, %v702_v29  ;;  %v986_v39 = vunpack.c.l.b16 %v870_v32  ;;  %v888_v45 = vrot.slane %v886_v35, 7  ;;  %v970_v47 = vunpack.c.l.b16 %v694_v37  ;;  %2207 = vmatpush.bf16.msrb.mxu2 %v7523_v10  ;;  %v7564_v15 = vld [vmem:[%s9423_s1 + $0x150] sm:$0xff]  ;;  %v7555_v16 = vld [vmem:[%s9423_s1 + $0x108] sm:$0xff] }
  0x82   : > { %1475 = vmatmul.bf16.gmra.mxu1 %v7501_v41  ;;  %v987_v41 = vunpack.c.l.b16 %v879_v33  ;;  %v971_v48 = vunpack.c.l.b16 %v703_v38  ;;  %v897_v49 = vrot.slane %v895_v36, 7  ;;  %v898_v50 = vshll.u32 %v552_v30, 16  ;;  %v7503_v21 = vld [vmem:[#allocation2 + $0x54] sm:$0xff]  ;;  %2921 = vmatpush.bf16.msrb.mxu3 %v7531_v14  ;;  %v553_v29 = vld [vmem:[#allocation2 + $0xe0] sm:$0x8] }
  0x83   : > { %v710_v53 = vshrl.u32 %v527_v43, 16  ;;  %v719_v54 = vshrl.u32 %v528_v44, 16  ;;  %v6746_v57 = vrot.slane %v881_v42, 11  ;;  %v441_v58 = vpack.c.bf16 %v409_v52, %v409_v52  ;;  %4044 = vmatpush.bf16.msrb.mxu1 %v7564_v15  ;;  %3299 = vmatpush.bf16.msrb.mxu0 %v7555_v16  ;;  %v529_v32 = vld [vmem:[#allocation2 + $0x60] sm:$0x8] }
  0x84   : > { %v1006_v56 = vpack.c.b16 %v987_v41, %v986_v39  ;;  %v705_v62 = vshrl.u32 %v526_v51, 16  ;;  %v442_v63 = vpack.c.bf16 %v410_v55, %v410_v55  ;;  %v425_v0 = vpack.c.bf16 %v393_v59, %v393_v59  ;;  %v7522_v59 = vld [vmem:[%s9423_s1 + $0x80] sm:$0xff]  ;;  %v532_v15 = vld [vmem:[#allocation2 + $0x70] sm:$0x8] }
  0x85   : > { %v998_v1 = vpack.c.b16 %v971_v48, %v970_v47  ;;  %v893_v3 = vrot.slane %v888_v45, 4  ;;  %v900_v4 = vor.u32 %v898_v50, %v897_v49  ;;  %475 = vst.msk [vmem:[#allocation2 + $0xf4] sm:$0xf] %vm446_vm0, %v441_v58  ;;  %v712_v6 = vrot.slane %v710_v53, 7  ;;  %2208 = vmatpush.bf16.msrb.mxu2 %v7522_v59 }
  0x86   : > { %v713_v7 = vshll.u32 %v527_v43, 16  ;;  %v721_v8 = vrot.slane %v719_v54, 7  ;;  %v722_v9 = vshll.u32 %v528_v44, 16  ;;  %476 = vst.msk [vmem:[#allocation2 + $0xf8] sm:$0xf] %vm446_vm0, %v442_v63  ;;  %v6738_v17 = vrot.slane %v705_v62, 11 }
  0x87   : > { %459 = vst.msk [vmem:[#allocation2 + $0x74] sm:$0xf] %vm446_vm0, %v425_v0  ;;  %v901_v13 = vsel %vm7974_vm3, %v893_v3, %v900_v4  ;;  %v717_v19 = vrot.slane %v712_v6, 4  ;;  %v555_v25 = vld [vmem:[#allocation2 + $0xe8] sm:$0xf]  ;;  %v903_v38 = vshrl.u32 %v553_v29, 16 }
  0x88   : > { %v715_v18 = vor.u32 %v713_v7, %v712_v6  ;;  %v724_v20 = vor.u32 %v722_v9, %v721_v8  ;;  %v989_v24 = vunpack.c.l.b16 %v901_v13  ;;  %v530_v2 = vld [vmem:[#allocation2 + $0x64] sm:$0xf]  ;;  %v531_v26 = vld [vmem:[#allocation2 + $0x68] sm:$0xf]  ;;  %v920_v42 = vshll.u32 %v555_v25, 16 }
  0x89   : > { %v732_v33 = vshrl.u32 %v530_v2, 16  ;;  %v741_v34 = vshrl.u32 %v531_v26, 16  ;;  %v727_v43 = vshrl.u32 %v529_v32, 16  ;;  %v735_v44 = vshll.u32 %v530_v2, 16  ;;  %v7530_v0 = vld [vmem:[%s9423_s1 + $0xc0] sm:$0xff] }
  0x8a   : > { %1137 = vmatmul.bf16.gmra.mxu2 %v1005_v61  ;;  %v891_v61 = vor.u32 %v889_v46, %v888_v45  ;;  %v716_v27 = vsel %vm7974_vm3, %v6738_v17, %v715_v18  ;;  %v725_v28 = vsel %vm7974_vm3, %v717_v19, %v724_v20  ;;  %v744_v48 = vshll.u32 %v531_v26, 16  ;;  %v7554_v3 = vld [vmem:[%s9423_s1 + $0x100] sm:$0xff]  ;;  %2922 = vmatpush.bf16.msrb.mxu3 %v7530_v0 }
  0x8b   : > { %v972_v36 = vunpack.c.l.b16 %v716_v27  ;;  %v973_v37 = vunpack.c.l.b16 %v725_v28  ;;  %v734_v46 = vrot.slane %v732_v33, 7  ;;  %v743_v47 = vrot.slane %v741_v34, 7  ;;  %3300 = vmatpush.bf16.msrb.mxu0 %v7554_v3  ;;  %v2356_v27 = vld [vmem:[#allocation2 + $0x18] sm:$0xf]  ;;  %v1605_v33 = vld [vmem:[#allocation2 + $0x4] sm:$0xf] }
  0x8c   : > { %v892_v12 = vsel %vm7974_vm3, %v6746_v57, %v891_v61  ;;  %v6747_v50 = vrot.slane %v903_v38, 11  ;;  %v6739_v53 = vrot.slane %v727_v43, 11  ;;  %v557_v54 = vld [vmem:[#allocation2 + $0xf4] sm:$0xf]  ;;  %v556_v61 = vld [vmem:[#allocation2 + $0xf0] sm:$0x8] }
  0x8d   : > { %1097 = vmatmul.bf16.gmra.mxu0 %v997_v5  ;;  %v426_v5 = vpack.c.bf16 %v394_v60, %v394_v60  ;;  %v988_v23 = vunpack.c.l.b16 %v892_v12  ;;  %v999_v49 = vpack.c.b16 %v973_v37, %v972_v36  ;;  %v739_v57 = vrot.slane %v734_v46, 4  ;;  %v7512_v60 = vld [vmem:[#allocation2 + $0xe4] sm:$0xff]  ;;  %v558_v62 = vld [vmem:[#allocation2 + $0xf8] sm:$0xf]  ;;  %v2354_v34 = vld [vmem:[#allocation2 + $0x10] sm:$0x8] }
  0x8e   : > { %v746_v58 = vor.u32 %v744_v48, %v743_v47  ;;  %v930_v63 = vshrl.u32 %v557_v54, 16  ;;  %v533_v7 = vld [vmem:[#allocation2 + $0x74] sm:$0xf]  ;;  %v7504_v12 = vld [vmem:[#allocation2 + $0x64] sm:$0xff]  ;;  %v939_v13 = vshrl.u32 %v558_v62, 16  ;;  %v925_v14 = vshrl.u32 %v556_v61, 16 }
  0x8f   : > { %460 = vst.msk [vmem:[#allocation2 + $0x78] sm:$0xf] %vm446_vm0, %v426_v5  ;;  %v1007_v35 = vpack.c.b16 %v989_v24, %v988_v23  ;;  %v933_v17 = vshll.u32 %v557_v54, 16  ;;  %v754_v19 = vshrl.u32 %v533_v7, 16  ;;  %v2355_v24 = vld [vmem:[#allocation2 + $0x14] sm:$0xf] }
  0x90   : > { %1520 = vmatmul.bf16.gmra.mxu3 %v7510_v22  ;;  %v554_v22 = vld [vmem:[#allocation2 + $0xe4] sm:$0xf]  ;;  %v932_v16 = vrot.slane %v930_v63, 7  ;;  %v942_v2 = vshll.u32 %v558_v62, 16  ;;  %v749_v26 = vshrl.u32 %v532_v15, 16  ;;  %v8256_v28 = vrot.slane %v925_v14, 11 }
  0x91   : > { %v908_v30 = vshrl.u32 %v554_v22, 16  ;;  %v911_v39 = vshll.u32 %v554_v22, 16  ;;  %v757_v29 = vshll.u32 %v533_v7, 16  ;;  %v8260_v32 = vrot.slane %v754_v19, 7  ;;  %v3447_v54 = vld [vmem:[#allocation2 + $0x18] sm:$0xf] }
  0x92   : > { %1480 = vmatmul.bf16.gmra.mxu1 %v7502_v31  ;;  %v917_v31 = vshrl.u32 %v555_v25, 16  ;;  %v941_v25 = vrot.slane %v939_v13, 7  ;;  %v2449_v38 = vshrl.u32 %v2356_v27, 16  ;;  %v2435_v47 = vshrl.u32 %v2354_v34, 16  ;;  %v7577_v62 = vld [vmem:[%s9423_s1 + $0x1b8] sm:$0xff]  ;;  %v7562_v13 = vld [vmem:[%s9423_s1 + $0x140] sm:$0xff] }
  0x93   : > { %v910_v41 = vrot.slane %v908_v30, 7  ;;  %v2443_v48 = vshll.u32 %v2355_v24, 16  ;;  %v1692_v59 = vshll.u32 %v1605_v33, 16  ;;  %v3540_v63 = vshrl.u32 %v3447_v54, 16  ;;  %v7513_v0 = vld [vmem:[#allocation2 + $0xf4] sm:$0xff]  ;;  %4754 = vmatpush.bf16.msra.mxu2 %v7577_v62 }
  0x94   : > { %v919_v45 = vrot.slane %v917_v31, 7  ;;  %v8258_v31 = vor.u32 %v933_v17, %v932_v16  ;;  %v7609_v14 = vld [vmem:[%s9423_s1 + $0x238] sm:$0xff] }
  0x95   : > { %v913_v51 = vor.u32 %v911_v39, %v910_v41  ;;  %v915_v52 = vrot.slane %v910_v41, 4  ;;  %v937_v39 = vrot.slane %v932_v16, 4  ;;  %v944_v41 = vor.u32 %v942_v2, %v941_v25  ;;  %v1607_v2 = vld [vmem:[#allocation2 + $0xc] sm:$0x1]  ;;  %5878 = vmatpush.bf16.msra.mxu0 %v7609_v14 }
  0x96   : > { %v922_v55 = vor.u32 %v920_v42, %v919_v45  ;;  %v534_v18 = vld [vmem:[#allocation2 + $0x78] sm:$0xf]  ;;  %v8262_v42 = vrot.slane %v749_v26, 11  ;;  %v1606_v45 = vld [vmem:[#allocation2 + $0x8] sm:$0xf]  ;;  %v3542_v15 = vrot.slane %v3540_v63, 4 }
  0x97   : > { %v914_v6 = vsel %vm7974_vm3, %v6747_v50, %v913_v51  ;;  %v763_v30 = vshrl.u32 %v534_v18, 16  ;;  %v766_v43 = vshll.u32 %v534_v18, 16  ;;  %v8269_v50 = vor.u32 %v757_v29, %v8260_v32 }
  0x98   : > { %v923_v9 = vsel %vm7974_vm3, %v915_v52, %v922_v55  ;;  %v990_v20 = vunpack.c.l.b16 %v914_v6  ;;  %v2452_v52 = vshll.u32 %v2356_v27, 16  ;;  %v2451_v55 = vrot.slane %v2449_v38, 7 }
  0x99   : > { %v1702_v61 = vshrl.u32 %v1606_v45, 16  ;;  %v945_v6 = vsel %vm7974_vm3, %v937_v39, %v944_v41 }
  0x9a   : > { %1142 = vmatmul.bf16.gmra.mxu2 %v1006_v56  ;;  %v737_v56 = vor.u32 %v735_v44, %v734_v46  ;;  %v765_v44 = vrot.slane %v763_v30, 7  ;;  %v1689_v46 = vshrl.u32 %v1605_v33, 16  ;;  %v2454_v18 = vor.u32 %v2452_v52, %v2451_v55  ;;  %v2359_v55 = vld [vmem:[#allocation2 + $0x28] sm:$0xf] }
  0x9b   : > { %v1704_v25 = vrot.slane %v1702_v61, 4  ;;  %v993_v30 = vunpack.c.l.b16 %v945_v6 }
  0x9c   : > { %v738_v10 = vsel %vm7974_vm3, %v6739_v53, %v737_v56  ;;  %v3446_v53 = vld [vmem:[#allocation2 + $0x14] sm:$0xf]  ;;  %v768_v7 = vor.u32 %v766_v43, %v765_v44 }
  0x9d   : > { %1102 = vmatmul.bf16.gmra.mxu0 %v998_v1  ;;  %v7563_v1 = vld [vmem:[%s9423_s1 + $0x148] sm:$0xff]  ;;  %v974_v22 = vunpack.c.l.b16 %v738_v10  ;;  %v3527_v56 = vshrl.u32 %v3446_v53, 16  ;;  %v7601_v10 = vld [vmem:[%s9423_s1 + $0x1f8] sm:$0xff] }
  0x9e   : > { %4045 = vmatpush.bf16.msrb.mxu1 %v7563_v1  ;;  %v761_v1 = vrot.slane %v8260_v32, 4  ;;  %5132 = vmatpush.bf16.msra.mxu3 %v7601_v10 }
  0x9f   : > { %v3529_v3 = vrot.slane %v3527_v56, 4 }
  0xa0   : > { %1525 = vmatmul.bf16.gmra.mxu3 %v7511_v11  ;;  %v747_v11 = vsel %vm7974_vm3, %v739_v57, %v746_v58  ;;  %v3530_v57 = vshll.u32 %v3446_v53, 16  ;;  %v3536_v58 = vshll.u32 %v3447_v54, 16  ;;  %v769_v32 = vsel %vm7974_vm3, %v761_v1, %v768_v7  ;;  %v3450_v1 = vld [vmem:[#allocation2 + $0x28] sm:$0xf] }
  0xa1   : > { %v975_v23 = vunpack.c.l.b16 %v747_v11  ;;  %v977_v44 = vunpack.c.l.b16 %v769_v32 }
  0xa2   : > { %1485 = vmatmul.bf16.gmra.mxu1 %v7503_v21  ;;  %v991_v21 = vunpack.c.l.b16 %v923_v9  ;;  %v6941_v9 = vrot.slane %v2435_v47, 11  ;;  %v1609_v47 = vld [vmem:[#allocation2 + $0x18] sm:$0xf] }
  0xa3   : > { %v1000_v37 = vpack.c.b16 %v975_v23, %v974_v22  ;;  %v1691_v22 = vrot.slane %v1689_v46, 4  ;;  %v1694_v23 = vrot.slane %v1692_v59, 5  ;;  %4046 = vmatpush.bf16.msrb.mxu1 %v7562_v13  ;;  %v1722_v59 = vshll.u32 %v1609_v47, 16 }
  0xa4   : > { %v1008_v36 = vpack.c.b16 %v991_v21, %v990_v20  ;;  %v3448_v20 = vld [vmem:[#allocation2 + $0x1c] sm:$0x1]  ;;  %v7505_v21 = vld [vmem:[#allocation2 + $0x74] sm:$0xff]  ;;  %v1726_v62 = vshrl.u32 %v1609_v47, 16 }
  0xa5   : > { %v7633_v47 = vld [vmem:[%s9424_s2 + $0x38] sm:$0xff] }
  0xa7   : > { %6431 = vmatpush.bf16.msra.mxu1 %v7633_v47 }
  0xa8   : > { %v1083_v4 = vpop.f32.mrf.mxu0 }
  0xa9   : > { %v1461_v5 = vpop.f32.mrf.mxu1 }
  0xaa   : > { %1147 = vmatmul.bf16.gmra.mxu2 %v1007_v35  ;;  %v8248_v8 = vadd.f32 %v1461_v5, %v1083_v4  ;;  %v2440_v35 = vshrl.u32 %v2355_v24, 16  ;;  %v3532_v4 = vrot.slane %v3530_v57, 5  ;;  %v8275_v5 = vrot.slane %v3536_v58, 5 }
  0xac   : > { %v2442_v51 = vrot.slane %v2440_v35, 7  ;;  %v3533_v26 = vor.u32 %v3532_v4, %v3529_v3  ;;  %v3543_v27 = vor.u32 %v3542_v15, %v8275_v5  ;;  %v1695_v35 = vor.u32 %v1694_v23, %v1691_v22  ;;  %v2357_v3 = vld [vmem:[#allocation2 + $0x20] sm:$0x8] }
  0xad   : > { %1107 = vmatmul.bf16.gmra.mxu0 %v999_v49  ;;  %v936_v49 = vsel %vm7974_vm3, %v8256_v28, %v8258_v31  ;;  %v3546_v28 = vshll.u32 %v3448_v20, 16  ;;  %v760_v31 = vsel %vm7974_vm3, %v8262_v42, %v8269_v50  ;;  %v1608_v42 = vld [vmem:[#allocation2 + $0x14] sm:$0xf]  ;;  %v2471_v4 = vshrl.u32 %v2359_v55, 16 }
  0xae   : > { %v1123_v11 = vpop.f32.mrf.mxu2  ;;  %v2445_v16 = vor.u32 %v2443_v48, %v2442_v51  ;;  %v2447_v17 = vrot.slane %v2442_v51, 4  ;;  %v992_v29 = vunpack.c.l.b16 %v936_v49  ;;  %v3534_v38 = vrot.slane %v3533_v26, 4  ;;  %v2358_v49 = vld [vmem:[#allocation2 + $0x24] sm:$0xf] }
  0xaf   : > { %v3544_v39 = vrot.slane %v3543_v27, 4  ;;  %v3548_v41 = vrot.slane %v3546_v28, 5  ;;  %v976_v43 = vunpack.c.l.b16 %v760_v31  ;;  %v1696_v51 = vrot.slane %v1695_v35, 4  ;;  %v1611_v26 = vld [vmem:[#allocation2 + $0x24] sm:$0xf] }
  0xb0   : > { %1530 = vmatmul.bf16.gmra.mxu3 %v7512_v60  ;;  %v1698_v60 = vshll.u32 %v1606_v45, 16  ;;  %v2446_v33 = vsel %vm7974_vm3, %v6941_v9, %v2445_v16  ;;  %v2455_v34 = vsel %vm7974_vm3, %v2447_v17, %v2454_v18  ;;  %v1009_v48 = vpack.c.b16 %v993_v30, %v992_v29  ;;  %v1610_v31 = vld [vmem:[#allocation2 + $0x1c] sm:$0x1] }
  0xb1   : > { %v2803_v45 = vunpack.c.l.b16 %v2446_v33  ;;  %v2804_v46 = vunpack.c.l.b16 %v2455_v34  ;;  %v1713_v54 = vshrl.u32 %v1608_v42, 16  ;;  %v3539_v56 = vsel %vm8306_vm6, %v3534_v38, %v8275_v5 }
  0xb2   : > { %1490 = vmatmul.bf16.gmra.mxu1 %v7504_v12  ;;  %v1501_v12 = vpop.f32.mrf.mxu3  ;;  %v8290_v24 = vrot.slane %v1698_v60, 5  ;;  %v3549_v57 = vsel %vm8306_vm6, %v3544_v39, %v3548_v41  ;;  %v1716_v58 = vshll.u32 %v1608_v42, 16  ;;  %v1001_v60 = vpack.c.b16 %v977_v44, %v976_v43 }
  0xb3   : > { %v8288_v19 = vadd.f32 %v1501_v12, %v1123_v11  ;;  %v2835_v61 = vpack.c.b16 %v2804_v46, %v2803_v45  ;;  %v2462_v63 = vshrl.u32 %v2358_v49, 16  ;;  %v3560_v9 = vshll.u32 %v3450_v1, 16 }
  0xb4   : > { %v3927_v10 = vunpack.c.l.b16 %v3539_v56  ;;  %v3928_v11 = vunpack.c.l.b16 %v3549_v57  ;;  %v1715_v5 = vrot.slane %v1713_v54, 4  ;;  %v3564_v12 = vshrl.u32 %v3450_v1, 16 }
  0xb5   : > { %v1718_v13 = vrot.slane %v1716_v58, 5  ;;  %v8315_v16 = vrot.slane %v3560_v9, 5  ;;  %v2457_v17 = vshrl.u32 %v2357_v3, 16  ;;  %v2464_v18 = vrot.slane %v2462_v63, 7 }
  0xb6   : > { %v2465_v20 = vshll.u32 %v2358_v49, 16  ;;  %v3566_v22 = vrot.slane %v3564_v12, 4  ;;  %v1701_v23 = vsel %vm8306_vm6, %v1696_v51, %v8290_v24  ;;  %v3959_v28 = vpack.c.b16 %v3928_v11, %v3927_v10 }
  0xb7   : > { %v8322_v29 = vrot.slane %v1722_v59, 5  ;;  %v1728_v30 = vrot.slane %v1726_v62, 4  ;;  %v1719_v32 = vor.u32 %v1718_v13, %v1715_v5  ;;  %v1737_v38 = vshrl.u32 %v1611_v26, 16  ;;  %v8333_v59 = vpop.f32.mrf.mxu1  ;;  %v2361_v62 = vld [vmem:[#allocation2 + $0x34] sm:$0xf] }
  0xb8   : > { %v3567_v34 = vor.u32 %v3566_v22, %v8315_v16  ;;  %v1740_v39 = vshll.u32 %v1611_v26, 16  ;;  %v2089_v41 = vunpack.c.l.b16 %v1701_v23  ;;  %v2469_v43 = vrot.slane %v2464_v18, 4  ;;  %v2360_v26 = vld [vmem:[#allocation2 + $0x30] sm:$0x8] }
  0xb9   : > { %v1729_v45 = vor.u32 %v1728_v30, %v8322_v29  ;;  %v1732_v46 = vshll.u32 %v1610_v31, 16  ;;  %v8329_v51 = vrot.slane %v1719_v32, 4  ;;  %v1739_v56 = vrot.slane %v1737_v38, 4 }
  0xba   : > { %1152 = vmatmul.bf16.gmra.mxu2 %v1008_v36  ;;  %v1705_v36 = vor.u32 %v1704_v25, %v8290_v24  ;;  %v2473_v25 = vrot.slane %v2471_v4, 7  ;;  %v2467_v24 = vor.u32 %v2465_v20, %v2464_v18  ;;  %v1742_v57 = vrot.slane %v1740_v39, 5  ;;  %v2362_v4 = vld [vmem:[#allocation2 + $0x38] sm:$0xf]  ;;  %v8348_v18 = vpop.f32.mrf.mxu3 }
  0xbb   : > { %v1730_v63 = vrot.slane %v1729_v45, 4  ;;  %v2493_v20 = vshrl.u32 %v2362_v4, 16  ;;  %v2479_v39 = vshrl.u32 %v2360_v26, 16 }
  0xbc   : > { %v1706_v52 = vrot.slane %v1705_v36, 4  ;;  %v1612_v36 = vld [vmem:[#allocation2 + $0x28] sm:$0xf]  ;;  %v1743_v12 = vor.u32 %v1742_v57, %v1739_v56  ;;  %v2364_v57 = vld [vmem:[#allocation2 + $0x44] sm:$0xf] }
  0xbd   : > { %1112 = vmatmul.bf16.gmra.mxu0 %v1000_v37  ;;  %v1708_v37 = vshll.u32 %v1607_v2, 16  ;;  %v2474_v2 = vshll.u32 %v2359_v55, 16  ;;  %v1750_v49 = vshrl.u32 %v1612_v36, 16 }
  0xbe   : > { %v1744_v38 = vrot.slane %v1743_v12, 4 }
  0xbf   : > { %v1710_v53 = vrot.slane %v1708_v37, 5  ;;  %v6942_v37 = vrot.slane %v2457_v17, 11  ;;  %v2476_v44 = vor.u32 %v2474_v2, %v2473_v25  ;;  %v1752_v3 = vrot.slane %v1750_v49, 4  ;;  %v3453_v17 = vld [vmem:[#allocation2 + $0x38] sm:$0xf] }
  0xc0   : > { %1535 = vmatmul.bf16.gmra.mxu3 %v7513_v0  ;;  %v3449_v0 = vld [vmem:[#allocation2 + $0x24] sm:$0xf]  ;;  %v3584_v23 = vshll.u32 %v3453_v17, 16 }
  0xc1   : > { %v3551_v6 = vshrl.u32 %v3449_v0, 16  ;;  %v3554_v7 = vshll.u32 %v3449_v0, 16  ;;  %v1711_v27 = vsel %vm8306_vm6, %v1706_v52, %v1710_v53  ;;  %v3568_v53 = vrot.slane %v3567_v34, 4 }
  0xc2   : > { %1495 = vmatmul.bf16.gmra.mxu1 %v7505_v21  ;;  %v3451_v21 = vld [vmem:[#allocation2 + $0x2c] sm:$0x1]  ;;  %v2090_v42 = vunpack.c.l.b16 %v1711_v27  ;;  %v2468_v55 = vsel %vm7974_vm3, %v6942_v37, %v2467_v24  ;;  %v1734_v0 = vrot.slane %v1732_v46, 5  ;;  %v7576_v27 = vld [vmem:[%s9423_s1 + $0x1b0] sm:$0xff]  ;;  %v8356_v32 = vrot.slane %v3584_v23, 5  ;;  %v8361_v46 = vpop.f32.mrf.mxu0 }
  0xc3   : > { %v3553_v14 = vrot.slane %v3551_v6, 4  ;;  %v3556_v15 = vrot.slane %v3554_v7, 5  ;;  %v3570_v35 = vshll.u32 %v3451_v21, 16  ;;  %v7538_v6 = vld [vmem:[#allocation2 + $0x14] sm:$0xff]  ;;  %v1725_v7 = vsel %vm8306_vm6, %v8329_v51, %v8322_v29  ;;  %4755 = vmatpush.bf16.msra.mxu2 %v7576_v27  ;;  %v3454_v37 = vld [vmem:[#allocation2 + $0x3c] sm:$0x1] }
  0xc4   : > { %v2121_v58 = vpack.c.b16 %v2090_v42, %v2089_v41  ;;  %v2805_v9 = vunpack.c.l.b16 %v2468_v55  ;;  %v1735_v29 = vsel %vm8306_vm6, %v1730_v63, %v1734_v0  ;;  %v2495_v41 = vrot.slane %v2493_v20, 7  ;;  %v7608_v0 = vld [vmem:[%s9423_s1 + $0x230] sm:$0xff] }
  0xc5   : > { %v3557_v33 = vor.u32 %v3556_v15, %v3553_v14  ;;  %v3572_v54 = vrot.slane %v3570_v35, 5  ;;  %v2484_v14 = vshrl.u32 %v2361_v62, 16  ;;  %v3452_v15 = vld [vmem:[#allocation2 + $0x34] sm:$0xf]  ;;  %v2487_v35 = vshll.u32 %v2361_v62, 16  ;;  %5879 = vmatpush.bf16.msra.mxu0 %v7608_v0 }
  0xc6   : > { %v3575_v21 = vshrl.u32 %v3452_v15, 16  ;;  %v3578_v22 = vshll.u32 %v3452_v15, 16  ;;  %v2496_v42 = vshll.u32 %v2362_v4, 16  ;;  %v3594_v51 = vshll.u32 %v3454_v37, 16 }
  0xc7   : > { %v3558_v52 = vrot.slane %v3557_v33, 4  ;;  %v3573_v11 = vsel %vm8306_vm6, %v3568_v53, %v3572_v54  ;;  %v2486_v34 = vrot.slane %v2484_v14, 7  ;;  %v1615_v53 = vld [vmem:[#allocation2 + $0x38] sm:$0xf]  ;;  %v2091_v54 = vunpack.c.l.b16 %v1725_v7  ;;  %v8372_v7 = vpop.f32.mrf.mxu2 }
  0xc8   : > { %v3930_v2 = vunpack.c.l.b16 %v3573_v11  ;;  %v3577_v30 = vrot.slane %v3575_v21, 4  ;;  %v3580_v31 = vrot.slane %v3578_v22, 5  ;;  %v2092_v55 = vunpack.c.l.b16 %v1735_v29 }
  0xc9   : > { %v3563_v10 = vsel %vm8306_vm6, %v3558_v52, %v8315_v16  ;;  %v1614_v52 = vld [vmem:[#allocation2 + $0x34] sm:$0xf]  ;;  %v2489_v56 = vor.u32 %v2487_v35, %v2486_v34  ;;  %v2498_v62 = vor.u32 %v2496_v42, %v2495_v41  ;;  %v1774_v23 = vshrl.u32 %v1615_v53, 16  ;;  %v3455_v35 = vld [vmem:[#allocation2 + $0x44] sm:$0xf] }
  0xca   : > { %1157 = vmatmul.bf16.gmra.mxu2 %v1009_v48  ;;  %v1746_v48 = vshll.u32 %v1612_v36, 16  ;;  %v3929_v25 = vunpack.c.l.b16 %v3563_v10  ;;  %v7600_v36 = vld [vmem:[%s9423_s1 + $0x1f0] sm:$0xff]  ;;  %v1764_v4 = vshll.u32 %v1614_v52, 16  ;;  %v2122_v12 = vpack.c.b16 %v2092_v55, %v2091_v54  ;;  %v1616_v54 = vld [vmem:[#allocation2 + $0x3c] sm:$0x1] }
  0xcb   : > { %5133 = vmatpush.bf16.msra.mxu3 %v7600_v36  ;;  %v3456_v36 = vld [vmem:[#allocation2 + $0x48] sm:$0xf] }
  0xcc   : > { %v8337_v1 = vrot.slane %v1746_v48, 5  ;;  %v3581_v48 = vor.u32 %v3580_v31, %v3577_v30  ;;  %v1766_v22 = vrot.slane %v1764_v4, 5  ;;  %v3608_v41 = vshll.u32 %v3456_v36, 16 }
  0xcd   : > { %1117 = vmatmul.bf16.gmra.mxu0 %v1001_v60  ;;  %v2477_v60 = vsel %vm7974_vm3, %v2469_v43, %v2476_v44  ;;  %v3960_v43 = vpack.c.b16 %v3930_v2, %v3929_v25  ;;  %v2365_v25 = vld [vmem:[#allocation2 + $0x48] sm:$0xf] }
  0xce   : > { %v2806_v5 = vunpack.c.l.b16 %v2477_v60  ;;  %v1753_v16 = vor.u32 %v1752_v3, %v8337_v1  ;;  %v6943_v60 = vrot.slane %v2479_v39, 11  ;;  %v1761_v3 = vshrl.u32 %v1614_v52, 16  ;;  %v7539_v2 = vld [vmem:[#allocation2 + $0x24] sm:$0xff] }
  0xcf   : > { %v3582_v10 = vrot.slane %v3581_v48, 4  ;;  %v3602_v39 = vshll.u32 %v3455_v35, 16  ;;  %v1776_v48 = vrot.slane %v1774_v23, 4  ;;  %v8393_v52 = vrot.slane %v3608_v41, 5 }
  0xd0   : > { %2923 = vmatmul.bf16.vlgmr.msrb.gmra.mxu3 %v2835_v61  ;;  %v1613_v61 = vld [vmem:[#allocation2 + $0x2c] sm:$0x1]  ;;  %v2836_v33 = vpack.c.b16 %v2806_v5, %v2805_v9  ;;  %v1754_v44 = vrot.slane %v1753_v16, 4  ;;  %v2506_v5 = vshrl.u32 %v2364_v57, 16  ;;  %v2490_v14 = vsel %vm7974_vm3, %v6943_v60, %v2489_v56 }
  0xd1   : > { %v1756_v13 = vshll.u32 %v1613_v61, 16  ;;  %v2491_v61 = vrot.slane %v2486_v34, 4  ;;  %v1763_v21 = vrot.slane %v1761_v3, 4  ;;  %v3587_v26 = vsel %vm8306_vm6, %v3582_v10, %v8356_v32 }
  0xd2   : > { %4047 = vmatmul.bf16.vlgmr.msrb.gmra.mxu1 %v3959_v28  ;;  %v3588_v28 = vshrl.u32 %v3453_v17, 16  ;;  %v2363_v17 = vld [vmem:[#allocation2 + $0x40] sm:$0x8]  ;;  %v8389_v29 = vrot.slane %v2506_v5, 7  ;;  %v2807_v30 = vunpack.c.l.b16 %v2490_v14  ;;  %v2509_v34 = vshll.u32 %v2364_v57, 16 }
  0xd3   : > { %v1758_v45 = vrot.slane %v1756_v13, 5  ;;  %v2499_v15 = vsel %vm7974_vm3, %v2491_v61, %v2498_v62  ;;  %v1767_v55 = vor.u32 %v1766_v22, %v1763_v21  ;;  %v3457_v57 = vld [vmem:[#allocation2 + $0x4c] sm:$0x1]  ;;  %v2518_v62 = vshll.u32 %v2365_v25, 16  ;;  %v2367_v5 = vld [vmem:[#allocation2 + $0x54] sm:$0xf] }
  0xd4   : > { %v3590_v24 = vrot.slane %v3588_v28, 4  ;;  %v2808_v31 = vunpack.c.l.b16 %v2499_v15  ;;  %v2511_v56 = vor.u32 %v2509_v34, %v8389_v29  ;;  %v1617_v15 = vld [vmem:[#allocation2 + $0x44] sm:$0xf]  ;;  %v2513_v21 = vrot.slane %v8389_v29, 4 }
  0xd5   : > { %v1759_v63 = vsel %vm8306_vm6, %v1754_v44, %v1758_v45  ;;  %v3612_v44 = vshrl.u32 %v3456_v36, 16  ;;  %v8402_v14 = vrot.slane %v1767_v55, 4  ;;  %v1785_v29 = vshrl.u32 %v1617_v15, 16 }
  0xd6   : > { %v3591_v49 = vor.u32 %v3590_v24, %v8356_v32  ;;  %v8380_v20 = vunpack.c.l.b16 %v1759_v63  ;;  %v2515_v24 = vshrl.u32 %v2365_v25, 16  ;;  %v3931_v32 = vunpack.c.l.b16 %v3587_v26  ;;  %v1618_v25 = vld [vmem:[#allocation2 + $0x48] sm:$0xf] }
  0xd7   : > { %v1788_v36 = vshll.u32 %v1617_v15, 16 }
  0xd8   : > { %v3592_v11 = vrot.slane %v3591_v49, 4  ;;  %v2517_v61 = vrot.slane %v2515_v24, 7  ;;  %v1798_v24 = vshrl.u32 %v1618_v25, 16 }
  0xda   : > { %2209 = vmatmul.bf16.vlgmr.msrb.gmra.mxu2 %v2121_v58  ;;  %v1749_v58 = vsel %vm8306_vm6, %v1744_v38, %v8337_v1  ;;  %v3596_v1 = vrot.slane %v3594_v51, 5  ;;  %v3599_v38 = vshrl.u32 %v3455_v35, 16  ;;  %v3604_v51 = vrot.slane %v3602_v39, 5 }
  0xdb   : > { %v8374_v13 = vunpack.c.l.b16 %v1749_v58  ;;  %v3614_v58 = vrot.slane %v3612_v44, 4  ;;  %v2520_v22 = vor.u32 %v2518_v62, %v2517_v61 }
  0xdc   : > { %v3597_v27 = vsel %vm8306_vm6, %v3592_v11, %v3596_v1  ;;  %v3601_v49 = vrot.slane %v3599_v38, 4  ;;  %v1780_v1 = vshll.u32 %v1616_v54, 16  ;;  %v7540_v54 = vld [vmem:[#allocation2 + $0x34] sm:$0xff] }
  0xdd   : > { %3301 = vmatmul.bf16.vlgmr.msrb.gmra.mxu0 %v7538_v6  ;;  %v1770_v6 = vshll.u32 %v1615_v53, 16  ;;  %v2837_v53 = vpack.c.b16 %v2808_v31, %v2807_v30  ;;  %v3615_v4 = vor.u32 %v3614_v58, %v8393_v52  ;;  %v2366_v30 = vld [vmem:[#allocation2 + $0x50] sm:$0x8]  ;;  %v2528_v31 = vshrl.u32 %v2367_v5, 16 }
  0xde   : > { %v3605_v63 = vor.u32 %v3604_v51, %v3601_v49  ;;  %v8414_v35 = vrot.slane %v1780_v1, 5  ;;  %v2521_v41 = vsel %vm7974_vm3, %v2513_v21, %v2520_v22  ;;  %v2523_v44 = vshrl.u32 %v2366_v30, 16 }
  0xdf   : > { %v1466_v47 = vpop.f32.mrf.mxu1  ;;  %v8387_v28 = vrot.slane %v1770_v6, 5  ;;  %v3618_v6 = vshll.u32 %v3457_v57, 16  ;;  %v2530_v51 = vrot.slane %v2528_v31, 7  ;;  %v1790_v57 = vrot.slane %v1788_v36, 5 }
  0xe0   : > { %2928 = vmatmul.bf16.gmra.mxu3 %v2836_v33  ;;  %v2501_v33 = vshrl.u32 %v2363_v17, 16  ;;  %v3606_v23 = vrot.slane %v3605_v63, 4  ;;  %v1800_v63 = vrot.slane %v1798_v24, 4 }
  0xe1   : > { %v1777_v11 = vor.u32 %v1776_v48, %v8387_v28 }
  0xe2   : > { %4052 = vmatmul.bf16.gmra.mxu1 %v3960_v43  ;;  %v3932_v43 = vunpack.c.l.b16 %v3597_v27  ;;  %v6944_v60 = vrot.slane %v2501_v33, 11  ;;  %v3620_v27 = vrot.slane %v3618_v6, 5  ;;  %v1619_v6 = vld [vmem:[#allocation2 + $0x4c] sm:$0x1] }
  0xe3   : > { %v1506_v9 = vpop.f32.mrf.mxu3  ;;  %v8412_v34 = vrot.slane %v1777_v11, 4  ;;  %v6945_v11 = vrot.slane %v2523_v44, 11  ;;  %v1804_v30 = vshll.u32 %v1619_v6, 16  ;;  %v1621_v6 = vld [vmem:[#allocation2 + $0x58] sm:$0xf] }
  0xe4   : > { %v3961_v3 = vpack.c.b16 %v3932_v43, %v3931_v32  ;;  %v3611_v43 = vsel %vm8306_vm6, %v3606_v23, %v8393_v52  ;;  %v3458_v52 = vld [vmem:[#allocation2 + $0x54] sm:$0xf] }
  0xe5   : > { %v3933_v61 = vunpack.c.l.b16 %v3611_v43  ;;  %v3623_v1 = vshrl.u32 %v3458_v52, 16  ;;  %v3626_v15 = vshll.u32 %v3458_v52, 16 }
  0xe7   : > { %v1468_v16 = vpop.f32.mrf.mxu1 }
  0xea   : > { %v1088_v37 = vpop.f32.mrf.mxu0  ;;  %2214 = vmatmul.bf16.gmra.mxu2 %v2122_v12  ;;  %v2123_v12 = vpack.c.b16 %v8380_v20, %v8374_v13  ;;  %v7632_v13 = vld [vmem:[%s9424_s2 + $0x30] sm:$0xff]  ;;  %v3616_v20 = vrot.slane %v3615_v4, 4 }
  0xeb   : > { %v8391_v42 = vadd.f32 %v1466_v47, %v1088_v37  ;;  %v1508_v45 = vpop.f32.mrf.mxu3  ;;  %6432 = vmatpush.bf16.msra.mxu1 %v7632_v13  ;;  %v1794_v37 = vshll.u32 %v1618_v25, 16  ;;  %v2535_v25 = vrot.slane %v2530_v51, 4  ;;  %v3625_v13 = vrot.slane %v3623_v1, 4 }
  0xec   : > { %v3621_v49 = vsel %vm8306_vm6, %v3616_v20, %v3620_v27  ;;  %v3628_v20 = vrot.slane %v3626_v15, 5 }
  0xed   : > { %3306 = vmatmul.bf16.gmra.mxu0 %v7539_v2  ;;  %v1128_v47 = vpop.f32.mrf.mxu2  ;;  %v2368_v2 = vld [vmem:[#allocation2 + $0x58] sm:$0xf]  ;;  %v8429_v62 = vrot.slane %v1794_v37, 5  ;;  %v3934_v4 = vunpack.c.l.b16 %v3621_v49  ;;  %v1783_v37 = vsel %vm8306_vm6, %v8412_v34, %v8414_v35  ;;  %v8455_v35 = vrot.slane %v1804_v30, 5 }
  0xee   : > { %v8396_v0 = vadd.f32 %v1506_v9, %v1128_v47  ;;  %v2512_v9 = vsel %vm7974_vm3, %v6944_v60, %v2511_v56  ;;  %v2537_v38 = vshrl.u32 %v2368_v2, 16  ;;  %v1787_v56 = vrot.slane %v1785_v29, 4 }
  0xef   : > { %v1471_v10 = vpop.f32.mrf.mxu1  ;;  %v2809_v32 = vunpack.c.l.b16 %v2512_v9  ;;  %v2540_v47 = vshll.u32 %v2368_v2, 16  ;;  %v2810_v60 = vunpack.c.l.b16 %v2521_v41  ;;  %v7575_v9 = vld [vmem:[%s9423_s1 + $0x1a8] sm:$0xff]  ;;  %v1801_v43 = vor.u32 %v1800_v63, %v8429_v62 }
  0xf0   : > { %2933 = vmatmul.bf16.gmra.mxu3 %v2837_v53  ;;  %v2531_v53 = vshll.u32 %v2367_v5, 16  ;;  %v2539_v58 = vrot.slane %v2537_v38, 7  ;;  %4756 = vmatpush.bf16.msra.mxu2 %v7575_v9  ;;  %v1791_v24 = vor.u32 %v1790_v57, %v1787_v56  ;;  %v3629_v38 = vor.u32 %v3628_v20, %v3625_v13  ;;  %v2369_v9 = vld [vmem:[#allocation2 + $0x60] sm:$0x8]  ;;  %v7541_v20 = vld [vmem:[#allocation2 + $0x44] sm:$0xff] }
  0xf1   : > { %v2838_v27 = vpack.c.b16 %v2810_v60, %v2809_v32  ;;  %v3962_v32 = vpack.c.b16 %v3934_v4, %v3933_v61  ;;  %v2370_v61 = vld [vmem:[#allocation2 + $0x64] sm:$0xf]  ;;  %v8461_v52 = vrot.slane %v1801_v43, 4 }
  0xf2   : > { %v1090_v17 = vpop.f32.mrf.mxu0  ;;  %4057 = vmatmul.bf16.gmra.mxu1 %v3961_v3  ;;  %v3459_v3 = vld [vmem:[#allocation2 + $0x58] sm:$0xf]  ;;  %v2542_v2 = vor.u32 %v2540_v47, %v2539_v58  ;;  %v8457_v57 = vrot.slane %v1791_v24, 4  ;;  %v3630_v58 = vrot.slane %v3629_v38, 4  ;;  %v3461_v24 = vld [vmem:[#allocation2 + $0x64] sm:$0xf] }
  0xf3   : > { %v8407_v26 = vadd.f32 %v1468_v16, %v1090_v17  ;;  %v1511_v33 = vpop.f32.mrf.mxu3  ;;  %v1773_v16 = vsel %vm8306_vm6, %v8402_v14, %v8387_v28  ;;  %v2533_v17 = vor.u32 %v2531_v53, %v2530_v51  ;;  %v3632_v21 = vshll.u32 %v3459_v3, 16  ;;  %v7607_v14 = vld [vmem:[%s9423_s1 + $0x228] sm:$0xff] }
  0xf4   : > { %v3636_v22 = vshrl.u32 %v3459_v3, 16  ;;  %v2543_v53 = vsel %vm7974_vm3, %v2535_v25, %v2542_v2  ;;  %v2095_v34 = vunpack.c.l.b16 %v1773_v16  ;;  %v2371_v16 = vld [vmem:[#allocation2 + $0x68] sm:$0xf]  ;;  %5880 = vmatpush.bf16.msra.mxu0 %v7607_v14  ;;  %v1797_v25 = vsel %vm8306_vm6, %v8457_v57, %v8429_v62  ;;  %v1622_v14 = vld [vmem:[#allocation2 + $0x5c] sm:$0x1] }
  0xf5   : > { %v1130_v39 = vpop.f32.mrf.mxu2  ;;  %v3634_v31 = vrot.slane %v3632_v21, 5  ;;  %v2534_v51 = vsel %vm7974_vm3, %v6945_v11, %v2533_v17  ;;  %v2812_v28 = vunpack.c.l.b16 %v2543_v53  ;;  %v2550_v11 = vshrl.u32 %v2370_v61, 16  ;;  %v3462_v38 = vld [vmem:[#allocation2 + $0x68] sm:$0xf] }
  0xf6   : > { %v8425_v48 = vadd.f32 %v1508_v45, %v1130_v39  ;;  %v3638_v29 = vrot.slane %v3636_v22, 4  ;;  %v2811_v3 = vunpack.c.l.b16 %v2534_v51  ;;  %v2559_v21 = vshrl.u32 %v2371_v16, 16 }
  0xf7   : > { %v1473_v55 = vpop.f32.mrf.mxu1  ;;  %v1807_v2 = vsel %vm8306_vm6, %v8461_v52, %v8455_v35  ;;  %v2562_v43 = vshll.u32 %v2371_v16, 16  ;;  %v3650_v53 = vshll.u32 %v3461_v24, 16 }
  0xf8   : > { %v3639_v44 = vor.u32 %v3638_v29, %v3634_v31  ;;  %v2839_v13 = vpack.c.b16 %v2812_v28, %v2811_v3 }
  0xf9   : > { %v3652_v52 = vrot.slane %v3650_v53, 5 }
  0xfa   : > { %v1093_v45 = vpop.f32.mrf.mxu0  ;;  %2219 = vmatmul.bf16.gmra.mxu2 %v2123_v12  ;;  %v3460_v12 = vld [vmem:[#allocation2 + $0x5c] sm:$0x1]  ;;  %v3640_v47 = vrot.slane %v3639_v44, 4  ;;  %v3647_v44 = vshrl.u32 %v3461_v24, 16 }
  0xfb   : > { %v8431_v5 = vadd.f32 %v1471_v10, %v1093_v45  ;;  %v1513_v23 = vpop.f32.mrf.mxu3  ;;  %v7599_v10 = vld [vmem:[%s9423_s1 + $0x1e8] sm:$0xff]  ;;  %v3642_v39 = vshll.u32 %v3460_v12, 16  ;;  %v1818_v12 = vshll.u32 %v1621_v6, 16 }
  0xfc   : > { %5134 = vmatpush.bf16.msra.mxu3 %v7599_v10 }
  0xfd   : > { %3311 = vmatmul.bf16.gmra.mxu0 %v7540_v54  ;;  %v1133_v36 = vpop.f32.mrf.mxu2  ;;  %v1620_v54 = vld [vmem:[#allocation2 + $0x54] sm:$0xf]  ;;  %v3644_v60 = vrot.slane %v3642_v39, 5  ;;  %v2553_v39 = vshll.u32 %v2370_v61, 16 }
  0xfe   : > { %v8443_v41 = vadd.f32 %v1511_v33, %v1133_v36  ;;  %v2096_v33 = vunpack.c.l.b16 %v1783_v37  ;;  %v1809_v4 = vshrl.u32 %v1620_v54, 16  ;;  %v1812_v10 = vshll.u32 %v1620_v54, 16 }
  0xff   : > { %v1476_v49 = vpop.f32.mrf.mxu1  ;;  %v3645_v17 = vsel %vm8306_vm6, %v3640_v47, %v3644_v60  ;;  %v2545_v36 = vshrl.u32 %v2369_v9, 16  ;;  %v2552_v37 = vrot.slane %v2550_v11, 7  ;;  %v3463_v60 = vld [vmem:[#allocation2 + $0x6c] sm:$0x1]  ;;  %v2097_v9 = vunpack.c.l.b16 %v1797_v25 }
 0x100   : > { %9434 = vst [vmem:[#allocation4_spill] sm:$0xff] %v8443_v41  ;;  %2938 = vmatmul.bf16.gmra.mxu3 %v2838_v27  ;;  %v2124_v15 = vpack.c.b16 %v2096_v33, %v2095_v34  ;;  %v8480_v30 = vrot.slane %v1809_v4, 4  ;;  %v3936_v29 = vunpack.c.l.b16 %v3645_v17  ;;  %v3656_v34 = vshll.u32 %v3462_v38, 16 }
 0x101   : > { %v3660_v33 = vshrl.u32 %v3462_v38, 16  ;;  %v1814_v54 = vrot.slane %v1812_v10, 5  ;;  %v2555_v16 = vor.u32 %v2553_v39, %v2552_v37  ;;  %v2557_v4 = vrot.slane %v2552_v37, 4  ;;  %v1623_v10 = vld [vmem:[#allocation2 + $0x64] sm:$0xf] }
 0x102   : > { %v1095_v56 = vpop.f32.mrf.mxu0  ;;  %4062 = vmatmul.bf16.gmra.mxu1 %v3962_v32  ;;  %v2561_v32 = vrot.slane %v2559_v21, 7  ;;  %v3658_v61 = vrot.slane %v3656_v34, 5  ;;  %v2098_v21 = vunpack.c.l.b16 %v1807_v2  ;;  %v7631_v2 = vld [vmem:[%s9424_s2 + $0x28] sm:$0xff]  ;;  %v1833_v39 = vshrl.u32 %v1623_v10, 16 }
 0x103   : > { %v8459_v63 = vadd.f32 %v1473_v55, %v1095_v56  ;;  %v1516_v45 = vpop.f32.mrf.mxu3  ;;  %v3635_v55 = vsel %vm8306_vm6, %v3630_v58, %v3634_v31  ;;  %v1822_v31 = vshrl.u32 %v1621_v6, 16  ;;  %v8484_v56 = vrot.slane %v1818_v12, 5  ;;  %6433 = vmatpush.bf16.msra.mxu1 %v7631_v2 }
 0x104   : > { %v3649_v58 = vrot.slane %v3647_v44, 4  ;;  %v3662_v3 = vrot.slane %v3660_v33, 4  ;;  %v2564_v6 = vor.u32 %v2562_v43, %v2561_v32  ;;  %v1836_v32 = vshll.u32 %v1623_v10, 16 }
 0x105   : > { %v1135_v1 = vpop.f32.mrf.mxu2  ;;  %v1824_v57 = vrot.slane %v1822_v31, 4  ;;  %v1815_v31 = vor.u32 %v1814_v54, %v8480_v30  ;;  %v2374_v30 = vld [vmem:[#allocation2 + $0x78] sm:$0xf]  ;;  %v2125_v43 = vpack.c.b16 %v2098_v21, %v2097_v9 }
 0x106   : > { %v8470_v22 = vadd.f32 %v1513_v23, %v1135_v1  ;;  %v3935_v23 = vunpack.c.l.b16 %v3635_v55  ;;  %v3653_v1 = vor.u32 %v3652_v52, %v3649_v58  ;;  %v3666_v55 = vshll.u32 %v3463_v60, 16  ;;  %v3465_v21 = vld [vmem:[#allocation2 + $0x78] sm:$0xf] }
 0x107   : > { %v1478_v27 = vpop.f32.mrf.mxu1  ;;  %v1825_v25 = vor.u32 %v1824_v57, %v8484_v56  ;;  %v1816_v54 = vrot.slane %v1815_v31, 4  ;;  %v2584_v31 = vshll.u32 %v2374_v30, 16  ;;  %v3680_v2 = vshll.u32 %v3465_v21, 16 }
 0x108   : > { %9435 = vst [vmem:[#allocation5_spill] sm:$0xff] %v8470_v22  ;;  %v3963_v47 = vpack.c.b16 %v3936_v29, %v3935_v23  ;;  %v2565_v29 = vsel %vm7974_vm3, %v2557_v4, %v2564_v6  ;;  %v3668_v24 = vrot.slane %v3666_v55, 5  ;;  %v8511_v4 = vrot.slane %v1836_v32, 5 }
 0x109   : > { %v2814_v53 = vunpack.c.l.b16 %v2565_v29  ;;  %v8505_v52 = vrot.slane %v1825_v25, 4 }
 0x10a   : > { %v1098_v62 = vpop.f32.mrf.mxu0  ;;  %2224 = vmatmul.bf16.gmra.mxu2 %v2124_v15  ;;  %v3663_v15 = vor.u32 %v3662_v3, %v3658_v61 }
 0x10b   : > { %v8482_v51 = vadd.f32 %v1476_v49, %v1098_v62  ;;  %v1518_v35 = vpop.f32.mrf.mxu3  ;;  %v6946_v49 = vrot.slane %v2545_v36, 11  ;;  %v2373_v36 = vld [vmem:[#allocation2 + $0x74] sm:$0xf]  ;;  %v1624_v62 = vld [vmem:[#allocation2 + $0x68] sm:$0xf] }
 0x10c   : > { %v2572_v34 = vshrl.u32 %v2373_v36, 16  ;;  %v1846_v6 = vshrl.u32 %v1624_v62, 16  ;;  %v2575_v9 = vshll.u32 %v2373_v36, 16 }
 0x10d   : > { %3316 = vmatmul.bf16.gmra.mxu0 %v7541_v20  ;;  %v1138_v28 = vpop.f32.mrf.mxu2  ;;  %v1828_v20 = vshll.u32 %v1622_v14, 16  ;;  %v2556_v23 = vsel %vm7974_vm3, %v6946_v49, %v2555_v16  ;;  %v7542_v14 = vld [vmem:[#allocation2 + $0x54] sm:$0xff]  ;;  %v8509_v16 = vrot.slane %v1833_v39, 4 }
 0x10e   : > { %v8486_v11 = vadd.f32 %v1516_v45, %v1138_v28  ;;  %v3654_v45 = vrot.slane %v3653_v1, 4  ;;  %v2813_v44 = vunpack.c.l.b16 %v2556_v23  ;;  %v1842_v28 = vshll.u32 %v1624_v62, 16  ;;  %v1625_v62 = vld [vmem:[#allocation2 + $0x6c] sm:$0x1] }
 0x10f   : > { %v1481_v17 = vpop.f32.mrf.mxu1  ;;  %v8499_v57 = vrot.slane %v1828_v20, 5  ;;  %v1848_v39 = vrot.slane %v1846_v6, 4 }
 0x110   : > { %9436 = vst [vmem:[#allocation6_spill] sm:$0xff] %v8486_v11  ;;  %2943 = vmatmul.bf16.gmra.mxu3 %v2839_v13  ;;  %v3664_v13 = vrot.slane %v3663_v15, 4  ;;  %v3659_v58 = vsel %vm8306_vm6, %v3654_v45, %v3658_v61  ;;  %v2840_v15 = vpack.c.b16 %v2814_v53, %v2813_v44  ;;  %v2574_v61 = vrot.slane %v2572_v34, 7  ;;  %v7574_v45 = vld [vmem:[%s9423_s1 + $0x1a0] sm:$0xff] }
 0x111   : > { %v3937_v55 = vunpack.c.l.b16 %v3659_v58  ;;  %v8518_v36 = vrot.slane %v1842_v28, 5  ;;  %4757 = vmatpush.bf16.msra.mxu2 %v7574_v45  ;;  %v1821_v58 = vsel %vm8306_vm6, %v1816_v54, %v8484_v56  ;;  %v1852_v54 = vshll.u32 %v1625_v62, 16 }
 0x112   : > { %v1100_v12 = vpop.f32.mrf.mxu0  ;;  %4067 = vmatmul.bf16.gmra.mxu1 %v3963_v47  ;;  %v2581_v47 = vshrl.u32 %v2374_v30, 16  ;;  %v3669_v3 = vsel %vm8306_vm6, %v3664_v13, %v3668_v24  ;;  %v3684_v13 = vshrl.u32 %v3465_v21, 16  ;;  %v2577_v30 = vor.u32 %v2575_v9, %v2574_v61 }
 0x113   : > { %v8493_v37 = vadd.f32 %v1478_v27, %v1100_v12  ;;  %v1521_v38 = vpop.f32.mrf.mxu3  ;;  %v2372_v27 = vld [vmem:[#allocation2 + $0x70] sm:$0x8]  ;;  %v3938_v10 = vunpack.c.l.b16 %v3669_v3  ;;  %v2579_v3 = vrot.slane %v2574_v61, 4  ;;  %v1849_v56 = vor.u32 %v1848_v39, %v8518_v36  ;;  %v1627_v61 = vld [vmem:[#allocation2 + $0x78] sm:$0xf] }
 0x114   : > { %v2567_v1 = vshrl.u32 %v2372_v27, 16  ;;  %v2583_v12 = vrot.slane %v2581_v47, 7  ;;  %v3682_v27 = vrot.slane %v3680_v2, 5  ;;  %v3686_v34 = vrot.slane %v3684_v13, 4 }
 0x115   : > { %v1140_v33 = vpop.f32.mrf.mxu2  ;;  %v3964_v47 = vpack.c.b16 %v3938_v10, %v3937_v55  ;;  %v2099_v55 = vunpack.c.l.b16 %v1821_v58  ;;  %v1850_v62 = vrot.slane %v1849_v56, 4  ;;  %v1854_v39 = vrot.slane %v1852_v54, 5  ;;  %v2377_v58 = vld [vmem:[#allocation2 + $0x88] sm:$0xf] }
 0x116   : > { %v8503_v60 = vadd.f32 %v1518_v35, %v1140_v33  ;;  %v3464_v35 = vld [vmem:[#allocation2 + $0x74] sm:$0xf]  ;;  %v6947_v32 = vrot.slane %v2567_v1, 11  ;;  %v2586_v28 = vor.u32 %v2584_v31, %v2583_v12  ;;  %v3687_v1 = vor.u32 %v3686_v34, %v3682_v27 }
 0x117   : > { %v1483_v49 = vpop.f32.mrf.mxu1  ;;  %v3671_v23 = vshrl.u32 %v3464_v35, 16  ;;  %v3674_v25 = vshll.u32 %v3464_v35, 16  ;;  %v1626_v35 = vld [vmem:[#allocation2 + $0x74] sm:$0xf] }
 0x118   : > { %9437 = vst [vmem:[#allocation7_spill] sm:$0xff] %v8503_v60  ;;  %v2587_v12 = vsel %vm7974_vm3, %v2579_v3, %v2586_v28  ;;  %v1857_v45 = vshrl.u32 %v1626_v35, 16 }
 0x119   : > { %v3673_v44 = vrot.slane %v3671_v23, 4  ;;  %v3676_v53 = vrot.slane %v3674_v25, 5  ;;  %v1839_v23 = vor.u32 %v8511_v4, %v8509_v16  ;;  %v1860_v25 = vshll.u32 %v1626_v35, 16  ;;  %v7606_v16 = vld [vmem:[%s9423_s1 + $0x220] sm:$0xff] }
 0x11a   : > { %v1103_v20 = vpop.f32.mrf.mxu0  ;;  %2229 = vmatmul.bf16.gmra.mxu2 %v2125_v43  ;;  %v3466_v43 = vld [vmem:[#allocation2 + $0x7c] sm:$0x1]  ;;  %v3688_v4 = vrot.slane %v3687_v1, 4  ;;  %5881 = vmatpush.bf16.msra.mxu0 %v7606_v16  ;;  %v1859_v34 = vrot.slane %v1857_v45, 4  ;;  %v7543_v1 = vld [vmem:[#allocation2 + $0x64] sm:$0xff] }
 0x11b   : > { %v8513_v29 = vadd.f32 %v1481_v17, %v1103_v20  ;;  %v1523_v24 = vpop.f32.mrf.mxu3  ;;  %v7598_v17 = vld [vmem:[%s9423_s1 + $0x1e0] sm:$0xff]  ;;  %v3690_v9 = vshll.u32 %v3466_v43, 16  ;;  %v1831_v20 = vsel %vm8306_vm6, %v8505_v52, %v8499_v57  ;;  %v1840_v13 = vrot.slane %v1839_v23, 4 }
 0x11c   : > { %5135 = vmatpush.bf16.msra.mxu3 %v7598_v17  ;;  %v2100_v52 = vunpack.c.l.b16 %v1831_v20  ;;  %v1870_v17 = vshrl.u32 %v1627_v61, 16  ;;  %v2376_v43 = vld [vmem:[#allocation2 + $0x84] sm:$0xf]  ;;  %v1855_v20 = vsel %vm8306_vm6, %v1850_v62, %v1854_v39 }
 0x11d   : > { %3321 = vmatmul.bf16.gmra.mxu0 %v7542_v14  ;;  %v1143_v33 = vpop.f32.mrf.mxu2  ;;  %v3677_v14 = vor.u32 %v3676_v53, %v3673_v44  ;;  %v1845_v35 = vsel %vm8306_vm6, %v1840_v13, %v8518_v36  ;;  %v2594_v23 = vshrl.u32 %v2376_v43, 16  ;;  %v1628_v13 = vld [vmem:[#allocation2 + $0x7c] sm:$0x1]  ;;  %v2597_v39 = vshll.u32 %v2376_v43, 16  ;;  %v1629_v43 = vld [vmem:[#allocation2 + $0x84] sm:$0xf] }
 0x11e   : > { %v8526_v6 = vadd.f32 %v1521_v38, %v1143_v33  ;;  %v2578_v38 = vsel %vm7974_vm3, %v6947_v32, %v2577_v30  ;;  %v1866_v32 = vshll.u32 %v1627_v61, 16  ;;  %v2816_v30 = vunpack.c.l.b16 %v2587_v12  ;;  %v3468_v61 = vld [vmem:[#allocation2 + $0x88] sm:$0xf] }
 0x11f   : > { %v1486_v21 = vpop.f32.mrf.mxu1  ;;  %v3678_v31 = vrot.slane %v3677_v14, 4  ;;  %v2815_v44 = vunpack.c.l.b16 %v2578_v38  ;;  %v1862_v33 = vrot.slane %v1860_v25, 5  ;;  %v2126_v3 = vpack.c.b16 %v2100_v52, %v2099_v55  ;;  %v2375_v14 = vld [vmem:[#allocation2 + $0x80] sm:$0x8]  ;;  %v3467_v38 = vld [vmem:[#allocation2 + $0x84] sm:$0xf] }
 0x120   : > { %9438 = vst [vmem:[#allocation8_spill] sm:$0xff] %v8526_v6  ;;  %2948 = vmatmul.bf16.gmra.mxu3 %v2840_v15  ;;  %v3692_v15 = vrot.slane %v3690_v9, 5  ;;  %v1872_v54 = vrot.slane %v1870_v17, 4  ;;  %v2603_v55 = vshrl.u32 %v2377_v58, 16  ;;  %v2589_v45 = vshrl.u32 %v2375_v14, 16 }
 0x121   : > { %v3683_v53 = vsel %vm8306_vm6, %v3678_v31, %v3682_v27  ;;  %v8555_v27 = vrot.slane %v1866_v32, 5  ;;  %v2841_v56 = vpack.c.b16 %v2816_v30, %v2815_v44  ;;  %v1863_v31 = vor.u32 %v1862_v33, %v1859_v34  ;;  %v3469_v17 = vld [vmem:[#allocation2 + $0x8c] sm:$0x1] }
 0x122   : > { %v1105_v10 = vpop.f32.mrf.mxu0  ;;  %4072 = vmatmul.bf16.gmra.mxu1 %v3964_v47  ;;  %v3693_v28 = vsel %vm8306_vm6, %v3688_v4, %v3692_v15  ;;  %v3695_v25 = vshrl.u32 %v3467_v38, 16  ;;  %v3698_v36 = vshll.u32 %v3467_v38, 16  ;;  %v3704_v16 = vshll.u32 %v3468_v61, 16 }
 0x123   : > { %v8539_v57 = vadd.f32 %v1483_v49, %v1105_v10  ;;  %v1526_v2 = vpop.f32.mrf.mxu3  ;;  %v3940_v12 = vunpack.c.l.b16 %v3693_v28  ;;  %v3708_v4 = vshrl.u32 %v3468_v61, 16  ;;  %v2596_v62 = vrot.slane %v2594_v23, 7 }
 0x124   : > { %v2606_v32 = vshll.u32 %v2377_v58, 16  ;;  %v3697_v44 = vrot.slane %v3695_v25, 4  ;;  %v2605_v30 = vrot.slane %v2603_v55, 7  ;;  %v2102_v61 = vunpack.c.l.b16 %v1855_v20  ;;  %v1630_v25 = vld [vmem:[#allocation2 + $0x88] sm:$0xf]  ;;  %v7630_v20 = vld [vmem:[%s9424_s2 + $0x20] sm:$0xff] }
 0x125   : > { %v1145_v49 = vpop.f32.mrf.mxu2  ;;  %v3710_v34 = vrot.slane %v3708_v4, 4  ;;  %v1873_v55 = vor.u32 %v1872_v54, %v8555_v27  ;;  %6434 = vmatpush.bf16.msra.mxu1 %v7630_v20 }
 0x126   : > { %v8546_v47 = vadd.f32 %v1523_v24, %v1145_v49  ;;  %v3939_v24 = vunpack.c.l.b16 %v3683_v53  ;;  %v3700_v49 = vrot.slane %v3698_v36, 5  ;;  %v8559_v53 = vrot.slane %v3704_v16, 5 }
 0x127   : > { %v1488_v9 = vpop.f32.mrf.mxu1  ;;  %v6948_v36 = vrot.slane %v2589_v45, 11  ;;  %v2601_v16 = vrot.slane %v2596_v62, 4  ;;  %v2608_v4 = vor.u32 %v2606_v32, %v2605_v30  ;;  %v2378_v45 = vld [vmem:[#allocation2 + $0x90] sm:$0x8] }
 0x128   : > { %9439 = vst [vmem:[#allocation9_spill] sm:$0xff] %v8546_v47  ;;  %v3965_v14 = vpack.c.b16 %v3940_v12, %v3939_v24  ;;  %v3701_v38 = vor.u32 %v3700_v49, %v3697_v44  ;;  %v3711_v23 = vor.u32 %v3710_v34, %v8559_v53  ;;  %v1881_v12 = vshrl.u32 %v1629_v43, 16  ;;  %v2380_v49 = vld [vmem:[#allocation2 + $0x98] sm:$0xf] }
 0x129   : > { %v1884_v44 = vshll.u32 %v1629_v43, 16 }
 0x12a   : > { %v1108_v10 = vpop.f32.mrf.mxu0  ;;  %2234 = vmatmul.bf16.gmra.mxu2 %v2126_v3  ;;  %v3714_v3 = vshll.u32 %v3469_v17, 16  ;;  %v3702_v54 = vrot.slane %v3701_v38, 4  ;;  %v1631_v38 = vld [vmem:[#allocation2 + $0x8c] sm:$0x1] }
 0x12b   : > { %v8557_v52 = vadd.f32 %v1486_v21, %v1108_v10  ;;  %v1528_v15 = vpop.f32.mrf.mxu3  ;;  %v8561_v21 = vunpack.c.l.b16 %v1845_v35  ;;  %v1876_v10 = vshll.u32 %v1628_v13, 16  ;;  %v2599_v35 = vor.u32 %v2597_v39, %v2596_v62 }
 0x12c   : > { %v3716_v24 = vrot.slane %v3714_v3, 5  ;;  %v8575_v39 = vrot.slane %v1873_v55, 4  ;;  %v2609_v3 = vsel %vm7974_vm3, %v2601_v16, %v2608_v4  ;;  %v8589_v43 = vrot.slane %v1884_v44, 5 }
 0x12d   : > { %3326 = vmatmul.bf16.gmra.mxu0 %v7543_v1  ;;  %v1148_v33 = vpop.f32.mrf.mxu2  ;;  %v8566_v1 = vrot.slane %v1863_v31, 4  ;;  %v3712_v31 = vrot.slane %v3711_v23, 4  ;;  %v2127_v13 = vpack.c.b16 %v2102_v61, %v8561_v21  ;;  %v8577_v32 = vrot.slane %v1876_v10, 5 }
 0x12e   : > { %v8563_v28 = vadd.f32 %v1526_v2, %v1148_v33  ;;  %v2379_v2 = vld [vmem:[#allocation2 + $0x94] sm:$0xf]  ;;  %v2600_v33 = vsel %vm7974_vm3, %v6948_v36, %v2599_v35  ;;  %v8587_v23 = vrot.slane %v1881_v12, 4  ;;  %v2611_v61 = vshrl.u32 %v2378_v45, 16 }
 0x12f   : > { %v1491_v58 = vpop.f32.mrf.mxu1  ;;  %v2616_v30 = vshrl.u32 %v2379_v2, 16  ;;  %v2625_v55 = vshrl.u32 %v2380_v49, 16  ;;  %v3717_v36 = vsel %vm8306_vm6, %v3712_v31, %v3716_v24  ;;  %v2619_v12 = vshll.u32 %v2379_v2, 16  ;;  %v7573_v2 = vld [vmem:[%s9423_s1 + $0x198] sm:$0xff] }
 0x130   : > { %9440 = vst [vmem:[#allocation10_spill] sm:$0xff] %v8563_v28  ;;  %2953 = vmatmul.bf16.gmra.mxu3 %v2841_v56  ;;  %v1890_v56 = vshll.u32 %v1630_v25, 16  ;;  %v2628_v44 = vshll.u32 %v2380_v49, 16  ;;  %v2818_v45 = vunpack.c.l.b16 %v2609_v3  ;;  %4758 = vmatpush.bf16.msra.mxu2 %v7573_v2 }
 0x131   : > { %v2618_v4 = vrot.slane %v2616_v30, 7  ;;  %v2627_v20 = vrot.slane %v2625_v55, 7 }
 0x132   : > { %v1110_v17 = vpop.f32.mrf.mxu0  ;;  %4077 = vmatmul.bf16.gmra.mxu1 %v3965_v14  ;;  %v1894_v14 = vshrl.u32 %v1630_v25, 16  ;;  %v8598_v35 = vrot.slane %v1890_v56, 5  ;;  %v7544_v25 = vld [vmem:[#allocation2 + $0x74] sm:$0xff] }
 0x133   : > { %v8569_v34 = vadd.f32 %v1488_v9, %v1110_v17  ;;  %v1531_v62 = vpop.f32.mrf.mxu3  ;;  %v3707_v17 = vsel %vm8306_vm6, %v3702_v54, %v8559_v53  ;;  %v2817_v9 = vunpack.c.l.b16 %v2600_v33  ;;  %v3942_v53 = vunpack.c.l.b16 %v3717_v36 }
 0x134   : > { %v1896_v28 = vrot.slane %v1894_v14, 4  ;;  %v3941_v6 = vunpack.c.l.b16 %v3707_v17  ;;  %v6949_v54 = vrot.slane %v2611_v61, 11  ;;  %v2621_v33 = vor.u32 %v2619_v12, %v2618_v4 }
 0x135   : > { %v1150_v21 = vpop.f32.mrf.mxu2  ;;  %v2623_v3 = vrot.slane %v2618_v4, 4  ;;  %v2630_v14 = vor.u32 %v2628_v44, %v2627_v20  ;;  %v2842_v55 = vpack.c.b16 %v2818_v45, %v2817_v9 }
 0x136   : > { %v8591_v10 = vadd.f32 %v1528_v15, %v1150_v21  ;;  %v1900_v15 = vshll.u32 %v1631_v38, 16  ;;  %v3470_v21 = vld [vmem:[#allocation2 + $0x94] sm:$0xf]  ;;  %v1897_v9 = vor.u32 %v1896_v28, %v8598_v35  ;;  %v3966_v12 = vpack.c.b16 %v3942_v53, %v3941_v6 }
 0x137   : > { %v1493_v16 = vpop.f32.mrf.mxu1  ;;  %v3719_v60 = vshrl.u32 %v3470_v21, 16  ;;  %v3722_v31 = vshll.u32 %v3470_v21, 16  ;;  %v2622_v21 = vsel %vm7974_vm3, %v6949_v54, %v2621_v33  ;;  %v2631_v2 = vsel %vm7974_vm3, %v2623_v3, %v2630_v14  ;;  %v1632_v6 = vld [vmem:[#allocation2 + $0x94] sm:$0xf]  ;;  %v2383_v14 = vld [vmem:[#allocation2 + $0xa8] sm:$0xf] }
 0x138   : > { %9441 = vst [vmem:[#allocation11_spill] sm:$0xff] %v8591_v10  ;;  %v3471_v10 = vld [vmem:[#allocation2 + $0x98] sm:$0xf]  ;;  %v8632_v3 = vrot.slane %v1897_v9, 4  ;;  %v2381_v9 = vld [vmem:[#allocation2 + $0xa0] sm:$0x8] }
 0x139   : > { %v3728_v49 = vshll.u32 %v3471_v10, 16  ;;  %v3732_v56 = vshrl.u32 %v3471_v10, 16  ;;  %v3721_v38 = vrot.slane %v3719_v60, 4  ;;  %v1879_v10 = vsel %vm8306_vm6, %v8575_v39, %v8577_v32 }
 0x13a   : > { %v1113_v47 = vpop.f32.mrf.mxu0  ;;  %2239 = vmatmul.bf16.gmra.mxu2 %v2127_v13  ;;  %v3724_v13 = vrot.slane %v3722_v31, 5  ;;  %v1887_v60 = vor.u32 %v8589_v43, %v8587_v23  ;;  %v9443_v39 = vsel %vm8306_vm6, %v8566_v1, %v8555_v27  ;;  %v2104_v32 = vunpack.c.l.b16 %v1879_v10  ;;  %v1633_v23 = vld [vmem:[#allocation2 + $0x98] sm:$0xf] }
 0x13b   : > { %v8600_v24 = vadd.f32 %v1491_v58, %v1113_v47  ;;  %v1533_v30 = vpop.f32.mrf.mxu3  ;;  %v7597_v47 = vld [vmem:[%s9423_s1 + $0x1d8] sm:$0xff]  ;;  %v3730_v61 = vrot.slane %v3728_v49, 5  ;;  %v3734_v17 = vrot.slane %v3732_v56, 4  ;;  %v2103_v28 = vunpack.c.l.b16 %v9443_v39  ;;  %v2382_v56 = vld [vmem:[#allocation2 + $0xa4] sm:$0xf] }
 0x13c   : > { %v3472_v58 = vld [vmem:[#allocation2 + $0x9c] sm:$0x1]  ;;  %5136 = vmatpush.bf16.msra.mxu3 %v7597_v47  ;;  %v3725_v20 = vor.u32 %v3724_v13, %v3721_v38  ;;  %v8628_v53 = vrot.slane %v1887_v60, 4  ;;  %v2819_v27 = vunpack.c.l.b16 %v2622_v21  ;;  %v2820_v1 = vunpack.c.l.b16 %v2631_v2 }
 0x13d   : > { %3331 = vmatmul.bf16.gmra.mxu0 %v7544_v25  ;;  %v1153_v36 = vpop.f32.mrf.mxu2  ;;  %v3738_v25 = vshll.u32 %v3472_v58, 16  ;;  %v3735_v44 = vor.u32 %v3734_v17, %v3730_v61  ;;  %v1914_v47 = vshll.u32 %v1633_v23, 16  ;;  %v1918_v58 = vshrl.u32 %v1633_v23, 16  ;;  %v7605_v13 = vld [vmem:[%s9423_s1 + $0x218] sm:$0xff] }
 0x13e   : > { %v8615_v4 = vadd.f32 %v1531_v62, %v1153_v36  ;;  %v8626_v62 = vrot.slane %v1900_v15, 5  ;;  %v3726_v31 = vrot.slane %v3725_v20, 4  ;;  %v1905_v15 = vshrl.u32 %v1632_v6, 16  ;;  %v7545_v20 = vld [vmem:[#allocation2 + $0x84] sm:$0xff]  ;;  %5882 = vmatpush.bf16.msra.mxu0 %v7605_v13  ;;  %v1634_v39 = vld [vmem:[#allocation2 + $0x9c] sm:$0x1] }
 0x13f   : > { %v1496_v45 = vpop.f32.mrf.mxu1  ;;  %v3736_v54 = vrot.slane %v3735_v44, 4  ;;  %v3740_v49 = vrot.slane %v3738_v25, 5  ;;  %v2638_v17 = vshrl.u32 %v2382_v56, 16  ;;  %v2128_v10 = vpack.c.b16 %v2104_v32, %v2103_v28 }
 0x140   : > { %9442 = vst [vmem:[#allocation12_spill] sm:$0xff] %v8615_v4  ;;  %2958 = vmatmul.bf16.gmra.mxu3 %v2842_v55  ;;  %v1908_v55 = vshll.u32 %v1632_v6, 16  ;;  %v2647_v25 = vshrl.u32 %v2383_v14, 16  ;;  %v1893_v44 = vsel %vm8306_vm6, %v8628_v53, %v8598_v35  ;;  %v1903_v21 = vsel %vm8306_vm6, %v8632_v3, %v8626_v62  ;;  %v3474_v35 = vld [vmem:[#allocation2 + $0xa8] sm:$0xf] }
 0x141   : > { %v3741_v60 = vsel %vm8306_vm6, %v3736_v54, %v3740_v49  ;;  %v2843_v2 = vpack.c.b16 %v2820_v1, %v2819_v27  ;;  %v1907_v28 = vrot.slane %v1905_v15, 4  ;;  %v8651_v6 = vrot.slane %v1914_v47, 5  ;;  %v3473_v49 = vld [vmem:[#allocation2 + $0xa4] sm:$0xf] }
 0x142   : > { %v1115_v43 = vpop.f32.mrf.mxu0  ;;  %4082 = vmatmul.bf16.gmra.mxu1 %v3966_v12  ;;  %v1910_v32 = vrot.slane %v1908_v55, 5  ;;  %v2640_v54 = vrot.slane %v2638_v17, 7  ;;  %v2650_v4 = vshll.u32 %v2383_v14, 16  ;;  %v3743_v62 = vshrl.u32 %v3473_v49, 16 }
 0x143   : > { %v8630_v33 = vadd.f32 %v1493_v16, %v1115_v43  ;;  %v1536_v38 = vpop.f32.mrf.mxu3  ;;  %v3731_v16 = vsel %vm8306_vm6, %v3726_v31, %v3730_v61  ;;  %v3944_v43 = vunpack.c.l.b16 %v3741_v60  ;;  %v2633_v31 = vshrl.u32 %v2381_v9, 16  ;;  %v3475_v60 = vld [vmem:[#allocation2 + $0xac] sm:$0x1] }
 0x144   : > { %v3943_v23 = vunpack.c.l.b16 %v3731_v16  ;;  %v3746_v27 = vshll.u32 %v3473_v49, 16  ;;  %v3752_v1 = vshll.u32 %v3474_v35, 16  ;;  %v3756_v15 = vshrl.u32 %v3474_v35, 16 }
 0x145   : > { %v1155_v36 = vpop.f32.mrf.mxu2  ;;  %v1911_v47 = vor.u32 %v1910_v32, %v1907_v28  ;;  %v1924_v13 = vshll.u32 %v1634_v39, 16  ;;  %v3745_v16 = vrot.slane %v3743_v62, 4  ;;  %v6950_v11 = vrot.slane %v2633_v31, 11  ;;  %v1636_v62 = vld [vmem:[#allocation2 + $0xa8] sm:$0xf] }
 0x146   : > { %v8641_v12 = vadd.f32 %v1533_v30, %v1155_v36  ;;  %v1920_v30 = vrot.slane %v1918_v58, 4  ;;  %v2641_v36 = vshll.u32 %v2382_v56, 16  ;;  %v3967_v17 = vpack.c.b16 %v3944_v43, %v3943_v23  ;;  %v1635_v43 = vld [vmem:[#allocation2 + $0xa4] sm:$0xf] }
 0x147   : > { %v1498_v61 = vpop.f32.mrf.mxu1  ;;  %v3748_v9 = vrot.slane %v3746_v27, 5  ;;  %v3754_v56 = vrot.slane %v3752_v1, 5  ;;  %v2105_v39 = vunpack.c.l.b16 %v1893_v44  ;;  %v8662_v23 = vrot.slane %v1924_v13, 5  ;;  %v2386_v1 = vld [vmem:[#allocation2 + $0xb8] sm:$0xf] }
 0x148   : > { %9444 = vst [vmem:[#allocation13_spill] sm:$0xff] %v8641_v12  ;;  %v2649_v12 = vrot.slane %v2647_v25, 7  ;;  %v1921_v58 = vor.u32 %v1920_v30, %v8651_v6  ;;  %v3758_v25 = vrot.slane %v3756_v15, 4  ;;  %v2106_v30 = vunpack.c.l.b16 %v1903_v21 }
 0x149   : > { %v3749_v22 = vor.u32 %v3748_v9, %v3745_v16  ;;  %v1938_v13 = vshll.u32 %v1636_v62, 16  ;;  %v1942_v16 = vshrl.u32 %v1636_v62, 16 }
 0x14a   : > { %v1118_v53 = vpop.f32.mrf.mxu0  ;;  %2244 = vmatmul.bf16.gmra.mxu2 %v2128_v10  ;;  %v3762_v10 = vshll.u32 %v3475_v60, 16  ;;  %v2652_v35 = vor.u32 %v2650_v4, %v2649_v12  ;;  %v3759_v28 = vor.u32 %v3758_v25, %v3754_v56  ;;  %v8671_v44 = vrot.slane %v1921_v58, 4 }
 0x14b   : > { %v8653_v3 = vadd.f32 %v1496_v45, %v1118_v53  ;;  %v1538_v55 = vpop.f32.mrf.mxu3  ;;  %v2643_v45 = vor.u32 %v2641_v36, %v2640_v54  ;;  %v2645_v53 = vrot.slane %v2640_v54, 4  ;;  %v3750_v54 = vrot.slane %v3749_v22, 4  ;;  %v8667_v36 = vld [vmem:[#allocation2 + $0xb4] sm:$0xf] }
 0x14c   : > { %v3760_v4 = vrot.slane %v3759_v28, 4  ;;  %v3764_v12 = vrot.slane %v3762_v10, 5  ;;  %v1929_v22 = vshrl.u32 %v1635_v43, 16  ;;  %v2129_v58 = vpack.c.b16 %v2106_v30, %v2105_v39 }
 0x14d   : > { %3336 = vmatmul.bf16.gmra.mxu0 %v7545_v20  ;;  %v1158_v14 = vpop.f32.mrf.mxu2  ;;  %v8660_v20 = vrot.slane %v1911_v47, 4  ;;  %v2644_v21 = vsel %vm7974_vm3, %v6950_v11, %v2643_v45  ;;  %v1932_v47 = vshll.u32 %v1635_v43, 16  ;;  %v3755_v9 = vsel %vm8306_vm6, %v3750_v54, %v3754_v56  ;;  %v3477_v54 = vld [vmem:[#allocation2 + $0xb8] sm:$0xf] }
 0x14e   : > { %v8656_v49 = vadd.f32 %v1536_v38, %v1158_v14  ;;  %v7629_v38 = vld [vmem:[%s9424_s2 + $0x18] sm:$0xff]  ;;  %v3765_v25 = vsel %vm8306_vm6, %v3760_v4, %v3764_v12  ;;  %v2384_v14 = vld [vmem:[#allocation2 + $0xb0] sm:$0x8]  ;;  %v2669_v45 = vshrl.u32 %v2386_v1, 16  ;;  %v2821_v10 = vunpack.c.l.b16 %v2644_v21 }
 0x14f   : > { %v8658_v32 = vpop.f32.mrf.mxu1  ;;  %6435 = vmatpush.bf16.msra.mxu1 %v7629_v38  ;;  %v1917_v11 = vsel %vm8306_vm6, %v8660_v20, %v8651_v6  ;;  %v1637_v6 = vld [vmem:[#allocation2 + $0xac] sm:$0x1]  ;;  %v1931_v39 = vrot.slane %v1929_v22, 4  ;;  %v1934_v56 = vrot.slane %v1932_v47, 5  ;;  %v8700_v30 = vrot.slane %v1938_v13, 5  ;;  %v7572_v22 = vld [vmem:[%s9423_s1 + $0x190] sm:$0xff] }
 0x150   : > { %9445 = vst [vmem:[#allocation14_spill] sm:$0xff] %v8656_v49  ;;  %2963 = vmatmul.bf16.gmra.mxu3 %v2843_v2  ;;  %v2653_v2 = vsel %vm7974_vm3, %v2645_v53, %v2652_v35  ;;  %v1944_v20 = vrot.slane %v1942_v16, 4  ;;  %v3945_v43 = vunpack.c.l.b16 %v3755_v9  ;;  %v3946_v62 = vunpack.c.l.b16 %v3765_v25  ;;  %v3476_v38 = vld [vmem:[#allocation2 + $0xb4] sm:$0xf]  ;;  %4759 = vmatpush.bf16.msra.mxu2 %v7572_v22 }
 0x151   : > { %v2822_v35 = vunpack.c.l.b16 %v2653_v2  ;;  %v2663_v12 = vshll.u32 %v8667_v36, 16  ;;  %v3767_v21 = vshrl.u32 %v3476_v38, 16  ;;  %v3770_v47 = vshll.u32 %v3476_v38, 16 }
 0x152   : > { %v1120_v31 = vpop.f32.mrf.mxu0  ;;  %4087 = vmatmul.bf16.gmra.mxu1 %v3967_v17  ;;  %v2660_v17 = vshrl.u32 %v8667_v36, 16  ;;  %v3776_v13 = vshll.u32 %v3477_v54, 16  ;;  %v3780_v16 = vshrl.u32 %v3477_v54, 16  ;;  %v1945_v9 = vor.u32 %v1944_v20, %v8700_v30  ;;  %v1638_v20 = vld [vmem:[#allocation2 + $0xb4] sm:$0xf] }
 0x153   : > { %v8669_v27 = vadd.f32 %v1498_v61, %v1120_v31  ;;  %v8677_v15 = vpop.f32.mrf.mxu3  ;;  %v8681_v61 = vadd.f32 %v8333_v59, %v8361_v46  ;;  %v7546_v59 = vld [vmem:[#allocation2 + $0x94] sm:$0xff]  ;;  %v1927_v46 = vsel %vm8306_vm6, %v8671_v44, %v8662_v23  ;;  %v2671_v23 = vrot.slane %v2669_v45, 7 }
 0x154   : > { %v2662_v31 = vrot.slane %v2660_v17, 7  ;;  %v2672_v44 = vshll.u32 %v2386_v1, 16  ;;  %v2844_v2 = vpack.c.b16 %v2822_v35, %v2821_v10  ;;  %v1935_v17 = vor.u32 %v1934_v56, %v1931_v39  ;;  %v7596_v1 = vld [vmem:[%s9423_s1 + $0x1d0] sm:$0xff] }
 0x155   : > { %v1160_v60 = vpop.f32.mrf.mxu2  ;;  %v1948_v25 = vshll.u32 %v1637_v6, 16  ;;  %v3968_v36 = vpack.c.b16 %v3946_v62, %v3945_v43  ;;  %v3772_v45 = vrot.slane %v3770_v47, 5  ;;  %v8712_v10 = vrot.slane %v3776_v13, 5  ;;  %v1639_v6 = vld [vmem:[#allocation2 + $0xb8] sm:$0xf]  ;;  %5137 = vmatpush.bf16.msra.mxu3 %v7596_v1 }
 0x156   : > { %v8692_v53 = vadd.f32 %v1538_v55, %v1160_v60  ;;  %v2655_v55 = vshrl.u32 %v2384_v14, 16  ;;  %v3769_v14 = vrot.slane %v3767_v21, 4  ;;  %v3782_v35 = vrot.slane %v3780_v16, 4 }
 0x157   : > { %v8698_v28 = vpop.f32.mrf.mxu1  ;;  %v2667_v39 = vrot.slane %v2662_v31, 4  ;;  %v2674_v56 = vor.u32 %v2672_v44, %v2671_v23  ;;  %v2107_v22 = vunpack.c.l.b16 %v1917_v11  ;;  %v1953_v47 = vshrl.u32 %v1638_v20, 16 }
 0x158   : > { %9446 = vst [vmem:[#allocation15_spill] sm:$0xff] %v8692_v53  ;;  %v6951_v54 = vrot.slane %v2655_v55, 11  ;;  %v2665_v53 = vor.u32 %v2663_v12, %v2662_v31  ;;  %v3773_v43 = vor.u32 %v3772_v45, %v3769_v14  ;;  %v3783_v62 = vor.u32 %v3782_v35, %v8712_v10 }
 0x159   : > { %v1956_v13 = vshll.u32 %v1638_v20, 16  ;;  %v1962_v16 = vshll.u32 %v1639_v6, 16  ;;  %v2108_v12 = vunpack.c.l.b16 %v1927_v46  ;;  %v8719_v31 = vrot.slane %v1948_v25, 5  ;;  %v2389_v25 = vld [vmem:[#allocation2 + $0xc8] sm:$0xf] }
 0x15a   : > { %v3302_v4 = vpop.f32.mrf.mxu0  ;;  %2249 = vmatmul.bf16.gmra.mxu2 %v2129_v58  ;;  %v3478_v58 = vld [vmem:[#allocation2 + $0xbc] sm:$0x1]  ;;  %v1966_v23 = vshrl.u32 %v1639_v6, 16  ;;  %v8723_v14 = vrot.slane %v1945_v9, 4  ;;  %v2666_v11 = vsel %vm7974_vm3, %v6951_v54, %v2665_v53  ;;  %v2675_v1 = vsel %vm7974_vm3, %v2667_v39, %v2674_v56 }
 0x15b   : > { %v8706_v60 = vpop.f32.mrf.mxu3  ;;  %v3786_v21 = vshll.u32 %v3478_v58, 16  ;;  %v2388_v58 = vld [vmem:[#allocation2 + $0xc4] sm:$0xf]  ;;  %v3784_v46 = vrot.slane %v3783_v62, 4  ;;  %v1958_v20 = vrot.slane %v1956_v13, 5  ;;  %v8731_v9 = vrot.slane %v1962_v16, 5 }
 0x15c   : > { %v1968_v6 = vrot.slane %v1966_v23, 4  ;;  %v2823_v54 = vunpack.c.l.b16 %v2666_v11  ;;  %v2824_v39 = vunpack.c.l.b16 %v2675_v1  ;;  %v2682_v56 = vshrl.u32 %v2388_v58, 16  ;;  %v3479_v1 = vld [vmem:[#allocation2 + $0xc4] sm:$0xf] }
 0x15d   : > { %3341 = vmatmul.bf16.gmra.mxu0 %v7546_v59  ;;  %v2210_v38 = vpop.f32.mrf.mxu2 }
 0x15e   : > { %v2290_v59 = vadd.f32 %v2210_v38, %v8248_v8  ;;  %v8721_v8 = vrot.slane %v1935_v17, 4  ;;  %v1640_v38 = vld [vmem:[#allocation2 + $0xbc] sm:$0x1]  ;;  %v1955_v17 = vrot.slane %v1953_v47, 4  ;;  %v2845_v11 = vpack.c.b16 %v2824_v39, %v2823_v54 }
 0x15f   : > { %v8716_v49 = vpop.f32.mrf.mxu1  ;;  %v1972_v16 = vshll.u32 %v1640_v38, 16  ;;  %v2694_v38 = vshll.u32 %v2389_v25, 16 }
 0x160   : > { %v3004_v55 = vadd.f32 %v8677_v15, %v2290_v59  ;;  %2968 = vmatmul.bf16.gmra.mxu3 %v2844_v2  ;;  %v3774_v15 = vrot.slane %v3773_v43, 4  ;;  %v3788_v2 = vrot.slane %v3786_v21, 5  ;;  %v2130_v43 = vpack.c.b16 %v2108_v12, %v2107_v22  ;;  %v7547_v22 = vld [vmem:[#allocation2 + $0xa4] sm:$0xff] }
 0x161   : > { %v1941_v62 = vsel %vm8306_vm6, %v8721_v8, %v8700_v30  ;;  %v2691_v21 = vshrl.u32 %v2389_v25, 16  ;;  %v1959_v12 = vor.u32 %v1958_v20, %v1955_v17 }
 0x162   : > { %v3304_v44 = vpop.f32.mrf.mxu0  ;;  %v3382_v45 = vadd.f32 %v3302_v4, %v3004_v55  ;;  %4092 = vmatmul.bf16.gmra.mxu1 %v3968_v36  ;;  %v7604_v4 = vld [vmem:[%s9423_s1 + $0x210] sm:$0xff]  ;;  %v2387_v36 = vld [vmem:[#allocation2 + $0xc0] sm:$0x8]  ;;  %v3779_v13 = vsel %vm8306_vm6, %v3774_v15, %v8712_v10  ;;  %v3789_v30 = vsel %vm8306_vm6, %v3784_v46, %v3788_v2  ;;  %v3794_v46 = vshll.u32 %v3479_v1, 16 }
 0x163   : > { %v8729_v35 = vpop.f32.mrf.mxu3  ;;  %5883 = vmatpush.bf16.msra.mxu0 %v7604_v4  ;;  %v2677_v23 = vshrl.u32 %v2387_v36, 16  ;;  %v3947_v10 = vunpack.c.l.b16 %v3779_v13  ;;  %v2693_v15 = vrot.slane %v2691_v21, 7  ;;  %v3948_v41 = vunpack.c.l.b16 %v3789_v30 }
 0x164   : > { %v8734_v53 = vadd.f32 %v8658_v32, %v3382_v45  ;;  %v1951_v32 = vsel %vm8306_vm6, %v8723_v14, %v8719_v31  ;;  %v2684_v31 = vrot.slane %v2682_v56, 7  ;;  %v2685_v14 = vshll.u32 %v2388_v58, 16  ;;  %v3480_v45 = vld [vmem:[#allocation2 + $0xc8] sm:$0xf]  ;;  %v3481_v56 = vld [vmem:[#allocation2 + $0xcc] sm:$0x1] }
 0x165   : > { %v2212_v59 = vpop.f32.mrf.mxu2  ;;  %v3800_v2 = vshll.u32 %v3480_v45, 16  ;;  %v1960_v20 = vrot.slane %v1959_v12, 4  ;;  %v6952_v39 = vrot.slane %v2677_v23, 11  ;;  %v3796_v25 = vrot.slane %v3794_v46, 5 }
 0x166   : > { %9447 = vst [vmem:[#allocation16_spill] sm:$0xff] %v8734_v53  ;;  %v2291_v47 = vadd.f32 %v2212_v59, %v8681_v61  ;;  %v1969_v61 = vor.u32 %v1968_v6, %v8731_v9  ;;  %v3791_v59 = vshrl.u32 %v3479_v1, 16  ;;  %v2687_v36 = vor.u32 %v2685_v14, %v2684_v31  ;;  %v1642_v14 = vld [vmem:[#allocation2 + $0xc8] sm:$0xf] }
 0x167   : > { %v8751_v55 = vpop.f32.mrf.mxu1  ;;  %v3804_v13 = vshrl.u32 %v3480_v45, 16  ;;  %v3810_v1 = vshll.u32 %v3481_v56, 16  ;;  %v2110_v23 = vunpack.c.l.b16 %v1951_v32  ;;  %v2391_v32 = vld [vmem:[#allocation2 + $0xd4] sm:$0xf] }
 0x168   : > { %v3005_v8 = vadd.f32 %v8706_v60, %v2291_v47  ;;  %v1970_v6 = vrot.slane %v1969_v61, 4  ;;  %v1974_v60 = vrot.slane %v1972_v16, 5  ;;  %v3793_v54 = vrot.slane %v3791_v59, 4  ;;  %v2392_v59 = vld [vmem:[#allocation2 + $0xd8] sm:$0xf] }
 0x169   : > { %v3802_v47 = vrot.slane %v3800_v2, 5  ;;  %v3806_v16 = vrot.slane %v3804_v13, 4  ;;  %v2704_v56 = vshrl.u32 %v2391_v32, 16 }
 0x16a   : > { %v3307_v4 = vpop.f32.mrf.mxu0  ;;  %2254 = vmatmul.bf16.gmra.mxu2 %v2130_v43  ;;  %v3383_v53 = vadd.f32 %v3304_v44, %v3005_v8  ;;  %v2689_v43 = vrot.slane %v2684_v31, 4  ;;  %v2696_v44 = vor.u32 %v2694_v38, %v2693_v15  ;;  %v3969_v8 = vpack.c.b16 %v3948_v41, %v3947_v10 }
 0x16b   : > { %v8757_v17 = vpop.f32.mrf.mxu3  ;;  %v3797_v12 = vor.u32 %v3796_v25, %v3793_v54  ;;  %v1965_v31 = vsel %vm8306_vm6, %v1960_v20, %v8731_v9  ;;  %v2688_v41 = vsel %vm7974_vm3, %v6952_v39, %v2687_v36  ;;  %v3812_v20 = vrot.slane %v3810_v1, 5  ;;  %v2390_v36 = vld [vmem:[#allocation2 + $0xd0] sm:$0x8] }
 0x16c   : > { %v8760_v58 = vadd.f32 %v8698_v28, %v3383_v53  ;;  %v1641_v28 = vld [vmem:[#allocation2 + $0xc4] sm:$0xf]  ;;  %v2697_v10 = vsel %vm7974_vm3, %v2689_v43, %v2696_v44  ;;  %v2825_v54 = vunpack.c.l.b16 %v2688_v41  ;;  %v2713_v44 = vshrl.u32 %v2392_v59, 16  ;;  %v3482_v41 = vld [vmem:[#allocation2 + $0xd4] sm:$0xf] }
 0x16d   : > { %3346 = vmatmul.bf16.gmra.mxu0 %v7547_v22  ;;  %v2215_v21 = vpop.f32.mrf.mxu2  ;;  %v2109_v22 = vunpack.c.l.b16 %v1941_v62  ;;  %v3807_v62 = vor.u32 %v3806_v16, %v3802_v47  ;;  %v3798_v9 = vrot.slane %v3797_v12, 4  ;;  %v1977_v15 = vshrl.u32 %v1641_v28, 16 }
 0x16e   : > { %v2292_v30 = vadd.f32 %v2215_v21, %v8391_v42  ;;  %v1975_v42 = vsel %vm8306_vm6, %v1970_v6, %v1974_v60  ;;  %v1980_v38 = vshll.u32 %v1641_v28, 16  ;;  %v1986_v6 = vshll.u32 %v1642_v14, 16 }
 0x16f   : > { %v8763_v61 = vpop.f32.mrf.mxu1  ;;  %v3808_v2 = vrot.slane %v3807_v62, 4  ;;  %v2826_v39 = vunpack.c.l.b16 %v2697_v10  ;;  %v8783_v21 = vunpack.c.l.b16 %v1965_v31  ;;  %v8785_v43 = vunpack.c.l.b16 %v1975_v42  ;;  %v3483_v10 = vld [vmem:[#allocation2 + $0xd8] sm:$0xf] }
 0x170   : > { %v3006_v53 = vadd.f32 %v8729_v35, %v2292_v30  ;;  %2973 = vmatmul.bf16.gmra.mxu3 %v2845_v11  ;;  %v7628_v35 = vld [vmem:[%s9424_s2 + $0x10] sm:$0xff]  ;;  %v3803_v30 = vsel %vm8306_vm6, %v3798_v9, %v3802_v47  ;;  %v1982_v12 = vrot.slane %v1980_v38, 5  ;;  %v8794_v28 = vrot.slane %v1986_v6, 5  ;;  %v1643_v6 = vld [vmem:[#allocation2 + $0xcc] sm:$0x1] }
 0x171   : > { %6436 = vmatpush.bf16.msra.mxu1 %v7628_v35  ;;  %v3813_v1 = vsel %vm8306_vm6, %v3808_v2, %v3812_v20  ;;  %v2846_v31 = vpack.c.b16 %v2826_v39, %v2825_v54  ;;  %v2706_v42 = vrot.slane %v2704_v56, 7  ;;  %v3949_v35 = vunpack.c.l.b16 %v3803_v30 }
 0x172   : > { %v3309_v45 = vpop.f32.mrf.mxu0  ;;  %v3384_v11 = vadd.f32 %v3307_v4, %v3006_v53  ;;  %4097 = vmatmul.bf16.gmra.mxu1 %v3969_v8  ;;  %v2131_v4 = vpack.c.b16 %v2110_v23, %v2109_v22  ;;  %v1979_v8 = vrot.slane %v1977_v15, 4  ;;  %v1990_v53 = vshrl.u32 %v1642_v14, 16  ;;  %v7571_v14 = vld [vmem:[%s9423_s1 + $0x188] sm:$0xff] }
 0x173   : > { %v8778_v46 = vpop.f32.mrf.mxu3  ;;  %v2699_v22 = vshrl.u32 %v2390_v36, 16  ;;  %v2715_v62 = vrot.slane %v2713_v44, 7  ;;  %v3815_v9 = vshrl.u32 %v3482_v41, 16  ;;  %v3950_v38 = vunpack.c.l.b16 %v3813_v1  ;;  %4760 = vmatpush.bf16.msra.mxu2 %v7571_v14 }
 0x174   : > { %v8781_v60 = vadd.f32 %v8716_v49, %v3384_v11  ;;  %v7548_v49 = vld [vmem:[#allocation2 + $0xb4] sm:$0xff]  ;;  %v2716_v11 = vshll.u32 %v2392_v59, 16  ;;  %v3818_v2 = vshll.u32 %v3482_v41, 16  ;;  %v3824_v20 = vshll.u32 %v3483_v10, 16 }
 0x175   : > { %v2217_v25 = vpop.f32.mrf.mxu2  ;;  %v6953_v54 = vrot.slane %v2699_v22, 11  ;;  %v3817_v39 = vrot.slane %v3815_v9, 4  ;;  %v3828_v36 = vshrl.u32 %v3483_v10, 16  ;;  %v1983_v30 = vor.u32 %v1982_v12, %v1979_v8  ;;  %v1644_v41 = vld [vmem:[#allocation2 + $0xd4] sm:$0xf] }
 0x176   : > { %v2293_v13 = vadd.f32 %v2217_v25, %v8407_v26  ;;  %v2707_v26 = vshll.u32 %v2391_v32, 16  ;;  %v1992_v32 = vrot.slane %v1990_v53, 4  ;;  %v3484_v25 = vld [vmem:[#allocation2 + $0xdc] sm:$0x1]  ;;  %v8808_v44 = vrot.slane %v3824_v20, 5 }
 0x177   : > { %v8790_v16 = vpop.f32.mrf.mxu1  ;;  %v2711_v1 = vrot.slane %v2706_v42, 4  ;;  %v2718_v53 = vor.u32 %v2716_v11, %v2715_v62  ;;  %v3830_v22 = vrot.slane %v3828_v36, 4  ;;  %v1645_v12 = vld [vmem:[#allocation2 + $0xd8] sm:$0xf]  ;;  %v2001_v11 = vshrl.u32 %v1644_v41, 16 }
 0x178   : > { %v3007_v23 = vadd.f32 %v8757_v17, %v2293_v13  ;;  %v2709_v59 = vor.u32 %v2707_v26, %v2706_v42  ;;  %v3834_v26 = vshll.u32 %v3484_v25, 16  ;;  %v1993_v9 = vor.u32 %v1992_v32, %v8794_v28  ;;  %v2395_v20 = vld [vmem:[#allocation2 + $0xe8] sm:$0xf] }
 0x179   : > { %v3831_v14 = vor.u32 %v3830_v22, %v8808_v44  ;;  %v2132_v42 = vpack.c.b16 %v8785_v43, %v8783_v21  ;;  %v2719_v62 = vsel %vm7974_vm3, %v2711_v1, %v2718_v53  ;;  %v2004_v43 = vshll.u32 %v1644_v41, 16  ;;  %v7549_v41 = vld [vmem:[#allocation2 + $0xc4] sm:$0xff] }
 0x17a   : > { %v3312_v47 = vpop.f32.mrf.mxu0  ;;  %2259 = vmatmul.bf16.gmra.mxu2 %v2131_v4  ;;  %v3385_v15 = vadd.f32 %v3309_v45, %v3007_v23  ;;  %v7595_v45 = vld [vmem:[%s9423_s1 + $0x1c8] sm:$0xff]  ;;  %v3820_v4 = vrot.slane %v3818_v2, 5  ;;  %v2710_v8 = vsel %vm7974_vm3, %v6953_v54, %v2709_v59  ;;  %v3836_v32 = vrot.slane %v3834_v26, 5 }
 0x17b   : > { %v8800_v17 = vpop.f32.mrf.mxu3  ;;  %5138 = vmatpush.bf16.msra.mxu3 %v7595_v45  ;;  %v8826_v36 = vrot.slane %v1993_v9, 4  ;;  %v2827_v21 = vunpack.c.l.b16 %v2710_v8  ;;  %v2828_v25 = vunpack.c.l.b16 %v2719_v62  ;;  %v2003_v26 = vrot.slane %v2001_v11, 4 }
 0x17c   : > { %v8803_v56 = vadd.f32 %v8751_v55, %v3385_v15  ;;  %v3970_v55 = vpack.c.b16 %v3950_v38, %v3949_v35  ;;  %v1996_v15 = vshll.u32 %v1643_v6, 16  ;;  %v8820_v35 = vrot.slane %v1983_v30, 4  ;;  %v2394_v38 = vld [vmem:[#allocation2 + $0xe4] sm:$0xf] }
 0x17d   : > { %3351 = vmatmul.bf16.gmra.mxu0 %v7548_v49  ;;  %v2220_v13 = vpop.f32.mrf.mxu2  ;;  %v3821_v49 = vor.u32 %v3820_v4, %v3817_v39  ;;  %v2393_v39 = vld [vmem:[#allocation2 + $0xe0] sm:$0x8]  ;;  %v2010_v4 = vshll.u32 %v1645_v12, 16  ;;  %v2726_v53 = vshrl.u32 %v2394_v38, 16  ;;  %v2729_v22 = vshll.u32 %v2394_v38, 16 }
 0x17e   : > { %v2294_v23 = vadd.f32 %v2220_v13, %v8431_v5  ;;  %v8828_v59 = vrot.slane %v1996_v15, 5  ;;  %v2014_v13 = vshrl.u32 %v1645_v12, 16  ;;  %v2721_v1 = vshrl.u32 %v2393_v39, 16  ;;  %v3485_v38 = vld [vmem:[#allocation2 + $0xe4] sm:$0xf] }
 0x17f   : > { %v8811_v10 = vpop.f32.mrf.mxu1  ;;  %v2006_v15 = vrot.slane %v2004_v43, 5  ;;  %v2738_v8 = vshll.u32 %v2395_v20, 16  ;;  %v8849_v62 = vrot.slane %v2010_v4, 5 }
 0x180   : > { %v3008_v2 = vadd.f32 %v8778_v46, %v2294_v23  ;;  %2978 = vmatmul.bf16.gmra.mxu3 %v2846_v31  ;;  %v3822_v46 = vrot.slane %v3821_v49, 4  ;;  %v3832_v31 = vrot.slane %v3831_v14, 4  ;;  %v2735_v23 = vshrl.u32 %v2395_v20, 16 }
 0x181   : > { %v2728_v14 = vrot.slane %v2726_v53, 7  ;;  %v6954_v39 = vrot.slane %v2721_v1, 11 }
 0x182   : > { %v3314_v5 = vpop.f32.mrf.mxu0  ;;  %v3386_v6 = vadd.f32 %v3312_v47, %v3008_v2  ;;  %4102 = vmatmul.bf16.gmra.mxu1 %v3970_v55  ;;  %v7603_v47 = vld [vmem:[%s9423_s1 + $0x208] sm:$0xff]  ;;  %v3837_v49 = vsel %vm8306_vm6, %v3832_v31, %v3836_v32  ;;  %v2737_v2 = vrot.slane %v2735_v23, 7  ;;  %v1646_v32 = vld [vmem:[#allocation2 + $0xdc] sm:$0x1]  ;;  %v2847_v23 = vpack.c.b16 %v2828_v25, %v2827_v21 }
 0x183   : > { %v8824_v54 = vpop.f32.mrf.mxu3  ;;  %5884 = vmatpush.bf16.msra.mxu0 %v7603_v47  ;;  %v3952_v31 = vunpack.c.l.b16 %v3837_v49  ;;  %v2731_v43 = vor.u32 %v2729_v22, %v2728_v14  ;;  %v3839_v47 = vshrl.u32 %v3485_v38, 16  ;;  %v3487_v49 = vld [vmem:[#allocation2 + $0xec] sm:$0x1] }
 0x184   : > { %v8831_v45 = vadd.f32 %v8763_v61, %v3386_v6  ;;  %v3827_v61 = vsel %vm8306_vm6, %v3822_v46, %v8808_v44  ;;  %v2016_v44 = vrot.slane %v2014_v13, 4  ;;  %v3486_v6 = vld [vmem:[#allocation2 + $0xe8] sm:$0xf] }
 0x185   : > { %v2222_v30 = vpop.f32.mrf.mxu2  ;;  %v3951_v46 = vunpack.c.l.b16 %v3827_v61  ;;  %v3852_v4 = vshrl.u32 %v3486_v6, 16  ;;  %v2020_v61 = vshll.u32 %v1646_v32, 16  ;;  %v3841_v1 = vrot.slane %v3839_v47, 4 }
 0x186   : > { %v2295_v55 = vadd.f32 %v2222_v30, %v8459_v63  ;;  %v1989_v63 = vsel %vm8306_vm6, %v8820_v35, %v8794_v28  ;;  %v3848_v30 = vshll.u32 %v3486_v6, 16  ;;  %v2733_v28 = vrot.slane %v2728_v14, 4 }
 0x187   : > { %v8842_v9 = vpop.f32.mrf.mxu1  ;;  %v2740_v35 = vor.u32 %v2738_v8, %v2737_v2  ;;  %v3971_v25 = vpack.c.b16 %v3952_v31, %v3951_v46  ;;  %v3858_v8 = vshll.u32 %v3487_v49, 16  ;;  %v2113_v6 = vunpack.c.l.b16 %v1989_v63 }
 0x188   : > { %v3009_v12 = vadd.f32 %v8800_v17, %v2295_v55  ;;  %v3842_v17 = vshll.u32 %v3485_v38, 16  ;;  %v2007_v55 = vor.u32 %v2006_v15, %v2003_v26  ;;  %v3854_v38 = vrot.slane %v3852_v4, 4 }
 0x189   : > { %v2732_v26 = vsel %vm7974_vm3, %v6954_v39, %v2731_v43  ;;  %v2741_v15 = vsel %vm7974_vm3, %v2733_v28, %v2740_v35  ;;  %v8876_v31 = vrot.slane %v2020_v61, 5  ;;  %v7627_v39 = vld [vmem:[%s9424_s2 + $0x8] sm:$0xff]  ;;  %v3860_v28 = vrot.slane %v3858_v8, 5 }
 0x18a   : > { %v3317_v11 = vpop.f32.mrf.mxu0  ;;  %2264 = vmatmul.bf16.gmra.mxu2 %v2132_v42  ;;  %v3387_v20 = vadd.f32 %v3314_v5, %v3009_v12  ;;  %v2017_v5 = vor.u32 %v2016_v44, %v8849_v62  ;;  %v3844_v42 = vrot.slane %v3842_v17, 5  ;;  %v8857_v12 = vrot.slane %v3848_v30, 5  ;;  %v1647_v44 = vld [vmem:[#allocation2 + $0xe4] sm:$0xf]  ;;  %v1648_v43 = vld [vmem:[#allocation2 + $0xe8] sm:$0xf]  ;;  %6437 = vmatpush.bf16.msra.mxu1 %v7627_v39 }
 0x18b   : > { %v8851_v53 = vpop.f32.mrf.mxu3  ;;  %v2829_v47 = vunpack.c.l.b16 %v2732_v26  ;;  %v2025_v63 = vshrl.u32 %v1647_v44, 16  ;;  %v2028_v35 = vshll.u32 %v1647_v44, 16 }
 0x18c   : > { %v8854_v13 = vadd.f32 %v8790_v16, %v3387_v20  ;;  %v1999_v16 = vsel %vm8306_vm6, %v8826_v36, %v8828_v59  ;;  %v3845_v14 = vor.u32 %v3844_v42, %v3841_v1  ;;  %v3855_v2 = vor.u32 %v3854_v38, %v8857_v12  ;;  %v8890_v1 = vld [vmem:[#allocation2 + $0xf4] sm:$0xf]  ;;  %v8898_v38 = vld [vmem:[#allocation2 + $0xec] sm:$0x1] }
 0x18d   : > { %3356 = vmatmul.bf16.gmra.mxu0 %v7549_v41  ;;  %v2225_v22 = vpop.f32.mrf.mxu2  ;;  %v2114_v36 = vunpack.c.l.b16 %v1999_v16  ;;  %v8872_v59 = vrot.slane %v2007_v55, 4  ;;  %v8874_v46 = vrot.slane %v2017_v5, 4  ;;  %v2034_v55 = vshll.u32 %v1648_v43, 16  ;;  %v8900_v16 = vld [vmem:[#allocation2 + $0xf8] sm:$0xf] }
 0x18e   : > { %v2296_v21 = vadd.f32 %v2225_v22, %v8482_v51  ;;  %v3846_v30 = vrot.slane %v3845_v14, 4  ;;  %v411_v22 = vld [vmem:[%s7932_s16 + $0xf0] sm:$0xff]  ;;  %v2030_v14 = vrot.slane %v2028_v35, 5  ;;  %v2748_v44 = vshrl.u32 %v8890_v1, 16 }
 0x18f   : > { %v8866_v41 = vpop.f32.mrf.mxu1  ;;  %v2133_v49 = vpack.c.b16 %v2114_v36, %v2113_v6  ;;  %v2023_v42 = vsel %vm8306_vm6, %v8874_v46, %v8876_v31  ;;  %v8910_v8 = vrot.slane %v2034_v55, 5  ;;  %v3489_v6 = vld [vmem:[#allocation2 + $0xf8] sm:$0xf]  ;;  %v443_v36 = vpack.c.bf16 %v411_v22, %v411_v22  ;;  %v2396_v31 = vld [vmem:[#allocation2 + $0xf0] sm:$0x8] }
 0x190   : > { %v3010_v51 = vadd.f32 %v8824_v54, %v2296_v21  ;;  %2983 = vmatmul.bf16.gmra.mxu3 %v2847_v23  ;;  %v2830_v54 = vunpack.c.l.b16 %v2741_v15  ;;  %v3856_v23 = vrot.slane %v3855_v2, 4  ;;  %v2038_v21 = vshrl.u32 %v1648_v43, 16 }
 0x191   : > { %v2027_v15 = vrot.slane %v2025_v63, 4  ;;  %v2044_v46 = vshll.u32 %v8898_v38, 16  ;;  %v7570_v63 = vld [vmem:[%s9423_s1 + $0x180] sm:$0xff]  ;;  %477 = vst.msk [vmem:[#allocation2 + $0x104] sm:$0xf] %vm446_vm0, %v443_v36  ;;  %v3872_v35 = vshll.u32 %v3489_v6, 16 }
 0x192   : > { %v3319_v32 = vpop.f32.mrf.mxu0  ;;  %v3388_v20 = vadd.f32 %v3317_v11, %v3010_v51  ;;  %4107 = vmatmul.bf16.gmra.mxu1 %v3971_v25  ;;  %v2013_v11 = vsel %vm8306_vm6, %v8872_v59, %v8849_v62  ;;  %v7550_v25 = vld [vmem:[#allocation2 + $0xd4] sm:$0xff]  ;;  %v3851_v62 = vsel %vm8306_vm6, %v3846_v30, %v8857_v12  ;;  %v2757_v12 = vshrl.u32 %v8900_v16, 16  ;;  %4761 = vmatpush.bf16.msra.mxu2 %v7570_v63  ;;  %v3490_v38 = vld [vmem:[#allocation2 + $0xfc] sm:$0x1] }
 0x193   : > { %v8881_v17 = vpop.f32.mrf.mxu3  ;;  %v3488_v51 = vld [vmem:[#allocation2 + $0xf4] sm:$0xf]  ;;  %v3876_v55 = vshrl.u32 %v3489_v6, 16  ;;  %v2751_v22 = vshll.u32 %v8890_v1, 16 }
 0x194   : > { %v8884_v4 = vadd.f32 %v8811_v10, %v3388_v20  ;;  %v2848_v10 = vpack.c.b16 %v2830_v54, %v2829_v47  ;;  %v3863_v39 = vshrl.u32 %v3488_v51, 16  ;;  %v3866_v43 = vshll.u32 %v3488_v51, 16 }
 0x195   : > { %v2227_v61 = vpop.f32.mrf.mxu2  ;;  %v3953_v47 = vunpack.c.l.b16 %v3851_v62  ;;  %v2759_v62 = vrot.slane %v2757_v12, 7 }
 0x196   : > { %v2297_v5 = vadd.f32 %v2227_v61, %v8493_v37  ;;  %v3861_v37 = vsel %vm8306_vm6, %v3856_v23, %v3860_v28  ;;  %v3865_v23 = vrot.slane %v3863_v39, 4  ;;  %v3868_v28 = vrot.slane %v3866_v43, 5 }
 0x197   : > { %v8902_v26 = vpop.f32.mrf.mxu1  ;;  %v3954_v54 = vunpack.c.l.b16 %v3861_v37  ;;  %v2760_v37 = vshll.u32 %v8900_v16, 16  ;;  %v3882_v39 = vshll.u32 %v3490_v38, 16  ;;  %v2115_v16 = vunpack.c.l.b16 %v2013_v11 }
 0x198   : > { %v3011_v2 = vadd.f32 %v8851_v53, %v2297_v5  ;;  %v2040_v53 = vrot.slane %v2038_v21, 4  ;;  %v7594_v5 = vld [vmem:[%s9423_s1 + $0x1c0] sm:$0xff]  ;;  %v3869_v36 = vor.u32 %v3868_v28, %v3865_v23  ;;  %v2116_v43 = vunpack.c.l.b16 %v2023_v42  ;;  %v1650_v28 = vld [vmem:[#allocation2 + $0xf4] sm:$0xf] }
 0x199   : > { %v3972_v51 = vpack.c.b16 %v3954_v54, %v3953_v47  ;;  %5139 = vmatpush.bf16.msra.mxu3 %v7594_v5  ;;  %v8942_v23 = vrot.slane %v2044_v46, 5  ;;  %v3884_v42 = vrot.slane %v3882_v39, 5  ;;  %v2049_v5 = vshrl.u32 %v1650_v28, 16  ;;  %v2400_v38 = vld [vmem:[#allocation2 + $0x104] sm:$0xf] }
 0x19a   : > { %v3322_v59 = vpop.f32.mrf.mxu0  ;;  %2269 = vmatmul.bf16.gmra.mxu2 %v2133_v49  ;;  %v3389_v20 = vadd.f32 %v3319_v32, %v3011_v2  ;;  %v2743_v32 = vshrl.u32 %v2396_v31, 16  ;;  %v2750_v49 = vrot.slane %v2748_v44, 7  ;;  %v8929_v2 = vrot.slane %v3872_v35, 5 }
 0x19b   : > { %v8919_v30 = vpop.f32.mrf.mxu3  ;;  %v2031_v44 = vor.u32 %v2030_v14, %v2027_v15  ;;  %v2041_v1 = vor.u32 %v2040_v53, %v8910_v8  ;;  %v2762_v15 = vor.u32 %v2760_v37, %v2759_v62  ;;  %v2134_v62 = vpack.c.b16 %v2116_v43, %v2115_v16 }
 0x19c   : > { %v8922_v61 = vadd.f32 %v8842_v9, %v3389_v20  ;;  %v3878_v9 = vrot.slane %v3876_v55, 4  ;;  %v412_v20 = vld [vmem:[%s7932_s16 + $0xf8] sm:$0xff]  ;;  %v6955_v35 = vrot.slane %v2743_v32, 11  ;;  %v2755_v47 = vrot.slane %v2750_v49, 4 }
 0x19d   : > { %3361 = vmatmul.bf16.gmra.mxu0 %v7550_v25  ;;  %v2230_v21 = vpop.f32.mrf.mxu2  ;;  %v8938_v54 = vrot.slane %v2031_v44, 4  ;;  %v8940_v53 = vrot.slane %v2041_v1, 4  ;;  %v7551_v1 = vld [vmem:[#allocation2 + $0xe4] sm:$0xff]  ;;  %v2770_v39 = vshrl.u32 %v2400_v38, 16  ;;  %v8974_v43 = vrot.slane %v2049_v5, 4 }
 0x19e   : > { %v2298_v25 = vadd.f32 %v2230_v21, %v8513_v29  ;;  %v3879_v31 = vor.u32 %v3878_v9, %v8929_v2  ;;  %v2753_v29 = vor.u32 %v2751_v22, %v2750_v49  ;;  %v2763_v46 = vsel %vm7974_vm3, %v2755_v47, %v2762_v15  ;;  %v3493_v5 = vld [vmem:[#allocation2 + $0x10c] sm:$0x1] }
 0x19f   : > { %v8933_v6 = vpop.f32.mrf.mxu1  ;;  %v2037_v37 = vsel %vm8306_vm6, %v8938_v54, %v8910_v8  ;;  %v2047_v9 = vsel %vm8306_vm6, %v8940_v53, %v8942_v23  ;;  %v2399_v8 = vld [vmem:[#allocation2 + $0x100] sm:$0x8]  ;;  %v2773_v23 = vshll.u32 %v2400_v38, 16 }
 0x1a0   : > { %v3012_v12 = vadd.f32 %v8881_v17, %v2298_v25  ;;  %2988 = vmatmul.bf16.gmra.mxu3 %v2848_v10  ;;  %v3870_v17 = vrot.slane %v3869_v36, 4  ;;  %v3880_v11 = vrot.slane %v3879_v31, 4  ;;  %v444_v10 = vpack.c.bf16 %v412_v20, %v412_v20 }
 0x1a1   : > { %v2754_v22 = vsel %vm7974_vm3, %v6955_v35, %v2753_v29  ;;  %v2832_v31 = vunpack.c.l.b16 %v2763_v46  ;;  %v2052_v20 = vshll.u32 %v1650_v28, 16 }
 0x1a2   : > { %v3324_v63 = vpop.f32.mrf.mxu0  ;;  %v3390_v14 = vadd.f32 %v3322_v59, %v3012_v12  ;;  %4112 = vmatmul.bf16.gmra.mxu1 %v3972_v51  ;;  %v7602_v59 = vld [vmem:[%s9423_s1 + $0x200] sm:$0xff]  ;;  %478 = vst.msk [vmem:[#allocation2 + $0x108] sm:$0xf] %vm446_vm0, %v444_v10  ;;  %v3875_v51 = vsel %vm8306_vm6, %v3870_v17, %v8929_v2  ;;  %v2831_v36 = vunpack.c.l.b16 %v2754_v22 }
 0x1a3   : > { %v8944_v55 = vpop.f32.mrf.mxu3  ;;  %5885 = vmatpush.bf16.msra.mxu0 %v7602_v59  ;;  %v3491_v12 = vld [vmem:[#allocation2 + $0x104] sm:$0xf]  ;;  %v3955_v2 = vunpack.c.l.b16 %v3875_v51  ;;  %v2772_v59 = vrot.slane %v2770_v39, 7  ;;  %v2054_v38 = vrot.slane %v2052_v20, 5 }
 0x1a4   : > { %v8947_v32 = vadd.f32 %v8866_v41, %v3390_v14  ;;  %v1651_v41 = vld [vmem:[#allocation2 + $0xf8] sm:$0xf]  ;;  %v3887_v29 = vshrl.u32 %v3491_v12, 16  ;;  %v3890_v14 = vshll.u32 %v3491_v12, 16  ;;  %v7626_v20 = vld [vmem:[%s9424_s2] sm:$0xff] }
 0x1a5   : > { %v2232_v49 = vpop.f32.mrf.mxu2  ;;  %v2058_v35 = vshll.u32 %v1651_v41, 16  ;;  %v2062_v53 = vshrl.u32 %v1651_v41, 16  ;;  %6438 = vmatpush.bf16.msra.mxu1 %v7626_v20 }
 0x1a6   : > { %v2299_v21 = vadd.f32 %v2232_v49, %v8539_v57  ;;  %v3885_v57 = vsel %vm8306_vm6, %v3880_v11, %v3884_v42  ;;  %v3889_v17 = vrot.slane %v3887_v29, 4  ;;  %v2849_v42 = vpack.c.b16 %v2832_v31, %v2831_v36 }
 0x1a7   : > { %v8966_v25 = vpop.f32.mrf.mxu1  ;;  %v3956_v15 = vunpack.c.l.b16 %v3885_v57  ;;  %v3892_v49 = vrot.slane %v3890_v14, 5  ;;  %v3906_v31 = vshll.u32 %v3493_v5, 16  ;;  %v8983_v39 = vrot.slane %v2058_v35, 5 }
 0x1a8   : > { %v3013_v44 = vadd.f32 %v8919_v30, %v2299_v21  ;;  %v2765_v30 = vshrl.u32 %v2399_v8, 16  ;;  %v2064_v12 = vrot.slane %v2062_v53, 4  ;;  %v2775_v14 = vor.u32 %v2773_v23, %v2772_v59 }
 0x1a9   : > { %v2401_v10 = vld [vmem:[#allocation2 + $0x108] sm:$0xf]  ;;  %v3973_v51 = vpack.c.b16 %v3956_v15, %v3955_v2  ;;  %v3893_v57 = vor.u32 %v3892_v49, %v3889_v17  ;;  %v2117_v17 = vunpack.c.l.b16 %v2037_v37  ;;  %v1652_v49 = vld [vmem:[#allocation2 + $0xfc] sm:$0x1]  ;;  %v3908_v53 = vrot.slane %v3906_v31, 5 }
 0x1aa   : > { %v3327_v16 = vpop.f32.mrf.mxu0  ;;  %2274 = vmatmul.bf16.gmra.mxu2 %v2134_v62  ;;  %v3391_v47 = vadd.f32 %v3324_v63, %v3013_v44  ;;  %v3492_v28 = vld [vmem:[#allocation2 + $0x108] sm:$0xf]  ;;  %v2779_v46 = vshrl.u32 %v2401_v10, 16  ;;  %v2782_v63 = vshll.u32 %v2401_v10, 16  ;;  %v6956_v29 = vrot.slane %v2765_v30, 11 }
 0x1ab   : > { %v2951_v54 = vpop.f32.mrf.mxu3  ;;  %v3896_v21 = vshll.u32 %v3492_v28, 16  ;;  %v3900_v62 = vshrl.u32 %v3492_v28, 16  ;;  %v2777_v10 = vrot.slane %v2772_v59, 4  ;;  %v2118_v28 = vunpack.c.l.b16 %v2047_v9 }
 0x1ac   : > { %v8977_v11 = vadd.f32 %v8902_v26, %v3391_v47  ;;  %v2781_v26 = vrot.slane %v2779_v46, 7  ;;  %v3894_v35 = vrot.slane %v3893_v57, 4  ;;  %v2055_v23 = vor.u32 %v2054_v38, %v8974_v43 }
 0x1ad   : > { %3366 = vmatmul.bf16.gmra.mxu0 %v7551_v1  ;;  %v2235_v22 = vpop.f32.mrf.mxu2  ;;  %v3898_v1 = vrot.slane %v3896_v21, 5  ;;  %v3902_v36 = vrot.slane %v3900_v62, 4  ;;  %v2068_v46 = vshll.u32 %v1652_v49, 16  ;;  %v2776_v37 = vsel %vm7974_vm3, %v6956_v29, %v2775_v14  ;;  %v7552_v62 = vld [vmem:[#allocation2 + $0xf4] sm:$0xff]  ;;  %v5285_v29 = vld [vmem:[#allocation2 + $0x24] sm:$0xf] }
 0x1ae   : > { %v2300_v41 = vadd.f32 %v2235_v22, %v8557_v52  ;;  %v2784_v52 = vor.u32 %v2782_v63, %v2781_v26  ;;  %v2065_v22 = vor.u32 %v2064_v12, %v8983_v39  ;;  %v2135_v63 = vpack.c.b16 %v2118_v28, %v2117_v17 }
 0x1af   : > { %v8980_v44 = vpop.f32.mrf.mxu1  ;;  %v3903_v2 = vor.u32 %v3902_v36, %v3898_v1  ;;  %v2056_v57 = vrot.slane %v2055_v23, 4  ;;  %v2070_v36 = vrot.slane %v2068_v46, 5  ;;  %v5366_v17 = vshrl.u32 %v5285_v29, 16 }
 0x1b0   : > { %v3014_v8 = vadd.f32 %v8944_v55, %v2300_v41  ;;  %2993 = vmatmul.bf16.gmra.mxu3 %v2849_v42  ;;  %v2785_v9 = vsel %vm7974_vm3, %v2777_v10, %v2784_v52  ;;  %v2833_v41 = vunpack.c.l.b16 %v2776_v37  ;;  %v2066_v26 = vrot.slane %v2065_v22, 4  ;;  %v5286_v10 = vld [vmem:[#allocation2 + $0x28] sm:$0xf]  ;;  %v4193_v37 = vld [vmem:[#allocation2 + $0x20] sm:$0x8] }
 0x1b1   : > { %v3904_v42 = vrot.slane %v3903_v2, 4  ;;  %v2061_v52 = vsel %vm8306_vm6, %v2056_v57, %v8983_v39  ;;  %v5369_v28 = vshll.u32 %v5285_v29, 16 }
 0x1b2   : > { %v3329_v47 = vpop.f32.mrf.mxu0  ;;  %v3392_v15 = vadd.f32 %v3327_v16, %v3014_v8  ;;  %4117 = vmatmul.bf16.gmra.mxu1 %v3973_v51  ;;  %v2834_v51 = vunpack.c.l.b16 %v2785_v9  ;;  %v2071_v20 = vsel %vm8306_vm6, %v2066_v26, %v2070_v36 }
 0x1b3   : > { %v2954_v55 = vpop.f32.mrf.mxu3  ;;  %v3909_v43 = vsel %vm8306_vm6, %v3904_v42, %v3908_v53  ;;  %v5379_v42 = vshrl.u32 %v5286_v10, 16  ;;  %v2120_v22 = vunpack.c.l.b16 %v2071_v20 }
 0x1b4   : > { %v8989_v30 = vadd.f32 %v8933_v6, %v3392_v15  ;;  %v3899_v6 = vsel %vm8306_vm6, %v3894_v35, %v3898_v1  ;;  %v3958_v8 = vunpack.c.l.b16 %v3909_v43  ;;  %v2850_v1 = vpack.c.b16 %v2834_v51, %v2833_v41  ;;  %v4194_v15 = vld [vmem:[#allocation2 + $0x24] sm:$0xf] }
 0x1b5   : > { %v2237_v59 = vpop.f32.mrf.mxu2  ;;  %v5375_v35 = vshll.u32 %v5286_v10, 16  ;;  %v4279_v39 = vshrl.u32 %v4194_v15, 16  ;;  %v5381_v43 = vrot.slane %v5379_v42, 4  ;;  %v4274_v51 = vshrl.u32 %v4193_v37, 16  ;;  %v4197_v42 = vld [vmem:[#allocation2 + $0x34] sm:$0xf] }
 0x1b6   : > { %v2301_v16 = vadd.f32 %v2237_v59, %v8569_v34  ;;  %v3957_v34 = vunpack.c.l.b16 %v3899_v6  ;;  %v2119_v59 = vunpack.c.l.b16 %v2061_v52  ;;  %v4282_v26 = vshll.u32 %v4194_v15, 16 }
 0x1b7   : > { %v8998_v5 = vpop.f32.mrf.mxu1  ;;  %v5377_v6 = vrot.slane %v5375_v35, 5  ;;  %v4281_v57 = vrot.slane %v4279_v39, 7 }
 0x1b8   : > { %v3015_v21 = vadd.f32 %v2951_v54, %v2301_v16  ;;  %v3974_v2 = vpack.c.b16 %v3958_v8, %v3957_v34  ;;  %v5371_v16 = vrot.slane %v5369_v28, 5 }
 0x1b9   : > { %v5382_v29 = vor.u32 %v5381_v43, %v5377_v6  ;;  %v4284_v20 = vor.u32 %v4282_v26, %v4281_v57 }
 0x1ba   : > { %v3332_v38 = vpop.f32.mrf.mxu0  ;;  %2279 = vmatmul.bf16.gmra.mxu2 %v2135_v63  ;;  %v3393_v31 = vadd.f32 %v3329_v47, %v3015_v21 }
 0x1bb   : > { %v2956_v12 = vpop.f32.mrf.mxu3  ;;  %v5383_v35 = vrot.slane %v5382_v29, 4 }
 0x1bc   : > { %v9005_v14 = vadd.f32 %v8966_v25, %v3393_v31  ;;  %v4195_v25 = vld [vmem:[#allocation2 + $0x28] sm:$0xf] }
 0x1bd   : > { %3371 = vmatmul.bf16.gmra.mxu0 %v7552_v62  ;;  %v2240_v54 = vpop.f32.mrf.mxu2  ;;  %v4288_v9 = vshrl.u32 %v4195_v25, 16  ;;  %v5287_v62 = vld [vmem:[#allocation2 + $0x2c] sm:$0x1]  ;;  %v4291_v31 = vshll.u32 %v4195_v25, 16 }
 0x1be   : > { %v2302_v47 = vadd.f32 %v2240_v54, %v8600_v24  ;;  %v5368_v24 = vrot.slane %v5366_v17, 4  ;;  %v7553_v54 = vld [vmem:[#allocation2 + $0x104] sm:$0xff] }
 0x1bf   : > { %v9013_v49 = vpop.f32.mrf.mxu1 }
 0x1c0   : > { %v3016_v53 = vadd.f32 %v2954_v55, %v2302_v47  ;;  %2998 = vmatmul.bf16.gmra.mxu3 %v2850_v1  ;;  %v2136_v55 = vpack.c.b16 %v2120_v22, %v2119_v59  ;;  %v5372_v34 = vor.u32 %v5371_v16, %v5368_v24  ;;  %v5385_v1 = vshll.u32 %v5287_v62, 16  ;;  %v4198_v59 = vld [vmem:[#allocation2 + $0x38] sm:$0xf]  ;;  %v4196_v62 = vld [vmem:[#allocation2 + $0x30] sm:$0x8] }
 0x1c1   : > { %v4301_v24 = vshrl.u32 %v4197_v42, 16 }
 0x1c2   : > { %v3334_v23 = vpop.f32.mrf.mxu0  ;;  %v3394_v46 = vadd.f32 %v3332_v38, %v3016_v53  ;;  %4122 = vmatmul.bf16.gmra.mxu1 %v3974_v2  ;;  %v4290_v38 = vrot.slane %v4288_v9, 7  ;;  %v4286_v2 = vrot.slane %v4281_v57, 4  ;;  %v5373_v28 = vrot.slane %v5372_v34, 4  ;;  %v7578_v53 = vld [vmem:[#allocation2 + $0x24] sm:$0xff] }
 0x1c3   : > { %v2959_v63 = vpop.f32.mrf.mxu3 }
 0x1c4   : > { %v9016_v21 = vadd.f32 %v8980_v44, %v3394_v46  ;;  %v7165_v44 = vrot.slane %v4274_v51, 11  ;;  %v4293_v17 = vor.u32 %v4291_v31, %v4290_v38  ;;  %v5289_v46 = vld [vmem:[#allocation2 + $0x38] sm:$0xf]  ;;  %v5378_v9 = vsel %vm8306_vm6, %v5373_v28, %v5377_v6 }
 0x1c5   : > { %v2242_v41 = vpop.f32.mrf.mxu2  ;;  %v5403_v26 = vshrl.u32 %v5289_v46, 16  ;;  %v5766_v34 = vunpack.c.l.b16 %v5378_v9 }
 0x1c6   : > { %v2303_v36 = vadd.f32 %v2242_v41, %v8630_v33  ;;  %v5387_v33 = vrot.slane %v5385_v1, 5  ;;  %v4285_v39 = vsel %vm7974_vm3, %v7165_v44, %v4284_v20  ;;  %v4294_v37 = vsel %vm7974_vm3, %v4286_v2, %v4293_v17 }
 0x1c7   : > { %v9019_v8 = vpop.f32.mrf.mxu1  ;;  %v4310_v41 = vshrl.u32 %v4198_v59, 16  ;;  %v4642_v38 = vunpack.c.l.b16 %v4285_v39  ;;  %v4643_v31 = vunpack.c.l.b16 %v4294_v37  ;;  %v4296_v1 = vshrl.u32 %v4196_v62, 16 }
 0x1c8   : > { %v3017_v10 = vadd.f32 %v2956_v12, %v2303_v36  ;;  %v5288_v12 = vld [vmem:[#allocation2 + $0x34] sm:$0xf]  ;;  %v5388_v16 = vsel %vm8306_vm6, %v5383_v35, %v5387_v33  ;;  %v4304_v44 = vshll.u32 %v4197_v42, 16  ;;  %v5405_v35 = vrot.slane %v5403_v26, 4 }
 0x1c9   : > { %v5393_v57 = vshll.u32 %v5288_v12, 16  ;;  %v5767_v29 = vunpack.c.l.b16 %v5388_v16  ;;  %v4312_v20 = vrot.slane %v4310_v41, 7  ;;  %v7166_v39 = vrot.slane %v4296_v1, 11 }
 0x1ca   : > { %v3337_v52 = vpop.f32.mrf.mxu0  ;;  %2284 = vmatmul.bf16.gmra.mxu2 %v2136_v55  ;;  %v3395_v47 = vadd.f32 %v3334_v23, %v3017_v10  ;;  %v5390_v55 = vshrl.u32 %v5288_v12, 16  ;;  %v4303_v10 = vrot.slane %v4301_v24, 7 }
 0x1cb   : > { %v2961_v15 = vpop.f32.mrf.mxu3  ;;  %v5395_v17 = vrot.slane %v5393_v57, 5 }
 0x1cc   : > { %v9022_v25 = vadd.f32 %v8998_v5, %v3395_v47  ;;  %v7610_v5 = vld [vmem:[#allocation2 + $0x14] sm:$0xff]  ;;  %v4313_v47 = vshll.u32 %v4198_v59, 16  ;;  %v5392_v2 = vrot.slane %v5390_v55, 4 }
 0x1cd   : > { %3376 = vmatmul.bf16.gmra.mxu0 %v7553_v54  ;;  %v2245_v22 = vpop.f32.mrf.mxu2 }
 0x1ce   : > { %v2304_v23 = vadd.f32 %v2245_v22, %v8653_v3  ;;  %v5399_v3 = vshll.u32 %v5289_v46, 16  ;;  %v5798_v22 = vpack.c.b16 %v5767_v29, %v5766_v34  ;;  %v4306_v46 = vor.u32 %v4304_v44, %v4303_v10  ;;  %v5291_v34 = vld [vmem:[#allocation2 + $0x44] sm:$0xf]  ;;  %v4201_v44 = vld [vmem:[#allocation2 + $0x48] sm:$0xf] }
 0x1cf   : > { %v9033_v43 = vpop.f32.mrf.mxu1  ;;  %v4315_v37 = vor.u32 %v4313_v47, %v4312_v20  ;;  %v5396_v9 = vor.u32 %v5395_v17, %v5392_v2 }
 0x1d0   : > { %v3018_v51 = vadd.f32 %v2959_v63, %v2304_v23  ;;  %5140 = vmatmul.bf16.vlgmr.msra.gmra.mxu3 %v7578_v53  ;;  %v5401_v28 = vrot.slane %v5399_v3, 5  ;;  %v5290_v53 = vld [vmem:[#allocation2 + $0x3c] sm:$0x1]  ;;  %v4308_v23 = vrot.slane %v4303_v10, 4  ;;  %v4307_v41 = vsel %vm7974_vm3, %v7166_v39, %v4306_v46 }
 0x1d1   : > { %v5397_v57 = vrot.slane %v5396_v9, 4  ;;  %v4644_v29 = vunpack.c.l.b16 %v4307_v41 }
 0x1d2   : > { %v3339_v36 = vpop.f32.mrf.mxu0  ;;  %v3396_v6 = vadd.f32 %v3337_v52, %v3018_v51  ;;  %6439 = vmatmul.bf16.vlgmr.msra.gmra.mxu1 %v7610_v5  ;;  %v4674_v52 = vpack.c.b16 %v4643_v31, %v4642_v38  ;;  %v5406_v24 = vor.u32 %v5405_v35, %v5401_v28  ;;  %v7579_v51 = vld [vmem:[#allocation2 + $0x34] sm:$0xff]  ;;  %v4200_v38 = vld [vmem:[#allocation2 + $0x44] sm:$0xf]  ;;  %v4199_v35 = vld [vmem:[#allocation2 + $0x40] sm:$0x8] }
 0x1d3   : > { %v2964_v54 = vpop.f32.mrf.mxu3  ;;  %v4323_v2 = vshrl.u32 %v4200_v38, 16 }
 0x1d4   : > { %v9036_v63 = vadd.f32 %v9013_v49, %v3396_v6  ;;  %v5409_v49 = vshll.u32 %v5290_v53, 16  ;;  %v5292_v6 = vld [vmem:[#allocation2 + $0x48] sm:$0xf] }
 0x1d5   : > { %v2247_v33 = vpop.f32.mrf.mxu2  ;;  %v5423_v53 = vshll.u32 %v5292_v6, 16  ;;  %v4325_v9 = vrot.slane %v4323_v2, 7  ;;  %v5294_v2 = vld [vmem:[#allocation2 + $0x54] sm:$0xf] }
 0x1d6   : > { %v2305_v12 = vadd.f32 %v2247_v33, %v8669_v27  ;;  %v4316_v27 = vsel %vm7974_vm3, %v4308_v23, %v4315_v37  ;;  %v5411_v3 = vrot.slane %v5409_v49, 5  ;;  %v5417_v33 = vshll.u32 %v5291_v34, 16 }
 0x1d7   : > { %v9039_v42 = vpop.f32.mrf.mxu1  ;;  %v4645_v1 = vunpack.c.l.b16 %v4316_v27  ;;  %v5425_v41 = vrot.slane %v5423_v53, 5 }
 0x1d8   : > { %v3019_v59 = vadd.f32 %v2961_v15, %v2305_v12  ;;  %v5407_v15 = vrot.slane %v5406_v24, 4  ;;  %v5427_v12 = vshrl.u32 %v5292_v6, 16 }
 0x1d9   : > { %v4675_v39 = vpack.c.b16 %v4645_v1, %v4644_v29 }
 0x1da   : > { %v3342_v5 = vpop.f32.mrf.mxu0  ;;  %4762 = vmatmul.bf16.vlgmr.msra.gmra.mxu2 %v4674_v52  ;;  %v3397_v16 = vadd.f32 %v3339_v36, %v3019_v59  ;;  %v7611_v36 = vld [vmem:[#allocation2 + $0x24] sm:$0xff]  ;;  %v5412_v47 = vsel %vm8306_vm6, %v5407_v15, %v5411_v3  ;;  %v4318_v59 = vshrl.u32 %v4199_v35, 16  ;;  %v5429_v27 = vrot.slane %v5427_v12, 4  ;;  %v5293_v3 = vld [vmem:[#allocation2 + $0x4c] sm:$0x1] }
 0x1db   : > { %v2966_v62 = vpop.f32.mrf.mxu3  ;;  %v5769_v37 = vunpack.c.l.b16 %v5412_v47  ;;  %v4335_v15 = vshll.u32 %v4201_v44, 16  ;;  %v5433_v6 = vshll.u32 %v5293_v3, 16  ;;  %v5295_v35 = vld [vmem:[#allocation2 + $0x58] sm:$0xf] }
 0x1dc   : > { %v9046_v55 = vadd.f32 %v9019_v8, %v3397_v16  ;;  %v5402_v8 = vsel %vm8306_vm6, %v5397_v57, %v5401_v28  ;;  %v5419_v16 = vrot.slane %v5417_v33, 5 }
 0x1dd   : > { %5886 = vmatmul.bf16.vlgmr.msra.gmra.mxu0 %v5798_v22  ;;  %v2250_v26 = vpop.f32.mrf.mxu2  ;;  %v4332_v22 = vshrl.u32 %v4201_v44, 16  ;;  %v5768_v46 = vunpack.c.l.b16 %v5402_v8  ;;  %v7580_v44 = vld [vmem:[#allocation2 + $0x44] sm:$0xff]  ;;  %v5435_v53 = vrot.slane %v5433_v6, 5 }
 0x1de   : > { %v2306_v31 = vadd.f32 %v2250_v26, %v8288_v19  ;;  %v5414_v19 = vshrl.u32 %v5291_v34, 16  ;;  %v5430_v34 = vor.u32 %v5429_v27, %v5425_v41 }
 0x1df   : > { %v9049_v10 = vpop.f32.mrf.mxu1  ;;  %v4334_v57 = vrot.slane %v4332_v22, 7  ;;  %v5799_v26 = vpack.c.b16 %v5769_v37, %v5768_v46  ;;  %v4203_v22 = vld [vmem:[#allocation2 + $0x54] sm:$0xf]  ;;  %v5438_v46 = vshrl.u32 %v5294_v2, 16  ;;  %v5441_v37 = vshll.u32 %v5294_v2, 16 }
 0x1e0   : > { %v3020_v20 = vadd.f32 %v2964_v54, %v2306_v31  ;;  %5145 = vmatmul.bf16.gmra.mxu3 %v7579_v51  ;;  %v1558_v54 = vadd.f32 %v8348_v18, %v8372_v7  ;;  %v5416_v49 = vrot.slane %v5414_v19, 4  ;;  %v4326_v51 = vshll.u32 %v4200_v38, 16 }
 0x1e1   : > { %v4337_v8 = vor.u32 %v4335_v15, %v4334_v57  ;;  %v5431_v33 = vrot.slane %v5430_v34, 4  ;;  %v4202_v57 = vld [vmem:[#allocation2 + $0x50] sm:$0x8]  ;;  %v4345_v15 = vshrl.u32 %v4203_v22, 16  ;;  %v4348_v2 = vshll.u32 %v4203_v22, 16 }
 0x1e2   : > { %v3344_v17 = vpop.f32.mrf.mxu0  ;;  %v3398_v52 = vadd.f32 %v3342_v5, %v3020_v20  ;;  %6444 = vmatmul.bf16.gmra.mxu1 %v7611_v36  ;;  %v5420_v36 = vor.u32 %v5419_v16, %v5416_v49  ;;  %v4328_v1 = vor.u32 %v4326_v51, %v4325_v9  ;;  %v4330_v20 = vrot.slane %v4325_v9, 4 }
 0x1e3   : > { %v2969_v23 = vpop.f32.mrf.mxu3  ;;  %v5451_v9 = vshrl.u32 %v5295_v35, 16 }
 0x1e4   : > { %v9058_v28 = vadd.f32 %v9033_v43, %v3398_v52  ;;  %v7167_v43 = vrot.slane %v4318_v59, 11  ;;  %v5421_v19 = vrot.slane %v5420_v36, 4  ;;  %v4338_v52 = vsel %vm7974_vm3, %v4330_v20, %v4337_v8 }
 0x1e5   : > { %v2252_v24 = vpop.f32.mrf.mxu2  ;;  %v5447_v59 = vshll.u32 %v5295_v35, 16  ;;  %v4340_v8 = vshrl.u32 %v4202_v57, 16 }
 0x1e6   : > { %v2307_v5 = vadd.f32 %v2252_v24, %v1558_v54  ;;  %v7612_v54 = vld [vmem:[#allocation2 + $0x34] sm:$0xff]  ;;  %v5426_v27 = vsel %vm8306_vm6, %v5421_v19, %v5425_v41 }
 0x1e7   : > { %v9060_v18 = vpop.f32.mrf.mxu1  ;;  %v5449_v36 = vrot.slane %v5447_v59, 5  ;;  %v5770_v6 = vunpack.c.l.b16 %v5426_v27  ;;  %v5297_v27 = vld [vmem:[#allocation2 + $0x64] sm:$0xf] }
 0x1e8   : > { %v3021_v7 = vadd.f32 %v2966_v62, %v2307_v5  ;;  %v5436_v5 = vsel %vm8306_vm6, %v5431_v33, %v5435_v53 }
 0x1ea   : > { %v3347_v31 = vpop.f32.mrf.mxu0  ;;  %4767 = vmatmul.bf16.gmra.mxu2 %v4675_v39  ;;  %v3399_v29 = vadd.f32 %v3344_v17, %v3021_v7  ;;  %v4329_v17 = vsel %vm7974_vm3, %v7167_v43, %v4328_v1  ;;  %v4204_v39 = vld [vmem:[#allocation2 + $0x58] sm:$0xf]  ;;  %v5443_v43 = vrot.slane %v5441_v37, 5  ;;  %v5296_v1 = vld [vmem:[#allocation2 + $0x5c] sm:$0x1] }
 0x1eb   : > { %v2971_v47 = vpop.f32.mrf.mxu3  ;;  %v4646_v16 = vunpack.c.l.b16 %v4329_v17  ;;  %v4354_v3 = vshrl.u32 %v4204_v39, 16 }
 0x1ec   : > { %v9063_v38 = vadd.f32 %v9039_v42, %v3399_v29  ;;  %v5771_v29 = vunpack.c.l.b16 %v5436_v5 }
 0x1ed   : > { %5891 = vmatmul.bf16.gmra.mxu0 %v5799_v26  ;;  %v2255_v62 = vpop.f32.mrf.mxu2  ;;  %v5440_v26 = vrot.slane %v5438_v46, 4  ;;  %v4356_v35 = vrot.slane %v4354_v3, 7  ;;  %v7168_v46 = vrot.slane %v4340_v8, 11 }
 0x1ee   : > { %v2308_v12 = vadd.f32 %v2255_v62, %v8396_v0  ;;  %v4647_v0 = vunpack.c.l.b16 %v4338_v52  ;;  %v4357_v62 = vshll.u32 %v4204_v39, 16 }
 0x1ef   : > { %v9070_v42 = vpop.f32.mrf.mxu1  ;;  %v5444_v33 = vor.u32 %v5443_v43, %v5440_v26 }
 0x1f0   : > { %v3022_v24 = vadd.f32 %v2969_v23, %v2308_v12  ;;  %5150 = vmatmul.bf16.gmra.mxu3 %v7580_v44  ;;  %v5453_v23 = vrot.slane %v5451_v9, 4  ;;  %v4676_v20 = vpack.c.b16 %v4647_v0, %v4646_v16  ;;  %v4347_v44 = vrot.slane %v4345_v15, 7  ;;  %v7581_v0 = vld [vmem:[#allocation2 + $0x54] sm:$0xff]  ;;  %v7613_v15 = vld [vmem:[#allocation2 + $0x44] sm:$0xff] }
 0x1f1   : > { %v5457_v12 = vshll.u32 %v5296_v1, 16  ;;  %v4207_v1 = vld [vmem:[#allocation2 + $0x68] sm:$0xf] }
 0x1f2   : > { %v3349_v49 = vpop.f32.mrf.mxu0  ;;  %v3400_v51 = vadd.f32 %v3347_v31, %v3022_v24  ;;  %6449 = vmatmul.bf16.gmra.mxu1 %v7612_v54  ;;  %v5454_v53 = vor.u32 %v5453_v23, %v5449_v36  ;;  %v4350_v37 = vor.u32 %v4348_v2, %v4347_v44  ;;  %v4352_v59 = vrot.slane %v4347_v44, 4  ;;  %v4206_v23 = vld [vmem:[#allocation2 + $0x64] sm:$0xf] }
 0x1f3   : > { %v2974_v7 = vpop.f32.mrf.mxu3  ;;  %v4359_v24 = vor.u32 %v4357_v62, %v4356_v35  ;;  %v5459_v22 = vrot.slane %v5457_v12, 5  ;;  %v4367_v12 = vshrl.u32 %v4206_v23, 16 }
 0x1f4   : > { %v9077_v34 = vadd.f32 %v9049_v10, %v3400_v51  ;;  %v5800_v10 = vpack.c.b16 %v5771_v29, %v5770_v6  ;;  %v5455_v16 = vrot.slane %v5454_v53, 4  ;;  %v9448_v51 = vld [vmem:[#allocation4_spill] sm:$0xff]  ;;  %v5462_v6 = vshrl.u32 %v5297_v27, 16 }
 0x1f5   : > { %v2257_v41 = vpop.f32.mrf.mxu2  ;;  %v4360_v3 = vsel %vm7974_vm3, %v4352_v59, %v4359_v24  ;;  %v4205_v53 = vld [vmem:[#allocation2 + $0x60] sm:$0x8]  ;;  %v5299_v24 = vld [vmem:[#allocation2 + $0x6c] sm:$0x1] }
 0x1f6   : > { %v2309_v31 = vadd.f32 %v2257_v41, %v8425_v48  ;;  %v5445_v48 = vrot.slane %v5444_v33, 4  ;;  %v5465_v41 = vshll.u32 %v5297_v27, 16  ;;  %v4649_v35 = vunpack.c.l.b16 %v4360_v3 }
 0x1f7   : > { %v9080_v19 = vpop.f32.mrf.mxu1  ;;  %v4369_v27 = vrot.slane %v4367_v12, 7  ;;  %v5481_v3 = vshll.u32 %v5299_v24, 16  ;;  %v7614_v12 = vld [vmem:[#allocation2 + $0x54] sm:$0xff] }
 0x1f8   : > { %v3023_v17 = vadd.f32 %v2971_v47, %v2309_v31  ;;  %v5298_v47 = vld [vmem:[#allocation2 + $0x68] sm:$0xf]  ;;  %v5450_v26 = vsel %vm8306_vm6, %v5445_v48, %v5449_v36 }
 0x1f9   : > { %v5475_v8 = vshrl.u32 %v5298_v47, 16  ;;  %v5772_v62 = vunpack.c.l.b16 %v5450_v26  ;;  %v9449_v48 = vld [vmem:[#allocation5_spill] sm:$0xff] }
 0x1fa   : > { %v3352_v52 = vpop.f32.mrf.mxu0  ;;  %4772 = vmatmul.bf16.gmra.mxu2 %v4676_v20  ;;  %v3401_v54 = vadd.f32 %v3349_v49, %v3023_v17  ;;  %v4351_v49 = vsel %vm7974_vm3, %v7168_v46, %v4350_v37  ;;  %v5471_v20 = vshll.u32 %v5298_v47, 16  ;;  %v4376_v17 = vshrl.u32 %v4207_v1, 16 }
 0x1fb   : > { %v2976_v9 = vpop.f32.mrf.mxu3  ;;  %v4648_v44 = vunpack.c.l.b16 %v4351_v49  ;;  %v5477_v37 = vrot.slane %v5475_v8, 4 }
 0x1fc   : > { %v9083_v39 = vadd.f32 %v9060_v18, %v3401_v54  ;;  %v5460_v18 = vsel %vm8306_vm6, %v5455_v16, %v5459_v22  ;;  %v5473_v46 = vrot.slane %v5471_v20, 5  ;;  %v4378_v47 = vrot.slane %v4376_v17, 7  ;;  %v5300_v17 = vld [vmem:[#allocation2 + $0x74] sm:$0xf] }
 0x1fd   : > { %5896 = vmatmul.bf16.gmra.mxu0 %v5800_v10  ;;  %v2260_v5 = vpop.f32.mrf.mxu2  ;;  %v5773_v33 = vunpack.c.l.b16 %v5460_v18  ;;  %v5464_v10 = vrot.slane %v5462_v6, 4  ;;  %v4374_v20 = vrot.slane %v4369_v27, 4 }
 0x1fe   : > { %v2310_v57 = vadd.f32 %v2260_v5, %v9448_v51  ;;  %v4370_v5 = vshll.u32 %v4206_v23, 16  ;;  %v4379_v51 = vshll.u32 %v4207_v1, 16  ;;  %v7582_v23 = vld [vmem:[#allocation2 + $0x64] sm:$0xff] }
 0x1ff   : > { %v9094_v43 = vpop.f32.mrf.mxu1  ;;  %v5801_v22 = vpack.c.b16 %v5773_v33, %v5772_v62  ;;  %v4209_v62 = vld [vmem:[#allocation2 + $0x74] sm:$0xf] }
 0x200   : > { %v3024_v29 = vadd.f32 %v2974_v7, %v2310_v57  ;;  %5155 = vmatmul.bf16.gmra.mxu3 %v7581_v0  ;;  %v5467_v7 = vrot.slane %v5465_v41, 5  ;;  %v4362_v0 = vshrl.u32 %v4205_v53, 16  ;;  %v4372_v41 = vor.u32 %v4370_v5, %v4369_v27  ;;  %v9450_v33 = vld [vmem:[#allocation6_spill] sm:$0xff] }
 0x201   : > { %v4381_v8 = vor.u32 %v4379_v51, %v4378_v47  ;;  %v5489_v27 = vshll.u32 %v5300_v17, 16 }
 0x202   : > { %v3354_v31 = vpop.f32.mrf.mxu0  ;;  %v3402_v2 = vadd.f32 %v3352_v52, %v3024_v29  ;;  %6454 = vmatmul.bf16.gmra.mxu1 %v7613_v15  ;;  %v4677_v52 = vpack.c.b16 %v4649_v35, %v4648_v44  ;;  %v5468_v15 = vor.u32 %v5467_v7, %v5464_v10  ;;  %v7169_v29 = vrot.slane %v4362_v0, 11 }
 0x203   : > { %v2979_v36 = vpop.f32.mrf.mxu3  ;;  %v5483_v35 = vrot.slane %v5481_v3, 5  ;;  %v4382_v7 = vsel %vm7974_vm3, %v4374_v20, %v4381_v8  ;;  %v5486_v0 = vshrl.u32 %v5300_v17, 16  ;;  %v4392_v20 = vshll.u32 %v4209_v62, 16 }
 0x204   : > { %v9097_v54 = vadd.f32 %v9070_v42, %v3402_v2  ;;  %v5478_v42 = vor.u32 %v5477_v37, %v5473_v46  ;;  %v5469_v1 = vrot.slane %v5468_v15, 4  ;;  %v4373_v10 = vsel %vm7974_vm3, %v7169_v29, %v4372_v41  ;;  %v4210_v37 = vld [vmem:[#allocation2 + $0x78] sm:$0xf] }
 0x205   : > { %v2262_v59 = vpop.f32.mrf.mxu2  ;;  %v4651_v15 = vunpack.c.l.b16 %v4382_v7  ;;  %v4401_v17 = vshll.u32 %v4210_v37, 16 }
 0x206   : > { %v2311_v16 = vadd.f32 %v2262_v59, %v9449_v48  ;;  %v5479_v2 = vrot.slane %v5478_v42, 4  ;;  %v5474_v24 = vsel %vm8306_vm6, %v5469_v1, %v5473_v46  ;;  %v4398_v42 = vshrl.u32 %v4210_v37, 16  ;;  %v7583_v37 = vld [vmem:[#allocation2 + $0x74] sm:$0xff] }
 0x207   : > { %v9100_v57 = vpop.f32.mrf.mxu1  ;;  %v5491_v1 = vrot.slane %v5489_v27, 5 }
 0x208   : > { %v3025_v49 = vadd.f32 %v2976_v9, %v2311_v16  ;;  %v5484_v48 = vsel %vm8306_vm6, %v5479_v2, %v5483_v35  ;;  %v4389_v16 = vshrl.u32 %v4209_v62, 16 }
 0x209   : > { %v5775_v3 = vunpack.c.l.b16 %v5484_v48 }
 0x20a   : > { %v3357_v26 = vpop.f32.mrf.mxu0  ;;  %4777 = vmatmul.bf16.gmra.mxu2 %v4677_v52  ;;  %v3403_v18 = vadd.f32 %v3354_v31, %v3025_v49  ;;  %v5301_v31 = vld [vmem:[#allocation2 + $0x78] sm:$0xf]  ;;  %v4650_v49 = vunpack.c.l.b16 %v4373_v10  ;;  %v4391_v41 = vrot.slane %v4389_v16, 7 }
 0x20b   : > { %v2981_v6 = vpop.f32.mrf.mxu3  ;;  %v5495_v5 = vshll.u32 %v5301_v31, 16  ;;  %v5499_v47 = vshrl.u32 %v5301_v31, 16 }
 0x20c   : > { %v9103_v44 = vadd.f32 %v9080_v19, %v3403_v18 }
 0x20d   : > { %5901 = vmatmul.bf16.gmra.mxu0 %v5801_v22  ;;  %v2265_v9 = vpop.f32.mrf.mxu2  ;;  %v4208_v22 = vld [vmem:[#allocation2 + $0x70] sm:$0x8]  ;;  %v5497_v2 = vrot.slane %v5495_v5, 5  ;;  %v5501_v35 = vrot.slane %v5499_v47, 4 }
 0x20e   : > { %v2312_v53 = vadd.f32 %v2265_v9, %v9450_v33  ;;  %v4384_v29 = vshrl.u32 %v4208_v22, 16  ;;  %v9451_v9 = vld [vmem:[#allocation7_spill] sm:$0xff]  ;;  %v4678_v33 = vpack.c.b16 %v4651_v15, %v4650_v49  ;;  %v5304_v49 = vld [vmem:[#allocation2 + $0x88] sm:$0xf] }
 0x20f   : > { %v9110_v19 = vpop.f32.mrf.mxu1  ;;  %v5502_v62 = vor.u32 %v5501_v35, %v5497_v2 }
 0x210   : > { %v3026_v59 = vadd.f32 %v2979_v36, %v2312_v53  ;;  %5160 = vmatmul.bf16.gmra.mxu3 %v7582_v23  ;;  %v5774_v36 = vunpack.c.l.b16 %v5474_v24  ;;  %v5488_v23 = vrot.slane %v5486_v0, 4  ;;  %v4400_v53 = vrot.slane %v4398_v42, 7 }
 0x211   : > { %v4394_v24 = vor.u32 %v4392_v20, %v4391_v41  ;;  %v4396_v0 = vrot.slane %v4391_v41, 4  ;;  %v4212_v41 = vld [vmem:[#allocation2 + $0x84] sm:$0xf] }
 0x212   : > { %v3359_v52 = vpop.f32.mrf.mxu0  ;;  %v3404_v51 = vadd.f32 %v3357_v26, %v3026_v59  ;;  %6459 = vmatmul.bf16.gmra.mxu1 %v7614_v12  ;;  %v5302_v12 = vld [vmem:[#allocation2 + $0x7c] sm:$0x1]  ;;  %v5802_v7 = vpack.c.b16 %v5775_v3, %v5774_v36  ;;  %v5492_v48 = vor.u32 %v5491_v1, %v5488_v23  ;;  %v4403_v27 = vor.u32 %v4401_v17, %v4400_v53  ;;  %v4213_v23 = vld [vmem:[#allocation2 + $0x88] sm:$0xf] }
 0x213   : > { %v2984_v18 = vpop.f32.mrf.mxu3  ;;  %v5505_v16 = vshll.u32 %v5302_v12, 16  ;;  %v5503_v36 = vrot.slane %v5502_v62, 4  ;;  %v4420_v62 = vshrl.u32 %v4213_v23, 16 }
 0x214   : > { %v9117_v46 = vadd.f32 %v9094_v43, %v3404_v51  ;;  %v7170_v43 = vrot.slane %v4384_v29, 11  ;;  %v5303_v51 = vld [vmem:[#allocation2 + $0x84] sm:$0xf]  ;;  %v5493_v42 = vrot.slane %v5492_v48, 4  ;;  %v4211_v48 = vld [vmem:[#allocation2 + $0x80] sm:$0x8] }
 0x215   : > { %v2267_v8 = vpop.f32.mrf.mxu2  ;;  %v5507_v3 = vrot.slane %v5505_v16, 5  ;;  %v9452_v29 = vld [vmem:[#allocation8_spill] sm:$0xff]  ;;  %v5510_v1 = vshrl.u32 %v5303_v51, 16  ;;  %v5513_v35 = vshll.u32 %v5303_v51, 16 }
 0x216   : > { %v2313_v26 = vadd.f32 %v2267_v8, %v9451_v9  ;;  %v4395_v15 = vsel %vm7974_vm3, %v7170_v43, %v4394_v24  ;;  %v7615_v8 = vld [vmem:[#allocation2 + $0x64] sm:$0xff]  ;;  %v5519_v9 = vshll.u32 %v5304_v49, 16  ;;  %v4411_v43 = vshrl.u32 %v4212_v41, 16 }
 0x217   : > { %v9120_v31 = vpop.f32.mrf.mxu1  ;;  %v4652_v53 = vunpack.c.l.b16 %v4395_v15 }
 0x218   : > { %v3027_v10 = vadd.f32 %v2981_v6, %v2313_v26  ;;  %v5523_v26 = vshrl.u32 %v5304_v49, 16 }
 0x21a   : > { %v3362_v59 = vpop.f32.mrf.mxu0  ;;  %4782 = vmatmul.bf16.gmra.mxu2 %v4678_v33  ;;  %v3405_v22 = vadd.f32 %v3359_v52, %v3027_v10  ;;  %v4404_v52 = vsel %vm7974_vm3, %v4396_v0, %v4403_v27  ;;  %v5498_v10 = vsel %vm8306_vm6, %v5493_v42, %v5497_v2  ;;  %v5515_v0 = vrot.slane %v5513_v35, 5 }
 0x21b   : > { %v2986_v5 = vpop.f32.mrf.mxu3  ;;  %v4653_v12 = vunpack.c.l.b16 %v4404_v52  ;;  %v5521_v27 = vrot.slane %v5519_v9, 5  ;;  %v5776_v51 = vunpack.c.l.b16 %v5498_v10  ;;  %v4406_v42 = vshrl.u32 %v4211_v48, 16 }
 0x21c   : > { %v9123_v47 = vadd.f32 %v9100_v57, %v3405_v22  ;;  %v5512_v22 = vrot.slane %v5510_v1, 4  ;;  %v4423_v52 = vshll.u32 %v4213_v23, 16 }
 0x21d   : > { %5906 = vmatmul.bf16.gmra.mxu0 %v5802_v7  ;;  %v2270_v6 = vpop.f32.mrf.mxu2  ;;  %v5508_v7 = vsel %vm8306_vm6, %v5503_v36, %v5507_v3  ;;  %v4679_v15 = vpack.c.b16 %v4653_v12, %v4652_v53  ;;  %v4413_v36 = vrot.slane %v4411_v43, 7  ;;  %v9453_v3 = vld [vmem:[#allocation9_spill] sm:$0xff]  ;;  %v7171_v10 = vrot.slane %v4406_v42, 11  ;;  %v5307_v42 = vld [vmem:[#allocation2 + $0x98] sm:$0xf] }
 0x21e   : > { %v2314_v20 = vadd.f32 %v2270_v6, %v9452_v29  ;;  %v5777_v49 = vunpack.c.l.b16 %v5508_v7  ;;  %v5305_v6 = vld [vmem:[#allocation2 + $0x8c] sm:$0x1]  ;;  %v4414_v29 = vshll.u32 %v4212_v41, 16  ;;  %v5516_v1 = vor.u32 %v5515_v0, %v5512_v22  ;;  %v4215_v22 = vld [vmem:[#allocation2 + $0x94] sm:$0xf] }
 0x21f   : > { %v9130_v57 = vpop.f32.mrf.mxu1  ;;  %v5529_v9 = vshll.u32 %v5305_v6, 16  ;;  %v4418_v53 = vrot.slane %v4413_v36, 4  ;;  %v4216_v0 = vld [vmem:[#allocation2 + $0x98] sm:$0xf] }
 0x220   : > { %v3028_v33 = vadd.f32 %v2984_v18, %v2314_v20  ;;  %5165 = vmatmul.bf16.gmra.mxu3 %v7583_v37  ;;  %v5525_v18 = vrot.slane %v5523_v26, 4  ;;  %v4422_v20 = vrot.slane %v4420_v62, 7  ;;  %v5517_v48 = vrot.slane %v5516_v1, 4  ;;  %v7584_v62 = vld [vmem:[#allocation2 + $0x84] sm:$0xff] }
 0x221   : > { %v5531_v41 = vrot.slane %v5529_v9, 5 }
 0x222   : > { %v3364_v17 = vpop.f32.mrf.mxu0  ;;  %v3406_v24 = vadd.f32 %v3362_v59, %v3028_v33  ;;  %6464 = vmatmul.bf16.gmra.mxu1 %v7615_v8  ;;  %v5526_v35 = vor.u32 %v5525_v18, %v5521_v27  ;;  %v4425_v12 = vor.u32 %v4423_v52, %v4422_v20  ;;  %v5306_v18 = vld [vmem:[#allocation2 + $0x94] sm:$0xf]  ;;  %v4214_v52 = vld [vmem:[#allocation2 + $0x90] sm:$0x8] }
 0x223   : > { %v2989_v16 = vpop.f32.mrf.mxu3  ;;  %v5534_v1 = vshrl.u32 %v5306_v18, 16 }
 0x224   : > { %v9137_v37 = vadd.f32 %v9110_v19, %v3406_v24  ;;  %v5803_v19 = vpack.c.b16 %v5777_v49, %v5776_v51  ;;  %v4416_v24 = vor.u32 %v4414_v29, %v4413_v36  ;;  %v9455_v51 = vld [vmem:[#allocation10_spill] sm:$0xff]  ;;  %v4426_v6 = vsel %vm7974_vm3, %v4418_v53, %v4425_v12 }
 0x225   : > { %v2272_v2 = vpop.f32.mrf.mxu2  ;;  %v4442_v29 = vshrl.u32 %v4216_v0, 16 }
 0x226   : > { %v2315_v59 = vadd.f32 %v2272_v2, %v9453_v3  ;;  %v5527_v2 = vrot.slane %v5526_v35, 4  ;;  %v5537_v35 = vshll.u32 %v5306_v18, 16 }
 0x227   : > { %v9140_v8 = vpop.f32.mrf.mxu1 }
 0x228   : > { %v3029_v26 = vadd.f32 %v2986_v5, %v2315_v59  ;;  %v5532_v36 = vsel %vm8306_vm6, %v5527_v2, %v5531_v41  ;;  %v4433_v59 = vshrl.u32 %v4215_v22, 16  ;;  %v4436_v41 = vshll.u32 %v4215_v22, 16 }
 0x229   : > { %v5539_v18 = vrot.slane %v5537_v35, 5 }
 0x22a   : > { %v3367_v33 = vpop.f32.mrf.mxu0  ;;  %4787 = vmatmul.bf16.gmra.mxu2 %v4679_v15  ;;  %v3407_v7 = vadd.f32 %v3364_v17, %v3029_v26  ;;  %v4417_v17 = vsel %vm7974_vm3, %v7171_v10, %v4416_v24  ;;  %v7616_v15 = vld [vmem:[#allocation2 + $0x74] sm:$0xff]  ;;  %v5547_v10 = vshrl.u32 %v5307_v42, 16  ;;  %v4655_v24 = vunpack.c.l.b16 %v4426_v6 }
 0x22b   : > { %v2991_v43 = vpop.f32.mrf.mxu3  ;;  %v4654_v26 = vunpack.c.l.b16 %v4417_v17  ;;  %v4435_v2 = vrot.slane %v4433_v59, 7 }
 0x22c   : > { %v9143_v23 = vadd.f32 %v9120_v31, %v3407_v7  ;;  %v5522_v31 = vsel %vm8306_vm6, %v5517_v48, %v5521_v27  ;;  %v5779_v27 = vunpack.c.l.b16 %v5532_v36  ;;  %v4428_v48 = vshrl.u32 %v4214_v52, 16 }
 0x22d   : > { %5911 = vmatmul.bf16.gmra.mxu0 %v5803_v19  ;;  %v2275_v5 = vpop.f32.mrf.mxu2  ;;  %v5543_v19 = vshll.u32 %v5307_v42, 16  ;;  %v5778_v53 = vunpack.c.l.b16 %v5522_v31  ;;  %v9457_v42 = vld [vmem:[#allocation11_spill] sm:$0xff]  ;;  %v4680_v6 = vpack.c.b16 %v4655_v24, %v4654_v26  ;;  %v4440_v59 = vrot.slane %v4435_v2, 4 }
 0x22e   : > { %9454 = vst [vmem:[#allocation4_spill] sm:$0xff] %v9143_v23  ;;  %v2316_v49 = vadd.f32 %v2275_v5, %v9455_v51  ;;  %v4444_v5 = vrot.slane %v4442_v29, 7  ;;  %v5536_v51 = vrot.slane %v5534_v1, 4  ;;  %v5549_v23 = vrot.slane %v5547_v10, 4  ;;  %v5308_v31 = vld [vmem:[#allocation2 + $0x9c] sm:$0x1] }
 0x22f   : > { %v9154_v3 = vpop.f32.mrf.mxu1  ;;  %v5545_v17 = vrot.slane %v5543_v19, 5  ;;  %v5804_v36 = vpack.c.b16 %v5779_v27, %v5778_v53  ;;  %v5553_v1 = vshll.u32 %v5308_v31, 16  ;;  %v5309_v19 = vld [vmem:[#allocation2 + $0xa4] sm:$0xf]  ;;  %v7585_v53 = vld [vmem:[#allocation2 + $0x94] sm:$0xff] }
 0x230   : > { %v3030_v20 = vadd.f32 %v2989_v16, %v2316_v49  ;;  %5170 = vmatmul.bf16.gmra.mxu3 %v7584_v62  ;;  %v4445_v62 = vshll.u32 %v4216_v0, 16 }
 0x231   : > { %v5550_v0 = vor.u32 %v5549_v23, %v5545_v17 }
 0x232   : > { %v3369_v9 = vpop.f32.mrf.mxu0  ;;  %v3408_v7 = vadd.f32 %v3367_v33, %v3030_v20  ;;  %6469 = vmatmul.bf16.gmra.mxu1 %v7616_v15  ;;  %v7172_v15 = vrot.slane %v4428_v48, 11  ;;  %v4438_v20 = vor.u32 %v4436_v41, %v4435_v2  ;;  %v4447_v29 = vor.u32 %v4445_v62, %v4444_v5  ;;  %v4218_v41 = vld [vmem:[#allocation2 + $0xa4] sm:$0xf] }
 0x233   : > { %v2994_v12 = vpop.f32.mrf.mxu3  ;;  %v5551_v23 = vrot.slane %v5550_v0, 4  ;;  %v5555_v2 = vrot.slane %v5553_v1, 5  ;;  %v9459_v5 = vld [vmem:[#allocation12_spill] sm:$0xff] }
 0x234   : > { %v9157_v16 = vadd.f32 %v9130_v57, %v3408_v7  ;;  %v5540_v57 = vor.u32 %v5539_v18, %v5536_v51  ;;  %v4439_v24 = vsel %vm7974_vm3, %v7172_v15, %v4438_v20  ;;  %v4219_v51 = vld [vmem:[#allocation2 + $0xa8] sm:$0xf] }
 0x235   : > { %v2277_v49 = vpop.f32.mrf.mxu2  ;;  %v7617_v18 = vld [vmem:[#allocation2 + $0x84] sm:$0xff] }
 0x236   : > { %9456 = vst [vmem:[#allocation5_spill] sm:$0xff] %v9157_v16  ;;  %v2317_v33 = vadd.f32 %v2277_v49, %v9457_v42  ;;  %v5310_v16 = vld [vmem:[#allocation2 + $0xa8] sm:$0xf]  ;;  %v5541_v27 = vrot.slane %v5540_v57, 4  ;;  %v4464_v57 = vshrl.u32 %v4219_v51, 16 }
 0x237   : > { %v9160_v52 = vpop.f32.mrf.mxu1  ;;  %v5567_v49 = vshll.u32 %v5310_v16, 16  ;;  %v5571_v42 = vshrl.u32 %v5310_v16, 16 }
 0x238   : > { %v3031_v22 = vadd.f32 %v2991_v43, %v2317_v33  ;;  %v4448_v43 = vsel %vm7974_vm3, %v4440_v59, %v4447_v29  ;;  %v4656_v33 = vunpack.c.l.b16 %v4439_v24  ;;  %v5546_v15 = vsel %vm8306_vm6, %v5541_v27, %v5545_v17  ;;  %v4217_v59 = vld [vmem:[#allocation2 + $0xa0] sm:$0x8] }
 0x239   : > { %v4455_v29 = vshrl.u32 %v4218_v41, 16  ;;  %v5780_v17 = vunpack.c.l.b16 %v5546_v15 }
 0x23a   : > { %v3372_v7 = vpop.f32.mrf.mxu0  ;;  %4792 = vmatmul.bf16.gmra.mxu2 %v4680_v6  ;;  %v3409_v35 = vadd.f32 %v3369_v9, %v3031_v22  ;;  %v5558_v9 = vshrl.u32 %v5309_v19, 16  ;;  %v4657_v6 = vunpack.c.l.b16 %v4448_v43  ;;  %v5556_v22 = vsel %vm8306_vm6, %v5551_v23, %v5555_v2 }
 0x23b   : > { %v2996_v10 = vpop.f32.mrf.mxu3  ;;  %v5781_v27 = vunpack.c.l.b16 %v5556_v22  ;;  %v4457_v23 = vrot.slane %v4455_v29, 7  ;;  %v4458_v2 = vshll.u32 %v4218_v41, 16 }
 0x23c   : > { %v9163_v26 = vadd.f32 %v9140_v8, %v3409_v35  ;;  %v5561_v8 = vshll.u32 %v5309_v19, 16  ;;  %v5560_v0 = vrot.slane %v5558_v9, 4  ;;  %v5569_v35 = vrot.slane %v5567_v49, 5  ;;  %v9461_v9 = vld [vmem:[#allocation13_spill] sm:$0xff] }
 0x23d   : > { %5916 = vmatmul.bf16.gmra.mxu0 %v5804_v36  ;;  %v2280_v48 = vpop.f32.mrf.mxu2  ;;  %v5573_v19 = vrot.slane %v5571_v42, 4  ;;  %v4681_v24 = vpack.c.b16 %v4657_v6, %v4656_v33  ;;  %v5805_v6 = vpack.c.b16 %v5781_v27, %v5780_v17  ;;  %v4462_v15 = vrot.slane %v4457_v23, 4  ;;  %v9463_v17 = vld [vmem:[#allocation14_spill] sm:$0xff] }
 0x23e   : > { %9458 = vst [vmem:[#allocation6_spill] sm:$0xff] %v9163_v26  ;;  %v2318_v62 = vadd.f32 %v2280_v48, %v9459_v5  ;;  %v5563_v16 = vrot.slane %v5561_v8, 5  ;;  %v4450_v48 = vshrl.u32 %v4217_v59, 16  ;;  %v4467_v26 = vshll.u32 %v4219_v51, 16 }
 0x23f   : > { %v9170_v31 = vpop.f32.mrf.mxu1  ;;  %v5574_v8 = vor.u32 %v5573_v19, %v5569_v35 }
 0x240   : > { %v3032_v36 = vadd.f32 %v2994_v12, %v2318_v62  ;;  %5175 = vmatmul.bf16.gmra.mxu3 %v7585_v53  ;;  %v5311_v12 = vld [vmem:[#allocation2 + $0xac] sm:$0x1]  ;;  %v4466_v62 = vrot.slane %v4464_v57, 7 }
 0x241   : > { %v5577_v49 = vshll.u32 %v5311_v12, 16  ;;  %v5575_v41 = vrot.slane %v5574_v8, 4  ;;  %v5313_v12 = vld [vmem:[#allocation2 + $0xb8] sm:$0xf] }
 0x242   : > { %v3374_v20 = vpop.f32.mrf.mxu0  ;;  %v3410_v1 = vadd.f32 %v3372_v7, %v3032_v36  ;;  %6474 = vmatmul.bf16.gmra.mxu1 %v7617_v18  ;;  %v5564_v18 = vor.u32 %v5563_v16, %v5560_v0  ;;  %v4469_v22 = vor.u32 %v4467_v26, %v4466_v62  ;;  %v7586_v0 = vld [vmem:[#allocation2 + $0xa4] sm:$0xff]  ;;  %v5312_v16 = vld [vmem:[#allocation2 + $0xb4] sm:$0xf]  ;;  %v5595_v8 = vshrl.u32 %v5313_v12, 16 }
 0x243   : > { %v2999_v43 = vpop.f32.mrf.mxu3  ;;  %v5579_v57 = vrot.slane %v5577_v49, 5  ;;  %v5585_v62 = vshll.u32 %v5312_v16, 16 }
 0x244   : > { %v9177_v53 = vadd.f32 %v9154_v3, %v3410_v1  ;;  %v7173_v3 = vrot.slane %v4450_v48, 11  ;;  %v4460_v1 = vor.u32 %v4458_v2, %v4457_v23  ;;  %v5565_v29 = vrot.slane %v5564_v18, 4  ;;  %v4221_v23 = vld [vmem:[#allocation2 + $0xb4] sm:$0xf] }
 0x245   : > { %v2282_v5 = vpop.f32.mrf.mxu2  ;;  %v4470_v26 = vsel %vm7974_vm3, %v4462_v15, %v4469_v22  ;;  %v5582_v2 = vshrl.u32 %v5312_v16, 16  ;;  %v5591_v18 = vshll.u32 %v5313_v12, 16  ;;  %v4477_v22 = vshrl.u32 %v4221_v23, 16 }
 0x246   : > { %9460 = vst [vmem:[#allocation7_spill] sm:$0xff] %v9177_v53  ;;  %v2319_v7 = vadd.f32 %v2282_v5, %v9461_v9 }
 0x247   : > { %v9180_v42 = vpop.f32.mrf.mxu1  ;;  %v9204_v16 = vrot.slane %v5591_v18, 5 }
 0x248   : > { %v3033_v33 = vadd.f32 %v2996_v10, %v2319_v7  ;;  %v4461_v10 = vsel %vm7974_vm3, %v7173_v3, %v4460_v1  ;;  %v4222_v7 = vld [vmem:[#allocation2 + $0xb8] sm:$0xf] }
 0x24a   : > { %v3377_v36 = vpop.f32.mrf.mxu0  ;;  %4797 = vmatmul.bf16.gmra.mxu2 %v4681_v24  ;;  %v3411_v59 = vadd.f32 %v3374_v20, %v3033_v33  ;;  %v5570_v20 = vsel %vm8306_vm6, %v5565_v29, %v5569_v35  ;;  %v7618_v24 = vld [vmem:[#allocation2 + $0x94] sm:$0xff]  ;;  %v4658_v33 = vunpack.c.l.b16 %v4461_v10  ;;  %v9197_v35 = vld [vmem:[%s9425_s3] ss:$0 sm:$0xff]  ;;  %v4486_v29 = vshrl.u32 %v4222_v7, 16 }
 0x24b   : > { %v3001_v51 = vpop.f32.mrf.mxu3  ;;  %v5782_v3 = vunpack.c.l.b16 %v5570_v20 }
 0x24c   : > { %v9183_v5 = vadd.f32 %v9160_v52, %v3411_v59  ;;  %v5580_v52 = vsel %vm8306_vm6, %v5575_v41, %v5579_v57  ;;  %v5584_v41 = vrot.slane %v5582_v2, 4  ;;  %v5587_v57 = vrot.slane %v5585_v62, 5 }
 0x24d   : > { %5921 = vmatmul.bf16.gmra.mxu0 %v5805_v6  ;;  %v2285_v19 = vpop.f32.mrf.mxu2  ;;  %v4659_v6 = vunpack.c.l.b16 %v4470_v26  ;;  %v5783_v1 = vunpack.c.l.b16 %v5580_v52  ;;  %v4480_v2 = vshll.u32 %v4221_v23, 16  ;;  %v4488_v62 = vrot.slane %v4486_v29, 7 }
 0x24e   : > { %9462 = vst [vmem:[#allocation8_spill] sm:$0xff] %v9183_v5  ;;  %v2320_v27 = vadd.f32 %v2285_v19, %v9463_v17  ;;  %v5314_v17 = vld [vmem:[#allocation2 + $0xbc] sm:$0x1] }
 0x24f   : > { %v6440_v48 = vpop.f32.mrf.mxu1  ;;  %v4682_v10 = vpack.c.b16 %v4659_v6, %v4658_v33  ;;  %v5806_v12 = vpack.c.b16 %v5783_v1, %v5782_v3 }
 0x250   : > { %v3034_v9 = vadd.f32 %v2999_v43, %v2320_v27  ;;  %5180 = vmatmul.bf16.gmra.mxu3 %v7586_v0  ;;  %v4220_v43 = vld [vmem:[#allocation2 + $0xb0] sm:$0x8]  ;;  %v9465_v27 = vld [vmem:[#allocation15_spill] sm:$0xff]  ;;  %v6441_v20 = vadd.f32 %v9197_v35, %v6440_v48 }
 0x251   : > { %v4472_v52 = vshrl.u32 %v4220_v43, 16  ;;  %v4224_v43 = vld [vmem:[#allocation2 + $0xc4] sm:$0xf] }
 0x252   : > { %v3379_v49 = vpop.f32.mrf.mxu0  ;;  %v3412_v15 = vadd.f32 %v3377_v36, %v3034_v9  ;;  %6479 = vmatmul.bf16.gmra.mxu1 %v7618_v24  ;;  %v5597_v36 = vrot.slane %v5595_v8, 4  ;;  %v4479_v24 = vrot.slane %v4477_v22, 7  ;;  %v4489_v9 = vshll.u32 %v4222_v7, 16 }
 0x253   : > { %v9199_v59 = vpop.f32.mrf.mxu3  ;;  %v7174_v3 = vrot.slane %v4472_v52, 11  ;;  %v9467_v52 = vld [vmem:[#allocation16_spill] sm:$0xff] }
 0x254   : > { %v9202_v0 = vadd.f32 %v9170_v31, %v3412_v15  ;;  %v5588_v31 = vor.u32 %v5587_v57, %v5584_v41  ;;  %v5598_v8 = vor.u32 %v5597_v36, %v9204_v16  ;;  %v4484_v1 = vrot.slane %v4479_v24, 4  ;;  %v7587_v41 = vld [vmem:[#allocation2 + $0xb4] sm:$0xff] }
 0x255   : > { %v2287_v19 = vpop.f32.mrf.mxu2  ;;  %v4491_v22 = vor.u32 %v4489_v9, %v4488_v62  ;;  %v4223_v62 = vld [vmem:[#allocation2 + $0xc0] sm:$0x8] }
 0x256   : > { %9464 = vst [vmem:[#allocation9_spill] sm:$0xff] %v9202_v0  ;;  %v2321_v26 = vadd.f32 %v2287_v19, %v9465_v27  ;;  %v5601_v0 = vshll.u32 %v5314_v17, 16  ;;  %v5589_v57 = vrot.slane %v5588_v31, 4  ;;  %v5599_v36 = vrot.slane %v5598_v8, 4  ;;  %v4225_v17 = vld [vmem:[#allocation2 + $0xc8] sm:$0xf] }
 0x257   : > { %v6442_v15 = vpop.f32.mrf.mxu1  ;;  %v4508_v9 = vshrl.u32 %v4225_v17, 16 }
 0x258   : > { %v3035_v18 = vadd.f32 %v3001_v51, %v2321_v26  ;;  %v6443_v33 = vadd.f32 %v9197_v35, %v6442_v15  ;;  %v4482_v51 = vor.u32 %v4480_v2, %v4479_v24  ;;  %v5603_v19 = vrot.slane %v5601_v0, 5  ;;  %v5315_v26 = vld [vmem:[#allocation2 + $0xc4] sm:$0xf] }
 0x259   : > { %v5594_v0 = vsel %vm8306_vm6, %v5589_v57, %v9204_v16  ;;  %v5609_v8 = vshll.u32 %v5315_v26, 16 }
 0x25a   : > { %v5887_v6 = vpop.f32.mrf.mxu0  ;;  %4802 = vmatmul.bf16.gmra.mxu2 %v4682_v10  ;;  %v3413_v48 = vadd.f32 %v3379_v49, %v3035_v18  ;;  %v7717_v23 = vpack.c.bf16 %v6443_v33, %v6441_v20  ;;  %v4499_v10 = vshrl.u32 %v4224_v43, 16  ;;  %v7619_v49 = vld [vmem:[#allocation2 + $0xa4] sm:$0xff]  ;;  %v4483_v24 = vsel %vm7974_vm3, %v7174_v3, %v4482_v51 }
 0x25b   : > { %v5143_v7 = vpop.f32.mrf.mxu3  ;;  %v5316_v20 = vld [vmem:[#allocation2 + $0xc8] sm:$0xf]  ;;  %v5604_v31 = vsel %vm8306_vm6, %v5599_v36, %v5603_v19  ;;  %v5606_v18 = vshrl.u32 %v5315_v26, 16  ;;  %v4494_v51 = vshrl.u32 %v4223_v62, 16  ;;  %v5784_v16 = vunpack.c.l.b16 %v5594_v0 }
 0x25c   : > { %v9219_v29 = vadd.f32 %v9180_v42, %v3413_v48  ;;  %7718 = vst [vmem:[%s9216_s10] sm:$0xff] %v7717_v23   ;;  %v4492_v42 = vsel %vm7974_vm3, %v4484_v1, %v4491_v22  ;;  %v5615_v33 = vshll.u32 %v5316_v20, 16  ;;  %v5619_v48 = vshrl.u32 %v5316_v20, 16 }
 0x25d   : > { %5926 = vmatmul.bf16.gmra.mxu0 %v5806_v12  ;;  %v4763_v27 = vpop.f32.mrf.mxu2  ;;  %v4660_v23 = vunpack.c.l.b16 %v4483_v24  ;;  %v4661_v3 = vunpack.c.l.b16 %v4492_v42  ;;  %v4501_v1 = vrot.slane %v4499_v10, 7  ;;  %v5785_v57 = vunpack.c.l.b16 %v5604_v31  ;;  %v5317_v42 = vld [vmem:[#allocation2 + $0xcc] sm:$0x1] }
 0x25e   : > { %9466 = vst [vmem:[#allocation10_spill] sm:$0xff] %v9219_v29  ;;  %v4843_v2 = vadd.f32 %v4763_v27, %v9467_v52  ;;  %v4502_v27 = vshll.u32 %v4224_v43, 16  ;;  %v4510_v52 = vrot.slane %v4508_v9, 7  ;;  %v4511_v29 = vshll.u32 %v4225_v17, 16 }
 0x25f   : > { %v6445_v12 = vpop.f32.mrf.mxu1  ;;  %v5608_v36 = vrot.slane %v5606_v18, 4  ;;  %v5611_v19 = vrot.slane %v5609_v8, 5  ;;  %v9233_v53 = vrot.slane %v5615_v33, 5  ;;  %v5621_v26 = vrot.slane %v5619_v48, 4 }
 0x260   : > { %5185 = vmatmul.bf16.gmra.mxu3 %v7587_v41  ;;  %v5221_v22 = vadd.f32 %v9199_v59, %v4843_v2  ;;  %v4683_v24 = vpack.c.b16 %v4661_v3, %v4660_v23  ;;  %v6446_v10 = vadd.f32 %v9197_v35, %v6445_v12  ;;  %v4504_v43 = vor.u32 %v4502_v27, %v4501_v1 }
 0x261   : > { %v4506_v2 = vrot.slane %v4501_v1, 4  ;;  %v4513_v17 = vor.u32 %v4511_v29, %v4510_v52  ;;  %v5807_v0 = vpack.c.b16 %v5785_v57, %v5784_v16  ;;  %v5612_v8 = vor.u32 %v5611_v19, %v5608_v36  ;;  %v5318_v1 = vld [vmem:[#allocation2 + $0xd4] sm:$0xf] }
 0x262   : > { %v5889_v15 = vpop.f32.mrf.mxu0  ;;  %6484 = vmatmul.bf16.gmra.mxu1 %v7619_v49  ;;  %v7175_v49 = vrot.slane %v4494_v51, 11  ;;  %v5967_v59 = vadd.f32 %v5887_v6, %v5221_v22  ;;  %v7588_v51 = vld [vmem:[#allocation2 + $0xc4] sm:$0xff]  ;;  %v5319_v22 = vld [vmem:[#allocation2 + $0xd8] sm:$0xf] }
 0x263   : > { %v5146_v41 = vpop.f32.mrf.mxu3  ;;  %v4514_v29 = vsel %vm7974_vm3, %v4506_v2, %v4513_v17  ;;  %v5613_v52 = vrot.slane %v5612_v8, 4  ;;  %v5639_v2 = vshll.u32 %v5319_v22, 16  ;;  %v5643_v17 = vshrl.u32 %v5319_v22, 16 }
 0x264   : > { %v6165_v48 = vmul.f32 %v5967_v59, %v5967_v59 }
 0x265   : > { %v4765_v5 = vpop.f32.mrf.mxu2 }
 0x266   : > { %v4844_v20 = vadd.f32 %v4765_v5, %v8760_v58  ;;  %v5622_v58 = vor.u32 %v5621_v26, %v9233_v53  ;;  %v5625_v5 = vshll.u32 %v5317_v42, 16 }
 0x267   : > { %v6447_v62 = vpop.f32.mrf.mxu1 }
 0x268   : > { %v5222_v9 = vadd.f32 %v5143_v7, %v4844_v20  ;;  %v6448_v31 = vadd.f32 %v9197_v35, %v6447_v62  ;;  %v4505_v7 = vsel %vm7974_vm3, %v7175_v49, %v4504_v43  ;;  %v5623_v16 = vrot.slane %v5622_v58, 4  ;;  %v7620_v49 = vld [vmem:[#allocation2 + $0xb4] sm:$0xff] }
 0x269   : > { %v5627_v57 = vrot.slane %v5625_v5, 5  ;;  %v4662_v26 = vunpack.c.l.b16 %v4505_v7  ;;  %v4663_v20 = vunpack.c.l.b16 %v4514_v29  ;;  %v5633_v43 = vshll.u32 %v5318_v1, 16 }
 0x26a   : > { %v5892_v18 = vpop.f32.mrf.mxu0  ;;  %v5968_v33 = vadd.f32 %v5889_v15, %v5222_v9  ;;  %4807 = vmatmul.bf16.gmra.mxu2 %v4683_v24  ;;  %v7722_v12 = vpack.c.bf16 %v6448_v31, %v6446_v10  ;;  %v4227_v24 = vld [vmem:[#allocation2 + $0xd4] sm:$0xf]  ;;  %v4228_v10 = vld [vmem:[#allocation2 + $0xd8] sm:$0xf]  ;;  %v9258_v29 = vrot.slane %v5639_v2, 5 }
 0x26b   : > { %v5148_v6 = vpop.f32.mrf.mxu3  ;;  %v4521_v31 = vshrl.u32 %v4227_v24, 16  ;;  %v4530_v8 = vshrl.u32 %v4228_v10, 16  ;;  %v4684_v5 = vpack.c.b16 %v4663_v20, %v4662_v26  ;;  %v5635_v7 = vrot.slane %v5633_v43, 5 }
 0x26c   : > { %v7637_v23 = vpack.c.bf16 %v5968_v33, %v5967_v59  ;;  %v6127_v3 = vadd.f32 %v5968_v33, %v5967_v59  ;;  %v6166_v15 = vmul.f32 %v5968_v33, %v5968_v33  ;;  %7809 = vst [vmem:[%s9216_s10 + $0x8] sm:$0xff] %v7722_v12   ;;  %v5630_v59 = vshrl.u32 %v5318_v1, 16  ;;  %v4226_v33 = vld [vmem:[#allocation2 + $0xd0] sm:$0x8] }
 0x26d   : > { %5931 = vmatmul.bf16.gmra.mxu0 %v5807_v0  ;;  %v4768_v27 = vpop.f32.mrf.mxu2  ;;  %v5618_v0 = vsel %vm8306_vm6, %v5613_v52, %v9233_v53  ;;  %v5320_v53 = vld [vmem:[#allocation2 + $0xdc] sm:$0x1]  ;;  %v4523_v52 = vrot.slane %v4521_v31, 7  ;;  %v4533_v20 = vshll.u32 %v4228_v10, 16 }
 0x26e   : > { %7638 = vst [vmem:[%s9244_s13] sm:$0xff] %v7637_v23   ;;  %v6197_v36 = vadd.f32 %v6166_v15, %v6165_v48  ;;  %v4845_v19 = vadd.f32 %v4768_v27, %v8781_v60  ;;  %v5628_v60 = vsel %vm8306_vm6, %v5623_v16, %v5627_v57  ;;  %v5632_v48 = vrot.slane %v5630_v59, 4 }
 0x26f   : > { %v6450_v42 = vpop.f32.mrf.mxu1  ;;  %v5787_v1 = vunpack.c.l.b16 %v5628_v60  ;;  %v4516_v27 = vshrl.u32 %v4226_v33, 16  ;;  %v4524_v16 = vshll.u32 %v4227_v24, 16  ;;  %v4532_v57 = vrot.slane %v4530_v8, 7 }
 0x270   : > { %v5223_v62 = vadd.f32 %v5146_v41, %v4845_v19  ;;  %5190 = vmatmul.bf16.gmra.mxu3 %v7588_v51  ;;  %v5645_v41 = vrot.slane %v5643_v17, 4  ;;  %v5786_v51 = vunpack.c.l.b16 %v5618_v0  ;;  %v6451_v26 = vadd.f32 %v9197_v35, %v6450_v42 }
 0x271   : > { %v5649_v43 = vshll.u32 %v5320_v53, 16  ;;  %v7176_v60 = vrot.slane %v4516_v27, 11  ;;  %v4526_v24 = vor.u32 %v4524_v16, %v4523_v52 }
 0x272   : > { %v5894_v9 = vpop.f32.mrf.mxu0  ;;  %v5969_v58 = vadd.f32 %v5892_v18, %v5223_v62  ;;  %6489 = vmatmul.bf16.gmra.mxu1 %v7620_v49  ;;  %v5636_v49 = vor.u32 %v5635_v7, %v5632_v48  ;;  %v5646_v59 = vor.u32 %v5645_v41, %v9258_v29  ;;  %v5808_v17 = vpack.c.b16 %v5787_v1, %v5786_v51  ;;  %v4230_v51 = vld [vmem:[#allocation2 + $0xe4] sm:$0xf]  ;;  %v4231_v1 = vld [vmem:[#allocation2 + $0xe8] sm:$0xf] }
 0x273   : > { %v5151_v12 = vpop.f32.mrf.mxu3  ;;  %v5651_v48 = vrot.slane %v5649_v43, 5  ;;  %v4527_v27 = vsel %vm7974_vm3, %v7176_v60, %v4526_v24 }
 0x274   : > { %v6128_v23 = vadd.f32 %v6127_v3, %v5969_v58  ;;  %v6167_v15 = vmul.f32 %v5969_v58, %v5969_v58  ;;  %v5637_v8 = vrot.slane %v5636_v49, 4  ;;  %v5647_v33 = vrot.slane %v5646_v59, 4 }
 0x275   : > { %v4770_v22 = vpop.f32.mrf.mxu2 }
 0x276   : > { %v6198_v18 = vadd.f32 %v6197_v36, %v6167_v15  ;;  %v4846_v19 = vadd.f32 %v4770_v22, %v8803_v56  ;;  %v4528_v36 = vrot.slane %v4523_v52, 4  ;;  %v4535_v56 = vor.u32 %v4533_v20, %v4532_v57  ;;  %v7589_v15 = vld [vmem:[#allocation2 + $0xd4] sm:$0xff] }
 0x277   : > { %v6452_v3 = vpop.f32.mrf.mxu1  ;;  %v5642_v16 = vsel %vm8306_vm6, %v5637_v8, %v9258_v29  ;;  %v5652_v57 = vsel %vm8306_vm6, %v5647_v33, %v5651_v48  ;;  %v4552_v20 = vshrl.u32 %v4231_v1, 16  ;;  %v4555_v33 = vshll.u32 %v4231_v1, 16 }
 0x278   : > { %v5224_v2 = vadd.f32 %v5148_v6, %v4846_v19  ;;  %v6453_v62 = vadd.f32 %v9197_v35, %v6452_v3  ;;  %v4536_v52 = vsel %vm7974_vm3, %v4528_v36, %v4535_v56  ;;  %v4664_v3 = vunpack.c.l.b16 %v4527_v27 }
 0x279   : > { %v5788_v24 = vunpack.c.l.b16 %v5642_v16  ;;  %v4554_v8 = vrot.slane %v4552_v20, 7 }
 0x27a   : > { %v5897_v0 = vpop.f32.mrf.mxu0  ;;  %v5970_v31 = vadd.f32 %v5894_v9, %v5224_v2  ;;  %4812 = vmatmul.bf16.gmra.mxu2 %v4684_v5  ;;  %v7727_v42 = vpack.c.bf16 %v6453_v62, %v6451_v26  ;;  %v5321_v9 = vld [vmem:[#allocation2 + $0xe4] sm:$0xf]  ;;  %v4229_v26 = vld [vmem:[#allocation2 + $0xe0] sm:$0x8]  ;;  %v4665_v2 = vunpack.c.l.b16 %v4536_v52 }
 0x27b   : > { %v9264_v10 = vpop.f32.mrf.mxu3  ;;  %v5654_v49 = vshrl.u32 %v5321_v9, 16  ;;  %v5657_v59 = vshll.u32 %v5321_v9, 16  ;;  %v4538_v29 = vshrl.u32 %v4229_v26, 16 }
 0x27c   : > { %v7642_v7 = vpack.c.bf16 %v5970_v31, %v5969_v58  ;;  %v6129_v6 = vadd.f32 %v6128_v23, %v5970_v31  ;;  %v6168_v41 = vmul.f32 %v5970_v31, %v5970_v31  ;;  %7810 = vst [vmem:[%s9216_s10 + $0x10] sm:$0xff] %v7727_v42   ;;  %v7621_v58 = vld [vmem:[#allocation2 + $0xc4] sm:$0xff]  ;;  %v5789_v31 = vunpack.c.l.b16 %v5652_v57 }
 0x27d   : > { %5936 = vmatmul.bf16.gmra.mxu0 %v5808_v17  ;;  %v4773_v53 = vpop.f32.mrf.mxu2  ;;  %v5322_v23 = vld [vmem:[#allocation2 + $0xe8] sm:$0xf]  ;;  %v4546_v42 = vshll.u32 %v4230_v51, 16  ;;  %v4685_v27 = vpack.c.b16 %v4665_v2, %v4664_v3  ;;  %v4557_v57 = vor.u32 %v4555_v33, %v4554_v8  ;;  %v5324_v2 = vld [vmem:[#allocation2 + $0xf4] sm:$0xf] }
 0x27e   : > { %7794 = vst [vmem:[%s9244_s13 + $0x8] sm:$0xff] %v7642_v7   ;;  %v6199_v5 = vadd.f32 %v6198_v18, %v6168_v41  ;;  %v4847_v22 = vadd.f32 %v4773_v53, %v8831_v45  ;;  %v4543_v18 = vshrl.u32 %v4230_v51, 16  ;;  %v5663_v17 = vshll.u32 %v5322_v23, 16  ;;  %v4233_v33 = vld [vmem:[#allocation2 + $0xf4] sm:$0xf] }
 0x27f   : > { %v6455_v19 = vpop.f32.mrf.mxu1  ;;  %v5667_v62 = vshrl.u32 %v5322_v23, 16  ;;  %v5656_v7 = vrot.slane %v5654_v49, 4  ;;  %v5659_v41 = vrot.slane %v5657_v59, 5  ;;  %v7177_v23 = vrot.slane %v4538_v29, 11 }
 0x280   : > { %v5225_v45 = vadd.f32 %v5151_v12, %v4847_v22  ;;  %5195 = vmatmul.bf16.gmra.mxu3 %v7589_v15  ;;  %v4545_v56 = vrot.slane %v4543_v18, 7  ;;  %v9278_v53 = vrot.slane %v5663_v17, 5  ;;  %v6456_v52 = vadd.f32 %v9197_v35, %v6455_v19 }
 0x281   : > { %v5669_v9 = vrot.slane %v5667_v62, 4  ;;  %v5809_v26 = vpack.c.b16 %v5789_v31, %v5788_v24  ;;  %v5660_v18 = vor.u32 %v5659_v41, %v5656_v7  ;;  %v7590_v31 = vld [vmem:[#allocation2 + $0xe4] sm:$0xff]  ;;  %v4234_v41 = vld [vmem:[#allocation2 + $0xf8] sm:$0xf] }
 0x282   : > { %v5899_v43 = vpop.f32.mrf.mxu0  ;;  %v5971_v60 = vadd.f32 %v5897_v0, %v5225_v45  ;;  %6494 = vmatmul.bf16.gmra.mxu1 %v7621_v58  ;;  %v5323_v58 = vld [vmem:[#allocation2 + $0xec] sm:$0x1]  ;;  %v4548_v16 = vor.u32 %v4546_v42, %v4545_v56  ;;  %v4550_v51 = vrot.slane %v4545_v56, 4  ;;  %v5325_v56 = vld [vmem:[#allocation2 + $0xf8] sm:$0xf] }
 0x283   : > { %v5156_v36 = vpop.f32.mrf.mxu3  ;;  %v5661_v29 = vrot.slane %v5660_v18, 4 }
 0x284   : > { %v6130_v48 = vadd.f32 %v6129_v6, %v5971_v60  ;;  %v6169_v12 = vmul.f32 %v5971_v60, %v5971_v60  ;;  %v4549_v3 = vsel %vm7974_vm3, %v7177_v23, %v4548_v16 }
 0x285   : > { %v4775_v15 = vpop.f32.mrf.mxu2  ;;  %v5666_v16 = vsel %vm8306_vm6, %v5661_v29, %v9278_v53 }
 0x286   : > { %v6200_v22 = vadd.f32 %v6199_v5, %v6169_v12  ;;  %v4848_v0 = vadd.f32 %v4775_v15, %v8854_v13  ;;  %v5670_v5 = vor.u32 %v5669_v9, %v9278_v53  ;;  %v5673_v13 = vshll.u32 %v5323_v58, 16  ;;  %v7622_v15 = vld [vmem:[#allocation2 + $0xd4] sm:$0xff] }
 0x287   : > { %v6457_v1 = vpop.f32.mrf.mxu1  ;;  %v5678_v9 = vshrl.u32 %v5324_v2, 16  ;;  %v5691_v58 = vshrl.u32 %v5325_v56, 16 }
 0x288   : > { %v5226_v6 = vadd.f32 %v9264_v10, %v4848_v0  ;;  %v6458_v20 = vadd.f32 %v9197_v35, %v6457_v1  ;;  %v4558_v10 = vsel %vm7974_vm3, %v4550_v51, %v4557_v57  ;;  %v5671_v42 = vrot.slane %v5670_v5, 4 }
 0x289   : > { %v5675_v8 = vrot.slane %v5673_v13, 5  ;;  %v5681_v0 = vshll.u32 %v5324_v2, 16  ;;  %v4565_v57 = vshrl.u32 %v4233_v33, 16  ;;  %v4574_v1 = vshrl.u32 %v4234_v41, 16  ;;  %v5326_v2 = vld [vmem:[#allocation2 + $0xfc] sm:$0x1] }
 0x28a   : > { %v5902_v45 = vpop.f32.mrf.mxu0  ;;  %v5972_v49 = vadd.f32 %v5899_v43, %v5226_v6  ;;  %4817 = vmatmul.bf16.gmra.mxu2 %v4685_v27  ;;  %v7732_v19 = vpack.c.bf16 %v6458_v20, %v6456_v52  ;;  %v5687_v52 = vshll.u32 %v5325_v56, 16  ;;  %v5790_v5 = vunpack.c.l.b16 %v5666_v16 }
 0x28b   : > { %v5158_v59 = vpop.f32.mrf.mxu3  ;;  %v5683_v18 = vrot.slane %v5681_v0, 5  ;;  %v4576_v29 = vrot.slane %v4574_v1, 7  ;;  %v4577_v56 = vshll.u32 %v4234_v41, 16 }
 0x28c   : > { %v7647_v17 = vpack.c.bf16 %v5972_v49, %v5971_v60  ;;  %v6131_v62 = vadd.f32 %v6130_v48, %v5972_v49  ;;  %v6170_v24 = vmul.f32 %v5972_v49, %v5972_v49  ;;  %7811 = vst [vmem:[%s9216_s10 + $0x18] sm:$0xff] %v7732_v19   ;;  %v4666_v60 = vunpack.c.l.b16 %v4549_v3 }
 0x28d   : > { %5941 = vmatmul.bf16.gmra.mxu0 %v5809_v26  ;;  %v4778_v43 = vpop.f32.mrf.mxu2  ;;  %v4667_v48 = vunpack.c.l.b16 %v4558_v10  ;;  %v5680_v26 = vrot.slane %v5678_v9, 4  ;;  %v5693_v49 = vrot.slane %v5691_v58, 4  ;;  %v4579_v41 = vor.u32 %v4577_v56, %v4576_v29 }
 0x28e   : > { %7795 = vst [vmem:[%s9244_s13 + $0x10] sm:$0xff] %v7647_v17   ;;  %v6201_v12 = vadd.f32 %v6200_v22, %v6170_v24  ;;  %v4849_v7 = vadd.f32 %v4778_v43, %v8884_v4  ;;  %v5676_v22 = vsel %vm8306_vm6, %v5671_v42, %v5675_v8  ;;  %v4232_v4 = vld [vmem:[#allocation2 + $0xf0] sm:$0x8]  ;;  %v4567_v24 = vrot.slane %v4565_v57, 7 }
 0x28f   : > { %v6460_v27 = vpop.f32.mrf.mxu1  ;;  %v4686_v20 = vpack.c.b16 %v4667_v48, %v4666_v60  ;;  %v5791_v53 = vunpack.c.l.b16 %v5676_v22  ;;  %v4560_v10 = vshrl.u32 %v4232_v4, 16  ;;  %v5684_v8 = vor.u32 %v5683_v18, %v5680_v26  ;;  %v4236_v4 = vld [vmem:[#allocation2 + $0x104] sm:$0xf]  ;;  %v7591_v26 = vld [vmem:[#allocation2 + $0xf4] sm:$0xff]  ;;  %v4237_v18 = vld [vmem:[#allocation2 + $0x108] sm:$0xf] }
 0x290   : > { %v5227_v23 = vadd.f32 %v5156_v36, %v4849_v7  ;;  %5200 = vmatmul.bf16.gmra.mxu3 %v7590_v31  ;;  %v9297_v36 = vrot.slane %v5687_v52, 5  ;;  %v4568_v31 = vshll.u32 %v4233_v33, 16  ;;  %v6461_v42 = vadd.f32 %v9197_v35, %v6460_v27 }
 0x291   : > { %v5810_v0 = vpack.c.b16 %v5791_v53, %v5790_v5  ;;  %v7178_v52 = vrot.slane %v4560_v10, 11  ;;  %v4572_v33 = vrot.slane %v4567_v24, 4  ;;  %v5327_v5 = vld [vmem:[#allocation2 + $0x104] sm:$0xf]  ;;  %v4596_v29 = vshrl.u32 %v4237_v18, 16 }
 0x292   : > { %v5904_v51 = vpop.f32.mrf.mxu0  ;;  %v5973_v6 = vadd.f32 %v5902_v45, %v5227_v23  ;;  %6499 = vmatmul.bf16.gmra.mxu1 %v7622_v15  ;;  %v5694_v7 = vor.u32 %v5693_v49, %v9297_v36  ;;  %v5697_v15 = vshll.u32 %v5326_v2, 16  ;;  %v4570_v58 = vor.u32 %v4568_v31, %v4567_v24 }
 0x293   : > { %v5161_v13 = vpop.f32.mrf.mxu3  ;;  %v4587_v2 = vshrl.u32 %v4236_v4, 16  ;;  %v5702_v56 = vshrl.u32 %v5327_v5, 16 }
 0x294   : > { %v6132_v19 = vadd.f32 %v6131_v62, %v5973_v6  ;;  %v6171_v3 = vmul.f32 %v5973_v6, %v5973_v6  ;;  %v5695_v16 = vrot.slane %v5694_v7, 4  ;;  %v5699_v22 = vrot.slane %v5697_v15, 5 }
 0x295   : > { %v4780_v17 = vpop.f32.mrf.mxu2 }
 0x296   : > { %v6202_v45 = vadd.f32 %v6201_v12, %v6171_v3  ;;  %v4850_v43 = vadd.f32 %v4780_v17, %v8922_v61  ;;  %v5685_v61 = vrot.slane %v5684_v8, 4  ;;  %v5328_v3 = vld [vmem:[#allocation2 + $0x108] sm:$0xf]  ;;  %v5700_v24 = vsel %vm8306_vm6, %v5695_v16, %v5699_v22  ;;  %v5329_v16 = vld [vmem:[#allocation2 + $0x10c] sm:$0x1] }
 0x297   : > { %v6462_v9 = vpop.f32.mrf.mxu1  ;;  %v7623_v17 = vld [vmem:[#allocation2 + $0xe4] sm:$0xff]  ;;  %v5711_v8 = vshll.u32 %v5328_v3, 16 }
 0x298   : > { %v5228_v62 = vadd.f32 %v5158_v59, %v4850_v43  ;;  %v6463_v60 = vadd.f32 %v9197_v35, %v6462_v9  ;;  %v5705_v43 = vshll.u32 %v5327_v5, 16 }
 0x299   : > { %v9317_v22 = vrot.slane %v5711_v8, 5 }
 0x29a   : > { %v5907_v48 = vpop.f32.mrf.mxu0  ;;  %v5974_v12 = vadd.f32 %v5904_v51, %v5228_v62  ;;  %4822 = vmatmul.bf16.gmra.mxu2 %v4686_v20  ;;  %v7737_v23 = vpack.c.bf16 %v6463_v60, %v6461_v42  ;;  %v4571_v51 = vsel %vm7974_vm3, %v7178_v52, %v4570_v58  ;;  %v4580_v20 = vsel %vm7974_vm3, %v4572_v33, %v4579_v41 }
 0x29b   : > { %v9303_v27 = vpop.f32.mrf.mxu3  ;;  %v4669_v15 = vunpack.c.l.b16 %v4580_v20  ;;  %v4589_v60 = vrot.slane %v4587_v2, 7  ;;  %v4590_v52 = vshll.u32 %v4236_v4, 16  ;;  %v4598_v33 = vrot.slane %v4596_v29, 7 }
 0x29c   : > { %v7652_v59 = vpack.c.bf16 %v5974_v12, %v5973_v6  ;;  %v6133_v57 = vadd.f32 %v6132_v19, %v5974_v12  ;;  %v6172_v1 = vmul.f32 %v5974_v12, %v5974_v12  ;;  %7812 = vst [vmem:[%s9216_s10 + $0x20] sm:$0xff] %v7737_v23   ;;  %v5690_v6 = vsel %vm8306_vm6, %v5685_v61, %v9297_v36  ;;  %v4235_v19 = vld [vmem:[#allocation2 + $0x100] sm:$0x8] }
 0x29d   : > { %5946 = vmatmul.bf16.gmra.mxu0 %v5810_v0  ;;  %v4783_v49 = vpop.f32.mrf.mxu2  ;;  %v5792_v9 = vunpack.c.l.b16 %v5690_v6  ;;  %v4582_v62 = vshrl.u32 %v4235_v19, 16  ;;  %v5793_v0 = vunpack.c.l.b16 %v5700_v24  ;;  %v4599_v41 = vshll.u32 %v4237_v18, 16 }
 0x29e   : > { %7796 = vst [vmem:[%s9244_s13 + $0x18] sm:$0xff] %v7652_v59   ;;  %v6203_v53 = vadd.f32 %v6202_v45, %v6172_v1  ;;  %v4851_v10 = vadd.f32 %v4783_v49, %v8947_v32  ;;  %v5715_v45 = vshrl.u32 %v5328_v3, 16  ;;  %v4668_v32 = vunpack.c.l.b16 %v4571_v51 }
 0x29f   : > { %v6465_v31 = vpop.f32.mrf.mxu1  ;;  %v5704_v12 = vrot.slane %v5702_v56, 4  ;;  %v5707_v61 = vrot.slane %v5705_v43, 5  ;;  %v7179_v5 = vrot.slane %v4582_v62, 11  ;;  %v4592_v51 = vor.u32 %v4590_v52, %v4589_v60  ;;  %v5331_v52 = vld [vmem:[#allocation2 + $0x118] sm:$0xf] }
 0x2a0   : > { %v5229_v42 = vadd.f32 %v5161_v13, %v4851_v10  ;;  %5205 = vmatmul.bf16.gmra.mxu3 %v7591_v26  ;;  %v5717_v59 = vrot.slane %v5715_v45, 4  ;;  %v4687_v26 = vpack.c.b16 %v4669_v15, %v4668_v32  ;;  %v6466_v4 = vadd.f32 %v9197_v35, %v6465_v31  ;;  %v7592_v32 = vld [vmem:[#allocation2 + $0x104] sm:$0xff] }
 0x2a1   : > { %v4594_v20 = vrot.slane %v4589_v60, 4  ;;  %v4601_v3 = vor.u32 %v4599_v41, %v4598_v33  ;;  %v5708_v18 = vor.u32 %v5707_v61, %v5704_v12  ;;  %v5721_v10 = vshll.u32 %v5329_v16, 16  ;;  %v5330_v60 = vld [vmem:[#allocation2 + $0x114] sm:$0xf]  ;;  %v4240_v16 = vld [vmem:[#allocation2 + $0x118] sm:$0xf] }
 0x2a2   : > { %v5909_v7 = vpop.f32.mrf.mxu0  ;;  %v5975_v36 = vadd.f32 %v5907_v48, %v5229_v42  ;;  %6504 = vmatmul.bf16.gmra.mxu1 %v7623_v17  ;;  %v5811_v19 = vpack.c.b16 %v5793_v0, %v5792_v9  ;;  %v5718_v2 = vor.u32 %v5717_v59, %v9317_v22  ;;  %v4593_v29 = vsel %vm7974_vm3, %v7179_v5, %v4592_v51  ;;  %v7624_v0 = vld [vmem:[#allocation2 + $0xf4] sm:$0xff] }
 0x2a3   : > { %v5166_v58 = vpop.f32.mrf.mxu3  ;;  %v4602_v56 = vsel %vm7974_vm3, %v4594_v20, %v4601_v3  ;;  %v5709_v43 = vrot.slane %v5708_v18, 4  ;;  %v4670_v33 = vunpack.c.l.b16 %v4593_v29  ;;  %v5739_v5 = vshrl.u32 %v5331_v52, 16 }
 0x2a4   : > { %v6134_v23 = vadd.f32 %v6133_v57, %v5975_v36  ;;  %v6173_v13 = vmul.f32 %v5975_v36, %v5975_v36  ;;  %v5719_v15 = vrot.slane %v5718_v2, 4  ;;  %v4671_v41 = vunpack.c.l.b16 %v4602_v56  ;;  %v5332_v56 = vld [vmem:[#allocation2 + $0x11c] sm:$0x1] }
 0x2a5   : > { %v4785_v1 = vpop.f32.mrf.mxu2  ;;  %v4618_v20 = vshrl.u32 %v4240_v16, 16 }
 0x2a6   : > { %v6204_v49 = vadd.f32 %v6203_v53, %v6173_v13  ;;  %v4852_v48 = vadd.f32 %v4785_v1, %v8977_v11  ;;  %v4239_v13 = vld [vmem:[#allocation2 + $0x114] sm:$0xf]  ;;  %v5726_v1 = vshrl.u32 %v5330_v60, 16 }
 0x2a7   : > { %v6467_v6 = vpop.f32.mrf.mxu1  ;;  %v4609_v51 = vshrl.u32 %v4239_v13, 16 }
 0x2a8   : > { %v5230_v57 = vadd.f32 %v9303_v27, %v4852_v48  ;;  %v6468_v17 = vadd.f32 %v9197_v35, %v6467_v6  ;;  %v5723_v27 = vrot.slane %v5721_v10, 5  ;;  %v4688_v48 = vpack.c.b16 %v4671_v41, %v4670_v33 }
 0x2aa   : > { %v5912_v24 = vpop.f32.mrf.mxu0  ;;  %v5976_v53 = vadd.f32 %v5909_v7, %v5230_v57  ;;  %4827 = vmatmul.bf16.gmra.mxu2 %v4687_v26  ;;  %v7742_v11 = vpack.c.bf16 %v6468_v17, %v6466_v4  ;;  %v5735_v26 = vshll.u32 %v5331_v52, 16  ;;  %v5728_v57 = vrot.slane %v5726_v1, 4 }
 0x2ab   : > { %v5168_v31 = vpop.f32.mrf.mxu3  ;;  %v5741_v17 = vrot.slane %v5739_v5, 4 }
 0x2ac   : > { %v7657_v42 = vpack.c.bf16 %v5976_v53, %v5975_v36  ;;  %v6135_v8 = vadd.f32 %v6134_v23, %v5976_v53  ;;  %v6174_v45 = vmul.f32 %v5976_v53, %v5976_v53  ;;  %7813 = vst [vmem:[%s9216_s10 + $0x28] sm:$0xff] %v7742_v11   ;;  %v5714_v36 = vsel %vm8306_vm6, %v5709_v43, %v9317_v22 }
 0x2ad   : > { %5951 = vmatmul.bf16.gmra.mxu0 %v5811_v19  ;;  %v4788_v7 = vpop.f32.mrf.mxu2  ;;  %v5724_v23 = vsel %vm8306_vm6, %v5719_v15, %v5723_v27  ;;  %v5794_v22 = vunpack.c.l.b16 %v5714_v36  ;;  %v5737_v2 = vrot.slane %v5735_v26, 5  ;;  %v4611_v43 = vrot.slane %v4609_v51, 7 }
 0x2ae   : > { %7797 = vst [vmem:[%s9244_s13 + $0x20] sm:$0xff] %v7657_v42   ;;  %v6205_v9 = vadd.f32 %v6204_v49, %v6174_v45  ;;  %v4853_v62 = vadd.f32 %v4788_v7, %v8989_v30  ;;  %v5729_v30 = vshll.u32 %v5330_v60, 16  ;;  %v5795_v10 = vunpack.c.l.b16 %v5724_v23 }
 0x2af   : > { %v6470_v12 = vpop.f32.mrf.mxu1  ;;  %v4612_v27 = vshll.u32 %v4239_v13, 16  ;;  %v4620_v42 = vrot.slane %v4618_v20, 7  ;;  %v4621_v45 = vshll.u32 %v4240_v16, 16  ;;  %v5742_v60 = vor.u32 %v5741_v17, %v5737_v2  ;;  %v7593_v16 = vld [vmem:[#allocation2 + $0x114] sm:$0xff] }
 0x2b0   : > { %v5231_v61 = vadd.f32 %v5166_v58, %v4853_v62  ;;  %5210 = vmatmul.bf16.gmra.mxu3 %v7592_v32  ;;  %v4238_v58 = vld [vmem:[#allocation2 + $0x110] sm:$0x8]  ;;  %v5731_v19 = vrot.slane %v5729_v30, 5  ;;  %v5812_v15 = vpack.c.b16 %v5795_v10, %v5794_v22 }
 0x2b1   : > { %v4604_v29 = vshrl.u32 %v4238_v58, 16  ;;  %v4623_v36 = vor.u32 %v4621_v45, %v4620_v42  ;;  %v5743_v26 = vrot.slane %v5742_v60, 4  ;;  %v7625_v58 = vld [vmem:[#allocation2 + $0x104] sm:$0xff] }
 0x2b2   : > { %v5914_v59 = vpop.f32.mrf.mxu0  ;;  %v5977_v49 = vadd.f32 %v5912_v24, %v5231_v61  ;;  %6509 = vmatmul.bf16.gmra.mxu1 %v7624_v0  ;;  %v6471_v24 = vadd.f32 %v9197_v35, %v6470_v12  ;;  %v5732_v0 = vor.u32 %v5731_v19, %v5728_v57  ;;  %v4614_v12 = vor.u32 %v4612_v27, %v4611_v43 }
 0x2b3   : > { %v5171_v4 = vpop.f32.mrf.mxu3  ;;  %v7180_v41 = vrot.slane %v4604_v29, 11  ;;  %v4616_v61 = vrot.slane %v4611_v43, 4 }
 0x2b4   : > { %v6136_v3 = vadd.f32 %v6135_v8, %v5977_v49  ;;  %v6175_v18 = vmul.f32 %v5977_v49, %v5977_v49  ;;  %v5733_v30 = vrot.slane %v5732_v0, 4 }
 0x2b5   : > { %v4790_v6 = vpop.f32.mrf.mxu2  ;;  %v4615_v51 = vsel %vm7974_vm3, %v7180_v41, %v4614_v12 }
 0x2b6   : > { %v6206_v53 = vadd.f32 %v6205_v9, %v6175_v18  ;;  %v4854_v11 = vadd.f32 %v4790_v6, %v9005_v14  ;;  %v5745_v9 = vshll.u32 %v5332_v56, 16  ;;  %v5738_v22 = vsel %vm8306_vm6, %v5733_v30, %v5737_v2 }
 0x2b7   : > { %v6472_v8 = vpop.f32.mrf.mxu1  ;;  %v4672_v57 = vunpack.c.l.b16 %v4615_v51 }
 0x2b8   : > { %v5232_v32 = vadd.f32 %v5168_v31, %v4854_v11  ;;  %v6473_v7 = vadd.f32 %v9197_v35, %v6472_v8  ;;  %v5747_v5 = vrot.slane %v5745_v9, 5  ;;  %v5796_v11 = vunpack.c.l.b16 %v5738_v22 }
 0x2ba   : > { %v5917_v62 = vpop.f32.mrf.mxu0  ;;  %v5978_v52 = vadd.f32 %v5914_v59, %v5232_v32  ;;  %4832 = vmatmul.bf16.gmra.mxu2 %v4688_v48  ;;  %v7747_v14 = vpack.c.bf16 %v6473_v7, %v6471_v24  ;;  %v5748_v10 = vsel %vm8306_vm6, %v5743_v26, %v5747_v5 }
 0x2bb   : > { %v5173_v33 = vpop.f32.mrf.mxu3  ;;  %v5797_v40 = vunpack.c.l.b16 %v5748_v10 }
 0x2bc   : > { %v7662_v23 = vpack.c.bf16 %v5978_v52, %v5977_v49  ;;  %v6137_v13 = vadd.f32 %v6136_v3, %v5978_v52  ;;  %v6176_v31 = vmul.f32 %v5978_v52, %v5978_v52  ;;  %7814 = vst [vmem:[%s9216_s10 + $0x30] sm:$0xff] %v7747_v14   ;;  %v4624_v49 = vsel %vm7974_vm3, %v4616_v61, %v4623_v36 }
 0x2bd   : > { %5956 = vmatmul.bf16.gmra.mxu0 %v5812_v15  ;;  %v4793_v1 = vpop.f32.mrf.mxu2  ;;  %v5813_v27 = vpack.c.b16 %v5797_v40, %v5796_v11 }
 0x2be   : > { %7798 = vst [vmem:[%s9244_s13 + $0x28] sm:$0xff] %v7662_v23   ;;  %v6207_v59 = vadd.f32 %v6206_v53, %v6176_v31  ;;  %v4855_v48 = vadd.f32 %v4793_v1, %v9016_v21  ;;  %v4673_v21 = vunpack.c.l.b16 %v4624_v49  ;;  %v9360_v31 = vld [vmem:[%s9425_s3] ss:$0 sm:$0xff] }
 0x2bf   : > { %v6475_v20 = vpop.f32.mrf.mxu1 }
 0x2c0   : > { %v5233_v3 = vadd.f32 %v5171_v4, %v4855_v48  ;;  %5215 = vmatmul.bf16.gmra.mxu3 %v7593_v16  ;;  %v4689_v56 = vpack.c.b16 %v4673_v21, %v4672_v57  ;;  %v6476_v2 = vadd.f32 %v9197_v35, %v6475_v20 }
 0x2c2   : > { %v5919_v18 = vpop.f32.mrf.mxu0  ;;  %v5979_v6 = vadd.f32 %v5917_v62, %v5233_v3  ;;  %6514 = vmatmul.bf16.gmra.mxu1 %v7625_v58 }
 0x2c3   : > { %v5176_v19 = vpop.f32.mrf.mxu3 }
 0x2c4   : > { %v6138_v17 = vadd.f32 %v6137_v13, %v5979_v6  ;;  %v6177_v53 = vmul.f32 %v5979_v6, %v5979_v6 }
 0x2c5   : > { %v4795_v24 = vpop.f32.mrf.mxu2 }
 0x2c6   : > { %v6208_v29 = vadd.f32 %v6207_v59, %v6177_v53  ;;  %v4856_v4 = vadd.f32 %v4795_v24, %v9022_v25 }
 0x2c7   : > { %v6477_v50 = vpop.f32.mrf.mxu1 }
 0x2c8   : > { %v5234_v43 = vadd.f32 %v5173_v33, %v4856_v4  ;;  %v6478_v42 = vadd.f32 %v9197_v35, %v6477_v50 }
 0x2ca   : > { %v5922_v45 = vpop.f32.mrf.mxu0  ;;  %v5980_v8 = vadd.f32 %v5919_v18, %v5234_v43  ;;  %4837 = vmatmul.bf16.gmra.mxu2 %v4689_v56  ;;  %v7752_v32 = vpack.c.bf16 %v6478_v42, %v6476_v2 }
 0x2cb   : > { %v5178_v15 = vpop.f32.mrf.mxu3 }
 0x2cc   : > { %v7667_v7 = vpack.c.bf16 %v5980_v8, %v5979_v6  ;;  %v6139_v62 = vadd.f32 %v6138_v17, %v5980_v8  ;;  %v6178_v0 = vmul.f32 %v5980_v8, %v5980_v8  ;;  %7815 = vst [vmem:[%s9216_s10 + $0x38] sm:$0xff] %v7752_v32  }
 0x2cd   : > { %5961 = vmatmul.bf16.gmra.mxu0 %v5813_v27  ;;  %v4798_v25 = vpop.f32.mrf.mxu2 }
 0x2ce   : > { %7799 = vst [vmem:[%s9244_s13 + $0x30] sm:$0xff] %v7667_v7   ;;  %v6209_v60 = vadd.f32 %v6208_v29, %v6178_v0  ;;  %v4857_v9 = vadd.f32 %v4798_v25, %v9036_v63 }
 0x2cf   : > { %v6480_v52 = vpop.f32.mrf.mxu1 }
 0x2d0   : > { %v5235_v14 = vadd.f32 %v5176_v19, %v4857_v9  ;;  %v6481_v63 = vadd.f32 %v9360_v31, %v6480_v52 }
 0x2d2   : > { %v5924_v33 = vpop.f32.mrf.mxu0  ;;  %v5981_v41 = vadd.f32 %v5922_v45, %v5235_v14 }
 0x2d3   : > { %v5181_v35 = vpop.f32.mrf.mxu3 }
 0x2d4   : > { %v6140_v12 = vadd.f32 %v6139_v62, %v5981_v41  ;;  %v6179_v61 = vmul.f32 %v5981_v41, %v5981_v41 }
 0x2d5   : > { %v4800_v36 = vpop.f32.mrf.mxu2 }
 0x2d6   : > { %v6210_v23 = vadd.f32 %v6209_v60, %v6179_v61  ;;  %v4858_v13 = vadd.f32 %v4800_v36, %v9046_v55 }
 0x2d7   : > { %v6482_v16 = vpop.f32.mrf.mxu1 }
 0x2d8   : > { %v5236_v1 = vadd.f32 %v5178_v15, %v4858_v13  ;;  %v6483_v30 = vadd.f32 %v9360_v31, %v6482_v16 }
 0x2da   : > { %v5927_v26 = vpop.f32.mrf.mxu0  ;;  %v5982_v5 = vadd.f32 %v5924_v33, %v5236_v1  ;;  %v7757_v59 = vpack.c.bf16 %v6483_v30, %v6481_v63 }
 0x2db   : > { %v5183_v48 = vpop.f32.mrf.mxu3 }
 0x2dc   : > { %v7672_v58 = vpack.c.bf16 %v5982_v5, %v5981_v41  ;;  %v6141_v51 = vadd.f32 %v6140_v12, %v5982_v5  ;;  %v6180_v49 = vmul.f32 %v5982_v5, %v5982_v5  ;;  %7816 = vst [vmem:[%s9216_s10 + $0x40] sm:$0xff] %v7757_v59  }
 0x2dd   : > { %v4803_v55 = vpop.f32.mrf.mxu2 }
 0x2de   : > { %7800 = vst [vmem:[%s9244_s13 + $0x38] sm:$0xff] %v7672_v58   ;;  %v6211_v20 = vadd.f32 %v6210_v23, %v6180_v49  ;;  %v4859_v3 = vadd.f32 %v4803_v55, %v9058_v28 }
 0x2df   : > { %v6485_v18 = vpop.f32.mrf.mxu1 }
 0x2e0   : > { %v5237_v22 = vadd.f32 %v5181_v35, %v4859_v3  ;;  %v6486_v40 = vadd.f32 %v9360_v31, %v6485_v18 }
 0x2e2   : > { %v5929_v10 = vpop.f32.mrf.mxu0  ;;  %v5983_v6 = vadd.f32 %v5927_v26, %v5237_v22 }
 0x2e3   : > { %v5186_v57 = vpop.f32.mrf.mxu3 }
 0x2e4   : > { %v6142_v21 = vadd.f32 %v6141_v51, %v5983_v6  ;;  %v6181_v19 = vmul.f32 %v5983_v6, %v5983_v6 }
 0x2e5   : > { %v4805_v17 = vpop.f32.mrf.mxu2 }
 0x2e6   : > { %v6212_v53 = vadd.f32 %v6211_v20, %v6181_v19  ;;  %v4860_v11 = vadd.f32 %v4805_v17, %v9063_v38 }
 0x2e7   : > { %v6487_v24 = vpop.f32.mrf.mxu1 }
 0x2e8   : > { %v5238_v29 = vadd.f32 %v5183_v48, %v4860_v11  ;;  %v6488_v4 = vadd.f32 %v9360_v31, %v6487_v24 }
 0x2ea   : > { %v5932_v28 = vpop.f32.mrf.mxu0  ;;  %v5984_v56 = vadd.f32 %v5929_v10, %v5238_v29  ;;  %v7762_v2 = vpack.c.bf16 %v6488_v4, %v6486_v40 }
 0x2eb   : > { %v5188_v50 = vpop.f32.mrf.mxu3 }
 0x2ec   : > { %v7677_v43 = vpack.c.bf16 %v5984_v56, %v5983_v6  ;;  %v6143_v27 = vadd.f32 %v6142_v21, %v5984_v56  ;;  %v6182_v42 = vmul.f32 %v5984_v56, %v5984_v56  ;;  %7817 = vst [vmem:[%s9216_s10 + $0x48] sm:$0xff] %v7762_v2  }
 0x2ed   : > { %v4808_v45 = vpop.f32.mrf.mxu2 }
 0x2ee   : > { %7801 = vst [vmem:[%s9244_s13 + $0x40] sm:$0xff] %v7677_v43   ;;  %v6213_v8 = vadd.f32 %v6212_v53, %v6182_v42  ;;  %v4861_v32 = vadd.f32 %v4808_v45, %v9077_v34 }
 0x2ef   : > { %v6490_v38 = vpop.f32.mrf.mxu1 }
 0x2f0   : > { %v5239_v15 = vadd.f32 %v5186_v57, %v4861_v32  ;;  %v6491_v33 = vadd.f32 %v9360_v31, %v6490_v38 }
 0x2f2   : > { %v5934_v7 = vpop.f32.mrf.mxu0  ;;  %v5985_v62 = vadd.f32 %v5932_v28, %v5239_v15 }
 0x2f3   : > { %v5191_v0 = vpop.f32.mrf.mxu3 }
 0x2f4   : > { %v6144_v25 = vadd.f32 %v6143_v27, %v5985_v62  ;;  %v6183_v60 = vmul.f32 %v5985_v62, %v5985_v62 }
 0x2f5   : > { %v4810_v9 = vpop.f32.mrf.mxu2 }
 0x2f6   : > { %v6214_v52 = vadd.f32 %v6213_v8, %v6183_v60  ;;  %v4862_v14 = vadd.f32 %v4810_v9, %v9083_v39 }
 0x2f7   : > { %v6492_v41 = vpop.f32.mrf.mxu1 }
 0x2f8   : > { %v5240_v35 = vadd.f32 %v5188_v50, %v4862_v14  ;;  %v6493_v12 = vadd.f32 %v9360_v31, %v6492_v41 }
 0x2fa   : > { %v5937_v34 = vpop.f32.mrf.mxu0  ;;  %v5986_v61 = vadd.f32 %v5934_v7, %v5240_v35  ;;  %v7767_v36 = vpack.c.bf16 %v6493_v12, %v6491_v33 }
 0x2fb   : > { %v5193_v23 = vpop.f32.mrf.mxu3 }
 0x2fc   : > { %v7682_v13 = vpack.c.bf16 %v5986_v61, %v5985_v62  ;;  %v6145_v63 = vadd.f32 %v6144_v25, %v5986_v61  ;;  %v6184_v16 = vmul.f32 %v5986_v61, %v5986_v61  ;;  %7818 = vst [vmem:[%s9216_s10 + $0x50] sm:$0xff] %v7767_v36  }
 0x2fd   : > { %v4813_v1 = vpop.f32.mrf.mxu2 }
 0x2fe   : > { %7802 = vst [vmem:[%s9244_s13 + $0x48] sm:$0xff] %v7682_v13   ;;  %v6215_v30 = vadd.f32 %v6214_v52, %v6184_v16  ;;  %v4863_v26 = vadd.f32 %v4813_v1, %v9097_v54 }
 0x2ff   : > { %v6495_v39 = vpop.f32.mrf.mxu1 }
 0x300   : > { %v5241_v5 = vadd.f32 %v5191_v0, %v4863_v26  ;;  %v6496_v18 = vadd.f32 %v9360_v31, %v6495_v39 }
 0x302   : > { %v5939_v59 = vpop.f32.mrf.mxu0  ;;  %v5987_v48 = vadd.f32 %v5937_v34, %v5241_v5 }
 0x303   : > { %v5196_v58 = vpop.f32.mrf.mxu3 }
 0x304   : > { %v6146_v51 = vadd.f32 %v6145_v63, %v5987_v48  ;;  %v6185_v49 = vmul.f32 %v5987_v48, %v5987_v48  ;;  %v9468_v63 = vld [vmem:[#allocation4_spill] sm:$0xff] }
 0x305   : > { %v4815_v55 = vpop.f32.mrf.mxu2 }
 0x306   : > { %v6216_v20 = vadd.f32 %v6215_v30, %v6185_v49  ;;  %v4864_v3 = vadd.f32 %v4815_v55, %v9103_v44 }
 0x307   : > { %v6497_v22 = vpop.f32.mrf.mxu1 }
 0x308   : > { %v5242_v10 = vadd.f32 %v5193_v23, %v4864_v3  ;;  %v6498_v6 = vadd.f32 %v9360_v31, %v6497_v22 }
 0x30a   : > { %v5942_v54 = vpop.f32.mrf.mxu0  ;;  %v5988_v57 = vadd.f32 %v5939_v59, %v5242_v10  ;;  %v7772_v21 = vpack.c.bf16 %v6498_v6, %v6496_v18 }
 0x30b   : > { %v5198_v19 = vpop.f32.mrf.mxu3 }
 0x30c   : > { %v7687_v17 = vpack.c.bf16 %v5988_v57, %v5987_v48  ;;  %v6147_v53 = vadd.f32 %v6146_v51, %v5988_v57  ;;  %v6186_v11 = vmul.f32 %v5988_v57, %v5988_v57  ;;  %7819 = vst [vmem:[%s9216_s10 + $0x58] sm:$0xff] %v7772_v21  }
 0x30d   : > { %v4818_v40 = vpop.f32.mrf.mxu2 }
 0x30e   : > { %7803 = vst [vmem:[%s9244_s13 + $0x50] sm:$0xff] %v7687_v17   ;;  %v6217_v24 = vadd.f32 %v6216_v20, %v6186_v11  ;;  %v4865_v29 = vadd.f32 %v4818_v40, %v9117_v46  ;;  %v9469_v20 = vld [vmem:[#allocation5_spill] sm:$0xff] }
 0x30f   : > { %v6500_v44 = vpop.f32.mrf.mxu1 }
 0x310   : > { %v5243_v4 = vadd.f32 %v5196_v58, %v4865_v29  ;;  %v6501_v8 = vadd.f32 %v9360_v31, %v6500_v44 }
 0x312   : > { %v5944_v28 = vpop.f32.mrf.mxu0  ;;  %v5989_v56 = vadd.f32 %v5942_v54, %v5243_v4 }
 0x313   : > { %v5201_v2 = vpop.f32.mrf.mxu3 }
 0x314   : > { %v6148_v50 = vadd.f32 %v6147_v53, %v5989_v56  ;;  %v6187_v43 = vmul.f32 %v5989_v56, %v5989_v56  ;;  %v9470_v53 = vld [vmem:[#allocation6_spill] sm:$0xff] }
 0x315   : > { %v4820_v27 = vpop.f32.mrf.mxu2 }
 0x316   : > { %v6218_v42 = vadd.f32 %v6217_v24, %v6187_v43  ;;  %v4866_v45 = vadd.f32 %v4820_v27, %v9123_v47 }
 0x317   : > { %v6502_v32 = vpop.f32.mrf.mxu1 }
 0x318   : > { %v5244_v38 = vadd.f32 %v5198_v19, %v4866_v45  ;;  %v6503_v15 = vadd.f32 %v9360_v31, %v6502_v32 }
 0x31a   : > { %v5947_v46 = vpop.f32.mrf.mxu0  ;;  %v5990_v7 = vadd.f32 %v5944_v28, %v5244_v38  ;;  %v7777_v62 = vpack.c.bf16 %v6503_v15, %v6501_v8  ;;  %v9471_v8 = vld [vmem:[#allocation7_spill] sm:$0xff] }
 0x31b   : > { %v5203_v0 = vpop.f32.mrf.mxu3 }
 0x31c   : > { %v7692_v25 = vpack.c.bf16 %v5990_v7, %v5989_v56  ;;  %v6149_v60 = vadd.f32 %v6148_v50, %v5990_v7  ;;  %v6188_v9 = vmul.f32 %v5990_v7, %v5990_v7  ;;  %7820 = vst [vmem:[%s9216_s10 + $0x60] sm:$0xff] %v7777_v62  }
 0x31d   : > { %v4823_v52 = vpop.f32.mrf.mxu2 }
 0x31e   : > { %7804 = vst [vmem:[%s9244_s13 + $0x58] sm:$0xff] %v7692_v25   ;;  %v6219_v14 = vadd.f32 %v6218_v42, %v6188_v9  ;;  %v4867_v33 = vadd.f32 %v4823_v52, %v9137_v37  ;;  %v9472_v52 = vld [vmem:[#allocation8_spill] sm:$0xff] }
 0x31f   : > { %v6505_v47 = vpop.f32.mrf.mxu1 }
 0x320   : > { %v5245_v41 = vadd.f32 %v5201_v2, %v4867_v33  ;;  %v6506_v1 = vadd.f32 %v9360_v31, %v6505_v47 }
 0x322   : > { %v5949_v35 = vpop.f32.mrf.mxu0  ;;  %v5991_v12 = vadd.f32 %v5947_v46, %v5245_v41 }
 0x323   : > { %v5206_v23 = vpop.f32.mrf.mxu3 }
 0x324   : > { %v6150_v34 = vadd.f32 %v6149_v60, %v5991_v12  ;;  %v6189_v61 = vmul.f32 %v5991_v12, %v5991_v12 }
 0x325   : > { %v4825_v36 = vpop.f32.mrf.mxu2 }
 0x326   : > { %v6220_v13 = vadd.f32 %v6219_v14, %v6189_v61  ;;  %v4868_v16 = vadd.f32 %v4825_v36, %v9468_v63 }
 0x327   : > { %v6507_v30 = vpop.f32.mrf.mxu1 }
 0x328   : > { %v5246_v26 = vadd.f32 %v5203_v0, %v4868_v16  ;;  %v6508_v39 = vadd.f32 %v9360_v31, %v6507_v30 }
 0x32a   : > { %v5952_v37 = vpop.f32.mrf.mxu0  ;;  %v5992_v5 = vadd.f32 %v5949_v35, %v5246_v26  ;;  %v7782_v59 = vpack.c.bf16 %v6508_v39, %v6506_v1  ;;  %v9473_v1 = vld [vmem:[#allocation9_spill] sm:$0xff] }
 0x32b   : > { %v5208_v18 = vpop.f32.mrf.mxu3 }
 0x32c   : > { %v7697_v48 = vpack.c.bf16 %v5992_v5, %v5991_v12  ;;  %v6151_v58 = vadd.f32 %v6150_v34, %v5992_v5  ;;  %v6190_v51 = vmul.f32 %v5992_v5, %v5992_v5  ;;  %7821 = vst [vmem:[%s9216_s10 + $0x68] sm:$0xff] %v7782_v59  }
 0x32d   : > { %v4828_v49 = vpop.f32.mrf.mxu2 }
 0x32e   : > { %7805 = vst [vmem:[%s9244_s13 + $0x60] sm:$0xff] %v7697_v48   ;;  %v6221_v55 = vadd.f32 %v6220_v13, %v6190_v51  ;;  %v4869_v3 = vadd.f32 %v4828_v49, %v9469_v20 }
 0x32f   : > { %v6510_v22 = vpop.f32.mrf.mxu1 }
 0x330   : > { %v5247_v10 = vadd.f32 %v5206_v23, %v4869_v3  ;;  %v6511_v40 = vadd.f32 %v9360_v31, %v6510_v22 }
 0x332   : > { %v5954_v6 = vpop.f32.mrf.mxu0  ;;  %v5993_v54 = vadd.f32 %v5952_v37, %v5247_v10 }
 0x333   : > { %v5211_v4 = vpop.f32.mrf.mxu3 }
 0x334   : > { %v6152_v57 = vadd.f32 %v6151_v58, %v5993_v54  ;;  %v6191_v21 = vmul.f32 %v5993_v54, %v5993_v54  ;;  %v9474_v58 = vld [vmem:[#allocation10_spill] sm:$0xff] }
 0x335   : > { %v4830_v19 = vpop.f32.mrf.mxu2 }
 0x336   : > { %v6222_v17 = vadd.f32 %v6221_v55, %v6191_v21  ;;  %v4870_v11 = vadd.f32 %v4830_v19, %v9470_v53 }
 0x337   : > { %v6512_v24 = vpop.f32.mrf.mxu1 }
 0x338   : > { %v5248_v29 = vadd.f32 %v5208_v18, %v4870_v11  ;;  %v6513_v44 = vadd.f32 %v9360_v31, %v6512_v24 }
 0x33a   : > { %v5994_v28 = vadd.f32 %v5954_v6, %v5248_v29  ;;  %v7787_v56 = vpack.c.bf16 %v6513_v44, %v6511_v40  ;;  %v5957_v2 = vpop.f32.mrf.mxu0 }
 0x33b   : > { %v5213_v7 = vpop.f32.mrf.mxu3 }
 0x33c   : > { %v7702_v50 = vpack.c.bf16 %v5994_v28, %v5993_v54  ;;  %v6153_v43 = vadd.f32 %v6152_v57, %v5994_v28  ;;  %v6192_v27 = vmul.f32 %v5994_v28, %v5994_v28  ;;  %7822 = vst [vmem:[%s9216_s10 + $0x70] sm:$0xff] %v7787_v56  }
 0x33d   : > { %v4833_v42 = vpop.f32.mrf.mxu2 }
 0x33e   : > { %7806 = vst [vmem:[%s9244_s13 + $0x68] sm:$0xff] %v7702_v50   ;;  %v6223_v45 = vadd.f32 %v6222_v17, %v6192_v27  ;;  %v4871_v32 = vadd.f32 %v4833_v42, %v9471_v8 }
 0x33f   : > { %v6515_v38 = vpop.f32.mrf.mxu1 }
 0x340   : > { %v5249_v15 = vadd.f32 %v5211_v4, %v4871_v32  ;;  %v6516_v33 = vadd.f32 %v9360_v31, %v6515_v38 }
 0x342   : > { %v5995_v46 = vadd.f32 %v5957_v2, %v5249_v15  ;;  %v5959_v25 = vpop.f32.mrf.mxu0 }
 0x343   : > { %v5216_v63 = vpop.f32.mrf.mxu3 }
 0x344   : > { %v6154_v62 = vadd.f32 %v6153_v43, %v5995_v46  ;;  %v6193_v0 = vmul.f32 %v5995_v46, %v5995_v46 }
 0x345   : > { %v4835_v60 = vpop.f32.mrf.mxu2 }
 0x346   : > { %v6224_v9 = vadd.f32 %v6223_v45, %v6193_v0  ;;  %v4872_v14 = vadd.f32 %v4835_v60, %v9472_v52 }
 0x347   : > { %v6517_v47 = vpop.f32.mrf.mxu1 }
 0x348   : > { %v5250_v41 = vadd.f32 %v5213_v7, %v4872_v14  ;;  %v6518_v35 = vadd.f32 %v9360_v31, %v6517_v47 }
 0x34a   : > { %v5996_v12 = vadd.f32 %v5959_v25, %v5250_v41  ;;  %v7792_v34 = vpack.c.bf16 %v6518_v35, %v6516_v33  ;;  %v5962_v26 = vpop.f32.mrf.mxu0 }
 0x34b   : > { %v5218_v49 = vpop.f32.mrf.mxu3 }
 0x34c   : > { %v7707_v61 = vpack.c.bf16 %v5996_v12, %v5995_v46  ;;  %v6155_v36 = vadd.f32 %v6154_v62, %v5996_v12  ;;  %v6194_v23 = vmul.f32 %v5996_v12, %v5996_v12  ;;  %7823 = vst [vmem:[%s9216_s10 + $0x78] sm:$0xff] %v7792_v34  }
 0x34d   : > { %v4838_v13 = vpop.f32.mrf.mxu2 }
 0x34e   : > { %7807 = vst [vmem:[%s9244_s13 + $0x70] sm:$0xff] %v7707_v61   ;;  %v6225_v16 = vadd.f32 %v6224_v9, %v6194_v23  ;;  %v4873_v30 = vadd.f32 %v4838_v13, %v9473_v1 }
 0x350   : > { %v5251_v39 = vadd.f32 %v5216_v63, %v4873_v30 }
 0x352   : > { %v5997_v37 = vadd.f32 %v5962_v26, %v5251_v39  ;;  %v5964_v20 = vpop.f32.mrf.mxu0 }
 0x354   : > { %v6156_v5 = vadd.f32 %v6155_v36, %v5997_v37  ;;  %v6195_v59 = vmul.f32 %v5997_v37, %v5997_v37 }
 0x355   : > { %v4840_v48 = vpop.f32.mrf.mxu2 }
 0x356   : > { %v6226_v31 = vadd.f32 %v6225_v16, %v6195_v59  ;;  %v4874_v51 = vadd.f32 %v4840_v48, %v9474_v58 }
 0x358   : > { %v5252_v55 = vadd.f32 %v5218_v49, %v4874_v51 }
 0x35a   : > { %v5998_v3 = vadd.f32 %v5964_v20, %v5252_v55 }
 0x35c   : > { %v7712_v18 = vpack.c.bf16 %v5998_v3, %v5997_v37  ;;  %v6157_v22 = vadd.f32 %v6156_v5, %v5998_v3  ;;  %v6196_v10 = vmul.f32 %v5998_v3, %v5998_v3 }
 0x35e   : > { %7808 = vst [vmem:[%s9244_s13 + $0x78] sm:$0xff] %v7712_v18   ;;  %v6158_v6 = vrot.slane %v6157_v22, 4  ;;  %v6227_v54 = vadd.f32 %v6226_v31, %v6196_v10 }
 0x360   : > { %v6159_v57 = vadd.f32 %v6158_v6, %v6157_v22  ;;  %v6228_v21 = vrot.slane %v6227_v54, 4 }
 0x362   : > { %v6160_v19 = vrot.slane %v6159_v57, 2  ;;  %v6229_v17 = vadd.f32 %v6228_v21, %v6227_v54 }
 0x364   : > { %v6161_v53 = vadd.f32 %v6160_v19, %v6159_v57  ;;  %v6230_v11 = vrot.slane %v6229_v17, 2 }
 0x366   : > { %v6162_v40 = vrot.slane %v6161_v53, 1  ;;  %v6231_v24 = vadd.f32 %v6230_v11, %v6229_v17 }
 0x368   : > { %v6163_v29 = vadd.f32 %v6162_v40, %v6161_v53  ;;  %v6232_v44 = vrot.slane %v6231_v24, 1 }
 0x36a   : > { %6164 = vst [vmem:[%s299_s19] sm:$0x1] %v6163_v29  ;;  %v6233_v4 = vadd.f32 %v6232_v44, %v6231_v24 }
 0x36c   : > { %6234 = vst [vmem:[%s302_s22] sm:$0x1] %v6233_v4 }
 0x36d PF: > { %s18_s24 = sadd.s32 1, %s7857_s24  }
 0x36e   : > { %p15_p4 = scmp.ge.s32.totalorder %s18_s24, 4  }
 0x370   :  { %17 = sbr.rel (!%p15_p4) target bundleno = 1 (0x1), region = 112 }

// kernel: residual_forward.4
= control target key start
LH: loop header
LB: loop body
LE: loop exit
PB: predicated region body
PF: predicated region fallthrough
CT: control target
= control target key end

     0   :  { %s7482_s21 = smov 0   ;;  %s8976_s0 = inlined_call_operand.vmem [shape: bf16[2,16,16,128], index: 0, kind: input, shape index: {}]   ;;  %s8977_s1 = inlined_call_operand.vmem [shape: bf16[3,3,128,128], index: 1, kind: input, shape index: {}]   ;;  %s8978_s2 = inlined_call_operand.vmem [shape: f32[1,128], index: 2, kind: input, shape index: {}]   ;;  %s8979_s3 = inlined_call_operand.vmem [shape: f32[1,128], index: 3, kind: input, shape index: {}]   ;;  %s8980_s4 = inlined_call_operand.vmem [shape: bf16[2,256,128], index: 4, kind: output, shape index: {0}]   ;;  %s8981_s5 = inlined_call_operand.vmem [shape: f32[2,1,128], index: 5, kind: output, shape index: {1}]   ;;  %s8982_s6 = inlined_call_operand.vmem [shape: f32[2,1,128], index: 6, kind: output, shape index: {2}]  }
   0x1 LB: > { %s6436_s22 = sadd.s32 4294967295, %s7444_s21   ;;  %p6440_p0 = scmp.ge.s32.totalorder %s7444_s21, 1  ;;  %s7444_s21 = sphi %s7482_s21, %s17_s21  }
   0x2   : > { %p217_p1 = scmp.lt.s32.totalorder %s7444_s21, 3 }
   0x4   : > { %p218_p2 = pnand %p6440_p0, %p217_p1 }
   0x6   : > { %221 = sbr.rel (%p218_p2) target bundleno = 839 (0x347), region = 36 }
   0xb   : > { %v7112_v0 = vld [vmem:[%s8977_s1 + $0x38] sm:$0xff]  ;;  %p253_p3 = scmp.lt.s32.totalorder %s6436_s22, 1  ;;  %v7446_v1 = vmov 0   ;;  %v7111_v2 = vld [vmem:[%s8977_s1 + $0x30] sm:$0xff]  ;;  %v7512_v3 = vld [vmem:[%s8978_s2] ss:$0 sm:$0xff] }
   0xc   : > { %286 = vst [vmem:[#allocation2 + $0x40] sm:$0xf] %v7446_v1  ;;  %7399 = vmatpush.bf16.msra.mxu1 %v7112_v0  ;;  %7400 = vmatpush.bf16.msra.mxu2 %v7112_v0  ;;  %v7110_v4 = vld [vmem:[%s8977_s1 + $0x28] sm:$0xff]  ;;  %v7523_v8 = vld [vmem:[%s8979_s3] ss:$0 sm:$0xff]  ;;  %v7108_v16 = vld [vmem:[%s8977_s1 + $0x18] sm:$0xff] }
   0xd   : > { %s9012_s22 = smov (!%p253_p3, %s6436_s22), 1  ;;  %287 = vst [vmem:[#allocation2 + $0x44] sm:$0xf] %v7446_v1  ;;  %7401 = vmatpush.bf16.msra.mxu3 %v7112_v0  ;;  %1170 = vmatpush.bf16.msra.mxu0 %v7112_v0  ;;  %v7109_v11 = vld [vmem:[%s8977_s1 + $0x20] sm:$0xff]  ;;  %v7107_v19 = vld [vmem:[%s8977_s1 + $0x10] sm:$0xff]  ;;  %v7106_v21 = vld [vmem:[%s8977_s1 + $0x8] sm:$0xff] }
   0xe   : > { %288 = vst [vmem:[#allocation2 + $0x48] sm:$0xf] %v7446_v1  ;;  %s7103_s27 = sshll.u32 %s9012_s22, 7  ;;  %vm687_vm0 = vsmask.f32 256  ;;  %v7105_v27 = vld [vmem:[%s8977_s1] sm:$0xff]  ;;  %s265_s24 = scalar_lea.vmem %s8981_s5, %s9012_s22 }
   0xf   : > { %s7507_s30 = scalar_lea.vmem %s8976_s0, %s7103_s27  ;;  %270 = vst [vmem:[#allocation2] sm:$0xf] %v7446_v1  ;;  %vm688_vm1 = vsmask.f32 4368  ;;  %vm1781_vm3 = vsmask.f32 3328  ;;  %s8769_s20 = scalar_lea.vmem %s8980_s4, %s7103_s27 }
  0x10   : > { %7402 = vmatpush.bf16.msra.mxu1 %v7111_v2  ;;  %7403 = vmatpush.bf16.msra.mxu2 %v7111_v2  ;;  %v7371_v5 = vld [vmem:[%s7507_s30 + $0x18] sm:$0xff]   ;;  %271 = vst [vmem:[#allocation2 + $0x4] sm:$0xf] %v7446_v1  ;;  %vm7565_vm2 = vmor %vm687_vm0, %vm688_vm1  ;;  %v7372_v54 = vld [vmem:[%s7507_s30 + $0x20] sm:$0xff]   ;;  %vm1782_vm4 = vsmask.f32 7440  ;;  %s268_s28 = scalar_lea.vmem %s8982_s6, %s9012_s22 }
  0x11   : > { %7404 = vmatpush.bf16.msra.mxu3 %v7111_v2  ;;  %1171 = vmatpush.bf16.msra.mxu0 %v7111_v2  ;;  %v7239_v6 = vunpack.c.l.bf16 %v7371_v5  ;;  %v7240_v7 = vunpack.c.h.bf16 %v7371_v5  ;;  %272 = vst [vmem:[#allocation2 + $0x8] sm:$0xf] %v7446_v1  ;;  %v7375_v42 = vld [vmem:[%s7507_s30 + $0x38] sm:$0xff]   ;;  %v7376_v57 = vld [vmem:[%s7507_s30 + $0x40] sm:$0xff]   ;;  %v7243_v60 = vunpack.c.l.bf16 %v7372_v54  ;;  %v7244_v61 = vunpack.c.h.bf16 %v7372_v54  ;;  %vm7936_vm5 = vmor %vm1781_vm3, %vm1782_vm4 }
  0x12   : > { %273 = vst [vmem:[#allocation2 + $0xc] sm:$0xf] %v7446_v1  ;;  %v7379_v43 = vld [vmem:[%s7507_s30 + $0x58] sm:$0xff]   ;;  %v7255_v44 = vunpack.c.l.bf16 %v7375_v42  ;;  %v7256_v45 = vunpack.c.h.bf16 %v7375_v42  ;;  %v7380_v62 = vld [vmem:[%s7507_s30 + $0x60] sm:$0xff]  }
  0x13   : > { %v416_v9 = vmul.f32 %v7512_v3, %v7239_v6  ;;  %v417_v10 = vmul.f32 %v7512_v3, %v7240_v7  ;;  %274 = vst [vmem:[#allocation2 + $0x10] sm:$0xf] %v7446_v1  ;;  %v619_v20 = vld [vmem:[#allocation2 + $0x40] sm:$0x8]  ;;  %v7271_v46 = vunpack.c.l.bf16 %v7379_v43  ;;  %v7272_v47 = vunpack.c.h.bf16 %v7379_v43 }
  0x14   : > { %7405 = vmatpush.bf16.msra.mxu1 %v7110_v4  ;;  %7406 = vmatpush.bf16.msra.mxu2 %v7110_v4  ;;  %275 = vst [vmem:[#allocation2 + $0x14] sm:$0xf] %v7446_v1  ;;  %v779_v22 = vshrl.u32 %v619_v20, 16  ;;  %v424_v48 = vmul.f32 %v7512_v3, %v7255_v44  ;;  %v425_v49 = vmul.f32 %v7512_v3, %v7256_v45  ;;  %v7259_v6 = vunpack.c.l.bf16 %v7376_v57 }
  0x15   : > { %7407 = vmatpush.bf16.msra.mxu3 %v7110_v4  ;;  %1172 = vmatpush.bf16.msra.mxu0 %v7110_v4  ;;  %v452_v12 = vadd.f32 %v7523_v8, %v416_v9  ;;  %v453_v13 = vadd.f32 %v7523_v8, %v417_v10  ;;  %276 = vst [vmem:[#allocation2 + $0x18] sm:$0xf] %v7446_v1  ;;  %v7260_v10 = vunpack.c.h.bf16 %v7376_v57 }
  0x16   : > { %277 = vst [vmem:[#allocation2 + $0x1c] sm:$0xf] %v7446_v1  ;;  %v6449_v30 = vrot.slane %v779_v22, 11  ;;  %v432_v50 = vmul.f32 %v7512_v3, %v7271_v46  ;;  %v433_v51 = vmul.f32 %v7512_v3, %v7272_v47  ;;  %v7604_v52 = vadd.f32 %v7523_v8, %v424_v48  ;;  %v607_v9 = vld [vmem:[#allocation2] sm:$0x8]  ;;  %v7144_v46 = vld [vmem:[%s8977_s1 + $0xb8] sm:$0xff] }
  0x17   : > { %v484_v14 = vmax.f32 %v452_v12, 0.0  ;;  %v485_v15 = vmax.f32 %v453_v13, 0.0  ;;  %278 = vst [vmem:[#allocation2 + $0x20] sm:$0xf] %v7446_v1  ;;  %v7607_v53 = vadd.f32 %v7523_v8, %v425_v49  ;;  %v608_v63 = vld [vmem:[#allocation2 + $0x4] sm:$0xf]  ;;  %v7276_v12 = vunpack.c.h.bf16 %v7380_v62 }
  0x18   : > { %7408 = vmatpush.bf16.msra.mxu1 %v7109_v11  ;;  %7409 = vmatpush.bf16.msra.mxu2 %v7109_v11  ;;  %279 = vst [vmem:[#allocation2 + $0x24] sm:$0xf] %v7446_v1  ;;  %v7613_v55 = vadd.f32 %v7523_v8, %v432_v50  ;;  %v7617_v56 = vadd.f32 %v7523_v8, %v433_v51  ;;  %v492_v58 = vmax.f32 %v7604_v52, 0.0  ;;  %v609_v0 = vld [vmem:[#allocation2 + $0x8] sm:$0xf]  ;;  %v696_v4 = vshrl.u32 %v608_v63, 16 }
  0x19   : > { %7410 = vmatpush.bf16.msra.mxu3 %v7109_v11  ;;  %1173 = vmatpush.bf16.msra.mxu0 %v7109_v11  ;;  %v516_v17 = vpack.c.bf16 %v484_v14, %v484_v14  ;;  %v517_v18 = vpack.c.bf16 %v485_v15, %v485_v15  ;;  %280 = vst [vmem:[#allocation2 + $0x28] sm:$0xf] %v7446_v1  ;;  %v493_v59 = vmax.f32 %v7607_v53, 0.0  ;;  %v705_v5 = vshrl.u32 %v609_v0, 16  ;;  %v7152_v47 = vld [vmem:[%s8977_s1 + $0xf8] sm:$0xff] }
  0x1a   : > { %281 = vst [vmem:[#allocation2 + $0x2c] sm:$0xf] %v7446_v1  ;;  %v500_v2 = vmax.f32 %v7613_v55, 0.0  ;;  %v501_v7 = vmax.f32 %v7617_v56, 0.0  ;;  %v7275_v11 = vunpack.c.l.bf16 %v7380_v62  ;;  %v691_v14 = vshrl.u32 %v607_v9, 16  ;;  %v7136_v48 = vld [vmem:[%s8977_s1 + $0x78] sm:$0xff] }
  0x1b   : > { %549 = vst [vmem:[#allocation2 + $0x44] sm:$0xf] %v516_v17  ;;  %v698_v15 = vrot.slane %v696_v4, 7  ;;  %v419_v17 = vmul.f32 %v7512_v3, %v7244_v61  ;;  %v708_v20 = vshll.u32 %v609_v0, 16  ;;  %v7651_v43 = vpack.c.bf16 %v492_v58, %v492_v58  ;;  %v7176_v51 = vld [vmem:[%s8977_s1 + $0x138] sm:$0xff]  ;;  %v7143_v58 = vld [vmem:[%s8977_s1 + $0xb0] sm:$0xff] }
  0x1c   : > { %7411 = vmatpush.bf16.msra.mxu1 %v7108_v16  ;;  %7412 = vmatpush.bf16.msra.mxu2 %v7108_v16  ;;  %550 = vst [vmem:[#allocation2 + $0x48] sm:$0xf] %v517_v18  ;;  %v699_v18 = vshll.u32 %v608_v63, 16  ;;  %v7653_v44 = vpack.c.bf16 %v493_v59, %v493_v59  ;;  %v7655_v45 = vpack.c.bf16 %v500_v2, %v500_v2  ;;  %v7151_v59 = vld [vmem:[%s8977_s1 + $0xf0] sm:$0xff]  ;;  %v7373_v2 = vld [vmem:[%s7507_s30 + $0x28] sm:$0xff]  }
  0x1d   : > { %7413 = vmatpush.bf16.msra.mxu3 %v7108_v16  ;;  %1174 = vmatpush.bf16.msra.mxu0 %v7108_v16  ;;  %282 = vst [vmem:[#allocation2 + $0x30] sm:$0xf] %v7446_v1  ;;  %v418_v16 = vmul.f32 %v7512_v3, %v7243_v60  ;;  %v7677_v56 = vpack.c.bf16 %v501_v7, %v501_v7  ;;  %v7135_v61 = vld [vmem:[%s8977_s1 + $0x70] sm:$0xff]  ;;  %v7377_v4 = vld [vmem:[%s7507_s30 + $0x48] sm:$0xff]   ;;  %v7248_v7 = vunpack.c.h.bf16 %v7373_v2 }
  0x1e   : > { %283 = vst [vmem:[#allocation2 + $0x34] sm:$0xf] %v7446_v1  ;;  %v7263_v9 = vunpack.c.l.bf16 %v7377_v4 }
  0x1f   : > { %284 = vst [vmem:[#allocation2 + $0x38] sm:$0xf] %v7446_v1 }
  0x20   : > { %7414 = vmatpush.bf16.msra.mxu1 %v7107_v19  ;;  %7415 = vmatpush.bf16.msra.mxu2 %v7107_v19  ;;  %285 = vst [vmem:[#allocation2 + $0x3c] sm:$0xf] %v7446_v1 }
  0x21   : > { %7416 = vmatpush.bf16.msra.mxu3 %v7107_v19  ;;  %1175 = vmatpush.bf16.msra.mxu0 %v7107_v19  ;;  %289 = vst [vmem:[#allocation2 + $0x4c] sm:$0xf] %v7446_v1  ;;  %v707_v19 = vrot.slane %v705_v5, 7 }
  0x22   : > { %v620_v23 = vld [vmem:[#allocation2 + $0x44] sm:$0xf]  ;;  %290 = vst [vmem:[#allocation2 + $0x50] sm:$0xf] %v7446_v1 }
  0x23   : > { %v621_v24 = vld [vmem:[#allocation2 + $0x48] sm:$0xf]  ;;  %v784_v25 = vshrl.u32 %v620_v23, 16  ;;  %v787_v26 = vshll.u32 %v620_v23, 16  ;;  %291 = vst [vmem:[#allocation2 + $0x54] sm:$0xf] %v7446_v1 }
  0x24   : > { %7417 = vmatpush.bf16.msra.mxu1 %v7106_v21  ;;  %7418 = vmatpush.bf16.msra.mxu2 %v7106_v21  ;;  %v793_v28 = vshrl.u32 %v621_v24, 16  ;;  %v796_v29 = vshll.u32 %v621_v24, 16  ;;  %292 = vst [vmem:[#allocation2 + $0x58] sm:$0xf] %v7446_v1  ;;  %v6445_v23 = vrot.slane %v691_v14, 11  ;;  %v703_v24 = vrot.slane %v698_v15, 4 }
  0x25   : > { %7419 = vmatpush.bf16.msra.mxu3 %v7106_v21  ;;  %1176 = vmatpush.bf16.msra.mxu0 %v7106_v21  ;;  %v786_v31 = vrot.slane %v784_v25, 7  ;;  %293 = vst [vmem:[#allocation2 + $0x5c] sm:$0xf] %v7446_v1  ;;  %v7226_v21 = vld [vmem:[%s7507_s30] sm:$0xff]   ;;  %v426_v25 = vmul.f32 %v7512_v3, %v7259_v6  ;;  %v7247_v6 = vunpack.c.l.bf16 %v7373_v2  ;;  %v7264_v14 = vunpack.c.h.bf16 %v7377_v4 }
  0x26   : > { %v795_v33 = vrot.slane %v793_v28, 7  ;;  %294 = vst [vmem:[#allocation2 + $0x60] sm:$0xf] %v7446_v1  ;;  %v710_v28 = vor.u32 %v708_v20, %v707_v19  ;;  %v7228_v42 = vunpack.c.h.bf16 %v7226_v21 }
  0x27   : > { %v789_v34 = vor.u32 %v787_v26, %v786_v31  ;;  %v791_v35 = vrot.slane %v786_v31, 4  ;;  %295 = vst [vmem:[#allocation2 + $0x64] sm:$0xf] %v7446_v1  ;;  %v455_v31 = vadd.f32 %v7523_v8, %v419_v17  ;;  %v421_v17 = vmul.f32 %v7512_v3, %v7248_v7  ;;  %v7141_v7 = vld [vmem:[%s8977_s1 + $0xa0] sm:$0xff] }
  0x28   : > { %7420 = vmatpush.bf16.msra.mxu1 %v7105_v27  ;;  %7421 = vmatpush.bf16.msra.mxu2 %v7105_v27  ;;  %v798_v36 = vor.u32 %v796_v29, %v795_v33  ;;  %296 = vst [vmem:[#allocation2 + $0x68] sm:$0xf] %v7446_v1  ;;  %v427_v29 = vmul.f32 %v7512_v3, %v7260_v10  ;;  %v7381_v10 = vld [vmem:[%s7507_s30 + $0x68] sm:$0xff]  }
  0x29   : > { %7422 = vmatpush.bf16.msra.mxu3 %v7105_v27  ;;  %1177 = vmatpush.bf16.msra.mxu0 %v7105_v27  ;;  %v790_v37 = vsel %vm7565_vm2, %v6449_v30, %v789_v34  ;;  %297 = vst [vmem:[#allocation2 + $0x6c] sm:$0xf] %v7446_v1  ;;  %v701_v27 = vor.u32 %v699_v18, %v698_v15  ;;  %v487_v53 = vmax.f32 %v455_v31, 0.0  ;;  %v622_v15 = vld [vmem:[#allocation2 + $0x50] sm:$0x8] }
  0x2a   : > { %v799_v38 = vsel %vm7565_vm2, %v791_v35, %v798_v36  ;;  %v1066_v39 = vunpack.c.l.b16 %v790_v37  ;;  %298 = vst [vmem:[#allocation2 + $0x70] sm:$0xf] %v7446_v1  ;;  %v454_v30 = vadd.f32 %v7523_v8, %v418_v16  ;;  %v434_v33 = vmul.f32 %v7512_v3, %v7275_v11 }
  0x2b   : > { %v1067_v40 = vunpack.c.l.b16 %v799_v38  ;;  %299 = vst [vmem:[#allocation2 + $0x74] sm:$0xf] %v7446_v1  ;;  %v435_v34 = vmul.f32 %v7512_v3, %v7276_v12  ;;  %v702_v36 = vsel %vm7565_vm2, %v6445_v23, %v701_v27  ;;  %v711_v37 = vsel %vm7565_vm2, %v703_v24, %v710_v28  ;;  %v7369_v24 = vld [vmem:[%s7507_s30 + $0x8] sm:$0xff]  }
  0x2c   : > { %300 = vst [vmem:[#allocation2 + $0x78] sm:$0xf] %v7446_v1  ;;  %v7227_v38 = vunpack.c.l.bf16 %v7226_v21  ;;  %v463_v49 = vadd.f32 %v7523_v8, %v427_v29  ;;  %v486_v52 = vmax.f32 %v454_v30, 0.0  ;;  %v7672_v54 = vadd.f32 %v7523_v8, %v434_v33  ;;  %2297 = vmatpush.bf16.msrb.mxu2 %v7144_v46  ;;  %1548 = vmatpush.bf16.msrb.mxu1 %v7136_v48  ;;  %v610_v29 = vld [vmem:[#allocation2 + $0x10] sm:$0x8] }
  0x2d   : > { %v1094_v41 = vpack.c.b16 %v1067_v40, %v1066_v39  ;;  %301 = vst [vmem:[#allocation2 + $0x7c] sm:$0xf] %v7446_v1  ;;  %v1058_v39 = vunpack.c.l.b16 %v702_v36  ;;  %v1059_v40 = vunpack.c.l.b16 %v711_v37  ;;  %3011 = vmatpush.bf16.msrb.mxu3 %v7152_v47  ;;  %v471_v60 = vadd.f32 %v7523_v8, %v435_v34  ;;  %3389 = vmatpush.bf16.msrb.mxu0 %v7176_v51 }
  0x2e   : > { %302 = vst [vmem:[#allocation2 + $0x80] sm:$0xf] %v7446_v1  ;;  %v410_v63 = vmul.f32 %v7512_v3, %v7227_v38  ;;  %v411_v0 = vmul.f32 %v7512_v3, %v7228_v42  ;;  %v495_v5 = vmax.f32 %v463_v49, 0.0  ;;  %v518_v11 = vpack.c.bf16 %v486_v52, %v486_v52 }
  0x2f   : > { %1198 = vmatmul.bf16.vlgmr.msra.gmra.mxu1 %v1094_v41  ;;  %303 = vst [vmem:[#allocation2 + $0x84] sm:$0xf] %v7446_v1  ;;  %v462_v41 = vadd.f32 %v7523_v8, %v426_v25  ;;  %v1090_v50 = vpack.c.b16 %v1059_v40, %v1058_v39  ;;  %v519_v12 = vpack.c.bf16 %v487_v53, %v487_v53  ;;  %v503_v21 = vmax.f32 %v471_v60, 0.0 }
  0x30   : > { %304 = vst [vmem:[#allocation2 + $0x88] sm:$0xf] %v7446_v1  ;;  %2298 = vmatpush.bf16.msrb.mxu2 %v7143_v58  ;;  %v420_v16 = vmul.f32 %v7512_v3, %v7247_v6  ;;  %v428_v18 = vmul.f32 %v7512_v3, %v7263_v9  ;;  %1549 = vmatpush.bf16.msrb.mxu1 %v7135_v61  ;;  %v7279_v23 = vunpack.c.l.bf16 %v7381_v10  ;;  %v7280_v30 = vunpack.c.h.bf16 %v7381_v10  ;;  %v7134_v6 = vld [vmem:[%s8977_s1 + $0x68] sm:$0xff] }
  0x31   : > { %305 = vst [vmem:[#allocation2 + $0x8c] sm:$0xf] %v7446_v1  ;;  %1178 = vmatmul.bf16.vlgmr.msra.gmra.mxu0 %v1090_v50  ;;  %v494_v62 = vmax.f32 %v462_v41, 0.0  ;;  %3012 = vmatpush.bf16.msrb.mxu3 %v7151_v59  ;;  %v527_v25 = vpack.c.bf16 %v495_v5, %v495_v5  ;;  %v446_v27 = vadd.f32 %v7523_v8, %v410_v63  ;;  %v801_v31 = vshrl.u32 %v622_v15, 16  ;;  %v7150_v63 = vld [vmem:[%s8977_s1 + $0xe8] sm:$0xff] }
  0x32   : > { %306 = vst [vmem:[#allocation2 + $0x90] sm:$0xf] %v7446_v1  ;;  %v447_v28 = vadd.f32 %v7523_v8, %v411_v0  ;;  %v456_v33 = vadd.f32 %v7523_v8, %v420_v16  ;;  %v457_v34 = vadd.f32 %v7523_v8, %v421_v17  ;;  %v464_v37 = vadd.f32 %v7523_v8, %v428_v18  ;;  %v7175_v0 = vld [vmem:[%s8977_s1 + $0x130] sm:$0xff] }
  0x33   : > { %307 = vst [vmem:[#allocation2 + $0x94] sm:$0xf] %v7446_v1  ;;  %v526_v19 = vpack.c.bf16 %v494_v62, %v494_v62  ;;  %v437_v39 = vmul.f32 %v7512_v3, %v7280_v30  ;;  %v7231_v42 = vunpack.c.l.bf16 %v7369_v24  ;;  %v535_v47 = vpack.c.bf16 %v503_v21, %v503_v21  ;;  %3390 = vmatpush.bf16.msrb.mxu0 %v7175_v0 }
  0x34   : > { %308 = vst [vmem:[#allocation2 + $0x98] sm:$0xf] %v7446_v1  ;;  %v478_v48 = vmax.f32 %v446_v27, 0.0  ;;  %v479_v49 = vmax.f32 %v447_v28, 0.0  ;;  %v488_v50 = vmax.f32 %v456_v33, 0.0  ;;  %v489_v51 = vmax.f32 %v457_v34, 0.0  ;;  %1550 = vmatpush.bf16.msrb.mxu1 %v7134_v6 }
  0x35   : > { %309 = vst [vmem:[#allocation2 + $0x9c] sm:$0xf] %v7446_v1  ;;  %v631_v13 = vld [vmem:[#allocation2 + $0x80] sm:$0x8]  ;;  %v7232_v52 = vunpack.c.h.bf16 %v7369_v24  ;;  %v412_v61 = vmul.f32 %v7512_v3, %v7231_v42  ;;  %3013 = vmatpush.bf16.msrb.mxu3 %v7150_v63 }
  0x36   : > { %310 = vst [vmem:[#allocation2 + $0xa0] sm:$0xf] %v7446_v1  ;;  %v867_v26 = vshrl.u32 %v631_v13, 16  ;;  %v502_v13 = vmax.f32 %v7672_v54, 0.0  ;;  %v496_v54 = vmax.f32 %v464_v37, 0.0  ;;  %v510_v62 = vpack.c.bf16 %v478_v48, %v478_v48 }
  0x37   : > { %311 = vst [vmem:[#allocation2 + $0xa4] sm:$0xf] %v7446_v1  ;;  %v511_v5 = vpack.c.bf16 %v479_v49, %v479_v49  ;;  %v520_v9 = vpack.c.bf16 %v488_v50, %v488_v50  ;;  %v7747_v10 = vpack.c.bf16 %v489_v51, %v489_v51 }
  0x38   : > { %312 = vst [vmem:[#allocation2 + $0xa8] sm:$0xf] %v7446_v1  ;;  %v7675_v55 = vrot.slane %v867_v26, 11  ;;  %v534_v46 = vpack.c.bf16 %v502_v13, %v502_v13  ;;  %v7750_v15 = vpack.c.bf16 %v496_v54, %v496_v54 }
  0x39   : > { %313 = vst [vmem:[#allocation2 + $0xac] sm:$0xf] %v7446_v1  ;;  %v634_v20 = vld [vmem:[#allocation2 + $0x90] sm:$0x8] }
  0x3a   : > { %314 = vst [vmem:[#allocation2 + $0xb0] sm:$0xf] %v7446_v1  ;;  %v889_v36 = vshrl.u32 %v634_v20, 16 }
  0x3b   : > { %315 = vst [vmem:[#allocation2 + $0xb4] sm:$0xf] %v7446_v1 }
  0x3c   : > { %316 = vst [vmem:[#allocation2 + $0xb8] sm:$0xf] %v7446_v1  ;;  %v7725_v53 = vrot.slane %v889_v36, 11 }
  0x3d   : > { %317 = vst [vmem:[#allocation2 + $0xbc] sm:$0xf] %v7446_v1 }
  0x3e   : > { %318 = vst [vmem:[#allocation2 + $0xc0] sm:$0xf] %v7446_v1 }
  0x3f   : > { %319 = vst [vmem:[#allocation2 + $0xc4] sm:$0xf] %v7446_v1 }
  0x40   : > { %320 = vst [vmem:[#allocation2 + $0xc8] sm:$0xf] %v7446_v1 }
  0x41   : > { %321 = vst [vmem:[#allocation2 + $0xcc] sm:$0xf] %v7446_v1 }
  0x42   : > { %322 = vst [vmem:[#allocation2 + $0xd0] sm:$0xf] %v7446_v1 }
  0x43   : > { %323 = vst [vmem:[#allocation2 + $0xd4] sm:$0xf] %v7446_v1 }
  0x44   : > { %324 = vst [vmem:[#allocation2 + $0xd8] sm:$0xf] %v7446_v1 }
  0x45   : > { %325 = vst [vmem:[#allocation2 + $0xdc] sm:$0xf] %v7446_v1  ;;  %v643_v22 = vld [vmem:[#allocation2 + $0xc0] sm:$0x8] }
  0x46   : > { %326 = vst [vmem:[#allocation2 + $0xe0] sm:$0xf] %v7446_v1  ;;  %v955_v35 = vshrl.u32 %v643_v22, 16  ;;  %v429_v22 = vmul.f32 %v7512_v3, %v7264_v14 }
  0x47   : > { %327 = vst [vmem:[#allocation2 + $0xe4] sm:$0xf] %v7446_v1 }
  0x48   : > { %328 = vst [vmem:[#allocation2 + $0xe8] sm:$0xf] %v7446_v1  ;;  %v7679_v57 = vrot.slane %v955_v35, 11  ;;  %v436_v35 = vmul.f32 %v7512_v3, %v7279_v23  ;;  %v465_v38 = vadd.f32 %v7523_v8, %v429_v22 }
  0x49   : > { %329 = vst [vmem:[#allocation2 + $0xec] sm:$0xf] %v7446_v1  ;;  %v646_v26 = vld [vmem:[#allocation2 + $0xd0] sm:$0x8] }
  0x4a   : > { %330 = vst [vmem:[#allocation2 + $0xf0] sm:$0xf] %v7446_v1  ;;  %v977_v40 = vshrl.u32 %v646_v26, 16  ;;  %v472_v41 = vadd.f32 %v7523_v8, %v436_v35  ;;  %v497_v58 = vmax.f32 %v465_v38, 0.0 }
  0x4b   : > { %331 = vst [vmem:[#allocation2 + $0xf4] sm:$0xf] %v7446_v1 }
  0x4c   : > { %332 = vst [vmem:[#allocation2 + $0xf8] sm:$0xf] %v7446_v1  ;;  %v504_v60 = vmax.f32 %v472_v41, 0.0  ;;  %v7752_v16 = vpack.c.bf16 %v497_v58, %v497_v58 }
  0x4d   : > { %333 = vst [vmem:[#allocation2 + $0xfc] sm:$0xf] %v7446_v1 }
  0x4e   : > { %334 = vst [vmem:[#allocation2 + $0x100] sm:$0xf] %v7446_v1  ;;  %v7754_v20 = vpack.c.bf16 %v504_v60, %v504_v60 }
  0x4f   : > { %335 = vst [vmem:[#allocation2 + $0x104] sm:$0xf] %v7446_v1 }
  0x50   : > { %336 = vst [vmem:[#allocation2 + $0x108] sm:$0xf] %v7446_v1 }
  0x51   : > { %337 = vst [vmem:[#allocation2 + $0x10c] sm:$0xf] %v7446_v1 }
  0x52   : > { %338 = vst [vmem:[#allocation2 + $0x110] sm:$0xf] %v7446_v1 }
  0x53   : > { %339 = vst [vmem:[#allocation2 + $0x114] sm:$0xf] %v7446_v1 }
  0x54   : > { %340 = vst [vmem:[#allocation2 + $0x118] sm:$0xf] %v7446_v1 }
  0x55   : > { %341 = vst [vmem:[#allocation2 + $0x11c] sm:$0xf] %v7446_v1  ;;  %v713_v1 = vshrl.u32 %v610_v29, 16 }
  0x56   : > { %557 = vst [vmem:[#allocation2 + $0x84] sm:$0xf] %v7651_v43  ;;  %v473_v43 = vadd.f32 %v7523_v8, %v437_v39  ;;  %v7133_v39 = vld [vmem:[%s8977_s1 + $0x60] sm:$0xff] }
  0x57   : > { %558 = vst [vmem:[#allocation2 + $0x88] sm:$0xf] %v7653_v44  ;;  %v7723_v44 = vrot.slane %v801_v31, 11  ;;  %v7729_v59 = vrot.slane %v713_v1, 11  ;;  %v7174_v31 = vld [vmem:[%s8977_s1 + $0x128] sm:$0xff]  ;;  %1551 = vmatpush.bf16.msrb.mxu1 %v7133_v39 }
  0x58   : > { %565 = vst [vmem:[#allocation2 + $0xc4] sm:$0xf] %v7655_v45  ;;  %v7727_v45 = vrot.slane %v977_v40, 11  ;;  %v505_v2 = vmax.f32 %v473_v43, 0.0  ;;  %3391 = vmatpush.bf16.msrb.mxu0 %v7174_v31 }
  0x59   : > { %566 = vst [vmem:[#allocation2 + $0xc8] sm:$0xf] %v7677_v56  ;;  %v7142_v56 = vld [vmem:[%s8977_s1 + $0xa8] sm:$0xff] }
  0x5a   : > { %551 = vst [vmem:[#allocation2 + $0x54] sm:$0xf] %v518_v11  ;;  %v413_v11 = vmul.f32 %v7512_v3, %v7232_v52  ;;  %2299 = vmatpush.bf16.msrb.mxu2 %v7142_v56  ;;  %v7757_v3 = vadd.f32 %v7523_v8, %v412_v61  ;;  %v7762_v26 = vpack.c.bf16 %v505_v2, %v505_v2 }
  0x5b   : > { %552 = vst [vmem:[#allocation2 + $0x58] sm:$0xf] %v519_v12 }
  0x5c   : > { %559 = vst [vmem:[#allocation2 + $0x94] sm:$0xf] %v526_v19  ;;  %v7768_v33 = vadd.f32 %v7523_v8, %v413_v11 }
  0x5d   : > { %v632_v4 = vld [vmem:[#allocation2 + $0x84] sm:$0xf]  ;;  %560 = vst [vmem:[#allocation2 + $0x98] sm:$0xf] %v527_v25 }
  0x5e   : > { %v633_v12 = vld [vmem:[#allocation2 + $0x88] sm:$0xf]  ;;  %v872_v13 = vshrl.u32 %v632_v4, 16  ;;  %v875_v14 = vshll.u32 %v632_v4, 16  ;;  %567 = vst [vmem:[#allocation2 + $0xd4] sm:$0xf] %v534_v46  ;;  %2300 = vmatpush.bf16.msrb.mxu2 %v7141_v7 }
  0x5f   : > { %v881_v17 = vshrl.u32 %v633_v12, 16  ;;  %v884_v18 = vshll.u32 %v633_v12, 16  ;;  %v644_v19 = vld [vmem:[#allocation2 + $0xc4] sm:$0xf]  ;;  %568 = vst [vmem:[#allocation2 + $0xd8] sm:$0xf] %v535_v47 }
  0x60   : > { %v874_v21 = vrot.slane %v872_v13, 7  ;;  %v645_v22 = vld [vmem:[#allocation2 + $0xc8] sm:$0xf]  ;;  %v960_v23 = vshrl.u32 %v644_v19, 16  ;;  %v963_v24 = vshll.u32 %v644_v19, 16  ;;  %v7149_v25 = vld [vmem:[%s8977_s1 + $0xe0] sm:$0xff] }
  0x61   : > { %v883_v27 = vrot.slane %v881_v17, 7  ;;  %v969_v28 = vshrl.u32 %v645_v22, 16  ;;  %v972_v29 = vshll.u32 %v645_v22, 16  ;;  %v623_v30 = vld [vmem:[#allocation2 + $0x54] sm:$0xf]  ;;  %3014 = vmatpush.bf16.msrb.mxu3 %v7149_v25 }
  0x62   : > { %v877_v34 = vor.u32 %v875_v14, %v874_v21  ;;  %v879_v35 = vrot.slane %v874_v21, 4  ;;  %v962_v36 = vrot.slane %v960_v23, 7  ;;  %v624_v37 = vld [vmem:[#allocation2 + $0x58] sm:$0xf]  ;;  %v806_v38 = vshrl.u32 %v623_v30, 16 }
  0x63   : > { %v886_v40 = vor.u32 %v884_v18, %v883_v27  ;;  %v971_v1 = vrot.slane %v969_v28, 7  ;;  %v809_v41 = vshll.u32 %v623_v30, 16  ;;  %v815_v42 = vshrl.u32 %v624_v37, 16  ;;  %v635_v43 = vld [vmem:[#allocation2 + $0x94] sm:$0xf]  ;;  %v7140_v28 = vld [vmem:[%s8977_s1 + $0x98] sm:$0xff] }
  0x64   : > { %v878_v8 = vsel %vm7565_vm2, %v7675_v55, %v877_v34  ;;  %v965_v46 = vor.u32 %v963_v24, %v962_v36  ;;  %v967_v47 = vrot.slane %v962_v36, 4  ;;  %v808_v48 = vrot.slane %v806_v38, 7  ;;  %543 = vst [vmem:[#allocation2 + $0x14] sm:$0xf] %v510_v62  ;;  %v636_v61 = vld [vmem:[#allocation2 + $0x98] sm:$0xf]  ;;  %2301 = vmatpush.bf16.msrb.mxu2 %v7140_v28 }
  0x65   : > { %v887_v49 = vsel %vm7565_vm2, %v879_v35, %v886_v40  ;;  %v1074_v50 = vunpack.c.l.b16 %v878_v8  ;;  %v974_v51 = vor.u32 %v972_v29, %v971_v1  ;;  %v817_v52 = vrot.slane %v815_v42, 7  ;;  %544 = vst [vmem:[#allocation2 + $0x18] sm:$0xf] %v511_v5  ;;  %v647_v2 = vld [vmem:[#allocation2 + $0xd4] sm:$0xf] }
  0x66   : > { %v1075_v54 = vunpack.c.l.b16 %v887_v49  ;;  %v966_v58 = vsel %vm7565_vm2, %v7679_v57, %v965_v46  ;;  %v811_v60 = vor.u32 %v809_v41, %v808_v48  ;;  %v813_v55 = vrot.slane %v808_v48, 4  ;;  %553 = vst [vmem:[#allocation2 + $0x64] sm:$0xf] %v520_v9  ;;  %v648_v13 = vld [vmem:[#allocation2 + $0xd8] sm:$0xf] }
  0x67   : > { %v975_v56 = vsel %vm7565_vm2, %v967_v47, %v974_v51  ;;  %v1082_v62 = vunpack.c.l.b16 %v966_v58  ;;  %v818_v63 = vshll.u32 %v624_v37, 16  ;;  %v894_v0 = vshrl.u32 %v635_v43, 16  ;;  %554 = vst [vmem:[#allocation2 + $0x68] sm:$0xf] %v7747_v10  ;;  %v625_v34 = vld [vmem:[#allocation2 + $0x60] sm:$0x8] }
  0x68   : > { %v1098_v4 = vpack.c.b16 %v1075_v54, %v1074_v50  ;;  %v1083_v5 = vunpack.c.l.b16 %v975_v56  ;;  %v812_v6 = vsel %vm7565_vm2, %v7723_v44, %v811_v60  ;;  %v897_v57 = vshll.u32 %v635_v43, 16  ;;  %561 = vst [vmem:[#allocation2 + $0xa4] sm:$0xf] %v7750_v15  ;;  %v637_v51 = vld [vmem:[#allocation2 + $0xa0] sm:$0x8] }
  0x69   : > { %v820_v7 = vor.u32 %v818_v63, %v817_v52  ;;  %v1068_v9 = vunpack.c.l.b16 %v812_v6  ;;  %v896_v11 = vrot.slane %v894_v0, 7  ;;  %v903_v12 = vshrl.u32 %v636_v61, 16  ;;  %562 = vst [vmem:[#allocation2 + $0xa8] sm:$0xf] %v7752_v16 }
  0x6a   : > { %1218 = vmatmul.bf16.vlgmr.msra.gmra.mxu2 %v1098_v4  ;;  %v1102_v14 = vpack.c.b16 %v1083_v5, %v1082_v62  ;;  %v906_v17 = vshll.u32 %v636_v61, 16  ;;  %v982_v10 = vshrl.u32 %v647_v2, 16  ;;  %v985_v18 = vshll.u32 %v647_v2, 16  ;;  %569 = vst [vmem:[#allocation2 + $0xe4] sm:$0xf] %v7754_v20 }
  0x6b   : > { %v821_v44 = vsel %vm7565_vm2, %v813_v55, %v820_v7  ;;  %v899_v19 = vor.u32 %v897_v57, %v896_v11  ;;  %v901_v21 = vrot.slane %v896_v11, 4  ;;  %v905_v15 = vrot.slane %v903_v12, 7  ;;  %v611_v22 = vld [vmem:[#allocation2 + $0x14] sm:$0xf]  ;;  %570 = vst [vmem:[#allocation2 + $0xe8] sm:$0xf] %v7762_v26 }
  0x6c   : > { %1238 = vmatmul.bf16.vlgmr.msra.gmra.mxu3 %v1102_v14  ;;  %v1069_v23 = vunpack.c.l.b16 %v821_v44  ;;  %v984_v24 = vrot.slane %v982_v10, 7  ;;  %v991_v16 = vshrl.u32 %v648_v13, 16  ;;  %v994_v25 = vshll.u32 %v648_v13, 16  ;;  %v612_v27 = vld [vmem:[#allocation2 + $0x18] sm:$0xf]  ;;  %v7173_v10 = vld [vmem:[%s8977_s1 + $0x120] sm:$0xff] }
  0x6d   : > { %v900_v20 = vsel %vm7565_vm2, %v7725_v53, %v899_v19  ;;  %v908_v29 = vor.u32 %v906_v17, %v905_v15  ;;  %v718_v30 = vshrl.u32 %v611_v22, 16  ;;  %v721_v31 = vshll.u32 %v611_v22, 16  ;;  %v626_v41 = vld [vmem:[#allocation2 + $0x64] sm:$0xf]  ;;  %v649_v11 = vld [vmem:[#allocation2 + $0xe0] sm:$0x8]  ;;  %3392 = vmatpush.bf16.msrb.mxu0 %v7173_v10 }
  0x6e   : > { %v1095_v35 = vpack.c.b16 %v1069_v23, %v1068_v9  ;;  %v1076_v26 = vunpack.c.l.b16 %v900_v20  ;;  %v987_v36 = vor.u32 %v985_v18, %v984_v24  ;;  %v989_v37 = vrot.slane %v984_v24, 4  ;;  %v627_v46 = vld [vmem:[#allocation2 + $0x68] sm:$0xf]  ;;  %v7132_v18 = vld [vmem:[%s8977_s1 + $0x58] sm:$0xff]  ;;  %v7139_v23 = vld [vmem:[%s8977_s1 + $0x90] sm:$0xff] }
  0x6f   : > { %v909_v38 = vsel %vm7565_vm2, %v901_v21, %v908_v29  ;;  %v993_v39 = vrot.slane %v991_v16, 7  ;;  %v720_v40 = vrot.slane %v718_v30, 7  ;;  %v727_v1 = vshrl.u32 %v612_v27, 16  ;;  %v638_v55 = vld [vmem:[#allocation2 + $0xa4] sm:$0xf]  ;;  %v7172_v20 = vld [vmem:[%s8977_s1 + $0x118] sm:$0xff]  ;;  %1552 = vmatpush.bf16.msrb.mxu1 %v7132_v18  ;;  %2302 = vmatpush.bf16.msrb.mxu2 %v7139_v23 }
  0x70   : > { %1203 = vmatmul.bf16.gmra.mxu1 %v1095_v35  ;;  %v1077_v42 = vunpack.c.l.b16 %v909_v38  ;;  %v988_v53 = vsel %vm7565_vm2, %v7727_v45, %v987_v36  ;;  %v730_v8 = vshll.u32 %v612_v27, 16  ;;  %v823_v47 = vshrl.u32 %v625_v34, 16  ;;  %v639_v57 = vld [vmem:[#allocation2 + $0xa8] sm:$0xf]  ;;  %v7147_v35 = vld [vmem:[%s8977_s1 + $0xd0] sm:$0xff] }
  0x71   : > { %v996_v48 = vor.u32 %v994_v25, %v993_v39  ;;  %v1084_v43 = vunpack.c.l.b16 %v988_v53  ;;  %v723_v49 = vor.u32 %v721_v31, %v720_v40  ;;  %v725_v50 = vrot.slane %v720_v40, 4  ;;  %v650_v22 = vld [vmem:[#allocation2 + $0xe4] sm:$0xf]  ;;  %v7374_v40 = vld [vmem:[%s7507_s30 + $0x30] sm:$0xff]   ;;  %3393 = vmatpush.bf16.msrb.mxu0 %v7172_v20 }
  0x72   : > { %v1099_v52 = vpack.c.b16 %v1077_v42, %v1076_v26  ;;  %v729_v54 = vrot.slane %v727_v1, 7  ;;  %v6451_v58 = vrot.slane %v823_v47, 11  ;;  %v828_v60 = vshrl.u32 %v626_v41, 16  ;;  %v651_v28 = vld [vmem:[#allocation2 + $0xe8] sm:$0xf]  ;;  %v7131_v26 = vld [vmem:[%s8977_s1 + $0x50] sm:$0xff] }
  0x73   : > { %v997_v61 = vsel %vm7565_vm2, %v989_v37, %v996_v48  ;;  %v724_v45 = vsel %vm7565_vm2, %v7729_v59, %v723_v49  ;;  %v831_v56 = vshll.u32 %v626_v41, 16  ;;  %v837_v62 = vshrl.u32 %v627_v46, 16  ;;  %v7148_v59 = vld [vmem:[%s8977_s1 + $0xd8] sm:$0xff]  ;;  %1553 = vmatpush.bf16.msrb.mxu1 %v7131_v26  ;;  %v652_v20 = vld [vmem:[#allocation2 + $0xf0] sm:$0x8] }
  0x74   : > { %v1085_v63 = vunpack.c.l.b16 %v997_v61  ;;  %v732_v0 = vor.u32 %v730_v8, %v729_v54  ;;  %v1060_v2 = vunpack.c.l.b16 %v724_v45  ;;  %v830_v4 = vrot.slane %v828_v60, 7  ;;  %3015 = vmatpush.bf16.msrb.mxu3 %v7148_v59  ;;  %v613_v8 = vld [vmem:[#allocation2 + $0x20] sm:$0x8]  ;;  %v7857_v59 = vld [vmem:[%s8979_s3] ss:$0 sm:$0xff] }
  0x75   : > { %v839_v5 = vrot.slane %v837_v62, 7  ;;  %v840_v6 = vshll.u32 %v627_v46, 16  ;;  %v911_v7 = vshrl.u32 %v637_v51, 16  ;;  %v916_v9 = vshrl.u32 %v638_v55, 16  ;;  %v628_v62 = vld [vmem:[#allocation2 + $0x70] sm:$0x8] }
  0x76   : > { %v1103_v12 = vpack.c.b16 %v1085_v63, %v1084_v43  ;;  %v733_v13 = vsel %vm7565_vm2, %v725_v50, %v732_v0  ;;  %v833_v14 = vor.u32 %v831_v56, %v830_v4  ;;  %v835_v17 = vrot.slane %v830_v4, 4  ;;  %v7378_v4 = vld [vmem:[%s7507_s30 + $0x50] sm:$0xff]  }
  0x77   : > { %v1061_v44 = vunpack.c.l.b16 %v733_v13  ;;  %v842_v19 = vor.u32 %v840_v6, %v839_v5  ;;  %v6455_v21 = vrot.slane %v911_v7, 11  ;;  %v918_v15 = vrot.slane %v916_v9, 7  ;;  %v640_v5 = vld [vmem:[#allocation2 + $0xb0] sm:$0x8]  ;;  %v7434_v7 = vld [vmem:[%s8978_s2] ss:$0 sm:$0xff] }
  0x78   : > { %v834_v24 = vsel %vm7565_vm2, %v6451_v58, %v833_v14  ;;  %v919_v16 = vshll.u32 %v638_v55, 16  ;;  %v925_v25 = vshrl.u32 %v639_v57, 16  ;;  %v928_v27 = vshll.u32 %v639_v57, 16  ;;  %3016 = vmatpush.bf16.msrb.mxu3 %v7147_v35  ;;  %v7138_v35 = vld [vmem:[%s8977_s1 + $0x88] sm:$0xff] }
  0x79   : > { %v1091_v29 = vpack.c.b16 %v1061_v44, %v1060_v2  ;;  %v843_v30 = vsel %vm7565_vm2, %v835_v17, %v842_v19  ;;  %v1070_v31 = vunpack.c.l.b16 %v834_v24  ;;  %v923_v34 = vrot.slane %v918_v15, 4  ;;  %v7370_v24 = vld [vmem:[%s7507_s30 + $0x10] sm:$0xff]   ;;  %2303 = vmatpush.bf16.msrb.mxu2 %v7138_v35 }
  0x7a   : > { %1223 = vmatmul.bf16.gmra.mxu2 %v1099_v52  ;;  %v1071_v36 = vunpack.c.l.b16 %v843_v30  ;;  %v921_v37 = vor.u32 %v919_v16, %v918_v15  ;;  %v927_v38 = vrot.slane %v925_v25, 7  ;;  %v999_v39 = vshrl.u32 %v649_v11, 16  ;;  %v7382_v11 = vld [vmem:[%s7507_s30 + $0x70] sm:$0xff]  }
  0x7b   : > { %1183 = vmatmul.bf16.gmra.mxu0 %v1091_v29  ;;  %v1004_v1 = vshrl.u32 %v650_v22, 16  ;;  %v1007_v41 = vshll.u32 %v650_v22, 16  ;;  %v1013_v42 = vshrl.u32 %v651_v28, 16  ;;  %v1016_v53 = vshll.u32 %v651_v28, 16 }
  0x7c   : > { %1243 = vmatmul.bf16.gmra.mxu3 %v1103_v12  ;;  %v1096_v46 = vpack.c.b16 %v1071_v36, %v1070_v31  ;;  %v922_v47 = vsel %vm7565_vm2, %v6455_v21, %v921_v37  ;;  %v930_v48 = vor.u32 %v928_v27, %v927_v38  ;;  %v6459_v43 = vrot.slane %v999_v39, 11 }
  0x7d   : > { %v1006_v49 = vrot.slane %v1004_v1, 7  ;;  %v1015_v50 = vrot.slane %v1013_v42, 7  ;;  %v480_v51 = vmax.f32 %v7757_v3, 0.0  ;;  %v481_v54 = vmax.f32 %v7768_v33, 0.0 }
  0x7e   : > { %v931_v52 = vsel %vm7565_vm2, %v923_v34, %v930_v48  ;;  %v735_v58 = vshrl.u32 %v613_v8, 16  ;;  %v7251_v60 = vunpack.c.l.bf16 %v7374_v40  ;;  %v1078_v55 = vunpack.c.l.b16 %v922_v47 }
  0x7f   : > { %v1009_v61 = vor.u32 %v1007_v41, %v1006_v49  ;;  %v1011_v45 = vrot.slane %v1006_v49, 4  ;;  %v1018_v56 = vor.u32 %v1016_v53, %v1015_v50  ;;  %v1079_v63 = vunpack.c.l.b16 %v931_v52 }
  0x80   : > { %1208 = vmatmul.bf16.gmra.mxu1 %v1096_v46  ;;  %v512_v0 = vpack.c.bf16 %v480_v51, %v480_v51  ;;  %v513_v3 = vpack.c.bf16 %v481_v54, %v481_v54  ;;  %v7252_v2 = vunpack.c.h.bf16 %v7374_v40  ;;  %v7848_v57 = vrot.slane %v735_v58, 11 }
  0x81   : > { %v1010_v6 = vsel %vm7565_vm2, %v6459_v43, %v1009_v61  ;;  %v1019_v33 = vsel %vm7565_vm2, %v1011_v45, %v1018_v56  ;;  %v422_v9 = vmul.f32 %v7434_v7, %v7251_v60  ;;  %v845_v17 = vshrl.u32 %v628_v62, 16  ;;  %v7146_v60 = vld [vmem:[%s8977_s1 + $0xc8] sm:$0xff] }
  0x82   : > { %v1086_v12 = vunpack.c.l.b16 %v1010_v6  ;;  %v1087_v13 = vunpack.c.l.b16 %v1019_v33  ;;  %545 = vst [vmem:[#allocation2 + $0x24] sm:$0xf] %v512_v0  ;;  %v423_v14 = vmul.f32 %v7434_v7, %v7252_v2  ;;  %v7267_v18 = vunpack.c.l.bf16 %v7378_v4  ;;  %v7130_v61 = vld [vmem:[%s8977_s1 + $0x48] sm:$0xff]  ;;  %v7882_v0 = vld [vmem:[#allocation2 + $0x30] sm:$0x8]  ;;  %3017 = vmatpush.bf16.msrb.mxu3 %v7146_v60  ;;  %v7145_v6 = vld [vmem:[%s8977_s1 + $0xc0] sm:$0xff] }
  0x83   : > { %546 = vst [vmem:[#allocation2 + $0x28] sm:$0xf] %v513_v3  ;;  %v458_v10 = vadd.f32 %v7857_v59, %v422_v9  ;;  %v7268_v44 = vunpack.c.h.bf16 %v7378_v4  ;;  %v933_v19 = vshrl.u32 %v640_v5, 16  ;;  %v1100_v21 = vpack.c.b16 %v1079_v63, %v1078_v55  ;;  %v7171_v55 = vld [vmem:[%s8977_s1 + $0x110] sm:$0xff]  ;;  %v7137_v3 = vld [vmem:[%s8977_s1 + $0x80] sm:$0xff]  ;;  %v7170_v33 = vld [vmem:[%s8977_s1 + $0x108] sm:$0xff]  ;;  %1554 = vmatpush.bf16.msrb.mxu1 %v7130_v61 }
  0x84   : > { %v1104_v15 = vpack.c.b16 %v1087_v13, %v1086_v12  ;;  %v459_v22 = vadd.f32 %v7857_v59, %v423_v14  ;;  %v7283_v23 = vunpack.c.l.bf16 %v7382_v11  ;;  %v7862_v25 = vrot.slane %v845_v17, 11  ;;  %3394 = vmatpush.bf16.msrb.mxu0 %v7171_v55  ;;  %v7129_v13 = vld [vmem:[%s8977_s1 + $0x40] sm:$0xff]  ;;  %2304 = vmatpush.bf16.msrb.mxu2 %v7137_v3  ;;  %v1702_v61 = vld [vmem:[#allocation2 + $0x8] sm:$0xf] }
  0x85   : > { %v490_v16 = vmax.f32 %v458_v10, 0.0  ;;  %v430_v27 = vmul.f32 %v7434_v7, %v7267_v18  ;;  %v431_v28 = vmul.f32 %v7434_v7, %v7268_v44  ;;  %v7864_v30 = vrot.slane %v933_v19, 11  ;;  %v7169_v44 = vld [vmem:[%s8977_s1 + $0x100] sm:$0xff] }
  0x86   : > { %v491_v29 = vmax.f32 %v459_v22, 0.0  ;;  %v7284_v31 = vunpack.c.h.bf16 %v7382_v11  ;;  %v438_v34 = vmul.f32 %v7434_v7, %v7283_v23  ;;  %v7235_v38 = vunpack.c.l.bf16 %v7370_v24  ;;  %3018 = vmatpush.bf16.msrb.mxu3 %v7145_v6  ;;  %v7216_v6 = vld [vmem:[%s8977_s1 + $0x1f8] sm:$0xff] }
  0x87   : > { %v522_v26 = vpack.c.bf16 %v490_v16, %v490_v16  ;;  %v466_v36 = vadd.f32 %v7857_v59, %v430_v27  ;;  %v467_v37 = vadd.f32 %v7857_v59, %v431_v28  ;;  %v1021_v41 = vshrl.u32 %v652_v20, 16  ;;  %1555 = vmatpush.bf16.msrb.mxu1 %v7129_v13 }
  0x88   : > { %v523_v39 = vpack.c.bf16 %v491_v29, %v491_v29  ;;  %v439_v40 = vmul.f32 %v7434_v7, %v7284_v31  ;;  %v474_v1 = vadd.f32 %v7857_v59, %v438_v34  ;;  %v7236_v46 = vunpack.c.h.bf16 %v7370_v24  ;;  %3395 = vmatpush.bf16.msrb.mxu0 %v7170_v33  ;;  %v7184_v33 = vld [vmem:[%s8977_s1 + $0x178] sm:$0xff] }
  0x89   : > { %v614_v42 = vld [vmem:[#allocation2 + $0x24] sm:$0xf]  ;;  %555 = vst [vmem:[#allocation2 + $0x74] sm:$0xf] %v522_v26  ;;  %v498_v53 = vmax.f32 %v466_v36, 0.0  ;;  %v499_v8 = vmax.f32 %v467_v37, 0.0  ;;  %v414_v47 = vmul.f32 %v7434_v7, %v7235_v38 }
  0x8a   : > { %1228 = vmatmul.bf16.gmra.mxu2 %v1100_v21  ;;  %v615_v48 = vld [vmem:[#allocation2 + $0x28] sm:$0xf]  ;;  %v740_v43 = vshrl.u32 %v614_v42, 16  ;;  %v743_v49 = vshll.u32 %v614_v42, 16  ;;  %556 = vst [vmem:[#allocation2 + $0x78] sm:$0xf] %v523_v39  ;;  %v475_v50 = vadd.f32 %v7857_v59, %v439_v40  ;;  %v415_v63 = vmul.f32 %v7434_v7, %v7236_v46  ;;  %5228 = vmatpush.bf16.msra.mxu3 %v7216_v6 }
  0x8b   : > { %v749_v51 = vshrl.u32 %v615_v48, 16  ;;  %v752_v52 = vshll.u32 %v615_v48, 16  ;;  %v530_v54 = vpack.c.bf16 %v498_v53, %v498_v53  ;;  %v531_v58 = vpack.c.bf16 %v499_v8, %v499_v8  ;;  %v7192_v48 = vld [vmem:[%s8977_s1 + $0x1b8] sm:$0xff]  ;;  %4135 = vmatpush.bf16.msra.mxu1 %v7184_v33 }
  0x8c   : > { %1248 = vmatmul.bf16.gmra.mxu3 %v1104_v15  ;;  %v742_v45 = vrot.slane %v740_v43, 7  ;;  %v506_v56 = vmax.f32 %v474_v1, 0.0  ;;  %v507_v62 = vmax.f32 %v475_v50, 0.0  ;;  %v7887_v4 = vrot.slane %v1021_v41, 11  ;;  %v1701_v15 = vld [vmem:[#allocation2 + $0x4] sm:$0xf]  ;;  %3396 = vmatpush.bf16.msrb.mxu0 %v7169_v44 }
  0x8d   : > { %v751_v2 = vrot.slane %v749_v51, 7  ;;  %563 = vst [vmem:[#allocation2 + $0xb4] sm:$0xf] %v530_v54  ;;  %v450_v5 = vadd.f32 %v7857_v59, %v414_v47  ;;  %v451_v17 = vadd.f32 %v7857_v59, %v415_v63  ;;  %v757_v18 = vshrl.u32 %v7882_v0, 16  ;;  %4850 = vmatpush.bf16.msra.mxu2 %v7192_v48 }
  0x8e   : > { %v745_v7 = vor.u32 %v743_v49, %v742_v45  ;;  %v747_v9 = vrot.slane %v742_v45, 4  ;;  %564 = vst [vmem:[#allocation2 + $0xb8] sm:$0xf] %v531_v58  ;;  %v538_v11 = vpack.c.bf16 %v506_v56, %v506_v56  ;;  %v539_v12 = vpack.c.bf16 %v507_v62, %v507_v62 }
  0x8f   : > { %v754_v14 = vor.u32 %v752_v52, %v751_v2  ;;  %v482_v10 = vmax.f32 %v450_v5, 0.0  ;;  %v483_v29 = vmax.f32 %v451_v17, 0.0  ;;  %v1785_v34 = vshrl.u32 %v1701_v15, 16 }
  0x90   : > { %v746_v19 = vsel %vm7565_vm2, %v7848_v57, %v745_v7  ;;  %v629_v21 = vld [vmem:[#allocation2 + $0x74] sm:$0xf]  ;;  %571 = vst [vmem:[#allocation2 + $0xf4] sm:$0xf] %v538_v11  ;;  %v1788_v38 = vshll.u32 %v1701_v15, 16  ;;  %v7224_v7 = vld [vmem:[%s8977_s1 + $0x238] sm:$0xff] }
  0x91   : > { %v755_v22 = vsel %vm7565_vm2, %v747_v9, %v754_v14  ;;  %v1062_v23 = vunpack.c.l.b16 %v746_v19  ;;  %v630_v59 = vld [vmem:[#allocation2 + $0x78] sm:$0xf]  ;;  %v850_v24 = vshrl.u32 %v629_v21, 16  ;;  %v853_v16 = vshll.u32 %v629_v21, 16  ;;  %572 = vst [vmem:[#allocation2 + $0xf8] sm:$0xf] %v539_v12  ;;  %5974 = vmatpush.bf16.msra.mxu0 %v7224_v7 }
  0x92   : > { %v1063_v27 = vunpack.c.l.b16 %v755_v22  ;;  %v859_v28 = vshrl.u32 %v630_v59, 16  ;;  %v862_v20 = vshll.u32 %v630_v59, 16  ;;  %v514_v57 = vpack.c.bf16 %v482_v10, %v482_v10  ;;  %v1703_v19 = vld [vmem:[#allocation2 + $0xc] sm:$0x1] }
  0x93   : > { %v852_v31 = vrot.slane %v850_v24, 7  ;;  %v515_v37 = vpack.c.bf16 %v483_v29, %v483_v29  ;;  %v1787_v47 = vrot.slane %v1785_v34, 4  ;;  %v1790_v51 = vrot.slane %v1788_v38, 5  ;;  %v2451_v38 = vld [vmem:[#allocation2 + $0x14] sm:$0xf] }
  0x94   : > { %v1092_v35 = vpack.c.b16 %v1063_v27, %v1062_v23  ;;  %v861_v26 = vrot.slane %v859_v28, 7  ;;  %v641_v36 = vld [vmem:[#allocation2 + $0xb4] sm:$0xf]  ;;  %547 = vst [vmem:[#allocation2 + $0x34] sm:$0xf] %v514_v57  ;;  %v1794_v13 = vshll.u32 %v1702_v61, 16 }
  0x95   : > { %v855_v39 = vor.u32 %v853_v16, %v852_v31  ;;  %v857_v40 = vrot.slane %v852_v31, 4  ;;  %v642_v1 = vld [vmem:[#allocation2 + $0xb8] sm:$0xf]  ;;  %v938_v41 = vshrl.u32 %v641_v36, 16  ;;  %v941_v42 = vshll.u32 %v641_v36, 16 }
  0x96   : > { %1188 = vmatmul.bf16.gmra.mxu0 %v1092_v35  ;;  %v864_v53 = vor.u32 %v862_v20, %v861_v26  ;;  %v947_v8 = vshrl.u32 %v642_v1, 16  ;;  %v950_v46 = vshll.u32 %v642_v1, 16  ;;  %548 = vst [vmem:[#allocation2 + $0x38] sm:$0xf] %v515_v37  ;;  %v1791_v12 = vor.u32 %v1790_v51, %v1787_v47  ;;  %v2450_v35 = vld [vmem:[#allocation2 + $0x10] sm:$0x8] }
  0x97   : > { %v856_v43 = vsel %vm7565_vm2, %v7862_v25, %v855_v39  ;;  %v940_v49 = vrot.slane %v938_v41, 7  ;;  %v653_v50 = vld [vmem:[#allocation2 + $0xf4] sm:$0xf]  ;;  %v1796_v59 = vrot.slane %v1794_v13, 5  ;;  %v1798_v20 = vshrl.u32 %v1702_v61, 16 }
  0x98   : > { %v865_v52 = vsel %vm7565_vm2, %v857_v40, %v864_v53  ;;  %v1072_v54 = vunpack.c.l.b16 %v856_v43  ;;  %v949_v58 = vrot.slane %v947_v8, 7  ;;  %v654_v60 = vld [vmem:[#allocation2 + $0xf8] sm:$0xf]  ;;  %v1026_v55 = vshrl.u32 %v653_v50, 16 }
  0x99   : > { %v1073_v45 = vunpack.c.l.b16 %v865_v52  ;;  %v943_v56 = vor.u32 %v941_v42, %v940_v49  ;;  %v945_v62 = vrot.slane %v940_v49, 4  ;;  %v1029_v63 = vshll.u32 %v653_v50, 16  ;;  %v2452_v47 = vld [vmem:[#allocation2 + $0x18] sm:$0xf] }
  0x9a   : > { %v952_v3 = vor.u32 %v950_v46, %v949_v58  ;;  %v1028_v2 = vrot.slane %v1026_v55, 7  ;;  %v1035_v25 = vshrl.u32 %v654_v60, 16  ;;  %v1038_v5 = vshll.u32 %v654_v60, 16 }
  0x9b   : > { %v1097_v9 = vpack.c.b16 %v1073_v45, %v1072_v54  ;;  %v944_v11 = vsel %vm7565_vm2, %v7864_v30, %v943_v56  ;;  %v617_v22 = vld [vmem:[#allocation2 + $0x34] sm:$0xf]  ;;  %v1792_v23 = vrot.slane %v1791_v12, 4  ;;  %v6448_v57 = vrot.slane %v757_v18, 11  ;;  %v1705_v45 = vld [vmem:[#allocation2 + $0x18] sm:$0xf] }
  0x9c   : > { %v953_v14 = vsel %vm7565_vm2, %v945_v62, %v952_v3  ;;  %v1080_v17 = vunpack.c.l.b16 %v944_v11  ;;  %v1031_v10 = vor.u32 %v1029_v63, %v1028_v2  ;;  %v1033_v44 = vrot.slane %v1028_v2, 4  ;;  %v1704_v54 = vld [vmem:[#allocation2 + $0x14] sm:$0xf]  ;;  %v7113_v11 = vld [vmem:[#allocation2 + $0x4] sm:$0xff] }
  0x9d   : > { %1213 = vmatmul.bf16.gmra.mxu1 %v1097_v9  ;;  %v1081_v21 = vunpack.c.l.b16 %v953_v14  ;;  %v1037_v15 = vrot.slane %v1035_v25, 7  ;;  %v618_v24 = vld [vmem:[#allocation2 + $0x38] sm:$0xf]  ;;  %v762_v16 = vshrl.u32 %v617_v22, 16  ;;  %v765_v27 = vshll.u32 %v617_v22, 16 }
  0x9e   : > { %v1032_v30 = vsel %vm7565_vm2, %v7887_v4, %v1031_v10  ;;  %v771_v34 = vshrl.u32 %v618_v24, 16  ;;  %v774_v4 = vshll.u32 %v618_v24, 16  ;;  %v1800_v37 = vrot.slane %v1798_v20, 4 }
  0x9f   : > { %v1101_v29 = vpack.c.b16 %v1081_v21, %v1080_v17  ;;  %v1040_v31 = vor.u32 %v1038_v5, %v1037_v15  ;;  %v1088_v26 = vunpack.c.l.b16 %v1032_v30  ;;  %v764_v36 = vrot.slane %v762_v16, 7  ;;  %v1706_v15 = vld [vmem:[#allocation2 + $0x1c] sm:$0x1]  ;;  %v2455_v30 = vld [vmem:[#allocation2 + $0x28] sm:$0xf] }
  0xa0   : > { %v773_v40 = vrot.slane %v771_v34, 7  ;;  %v1797_v1 = vsel %vm7936_vm5, %v1792_v23, %v1796_v59  ;;  %v1804_v41 = vshll.u32 %v1703_v19, 16  ;;  %v1801_v18 = vor.u32 %v1800_v37, %v1796_v59  ;;  %v2454_v59 = vld [vmem:[#allocation2 + $0x24] sm:$0xf] }
  0xa1   : > { %1233 = vmatmul.bf16.gmra.mxu2 %v1101_v29  ;;  %v1041_v39 = vsel %vm7565_vm2, %v1033_v44, %v1040_v31  ;;  %v767_v53 = vor.u32 %v765_v27, %v764_v36  ;;  %v769_v0 = vrot.slane %v764_v36, 4  ;;  %v2531_v48 = vshrl.u32 %v2450_v35, 16  ;;  %v1707_v36 = vld [vmem:[#allocation2 + $0x24] sm:$0xf] }
  0xa2   : > { %v1089_v42 = vunpack.c.l.b16 %v1041_v39  ;;  %v776_v8 = vor.u32 %v774_v4, %v773_v40  ;;  %v1806_v46 = vrot.slane %v1804_v41, 5  ;;  %v2536_v43 = vshrl.u32 %v2451_v38, 16  ;;  %v1708_v40 = vld [vmem:[#allocation2 + $0x28] sm:$0xf] }
  0xa3   : > { %v768_v50 = vsel %vm7565_vm2, %v6448_v57, %v767_v53  ;;  %v1802_v51 = vrot.slane %v1801_v18, 4  ;;  %v2539_v52 = vshll.u32 %v2451_v38, 16  ;;  %v6653_v55 = vrot.slane %v2531_v48, 11  ;;  %v2453_v57 = vld [vmem:[#allocation2 + $0x20] sm:$0x8] }
  0xa4   : > { %v1105_v49 = vpack.c.b16 %v1089_v42, %v1088_v26  ;;  %v777_v58 = vsel %vm7565_vm2, %v769_v0, %v776_v8  ;;  %v1064_v60 = vunpack.c.l.b16 %v768_v50  ;;  %v2538_v61 = vrot.slane %v2536_v43, 7 }
  0xa5   : > { %v1065_v56 = vunpack.c.l.b16 %v777_v58  ;;  %v1807_v62 = vsel %vm7936_vm5, %v1802_v51, %v1806_v46  ;;  %v2545_v63 = vshrl.u32 %v2452_v47, 16  ;;  %v2548_v3 = vshll.u32 %v2452_v47, 16  ;;  %v7153_v47 = vld [vmem:[#allocation2 + $0x14] sm:$0xff] }
  0xa6   : > { %1253 = vmatmul.bf16.gmra.mxu3 %v1105_v49  ;;  %v2541_v2 = vor.u32 %v2539_v52, %v2538_v61  ;;  %v2543_v25 = vrot.slane %v2538_v61, 4  ;;  %v1809_v5 = vshrl.u32 %v1704_v54, 16  ;;  %v1812_v7 = vshll.u32 %v1704_v54, 16  ;;  %v7191_v49 = vld [vmem:[%s8977_s1 + $0x1b0] sm:$0xff] }
  0xa7   : > { %v1093_v6 = vpack.c.b16 %v1065_v56, %v1064_v60  ;;  %v2547_v33 = vrot.slane %v2545_v63, 7  ;;  %v1818_v9 = vshll.u32 %v1705_v45, 16  ;;  %v2185_v12 = vunpack.c.l.b16 %v1797_v1  ;;  %v7114_v58 = vld [vmem:[#allocation2 + $0x14] sm:$0xff]  ;;  %4851 = vmatpush.bf16.msra.mxu2 %v7191_v49  ;;  %v2461_v49 = vld [vmem:[#allocation2 + $0x48] sm:$0xf] }
  0xa8   : > { %v2186_v13 = vunpack.c.l.b16 %v1807_v62  ;;  %v2542_v14 = vsel %vm7565_vm2, %v6653_v55, %v2541_v2  ;;  %v1822_v17 = vshrl.u32 %v1705_v45, 16  ;;  %v1811_v44 = vrot.slane %v1809_v5, 4  ;;  %v2457_v61 = vld [vmem:[#allocation2 + $0x34] sm:$0xf]  ;;  %v1709_v62 = vld [vmem:[#allocation2 + $0x2c] sm:$0x1] }
  0xa9   : > { %1193 = vmatmul.bf16.gmra.mxu0 %v1093_v6  ;;  %v2550_v10 = vor.u32 %v2548_v3, %v2547_v33  ;;  %v1814_v19 = vrot.slane %v1812_v7, 5  ;;  %v1820_v21 = vrot.slane %v1818_v9, 5  ;;  %v2899_v16 = vunpack.c.l.b16 %v2542_v14  ;;  %v2458_v2 = vld [vmem:[#allocation2 + $0x38] sm:$0xf]  ;;  %v7183_v5 = vld [vmem:[%s8977_s1 + $0x170] sm:$0xff] }
  0xaa   : > { %v1824_v22 = vrot.slane %v1822_v17, 4  ;;  %v2217_v24 = vpack.c.b16 %v2186_v13, %v2185_v12  ;;  %v1828_v31 = vshll.u32 %v1706_v15, 16  ;;  %v2558_v34 = vshrl.u32 %v2454_v59, 16  ;;  %v7223_v6 = vld [vmem:[%s8977_s1 + $0x230] sm:$0xff]  ;;  %4136 = vmatpush.bf16.msra.mxu1 %v7183_v5 }
  0xab   : > { %v2551_v23 = vsel %vm7565_vm2, %v2543_v25, %v2550_v10  ;;  %v1815_v20 = vor.u32 %v1814_v19, %v1811_v44  ;;  %v2567_v35 = vshrl.u32 %v2455_v30, 16  ;;  %v2553_v26 = vshrl.u32 %v2453_v57, 16  ;;  %v7215_v25 = vld [vmem:[%s8977_s1 + $0x1f0] sm:$0xff]  ;;  %5975 = vmatpush.bf16.msra.mxu0 %v7223_v6 }
  0xac   : > { %v2900_v27 = vunpack.c.l.b16 %v2551_v23  ;;  %v1825_v29 = vor.u32 %v1824_v22, %v1820_v21  ;;  %v1830_v39 = vrot.slane %v1828_v31, 5  ;;  %v2560_v1 = vrot.slane %v2558_v34, 7  ;;  %5229 = vmatpush.bf16.msra.mxu3 %v7215_v25  ;;  %v2456_v14 = vld [vmem:[#allocation2 + $0x30] sm:$0x8] }
  0xad   : > { %1556 = vmatmul.bf16.vlgmr.msrb.gmra.mxu1 %v7113_v11  ;;  %v1816_v37 = vrot.slane %v1815_v20, 4  ;;  %v2561_v41 = vshll.u32 %v2454_v59, 16  ;;  %v2569_v42 = vrot.slane %v2567_v35, 7  ;;  %v2570_v53 = vshll.u32 %v2455_v30, 16  ;;  %v1710_v20 = vld [vmem:[#allocation2 + $0x34] sm:$0xf] }
  0xae   : > { %v2931_v4 = vpack.c.b16 %v2900_v27, %v2899_v16  ;;  %v1826_v38 = vrot.slane %v1825_v29, 4  ;;  %v1833_v0 = vshrl.u32 %v1707_v36, 16  ;;  %v1836_v18 = vshll.u32 %v1707_v36, 16  ;;  %v1711_v29 = vld [vmem:[#allocation2 + $0x38] sm:$0xf] }
  0xaf   : > { %v1842_v8 = vshll.u32 %v1708_v40, 16  ;;  %v1846_v46 = vshrl.u32 %v1708_v40, 16  ;;  %v1821_v48 = vsel %vm7936_vm5, %v1816_v37, %v1820_v21  ;;  %v6654_v50 = vrot.slane %v2553_v26, 11 }
  0xb0   : > { %v1831_v43 = vsel %vm7936_vm5, %v1826_v38, %v1830_v39  ;;  %v2563_v51 = vor.u32 %v2561_v41, %v2560_v1  ;;  %v2565_v52 = vrot.slane %v2560_v1, 4  ;;  %v2572_v54 = vor.u32 %v2570_v53, %v2569_v42  ;;  %v7115_v1 = vld [vmem:[#allocation2 + $0x24] sm:$0xff] }
  0xb1   : > { %2305 = vmatmul.bf16.vlgmr.msrb.gmra.mxu2 %v2217_v24  ;;  %v1835_v60 = vrot.slane %v1833_v0, 4  ;;  %v1838_v55 = vrot.slane %v1836_v18, 5  ;;  %v2187_v45 = vunpack.c.l.b16 %v1821_v48  ;;  %v2188_v56 = vunpack.c.l.b16 %v1831_v43  ;;  %v1712_v48 = vld [vmem:[#allocation2 + $0x3c] sm:$0x1]  ;;  %v2460_v43 = vld [vmem:[#allocation2 + $0x44] sm:$0xf] }
  0xb2   : > { %v1844_v63 = vrot.slane %v1842_v8, 5  ;;  %v1848_v3 = vrot.slane %v1846_v46, 4  ;;  %v2564_v33 = vsel %vm7565_vm2, %v6654_v50, %v2563_v51  ;;  %v2573_v7 = vsel %vm7565_vm2, %v2565_v52, %v2572_v54 }
  0xb3   : > { %v1839_v9 = vor.u32 %v1838_v55, %v1835_v60  ;;  %v1852_v11 = vshll.u32 %v1709_v62, 16  ;;  %v2218_v12 = vpack.c.b16 %v2188_v56, %v2187_v45  ;;  %v2580_v17 = vshrl.u32 %v2457_v61, 16  ;;  %v2459_v55 = vld [vmem:[#allocation2 + $0x40] sm:$0x8]  ;;  %v1713_v62 = vld [vmem:[#allocation2 + $0x44] sm:$0xf] }
  0xb4   : > { %v1849_v13 = vor.u32 %v1848_v3, %v1844_v63  ;;  %v2589_v10 = vshrl.u32 %v2458_v2, 16  ;;  %v2901_v44 = vunpack.c.l.b16 %v2564_v33  ;;  %v2902_v19 = vunpack.c.l.b16 %v2573_v7 }
  0xb5   : > { %v1840_v21 = vrot.slane %v1839_v9, 4  ;;  %v1854_v15 = vrot.slane %v1852_v11, 5  ;;  %v2575_v22 = vshrl.u32 %v2456_v14, 16  ;;  %v2583_v23 = vshll.u32 %v2457_v61, 16 }
  0xb6   : > { %3019 = vmatmul.bf16.vlgmr.msrb.gmra.mxu3 %v2931_v4  ;;  %v1850_v59 = vrot.slane %v1849_v13, 4  ;;  %v2582_v30 = vrot.slane %v2580_v17, 7  ;;  %v2591_v24 = vrot.slane %v2589_v10, 7  ;;  %v2592_v16 = vshll.u32 %v2458_v2, 16  ;;  %v7154_v4 = vld [vmem:[#allocation2 + $0x24] sm:$0xff]  ;;  %v7155_v17 = vld [vmem:[#allocation2 + $0x34] sm:$0xff] }
  0xb7   : > { %v2932_v27 = vpack.c.b16 %v2902_v19, %v2901_v44  ;;  %v1845_v31 = vsel %vm7936_vm5, %v1840_v21, %v1844_v63  ;;  %v6655_v57 = vrot.slane %v2575_v22, 11  ;;  %v1857_v37 = vshrl.u32 %v1710_v20, 16  ;;  %v1714_v63 = vld [vmem:[#allocation2 + $0x48] sm:$0xf] }
  0xb8   : > { %v1855_v34 = vsel %vm7936_vm5, %v1850_v59, %v1854_v15  ;;  %v2585_v35 = vor.u32 %v2583_v23, %v2582_v30  ;;  %v2587_v26 = vrot.slane %v2582_v30, 4  ;;  %v2594_v36 = vor.u32 %v2592_v16, %v2591_v24  ;;  %v7190_v19 = vld [vmem:[%s8977_s1 + $0x1a8] sm:$0xff] }
  0xb9   : > { %3397 = vmatmul.bf16.vlgmr.msrb.gmra.mxu0 %v7153_v47  ;;  %v1860_v38 = vshll.u32 %v1710_v20, 16  ;;  %v1866_v39 = vshll.u32 %v1711_v29, 16  ;;  %v1870_v40 = vshrl.u32 %v1711_v29, 16  ;;  %v2189_v41 = vunpack.c.l.b16 %v1845_v31  ;;  %4852 = vmatpush.bf16.msra.mxu2 %v7190_v19  ;;  %v1715_v31 = vld [vmem:[#allocation2 + $0x4c] sm:$0x1] }
  0xba   : > { %v2190_v42 = vunpack.c.l.b16 %v1855_v34  ;;  %v2586_v53 = vsel %vm7565_vm2, %v6655_v57, %v2585_v35  ;;  %v2595_v0 = vsel %vm7565_vm2, %v2587_v26, %v2594_v36  ;;  %v1859_v18 = vrot.slane %v1857_v37, 4  ;;  %v7214_v57 = vld [vmem:[%s8977_s1 + $0x1e8] sm:$0xff] }
  0xbb   : > { %v1862_v8 = vrot.slane %v1860_v38, 5  ;;  %v1868_v46 = vrot.slane %v1866_v39, 5  ;;  %v1872_v47 = vrot.slane %v1870_v40, 4  ;;  %v2903_v51 = vunpack.c.l.b16 %v2586_v53  ;;  %v7182_v34 = vld [vmem:[%s8977_s1 + $0x168] sm:$0xff]  ;;  %v2463_v39 = vld [vmem:[#allocation2 + $0x54] sm:$0xf]  ;;  %5230 = vmatpush.bf16.msra.mxu3 %v7214_v57  ;;  %v8004_v53 = vpop.f32.mrf.mxu1 }
  0xbc   : > { %v2219_v50 = vpack.c.b16 %v2190_v42, %v2189_v41  ;;  %v2904_v52 = vunpack.c.l.b16 %v2595_v0  ;;  %v1876_v60 = vshll.u32 %v1712_v48, 16  ;;  %v2602_v61 = vshrl.u32 %v2460_v43, 16  ;;  %v7222_v35 = vld [vmem:[%s8977_s1 + $0x228] sm:$0xff]  ;;  %v2464_v40 = vld [vmem:[#allocation2 + $0x58] sm:$0xf]  ;;  %4137 = vmatpush.bf16.msra.mxu1 %v7182_v34 }
  0xbd   : > { %1561 = vmatmul.bf16.gmra.mxu1 %v7114_v58  ;;  %v1863_v54 = vor.u32 %v1862_v8, %v1859_v18  ;;  %v1873_v58 = vor.u32 %v1872_v47, %v1868_v46  ;;  %v2611_v45 = vshrl.u32 %v2461_v49, 16  ;;  %v2597_v5 = vshrl.u32 %v2459_v55, 16  ;;  %5976 = vmatpush.bf16.msra.mxu0 %v7222_v35  ;;  %v2462_v0 = vld [vmem:[#allocation2 + $0x50] sm:$0x8]  ;;  %v2467_v19 = vld [vmem:[#allocation2 + $0x68] sm:$0xf] }
  0xbe   : > { %v2933_v56 = vpack.c.b16 %v2904_v52, %v2903_v51  ;;  %v1878_v25 = vrot.slane %v1876_v60, 5  ;;  %v2604_v6 = vrot.slane %v2602_v61, 7  ;;  %v2605_v33 = vshll.u32 %v2460_v43, 16  ;;  %v1717_v51 = vld [vmem:[#allocation2 + $0x58] sm:$0xf] }
  0xbf   : > { %v1864_v3 = vrot.slane %v1863_v54, 4  ;;  %v1874_v2 = vrot.slane %v1873_v58, 4  ;;  %v2613_v7 = vrot.slane %v2611_v45, 7  ;;  %v2614_v9 = vshll.u32 %v2461_v49, 16 }
  0xc0   : > { %v1881_v11 = vshrl.u32 %v1713_v62, 16  ;;  %v1890_v13 = vshll.u32 %v1714_v63, 16  ;;  %v1894_v14 = vshrl.u32 %v1714_v63, 16  ;;  %v6656_v21 = vrot.slane %v2597_v5, 11 }
  0xc1   : > { %2310 = vmatmul.bf16.gmra.mxu2 %v2218_v12  ;;  %v1884_v12 = vshll.u32 %v1713_v62, 16  ;;  %v1869_v10 = vsel %vm7936_vm5, %v1864_v3, %v1868_v46  ;;  %v1879_v44 = vsel %vm7936_vm5, %v1874_v2, %v1878_v25  ;;  %v2607_v15 = vor.u32 %v2605_v33, %v2604_v6  ;;  %v7156_v3 = vld [vmem:[#allocation2 + $0x44] sm:$0xff] }
  0xc2   : > { %v2609_v22 = vrot.slane %v2604_v6, 4  ;;  %v2616_v23 = vor.u32 %v2614_v9, %v2613_v7  ;;  %v1883_v59 = vrot.slane %v1881_v11, 4  ;;  %v1892_v24 = vrot.slane %v1890_v13, 5  ;;  %v7117_v33 = vld [vmem:[#allocation2 + $0x44] sm:$0xff] }
  0xc3   : > { %v1886_v30 = vrot.slane %v1884_v12, 5  ;;  %v1896_v16 = vrot.slane %v1894_v14, 4  ;;  %v2191_v20 = vunpack.c.l.b16 %v1869_v10  ;;  %v2192_v29 = vunpack.c.l.b16 %v1879_v44  ;;  %v8010_v11 = vpop.f32.mrf.mxu1  ;;  %v2466_v10 = vld [vmem:[#allocation2 + $0x64] sm:$0xf]  ;;  %v1718_v44 = vld [vmem:[#allocation2 + $0x5c] sm:$0x1] }
  0xc4   : > { %v2608_v26 = vsel %vm7565_vm2, %v6656_v21, %v2607_v15  ;;  %v2617_v36 = vsel %vm7565_vm2, %v2609_v22, %v2616_v23  ;;  %v1900_v38 = vshll.u32 %v1715_v31, 16  ;;  %v2624_v18 = vshrl.u32 %v2463_v39, 16  ;;  %v8012_v21 = vpop.f32.mrf.mxu0 }
  0xc5   : > { %v1897_v37 = vor.u32 %v1896_v16, %v1892_v24  ;;  %v2905_v41 = vunpack.c.l.b16 %v2608_v26  ;;  %v2906_v42 = vunpack.c.l.b16 %v2617_v36  ;;  %v2633_v8 = vshrl.u32 %v2464_v40, 16 }
  0xc6   : > { %3024 = vmatmul.bf16.gmra.mxu3 %v2932_v27  ;;  %v7116_v27 = vld [vmem:[#allocation2 + $0x34] sm:$0xff]  ;;  %v1902_v48 = vrot.slane %v1900_v38, 5  ;;  %v2619_v49 = vshrl.u32 %v2462_v0, 16  ;;  %v2626_v52 = vrot.slane %v2624_v18, 7  ;;  %v2627_v54 = vshll.u32 %v2463_v39, 16 }
  0xc7   : > { %v1898_v47 = vrot.slane %v1897_v37, 4  ;;  %v2934_v43 = vpack.c.b16 %v2906_v42, %v2905_v41  ;;  %v2635_v58 = vrot.slane %v2633_v8, 7  ;;  %v2636_v60 = vshll.u32 %v2464_v40, 16  ;;  %v1719_v42 = vld [vmem:[#allocation2 + $0x64] sm:$0xf] }
  0xc8   : > { %v1914_v62 = vshll.u32 %v1717_v51, 16  ;;  %v1918_v63 = vshrl.u32 %v1717_v51, 16  ;;  %v6657_v2 = vrot.slane %v2619_v49, 11  ;;  %v2629_v25 = vor.u32 %v2627_v54, %v2626_v52  ;;  %v1720_v0 = vld [vmem:[#allocation2 + $0x68] sm:$0xf]  ;;  %v7157_v51 = vld [vmem:[#allocation2 + $0x54] sm:$0xff] }
  0xc9   : > { %3402 = vmatmul.bf16.gmra.mxu0 %v7154_v4  ;;  %v1887_v4 = vor.u32 %v1886_v30, %v1883_v59  ;;  %v1903_v61 = vsel %vm7936_vm5, %v1898_v47, %v1902_v48  ;;  %v2631_v5 = vrot.slane %v2626_v52, 4  ;;  %v2638_v6 = vor.u32 %v2636_v60, %v2635_v58 }
  0xca   : > { %v2194_v9 = vunpack.c.l.b16 %v1903_v61  ;;  %v1916_v14 = vrot.slane %v1914_v62, 5  ;;  %v2630_v15 = vsel %vm7565_vm2, %v6657_v2, %v2629_v25  ;;  %v2646_v59 = vshrl.u32 %v2466_v10, 16 }
  0xcb   : > { %v1888_v46 = vrot.slane %v1887_v4, 4  ;;  %v2639_v22 = vsel %vm7565_vm2, %v2631_v5, %v2638_v6  ;;  %v2907_v31 = vunpack.c.l.b16 %v2630_v15  ;;  %v2649_v36 = vshll.u32 %v2466_v10, 16 }
  0xcc   : > { %v2908_v57 = vunpack.c.l.b16 %v2639_v22  ;;  %v2648_v26 = vrot.slane %v2646_v59, 7  ;;  %v2658_v4 = vshll.u32 %v2467_v19, 16  ;;  %v1929_v52 = vshrl.u32 %v1719_v42, 16 }
  0xcd   : > { %1566 = vmatmul.bf16.gmra.mxu1 %v7115_v1  ;;  %v2220_v1 = vpack.c.b16 %v2192_v29, %v2191_v20  ;;  %v1893_v55 = vsel %vm7936_vm5, %v1888_v46, %v1892_v24  ;;  %v2465_v20 = vld [vmem:[#allocation2 + $0x60] sm:$0x8]  ;;  %v2655_v29 = vshrl.u32 %v2467_v19, 16  ;;  %v8024_v46 = vpop.f32.mrf.mxu0  ;;  %v1932_v54 = vshll.u32 %v1719_v42, 16 }
  0xce   : > { %v2193_v7 = vunpack.c.l.b16 %v1893_v55  ;;  %v2641_v35 = vshrl.u32 %v2465_v20, 16  ;;  %v2651_v8 = vor.u32 %v2649_v36, %v2648_v26  ;;  %v2653_v49 = vrot.slane %v2648_v26, 4  ;;  %v7189_v55 = vld [vmem:[%s8977_s1 + $0x1a0] sm:$0xff] }
  0xcf   : > { %v2657_v40 = vrot.slane %v2655_v29, 7  ;;  %v1938_v58 = vshll.u32 %v1720_v0, 16  ;;  %v1942_v60 = vshrl.u32 %v1720_v0, 16  ;;  %4853 = vmatpush.bf16.msra.mxu2 %v7189_v55  ;;  %v1931_v2 = vrot.slane %v1929_v52, 4 }
  0xd0   : > { %v2221_v23 = vpack.c.b16 %v2194_v9, %v2193_v7  ;;  %v6658_v18 = vrot.slane %v2641_v35, 11  ;;  %v1934_v25 = vrot.slane %v1932_v54, 5  ;;  %v7181_v7 = vld [vmem:[%s8977_s1 + $0x160] sm:$0xff]  ;;  %v1721_v9 = vld [vmem:[#allocation2 + $0x6c] sm:$0x1] }
  0xd1   : > { %2315 = vmatmul.bf16.gmra.mxu2 %v2219_v50  ;;  %v1716_v50 = vld [vmem:[#allocation2 + $0x54] sm:$0xf]  ;;  %v1940_v5 = vrot.slane %v1938_v58, 5  ;;  %v1944_v6 = vrot.slane %v1942_v60, 4  ;;  %4138 = vmatpush.bf16.msra.mxu1 %v7181_v7  ;;  %v1948_v59 = vshll.u32 %v1721_v9, 16 }
  0xd2   : > { %v1905_v45 = vshrl.u32 %v1716_v50, 16  ;;  %v1935_v22 = vor.u32 %v1934_v25, %v1931_v2  ;;  %v1723_v35 = vld [vmem:[#allocation2 + $0x78] sm:$0xf] }
  0xd4   : > { %v1907_v12 = vrot.slane %v1905_v45, 4  ;;  %v7118_v45 = vld [vmem:[#allocation2 + $0x54] sm:$0xff]  ;;  %v1936_v26 = vrot.slane %v1935_v22, 4 }
  0xd6   : > { %3029 = vmatmul.bf16.gmra.mxu3 %v2933_v56  ;;  %v1908_v56 = vshll.u32 %v1716_v50, 16  ;;  %v2660_v50 = vor.u32 %v2658_v4, %v2657_v40  ;;  %v1950_v4 = vrot.slane %v1948_v59, 5 }
  0xd8   : > { %v1910_v13 = vrot.slane %v1908_v56, 5 }
  0xd9   : > { %3407 = vmatmul.bf16.gmra.mxu0 %v7155_v17  ;;  %v1920_v17 = vrot.slane %v1918_v63, 4  ;;  %v2652_v63 = vsel %vm7565_vm2, %v6658_v18, %v2651_v8  ;;  %v1962_v18 = vshll.u32 %v1723_v35, 16  ;;  %v1966_v8 = vshrl.u32 %v1723_v35, 16 }
  0xda   : > { %v1911_v24 = vor.u32 %v1910_v13, %v1907_v12  ;;  %v7221_v12 = vld [vmem:[%s8977_s1 + $0x220] sm:$0xff] }
  0xdb   : > { %v1921_v16 = vor.u32 %v1920_v17, %v1916_v14  ;;  %v2470_v17 = vld [vmem:[#allocation2 + $0x78] sm:$0xf]  ;;  %5977 = vmatpush.bf16.msra.mxu0 %v7221_v12 }
  0xdc   : > { %v1912_v37 = vrot.slane %v1911_v24, 4  ;;  %v2677_v20 = vshrl.u32 %v2470_v17, 16 }
  0xdd   : > { %1571 = vmatmul.bf16.gmra.mxu1 %v7116_v27  ;;  %v1924_v27 = vshll.u32 %v1718_v44, 16  ;;  %v1922_v38 = vrot.slane %v1921_v16, 4  ;;  %v2909_v44 = vunpack.c.l.b16 %v2652_v63  ;;  %v2468_v16 = vld [vmem:[#allocation2 + $0x70] sm:$0x8] }
  0xde   : > { %v1917_v48 = vsel %vm7936_vm5, %v1912_v37, %v1916_v14  ;;  %v2469_v14 = vld [vmem:[#allocation2 + $0x74] sm:$0xf]  ;;  %v2663_v37 = vshrl.u32 %v2468_v16, 16  ;;  %v2679_v40 = vrot.slane %v2677_v20, 7 }
  0xdf   : > { %v1926_v39 = vrot.slane %v1924_v27, 5  ;;  %v2195_v56 = vunpack.c.l.b16 %v1917_v48  ;;  %v2668_v27 = vshrl.u32 %v2469_v14, 16  ;;  %v7158_v48 = vld [vmem:[#allocation2 + $0x64] sm:$0xff] }
  0xe0   : > { %v6659_v52 = vrot.slane %v2663_v37, 11  ;;  %v1726_v37 = vld [vmem:[#allocation2 + $0x88] sm:$0xf] }
  0xe1   : > { %2320 = vmatmul.bf16.gmra.mxu2 %v2220_v1  ;;  %v2935_v1 = vpack.c.b16 %v2908_v57, %v2907_v31  ;;  %v1722_v57 = vld [vmem:[#allocation2 + $0x74] sm:$0xf] }
  0xe2   : > { %v1953_v42 = vshrl.u32 %v1722_v57, 16  ;;  %v1956_v0 = vshll.u32 %v1722_v57, 16 }
  0xe4   : > { %v1955_v55 = vrot.slane %v1953_v42, 4 }
  0xe6   : > { %3034 = vmatmul.bf16.gmra.mxu3 %v2934_v43  ;;  %v1927_v43 = vsel %vm7936_vm5, %v1922_v38, %v1926_v39  ;;  %v2670_v38 = vrot.slane %v2668_v27, 7  ;;  %v2671_v39 = vshll.u32 %v2469_v14, 16 }
  0xe7   : > { %v2196_v62 = vunpack.c.l.b16 %v1927_v43 }
  0xe8   : > { %v2673_v54 = vor.u32 %v2671_v39, %v2670_v38  ;;  %v2675_v58 = vrot.slane %v2670_v38, 4 }
  0xe9   : > { %3412 = vmatmul.bf16.gmra.mxu0 %v7156_v3  ;;  %v2661_v3 = vsel %vm7565_vm2, %v2653_v49, %v2660_v50  ;;  %v2222_v10 = vpack.c.b16 %v2196_v62, %v2195_v56  ;;  %v1941_v50 = vsel %vm7936_vm5, %v1936_v26, %v1940_v5  ;;  %v1964_v56 = vrot.slane %v1962_v18, 5 }
  0xea   : > { %v2910_v19 = vunpack.c.l.b16 %v2661_v3  ;;  %v1968_v62 = vrot.slane %v1966_v8, 4  ;;  %v7119_v3 = vld [vmem:[#allocation2 + $0x64] sm:$0xff]  ;;  %v2197_v2 = vunpack.c.l.b16 %v1941_v50 }
  0xec   : > { %v2936_v29 = vpack.c.b16 %v2910_v19, %v2909_v44  ;;  %v1969_v12 = vor.u32 %v1968_v62, %v1964_v56  ;;  %v7188_v62 = vld [vmem:[%s8977_s1 + $0x198] sm:$0xff] }
  0xed   : > { %1576 = vmatmul.bf16.gmra.mxu1 %v7117_v33  ;;  %v8018_v30 = vpop.f32.mrf.mxu2  ;;  %v8022_v41 = vpop.f32.mrf.mxu1  ;;  %v7213_v33 = vld [vmem:[%s8977_s1 + $0x1e0] sm:$0xff]  ;;  %4854 = vmatpush.bf16.msra.mxu2 %v7188_v62 }
  0xee   : > { %5231 = vmatpush.bf16.msra.mxu3 %v7213_v33  ;;  %v1970_v57 = vrot.slane %v1969_v12, 4  ;;  %v2476_v12 = vld [vmem:[#allocation2 + $0x98] sm:$0xf] }
  0xef   : > { %v8020_v34 = vpop.f32.mrf.mxu3 }
  0xf1   : > { %2325 = vmatmul.bf16.gmra.mxu2 %v2221_v23  ;;  %v1945_v23 = vor.u32 %v1944_v6, %v1940_v5  ;;  %v1724_v6 = vld [vmem:[#allocation2 + $0x7c] sm:$0x1]  ;;  %v2674_v5 = vsel %vm7565_vm2, %v6659_v52, %v2673_v54  ;;  %v1990_v52 = vshrl.u32 %v1726_v37, 16  ;;  %v7159_v54 = vld [vmem:[#allocation2 + $0x74] sm:$0xff] }
  0xf2   : > { %v1972_v14 = vshll.u32 %v1724_v6, 16  ;;  %v2911_v19 = vunpack.c.l.b16 %v2674_v5 }
  0xf3   : > { %v1946_v36 = vrot.slane %v1945_v23, 4  ;;  %v2471_v23 = vld [vmem:[#allocation2 + $0x80] sm:$0x8] }
  0xf4   : > { %v1974_v35 = vrot.slane %v1972_v14, 5 }
  0xf5   : > { %v8026_v47 = vpop.f32.mrf.mxu2  ;;  %v8050_v13 = vpop.f32.mrf.mxu1 }
  0xf6   : > { %3039 = vmatmul.bf16.gmra.mxu3 %v2935_v1  ;;  %v2680_v1 = vshll.u32 %v2470_v17, 16  ;;  %v2472_v17 = vld [vmem:[#allocation2 + $0x84] sm:$0xf]  ;;  %v1975_v18 = vsel %vm7936_vm5, %v1970_v57, %v1974_v35 }
  0xf7   : > { %v8035_v61 = vpop.f32.mrf.mxu3  ;;  %v2690_v59 = vshrl.u32 %v2472_v17, 16 }
  0xf8   : > { %v8054_v24 = vpop.f32.mrf.mxu0  ;;  %v2682_v60 = vor.u32 %v2680_v1, %v2679_v40  ;;  %v2693_v40 = vshll.u32 %v2472_v17, 16 }
  0xf9   : > { %3417 = vmatmul.bf16.gmra.mxu0 %v7157_v51  ;;  %v1951_v51 = vsel %vm7936_vm5, %v1946_v36, %v1950_v4  ;;  %v2685_v36 = vshrl.u32 %v2471_v23, 16  ;;  %v1725_v4 = vld [vmem:[#allocation2 + $0x84] sm:$0xf]  ;;  %v2692_v39 = vrot.slane %v2690_v59, 7 }
  0xfa   : > { %v2198_v25 = vunpack.c.l.b16 %v1951_v51  ;;  %v2683_v7 = vsel %vm7565_vm2, %v2675_v58, %v2682_v60  ;;  %v1980_v50 = vshll.u32 %v1725_v4, 16  ;;  %v1986_v51 = vshll.u32 %v1726_v37, 16 }
  0xfb   : > { %v2912_v22 = vunpack.c.l.b16 %v2683_v7  ;;  %v6660_v58 = vrot.slane %v2685_v36, 11  ;;  %v2695_v60 = vor.u32 %v2693_v40, %v2692_v39 }
  0xfc   : > { %v2223_v44 = vpack.c.b16 %v2198_v25, %v2197_v2  ;;  %v2200_v2 = vunpack.c.l.b16 %v1975_v18  ;;  %v2475_v25 = vld [vmem:[#allocation2 + $0x94] sm:$0xf]  ;;  %v1982_v5 = vrot.slane %v1980_v50, 5  ;;  %v1988_v7 = vrot.slane %v1986_v51, 5 }
  0xfd   : > { %1581 = vmatmul.bf16.gmra.mxu1 %v7118_v45  ;;  %v8052_v15 = vpop.f32.mrf.mxu2  ;;  %v8060_v49 = vpop.f32.mrf.mxu1  ;;  %v1958_v45 = vrot.slane %v1956_v0, 5  ;;  %v2937_v26 = vpack.c.b16 %v2912_v22, %v2911_v19  ;;  %v7180_v19 = vld [vmem:[%s8977_s1 + $0x158] sm:$0xff]  ;;  %v2696_v22 = vsel %vm7565_vm2, %v6660_v58, %v2695_v60  ;;  %v2712_v59 = vshrl.u32 %v2475_v25, 16 }
  0xfe   : > { %4139 = vmatpush.bf16.msra.mxu1 %v7180_v19  ;;  %v2913_v37 = vunpack.c.l.b16 %v2696_v22  ;;  %v2715_v18 = vshll.u32 %v2475_v25, 16 }
  0xff   : > { %v8056_v31 = vpop.f32.mrf.mxu3  ;;  %v1959_v9 = vor.u32 %v1958_v45, %v1955_v55  ;;  %v2697_v55 = vrot.slane %v2692_v39, 4 }
 0x100   : > { %v8066_v63 = vpop.f32.mrf.mxu0 }
 0x101   : > { %2330 = vmatmul.bf16.gmra.mxu2 %v2222_v10  ;;  %v2473_v10 = vld [vmem:[#allocation2 + $0x88] sm:$0xf] }
 0x102   : > { %v2699_v16 = vshrl.u32 %v2473_v10, 16  ;;  %v2702_v42 = vshll.u32 %v2473_v10, 16  ;;  %v1727_v10 = vld [vmem:[#allocation2 + $0x8c] sm:$0x1] }
 0x103   : > { %v1996_v36 = vshll.u32 %v1727_v10, 16 }
 0x104   : > { %v2701_v1 = vrot.slane %v2699_v16, 7  ;;  %v2721_v16 = vshrl.u32 %v2476_v12, 16 }
 0x105   : > { %v8058_v43 = vpop.f32.mrf.mxu2  ;;  %v8076_v20 = vpop.f32.mrf.mxu1 }
 0x106   : > { %3044 = vmatmul.bf16.gmra.mxu3 %v2936_v29  ;;  %v1960_v29 = vrot.slane %v1959_v9, 4  ;;  %v2704_v45 = vor.u32 %v2702_v42, %v2701_v1  ;;  %v1992_v9 = vrot.slane %v1990_v52, 4  ;;  %v7220_v1 = vld [vmem:[%s8977_s1 + $0x218] sm:$0xff]  ;;  %v1998_v52 = vrot.slane %v1996_v36, 5 }
 0x107   : > { %v8068_v33 = vpop.f32.mrf.mxu3  ;;  %5978 = vmatpush.bf16.msra.mxu0 %v7220_v1  ;;  %v1730_v1 = vld [vmem:[#allocation2 + $0x9c] sm:$0x1] }
 0x108   : > { %v1965_v0 = vsel %vm7936_vm5, %v1960_v29, %v1964_v56  ;;  %v7120_v56 = vld [vmem:[#allocation2 + $0x74] sm:$0xff]  ;;  %v2705_v23 = vsel %vm7565_vm2, %v2697_v55, %v2704_v45 }
 0x109   : > { %3422 = vmatmul.bf16.gmra.mxu0 %v7158_v48  ;;  %v1977_v48 = vshrl.u32 %v1725_v4, 16  ;;  %v2474_v4 = vld [vmem:[#allocation2 + $0x90] sm:$0x8]  ;;  %v2914_v39 = vunpack.c.l.b16 %v2705_v23  ;;  %v1728_v55 = vld [vmem:[#allocation2 + $0x94] sm:$0xf] }
 0x10a   : > { %v2707_v42 = vshrl.u32 %v2474_v4, 16  ;;  %v1729_v45 = vld [vmem:[#allocation2 + $0x98] sm:$0xf]  ;;  %v2004_v10 = vshll.u32 %v1728_v55, 16 }
 0x10b   : > { %v1979_v6 = vrot.slane %v1977_v48, 4  ;;  %v2723_v48 = vrot.slane %v2721_v16, 7  ;;  %v2938_v58 = vpack.c.b16 %v2914_v39, %v2913_v37  ;;  %v2014_v19 = vshrl.u32 %v1729_v45, 16 }
 0x10c   : > { %v2006_v4 = vrot.slane %v2004_v10, 5 }
 0x10d   : > { %1586 = vmatmul.bf16.gmra.mxu1 %v7119_v3  ;;  %v8074_v27 = vpop.f32.mrf.mxu2  ;;  %v2199_v3 = vunpack.c.l.b16 %v1965_v0  ;;  %v1983_v35 = vor.u32 %v1982_v5, %v1979_v6  ;;  %v2714_v0 = vrot.slane %v2712_v59, 7  ;;  %v7121_v59 = vld [vmem:[#allocation2 + $0x84] sm:$0xff]  ;;  %v2016_v39 = vrot.slane %v2014_v19, 4 }
 0x10e   : > { %v1731_v19 = vld [vmem:[#allocation2 + $0xa4] sm:$0xf] }
 0x10f   : > { %v8084_v8 = vpop.f32.mrf.mxu3  ;;  %v2224_v57 = vpack.c.b16 %v2200_v2, %v2199_v3  ;;  %v1984_v50 = vrot.slane %v1983_v35, 4  ;;  %v2717_v3 = vor.u32 %v2715_v18, %v2714_v0  ;;  %v2719_v6 = vrot.slane %v2714_v0, 4  ;;  %v2479_v18 = vld [vmem:[#allocation2 + $0xa8] sm:$0xf] }
 0x111   : > { %2335 = vmatmul.bf16.gmra.mxu2 %v2223_v44  ;;  %v7212_v44 = vld [vmem:[%s8977_s1 + $0x1d8] sm:$0xff]  ;;  %v1989_v2 = vsel %vm7936_vm5, %v1984_v50, %v1988_v7 }
 0x112   : > { %5232 = vmatpush.bf16.msra.mxu3 %v7212_v44  ;;  %v2010_v44 = vshll.u32 %v1729_v45, 16  ;;  %v2201_v16 = vunpack.c.l.b16 %v1989_v2 }
 0x113   : > { %v8078_v38 = vpop.f32.mrf.mxu0 }
 0x114   : > { %v2012_v37 = vrot.slane %v2010_v44, 5 }
 0x115   : > { %v8089_v14 = vpop.f32.mrf.mxu2 }
 0x116   : > { %3049 = vmatmul.bf16.gmra.mxu3 %v2937_v26  ;;  %v1993_v26 = vor.u32 %v1992_v9, %v1988_v7  ;;  %v7160_v9 = vld [vmem:[#allocation2 + $0x84] sm:$0xff] }
 0x117   : > { %v8105_v40 = vpop.f32.mrf.mxu3 }
 0x118   : > { %v1994_v51 = vrot.slane %v1993_v26, 4 }
 0x119   : > { %3427 = vmatmul.bf16.gmra.mxu0 %v7159_v54  ;;  %v2724_v54 = vshll.u32 %v2476_v12, 16  ;;  %v2001_v12 = vshrl.u32 %v1728_v55, 16  ;;  %v2477_v55 = vld [vmem:[#allocation2 + $0xa0] sm:$0x8] }
 0x11a   : > { %v8091_v17 = vpop.f32.mrf.mxu1  ;;  %v1999_v25 = vsel %vm7936_vm5, %v1994_v51, %v1998_v52 }
 0x11b   : > { %v8103_v29 = vpop.f32.mrf.mxu0  ;;  %v2726_v5 = vor.u32 %v2724_v54, %v2723_v48  ;;  %v2003_v36 = vrot.slane %v2001_v12, 4  ;;  %v2017_v54 = vor.u32 %v2016_v39, %v2012_v37  ;;  %v2025_v39 = vshrl.u32 %v1731_v19, 16 }
 0x11d   : > { %1591 = vmatmul.bf16.gmra.mxu1 %v7120_v56  ;;  %v6661_v56 = vrot.slane %v2707_v42, 11  ;;  %v2727_v35 = vsel %vm7565_vm2, %v2719_v6, %v2726_v5  ;;  %v2478_v42 = vld [vmem:[#allocation2 + $0xa4] sm:$0xf]  ;;  %v2007_v52 = vor.u32 %v2006_v4, %v2003_v36  ;;  %v2729_v6 = vshrl.u32 %v2477_v55, 16  ;;  %v7187_v55 = vld [vmem:[%s8977_s1 + $0x190] sm:$0xff] }
 0x11e   : > { %v2916_v51 = vunpack.c.l.b16 %v2727_v35  ;;  %v2734_v45 = vshrl.u32 %v2478_v42, 16  ;;  %v2018_v12 = vrot.slane %v2017_v54, 4  ;;  %v1732_v35 = vld [vmem:[#allocation2 + $0xa8] sm:$0xf]  ;;  %4855 = vmatpush.bf16.msra.mxu2 %v7187_v55 }
 0x11f   : > { %v2718_v7 = vsel %vm7565_vm2, %v6661_v56, %v2717_v3  ;;  %v2743_v3 = vshrl.u32 %v2479_v18, 16  ;;  %v2038_v54 = vshrl.u32 %v1732_v35, 16 }
 0x120   : > { %v2915_v50 = vunpack.c.l.b16 %v2718_v7  ;;  %v2736_v44 = vrot.slane %v2734_v45, 7  ;;  %v2746_v7 = vshll.u32 %v2479_v18, 16  ;;  %v7122_v45 = vld [vmem:[#allocation2 + $0x94] sm:$0xff] }
 0x121   : > { %2340 = vmatmul.bf16.gmra.mxu2 %v2224_v57  ;;  %v2202_v57 = vunpack.c.l.b16 %v1999_v25 }
 0x122   : > { %v8110_v60 = vpop.f32.mrf.mxu1  ;;  %v2939_v25 = vpack.c.b16 %v2916_v51, %v2915_v50 }
 0x123   : > { %v2225_v48 = vpack.c.b16 %v2202_v57, %v2201_v16  ;;  %v2737_v16 = vshll.u32 %v2478_v42, 16  ;;  %v2745_v57 = vrot.slane %v2743_v3, 7  ;;  %v2741_v42 = vrot.slane %v2736_v44, 4 }
 0x124   : > { %v8112_v62 = vpop.f32.mrf.mxu2 }
 0x125   : > { %v2748_v18 = vor.u32 %v2746_v7, %v2745_v57  ;;  %v7179_v57 = vld [vmem:[%s8977_s1 + $0x150] sm:$0xff] }
 0x126   : > { %3054 = vmatmul.bf16.gmra.mxu3 %v2938_v58  ;;  %v8118_v22 = vpop.f32.mrf.mxu0  ;;  %v2020_v58 = vshll.u32 %v1730_v1, 16  ;;  %v2028_v1 = vshll.u32 %v1731_v19, 16  ;;  %4140 = vmatpush.bf16.msra.mxu1 %v7179_v57 }
 0x128   : > { %v2022_v10 = vrot.slane %v2020_v58, 5 }
 0x129   : > { %v8120_v23 = vpop.f32.mrf.mxu3  ;;  %3432 = vmatmul.bf16.gmra.mxu0 %v7160_v9  ;;  %v2008_v9 = vrot.slane %v2007_v52, 4  ;;  %v2034_v52 = vshll.u32 %v1732_v35, 16 }
 0x12a   : > { %8987 = vst [vmem:[#allocation4_spill] sm:$0xff] %v8120_v23  ;;  %v1557_v26 = vpop.f32.mrf.mxu1  ;;  %v2023_v51 = vsel %vm7936_vm5, %v2018_v12, %v2022_v10 }
 0x12b   : > { %v2013_v50 = vsel %vm7936_vm5, %v2008_v9, %v2012_v37  ;;  %v2204_v19 = vunpack.c.l.b16 %v2023_v51  ;;  %v2030_v37 = vrot.slane %v2028_v1, 5  ;;  %v2481_v9 = vld [vmem:[#allocation2 + $0xb4] sm:$0xf]  ;;  %v1733_v1 = vld [vmem:[#allocation2 + $0xac] sm:$0x1] }
 0x12c   : > { %v8126_v0 = vpop.f32.mrf.mxu2  ;;  %v2756_v51 = vshrl.u32 %v2481_v9, 16  ;;  %v2759_v23 = vshll.u32 %v2481_v9, 16 }
 0x12d   : > { %1596 = vmatmul.bf16.gmra.mxu1 %v7121_v59  ;;  %v1637_v59 = vadd.f32 %v1557_v26, %v8012_v21  ;;  %v6662_v21 = vrot.slane %v2729_v6, 11  ;;  %v2739_v26 = vor.u32 %v2737_v16, %v2736_v44  ;;  %v2036_v6 = vrot.slane %v2034_v52, 5  ;;  %v7211_v44 = vld [vmem:[%s8977_s1 + $0x1d0] sm:$0xff] }
 0x12e   : > { %v8128_v56 = vpop.f32.mrf.mxu0  ;;  %v2040_v16 = vrot.slane %v2038_v54, 4  ;;  %5233 = vmatpush.bf16.msra.mxu3 %v7211_v44 }
 0x131   : > { %v8130_v2 = vpop.f32.mrf.mxu3  ;;  %2345 = vmatmul.bf16.gmra.mxu2 %v2225_v48  ;;  %v7161_v48 = vld [vmem:[#allocation2 + $0x94] sm:$0xff] }
 0x132   : > { %8988 = vst [vmem:[#allocation5_spill] sm:$0xff] %v8130_v2  ;;  %v1559_v5 = vpop.f32.mrf.mxu1 }
 0x133   : > { %v1638_v7 = vadd.f32 %v1559_v5, %v8024_v46 }
 0x134   : > { %v2306_v36 = vpop.f32.mrf.mxu2 }
 0x135   : > { %v2386_v4 = vadd.f32 %v2306_v36, %v1637_v59  ;;  %v2027_v59 = vrot.slane %v2025_v39, 4  ;;  %v2482_v36 = vld [vmem:[#allocation2 + $0xb8] sm:$0xf]  ;;  %v2740_v39 = vsel %vm7565_vm2, %v6662_v21, %v2739_v26  ;;  %v2044_v21 = vshll.u32 %v1733_v1, 16 }
 0x136   : > { %3059 = vmatmul.bf16.gmra.mxu3 %v2939_v25  ;;  %v3398_v58 = vpop.f32.mrf.mxu0  ;;  %v2203_v25 = vunpack.c.l.b16 %v2013_v50  ;;  %v2480_v50 = vld [vmem:[#allocation2 + $0xb0] sm:$0x8]  ;;  %v2765_v52 = vshrl.u32 %v2482_v36, 16  ;;  %v2768_v57 = vshll.u32 %v2482_v36, 16 }
 0x137   : > { %v2031_v5 = vor.u32 %v2030_v37, %v2027_v59  ;;  %v2751_v2 = vshrl.u32 %v2480_v50, 16  ;;  %v2046_v37 = vrot.slane %v2044_v21, 5  ;;  %v7123_v21 = vld [vmem:[#allocation2 + $0xa4] sm:$0xff] }
 0x138   : > { %v2226_v46 = vpack.c.b16 %v2204_v19, %v2203_v25  ;;  %v2767_v44 = vrot.slane %v2765_v52, 7 }
 0x139   : > { %v3020_v3 = vpop.f32.mrf.mxu3  ;;  %3437 = vmatmul.bf16.gmra.mxu0 %v7161_v48  ;;  %v6663_v1 = vrot.slane %v2751_v2, 11 }
 0x13a   : > { %v3100_v12 = vadd.f32 %v3020_v3, %v2386_v4  ;;  %v1562_v10 = vpop.f32.mrf.mxu1  ;;  %v2749_v4 = vsel %vm7565_vm2, %v2741_v42, %v2748_v18  ;;  %v7219_v42 = vld [vmem:[%s8977_s1 + $0x210] sm:$0xff]  ;;  %v2758_v18 = vrot.slane %v2756_v51, 7  ;;  %v2770_v9 = vor.u32 %v2768_v57, %v2767_v44 }
 0x13b   : > { %v1639_v35 = vadd.f32 %v1562_v10, %v8054_v24  ;;  %v2917_v24 = vunpack.c.l.b16 %v2740_v39  ;;  %v2918_v3 = vunpack.c.l.b16 %v2749_v4  ;;  %v2041_v10 = vor.u32 %v2040_v16, %v2036_v6  ;;  %5979 = vmatpush.bf16.msra.mxu0 %v7219_v42  ;;  %v1734_v16 = vld [vmem:[#allocation2 + $0xb4] sm:$0xf]  ;;  %v1735_v39 = vld [vmem:[#allocation2 + $0xb8] sm:$0xf] }
 0x13c   : > { %v2308_v48 = vpop.f32.mrf.mxu2  ;;  %v8152_v54 = vadd.f32 %v3398_v58, %v3100_v12  ;;  %v2032_v12 = vrot.slane %v2031_v5, 4  ;;  %v2763_v50 = vrot.slane %v2758_v18, 4  ;;  %v2049_v52 = vshrl.u32 %v1734_v16, 16 }
 0x13d   : > { %v2387_v55 = vadd.f32 %v2308_v48, %v1638_v7  ;;  %1601 = vmatmul.bf16.gmra.mxu1 %v7122_v45  ;;  %v2940_v25 = vpack.c.b16 %v2918_v3, %v2917_v24  ;;  %v2042_v59 = vrot.slane %v2041_v10, 4  ;;  %v2761_v48 = vor.u32 %v2759_v23, %v2758_v18 }
 0x13e   : > { %v3400_v26 = vpop.f32.mrf.mxu0  ;;  %v2037_v36 = vsel %vm7936_vm5, %v2032_v12, %v2036_v6  ;;  %v2052_v24 = vshll.u32 %v1734_v16, 16  ;;  %v2062_v3 = vshrl.u32 %v1735_v39, 16  ;;  %v2771_v6 = vsel %vm7565_vm2, %v2763_v50, %v2770_v9 }
 0x13f   : > { %v2047_v5 = vsel %vm7936_vm5, %v2042_v59, %v2046_v37  ;;  %v2205_v2 = vunpack.c.l.b16 %v2037_v36  ;;  %v2920_v16 = vunpack.c.l.b16 %v2771_v6 }
 0x140   : > { %v2206_v42 = vunpack.c.l.b16 %v2047_v5  ;;  %v2054_v57 = vrot.slane %v2052_v24, 5  ;;  %v2064_v12 = vrot.slane %v2062_v3, 4 }
 0x141   : > { %v3022_v58 = vpop.f32.mrf.mxu3  ;;  %2350 = vmatmul.bf16.gmra.mxu2 %v2226_v46 }
 0x142   : > { %v3101_v45 = vadd.f32 %v3022_v58, %v2387_v55  ;;  %v1564_v19 = vpop.f32.mrf.mxu1  ;;  %v7162_v55 = vld [vmem:[#allocation2 + $0xa4] sm:$0xff] }
 0x143   : > { %v1640_v7 = vadd.f32 %v1564_v19, %v8066_v63  ;;  %v2058_v63 = vshll.u32 %v1735_v39, 16  ;;  %v1736_v19 = vld [vmem:[#allocation2 + $0xbc] sm:$0x1]  ;;  %v2485_v39 = vld [vmem:[#allocation2 + $0xc8] sm:$0xf] }
 0x144   : > { %v2311_v4 = vpop.f32.mrf.mxu2  ;;  %v8160_v46 = vadd.f32 %v3400_v26, %v3101_v45  ;;  %v2051_v26 = vrot.slane %v2049_v52, 4  ;;  %v2484_v45 = vld [vmem:[#allocation2 + $0xc4] sm:$0xf]  ;;  %v2068_v36 = vshll.u32 %v1736_v19, 16  ;;  %v2483_v52 = vld [vmem:[#allocation2 + $0xc0] sm:$0x8] }
 0x145   : > { %v2388_v51 = vadd.f32 %v2311_v4, %v1639_v35  ;;  %v2762_v35 = vsel %vm7565_vm2, %v6663_v1, %v2761_v48  ;;  %v2060_v58 = vrot.slane %v2058_v63, 5  ;;  %v2227_v48 = vpack.c.b16 %v2206_v42, %v2205_v2  ;;  %v1737_v63 = vld [vmem:[#allocation2 + $0xc4] sm:$0xf] }
 0x146   : > { %3064 = vmatmul.bf16.gmra.mxu3 %v2940_v25  ;;  %v3403_v10 = vpop.f32.mrf.mxu0  ;;  %v2919_v37 = vunpack.c.l.b16 %v2762_v35  ;;  %v2778_v50 = vshrl.u32 %v2484_v45, 16  ;;  %v2055_v9 = vor.u32 %v2054_v57, %v2051_v26  ;;  %v2787_v5 = vshrl.u32 %v2485_v39, 16 }
 0x147   : > { %v2773_v3 = vshrl.u32 %v2483_v52, 16  ;;  %v2781_v35 = vshll.u32 %v2484_v45, 16  ;;  %v2790_v6 = vshll.u32 %v2485_v39, 16  ;;  %v2070_v42 = vrot.slane %v2068_v36, 5  ;;  %v7163_v45 = vld [vmem:[#allocation2 + $0xb4] sm:$0xff] }
 0x148   : > { %v2941_v24 = vpack.c.b16 %v2920_v16, %v2919_v37  ;;  %v2073_v57 = vshrl.u32 %v1737_v63, 16 }
 0x149   : > { %v3025_v23 = vpop.f32.mrf.mxu3  ;;  %3442 = vmatmul.bf16.gmra.mxu0 %v7162_v55 }
 0x14a   : > { %v3102_v18 = vadd.f32 %v3025_v23, %v2388_v51  ;;  %v1567_v44 = vpop.f32.mrf.mxu1  ;;  %v2065_v51 = vor.u32 %v2064_v12, %v2060_v58  ;;  %v2780_v23 = vrot.slane %v2778_v50, 7  ;;  %v2076_v12 = vshll.u32 %v1737_v63, 16  ;;  %v2487_v63 = vld [vmem:[#allocation2 + $0xd4] sm:$0xf] }
 0x14b   : > { %v1641_v25 = vadd.f32 %v1567_v44, %v8078_v38  ;;  %v2789_v44 = vrot.slane %v2787_v5, 7  ;;  %v6664_v50 = vrot.slane %v2773_v3, 11  ;;  %v2075_v52 = vrot.slane %v2073_v57, 4  ;;  %v2488_v3 = vld [vmem:[#allocation2 + $0xd8] sm:$0xf] }
 0x14c   : > { %v2313_v59 = vpop.f32.mrf.mxu2  ;;  %v8169_v4 = vadd.f32 %v3403_v10, %v3102_v18  ;;  %v1738_v10 = vld [vmem:[#allocation2 + $0xc8] sm:$0xf]  ;;  %v2066_v2 = vrot.slane %v2065_v51, 4  ;;  %v2785_v51 = vrot.slane %v2780_v23, 4  ;;  %v2078_v5 = vrot.slane %v2076_v12, 5 }
 0x14d   : > { %v2389_v1 = vadd.f32 %v2313_v59, %v1640_v7  ;;  %1606 = vmatmul.bf16.gmra.mxu1 %v7123_v21  ;;  %v2056_v21 = vrot.slane %v2055_v9, 4  ;;  %v2082_v59 = vshll.u32 %v1738_v10, 16  ;;  %v2086_v37 = vshrl.u32 %v1738_v10, 16  ;;  %v2486_v12 = vld [vmem:[#allocation2 + $0xd0] sm:$0x8] }
 0x14e   : > { %v3405_v55 = vpop.f32.mrf.mxu0  ;;  %v2783_v9 = vor.u32 %v2781_v35, %v2780_v23  ;;  %v2792_v36 = vor.u32 %v2790_v6, %v2789_v44  ;;  %v2079_v57 = vor.u32 %v2078_v5, %v2075_v52  ;;  %v2803_v52 = vshll.u32 %v2487_v63, 16 }
 0x14f   : > { %v2061_v39 = vsel %vm7936_vm5, %v2056_v21, %v2060_v58  ;;  %v7124_v58 = vld [vmem:[#allocation2 + $0xb4] sm:$0xff]  ;;  %v7210_v21 = vld [vmem:[%s8977_s1 + $0x1c8] sm:$0xff]  ;;  %v2812_v5 = vshll.u32 %v2488_v3, 16 }
 0x150   : > { %v2207_v10 = vunpack.c.l.b16 %v2061_v39  ;;  %v2784_v6 = vsel %vm7565_vm2, %v6664_v50, %v2783_v9  ;;  %v2793_v44 = vsel %vm7565_vm2, %v2785_v51, %v2792_v36  ;;  %5234 = vmatpush.bf16.msra.mxu3 %v7210_v21 }
 0x151   : > { %v3027_v38 = vpop.f32.mrf.mxu3  ;;  %2355 = vmatmul.bf16.gmra.mxu2 %v2227_v48  ;;  %v2921_v9 = vunpack.c.l.b16 %v2784_v6 }
 0x152   : > { %v3103_v18 = vadd.f32 %v3027_v38, %v2389_v1  ;;  %v1569_v7 = vpop.f32.mrf.mxu1  ;;  %v2071_v1 = vsel %vm7936_vm5, %v2066_v2, %v2070_v42  ;;  %v7178_v2 = vld [vmem:[%s8977_s1 + $0x148] sm:$0xff] }
 0x153   : > { %v1642_v26 = vadd.f32 %v1569_v7, %v8103_v29  ;;  %v1739_v7 = vld [vmem:[#allocation2 + $0xcc] sm:$0x1]  ;;  %4141 = vmatpush.bf16.msra.mxu1 %v7178_v2 }
 0x154   : > { %v2316_v19 = vpop.f32.mrf.mxu2  ;;  %v8172_v16 = vadd.f32 %v3405_v55, %v3103_v18  ;;  %v7186_v55 = vld [vmem:[%s8977_s1 + $0x188] sm:$0xff]  ;;  %v2208_v18 = vunpack.c.l.b16 %v2071_v1 }
 0x155   : > { %v2390_v48 = vadd.f32 %v2316_v19, %v1641_v25  ;;  %v8181_v25 = vrot.slane %v2082_v59, 5  ;;  %4856 = vmatpush.bf16.msra.mxu2 %v7186_v55  ;;  %v2800_v19 = vshrl.u32 %v2487_v63, 16  ;;  %v2795_v55 = vshrl.u32 %v2486_v12, 16 }
 0x156   : > { %3069 = vmatmul.bf16.gmra.mxu3 %v2941_v24  ;;  %v3408_v29 = vpop.f32.mrf.mxu0  ;;  %v2088_v24 = vrot.slane %v2086_v37, 4  ;;  %v2228_v50 = vpack.c.b16 %v2208_v18, %v2207_v10 }
 0x157   : > { %v2802_v36 = vrot.slane %v2800_v19, 7  ;;  %v6665_v12 = vrot.slane %v2795_v55, 11 }
 0x158   : > { %v2089_v37 = vor.u32 %v2088_v24, %v8181_v25  ;;  %v7218_v24 = vld [vmem:[%s8977_s1 + $0x208] sm:$0xff] }
 0x159   : > { %v3030_v38 = vpop.f32.mrf.mxu3  ;;  %3447 = vmatmul.bf16.gmra.mxu0 %v7163_v45  ;;  %v2809_v45 = vshrl.u32 %v2488_v3, 16  ;;  %v2805_v19 = vor.u32 %v2803_v52, %v2802_v36  ;;  %v2490_v52 = vld [vmem:[#allocation2 + $0xe4] sm:$0xf] }
 0x15a   : > { %v3104_v23 = vadd.f32 %v3030_v38, %v2390_v48  ;;  %v1572_v35 = vpop.f32.mrf.mxu1  ;;  %v2092_v48 = vshll.u32 %v1739_v7, 16  ;;  %v1740_v38 = vld [vmem:[#allocation2 + $0xd4] sm:$0xf]  ;;  %v1741_v7 = vld [vmem:[#allocation2 + $0xd8] sm:$0xf]  ;;  %v2090_v21 = vrot.slane %v2089_v37, 4  ;;  %5980 = vmatpush.bf16.msra.mxu0 %v7218_v24 }
 0x15b   : > { %v1643_v42 = vadd.f32 %v1572_v35, %v8118_v22  ;;  %v2922_v22 = vunpack.c.l.b16 %v2793_v44  ;;  %v2080_v35 = vrot.slane %v2079_v57, 4  ;;  %v2100_v10 = vshll.u32 %v1740_v38, 16 }
 0x15c   : > { %v2318_v59 = vpop.f32.mrf.mxu2  ;;  %v8195_v39 = vadd.f32 %v3408_v29, %v3104_v23  ;;  %v2094_v29 = vrot.slane %v2092_v48, 5  ;;  %v2811_v23 = vrot.slane %v2809_v45, 7  ;;  %v2106_v44 = vshll.u32 %v1741_v7, 16 }
 0x15d   : > { %v2391_v1 = vadd.f32 %v2318_v59, %v1642_v26  ;;  %1611 = vmatmul.bf16.gmra.mxu1 %v7124_v58  ;;  %v2097_v58 = vshrl.u32 %v1740_v38, 16  ;;  %v2942_v6 = vpack.c.b16 %v2922_v22, %v2921_v9  ;;  %v2110_v63 = vshrl.u32 %v1741_v7, 16  ;;  %v7164_v38 = vld [vmem:[#allocation2 + $0xc4] sm:$0xff] }
 0x15e   : > { %8989 = vst [vmem:[#allocation6_spill] sm:$0xff] %v8195_v39  ;;  %v3410_v51 = vpop.f32.mrf.mxu0  ;;  %v2085_v57 = vsel %vm7936_vm5, %v2080_v35, %v8181_v25  ;;  %v2095_v37 = vsel %vm7936_vm5, %v2090_v21, %v2094_v29  ;;  %v2807_v48 = vrot.slane %v2802_v36, 4  ;;  %v2814_v45 = vor.u32 %v2812_v5, %v2811_v23  ;;  %v1742_v25 = vld [vmem:[#allocation2 + $0xdc] sm:$0x1]  ;;  %v7125_v5 = vld [vmem:[#allocation2 + $0xc4] sm:$0xff] }
 0x15f   : > { %v2102_v9 = vrot.slane %v2100_v10, 5  ;;  %v2112_v55 = vrot.slane %v2110_v63, 4  ;;  %v2209_v7 = vunpack.c.l.b16 %v2085_v57  ;;  %v2806_v35 = vsel %vm7565_vm2, %v6665_v12, %v2805_v19  ;;  %v2489_v21 = vld [vmem:[#allocation2 + $0xe0] sm:$0x8] }
 0x160   : > { %v2822_v29 = vshrl.u32 %v2490_v52, 16  ;;  %v2923_v63 = vunpack.c.l.b16 %v2806_v35  ;;  %v2817_v12 = vshrl.u32 %v2489_v21, 16  ;;  %v1743_v21 = vld [vmem:[#allocation2 + $0xe4] sm:$0xf] }
 0x161   : > { %v3032_v26 = vpop.f32.mrf.mxu3  ;;  %2360 = vmatmul.bf16.gmra.mxu2 %v2228_v50 }
 0x162   : > { %v3105_v18 = vadd.f32 %v3032_v26, %v2391_v1  ;;  %v1574_v2 = vpop.f32.mrf.mxu1  ;;  %v2099_v1 = vrot.slane %v2097_v58, 4  ;;  %v2210_v26 = vunpack.c.l.b16 %v2095_v37 }
 0x163   : > { %v1644_v3 = vadd.f32 %v1574_v2, %v8128_v56  ;;  %v2108_v56 = vrot.slane %v2106_v44, 5  ;;  %v7383_v2 = vld [vmem:[%s7507_s30 + $0x78] sm:$0xff]  }
 0x164   : > { %v2321_v59 = vpop.f32.mrf.mxu2  ;;  %v8206_v22 = vadd.f32 %v3410_v51, %v3105_v18  ;;  %v2103_v51 = vor.u32 %v2102_v9, %v2099_v1  ;;  %v2116_v18 = vshll.u32 %v1742_v25, 16  ;;  %v2229_v44 = vpack.c.b16 %v2210_v26, %v2209_v7  ;;  %v7436_v7 = vld [vmem:[%s8978_s2] ss:$0 sm:$0xff] }
 0x165   : > { %v2392_v50 = vadd.f32 %v2321_v59, %v1643_v42  ;;  %v2815_v42 = vsel %vm7565_vm2, %v2807_v48, %v2814_v45  ;;  %v2113_v10 = vor.u32 %v2112_v55, %v2108_v56  ;;  %v7287_v19 = vunpack.c.l.bf16 %v7383_v2 }
 0x166   : > { %8990 = vst [vmem:[#allocation7_spill] sm:$0xff] %v8206_v22  ;;  %3074 = vmatmul.bf16.gmra.mxu3 %v2942_v6  ;;  %v3413_v24 = vpop.f32.mrf.mxu0  ;;  %v2491_v6 = vld [vmem:[#allocation2 + $0xe8] sm:$0xf]  ;;  %v2924_v59 = vunpack.c.l.b16 %v2815_v42  ;;  %v7288_v37 = vunpack.c.h.bf16 %v7383_v2  ;;  %v2104_v1 = vrot.slane %v2103_v51, 4  ;;  %v8215_v9 = vrot.slane %v2822_v29, 7 }
 0x167   : > { %v2118_v55 = vrot.slane %v2116_v18, 5  ;;  %v2825_v25 = vshll.u32 %v2490_v52, 16  ;;  %v440_v26 = vmul.f32 %v7436_v7, %v7287_v19  ;;  %v2834_v51 = vshll.u32 %v2491_v6, 16  ;;  %v7437_v52 = vld [vmem:[%s8979_s3] ss:$0 sm:$0xff] }
 0x168   : > { %v441_v42 = vmul.f32 %v7436_v7, %v7288_v37  ;;  %v6666_v2 = vrot.slane %v2817_v12, 11  ;;  %v7165_v12 = vld [vmem:[#allocation2 + $0xd4] sm:$0xff]  ;;  %v5383_v22 = vld [vmem:[#allocation2 + $0x2c] sm:$0x1] }
 0x169   : > { %v3035_v36 = vpop.f32.mrf.mxu3  ;;  %3452 = vmatmul.bf16.gmra.mxu0 %v7164_v38  ;;  %v2114_v38 = vrot.slane %v2113_v10, 4  ;;  %v476_v29 = vadd.f32 %v7437_v52, %v440_v26 }
 0x16a   : > { %v3106_v23 = vadd.f32 %v3035_v36, %v2392_v50  ;;  %v1577_v58 = vpop.f32.mrf.mxu1  ;;  %v2831_v50 = vshrl.u32 %v2491_v6, 16  ;;  %v2943_v36 = vpack.c.b16 %v2924_v59, %v2923_v63  ;;  %v2827_v63 = vor.u32 %v2825_v25, %v8215_v9  ;;  %v1744_v59 = vld [vmem:[#allocation2 + $0xe8] sm:$0xf] }
 0x16b   : > { %v2119_v18 = vsel %vm7936_vm5, %v2114_v38, %v2118_v55  ;;  %v477_v19 = vadd.f32 %v7437_v52, %v441_v42  ;;  %v2130_v26 = vshll.u32 %v1744_v59, 16  ;;  %v8232_v55 = vld [vmem:[#allocation2 + $0xf4] sm:$0xf] }
 0x16c   : > { %v2323_v57 = vpop.f32.mrf.mxu2  ;;  %v8213_v48 = vadd.f32 %v3413_v24, %v3106_v23  ;;  %v2212_v38 = vunpack.c.l.b16 %v2119_v18  ;;  %v1745_v18 = vld [vmem:[#allocation2 + $0xec] sm:$0x1] }
 0x16d   : > { %v2393_v45 = vadd.f32 %v2323_v57, %v1644_v3  ;;  %1616 = vmatmul.bf16.gmra.mxu1 %v7125_v5  ;;  %v2109_v3 = vsel %vm7936_vm5, %v2104_v1, %v2108_v56  ;;  %v2833_v5 = vrot.slane %v2831_v50, 7  ;;  %v2121_v57 = vshrl.u32 %v1743_v21, 16 }
 0x16e   : > { %8991 = vst [vmem:[#allocation8_spill] sm:$0xff] %v8213_v48  ;;  %v3415_v35 = vpop.f32.mrf.mxu0  ;;  %v2124_v56 = vshll.u32 %v1743_v21, 16  ;;  %v8229_v37 = vunpack.c.l.b16 %v2109_v3  ;;  %v2829_v1 = vrot.slane %v8215_v9, 4  ;;  %v508_v50 = vmax.f32 %v476_v29, 0.0  ;;  %v7126_v29 = vld [vmem:[#allocation2 + $0xd4] sm:$0xff] }
 0x16f   : > { %v2836_v7 = vor.u32 %v2834_v51, %v2833_v5  ;;  %v509_v25 = vmax.f32 %v477_v19, 0.0  ;;  %v2828_v21 = vsel %vm7565_vm2, %v6666_v2, %v2827_v63  ;;  %v2123_v3 = vrot.slane %v2121_v57, 4  ;;  %v7185_v5 = vld [vmem:[%s8977_s1 + $0x180] sm:$0xff]  ;;  %v8241_v51 = vld [vmem:[#allocation2 + $0xf8] sm:$0xf] }
 0x170   : > { %v2126_v9 = vrot.slane %v2124_v56, 5  ;;  %4857 = vmatpush.bf16.msra.mxu2 %v7185_v5  ;;  %v2925_v56 = vunpack.c.l.b16 %v2828_v21  ;;  %v7209_v19 = vld [vmem:[%s8977_s1 + $0x1c0] sm:$0xff] }
 0x171   : > { %v3037_v24 = vpop.f32.mrf.mxu3  ;;  %2365 = vmatmul.bf16.gmra.mxu2 %v2229_v44  ;;  %v1645_v44 = vadd.f32 %v1577_v58, %v8004_v53  ;;  %v540_v53 = vpack.c.bf16 %v508_v50, %v508_v50  ;;  %v2837_v57 = vsel %vm7565_vm2, %v2829_v1, %v2836_v7  ;;  %v1746_v50 = vld [vmem:[#allocation2 + $0xf4] sm:$0xf]  ;;  %v2853_v1 = vshrl.u32 %v8241_v51, 16  ;;  %5235 = vmatpush.bf16.msra.mxu3 %v7209_v19 }
 0x172   : > { %v3107_v23 = vadd.f32 %v3037_v24, %v2393_v45  ;;  %v1579_v10 = vpop.f32.mrf.mxu1  ;;  %v2134_v24 = vshrl.u32 %v1744_v59, 16  ;;  %v8243_v59 = vrot.slane %v2130_v26, 5  ;;  %v2847_v19 = vshll.u32 %v8232_v55, 16 }
 0x173   : > { %573 = vst [vmem:[#allocation2 + $0x104] sm:$0xf] %v540_v53  ;;  %v1646_v26 = vadd.f32 %v1579_v10, %v8010_v11  ;;  %v2140_v11 = vshll.u32 %v1745_v18, 16 }
 0x174   : > { %v2326_v6 = vpop.f32.mrf.mxu2  ;;  %v8234_v58 = vadd.f32 %v3415_v35, %v3107_v23  ;;  %v2136_v35 = vrot.slane %v2134_v24, 4  ;;  %v2844_v23 = vshrl.u32 %v8232_v55, 16  ;;  %v1747_v24 = vld [vmem:[#allocation2 + $0xf8] sm:$0xf] }
 0x175   : > { %v2394_v45 = vadd.f32 %v2326_v6, %v1645_v44  ;;  %v2230_v44 = vpack.c.b16 %v2212_v38, %v8229_v37  ;;  %v7177_v6 = vld [vmem:[%s8977_s1 + $0x140] sm:$0xff]  ;;  %v2148_v37 = vshll.u32 %v1746_v50, 16  ;;  %v2154_v7 = vshll.u32 %v1747_v24, 16 }
 0x176   : > { %3079 = vmatmul.bf16.gmra.mxu3 %v2943_v36  ;;  %8992 = vst [vmem:[#allocation9_spill] sm:$0xff] %v8234_v58  ;;  %v3418_v42 = vpop.f32.mrf.mxu0  ;;  %v541_v36 = vpack.c.bf16 %v509_v25, %v509_v25  ;;  %v2492_v25 = vld [vmem:[#allocation2 + $0xf0] sm:$0x8]  ;;  %4142 = vmatpush.bf16.msra.mxu1 %v7177_v6  ;;  %v2158_v53 = vshrl.u32 %v1747_v24, 16 }
 0x177   : > { %v2839_v48 = vshrl.u32 %v2492_v25, 16 }
 0x178   : > { %574 = vst [vmem:[#allocation2 + $0x108] sm:$0xf] %v541_v36  ;;  %v2137_v36 = vor.u32 %v2136_v35, %v8243_v59  ;;  %v2856_v35 = vshll.u32 %v8241_v51, 16 }
 0x179   : > { %v3040_v52 = vpop.f32.mrf.mxu3  ;;  %3457 = vmatmul.bf16.gmra.mxu0 %v7165_v12  ;;  %v2145_v12 = vshrl.u32 %v1746_v50, 16  ;;  %v2160_v50 = vrot.slane %v2158_v53, 4 }
 0x17a   : > { %v3108_v2 = vadd.f32 %v3040_v52, %v2394_v45  ;;  %v1582_v63 = vpop.f32.mrf.mxu1  ;;  %v2127_v45 = vor.u32 %v2126_v9, %v2123_v3  ;;  %v2926_v52 = vunpack.c.l.b16 %v2837_v57  ;;  %v2150_v3 = vrot.slane %v2148_v37, 5  ;;  %v2496_v53 = vld [vmem:[#allocation2 + $0x104] sm:$0xf] }
 0x17b   : > { %v2147_v10 = vrot.slane %v2145_v12, 4  ;;  %v8260_v9 = vrot.slane %v2154_v7, 5  ;;  %v2855_v57 = vrot.slane %v2853_v1, 7  ;;  %v2138_v24 = vrot.slane %v2137_v36, 4 }
 0x17c   : > { %v2328_v38 = vpop.f32.mrf.mxu2  ;;  %v8257_v21 = vadd.f32 %v3418_v42, %v3108_v2  ;;  %v7217_v42 = vld [vmem:[%s8977_s1 + $0x200] sm:$0xff]  ;;  %v1748_v2 = vld [vmem:[#allocation2 + $0xfc] sm:$0x1]  ;;  %v2128_v6 = vrot.slane %v2127_v45, 4  ;;  %v2142_v12 = vrot.slane %v2140_v11, 5  ;;  %v6667_v45 = vrot.slane %v2839_v48, 11 }
 0x17d   : > { %v2395_v5 = vadd.f32 %v2328_v38, %v1646_v26  ;;  %1621 = vmatmul.bf16.gmra.mxu1 %v7126_v29  ;;  %v2846_v29 = vrot.slane %v2844_v23, 7  ;;  %v2944_v26 = vpack.c.b16 %v2926_v52, %v2925_v56  ;;  %5981 = vmatpush.bf16.msra.mxu0 %v7217_v42  ;;  %v2151_v25 = vor.u32 %v2150_v3, %v2147_v10  ;;  %v7166_v3 = vld [vmem:[#allocation2 + $0xe4] sm:$0xff] }
 0x17e   : > { %8993 = vst [vmem:[#allocation10_spill] sm:$0xff] %v8257_v21  ;;  %v3420_v58 = vpop.f32.mrf.mxu0  ;;  %v2161_v55 = vor.u32 %v2160_v50, %v8260_v9  ;;  %v2164_v7 = vshll.u32 %v1748_v2, 16  ;;  %v1647_v21 = vadd.f32 %v1582_v63, %v8022_v41  ;;  %v2133_v51 = vsel %vm7936_vm5, %v2128_v6, %v8243_v59  ;;  %v2495_v50 = vld [vmem:[#allocation2 + $0x100] sm:$0x8] }
 0x17f   : > { %v2851_v56 = vrot.slane %v2846_v29, 4  ;;  %v2858_v1 = vor.u32 %v2856_v35, %v2855_v57  ;;  %v2497_v52 = vld [vmem:[#allocation2 + $0x108] sm:$0xf]  ;;  %v2866_v11 = vshrl.u32 %v2496_v53, 16  ;;  %v2152_v41 = vrot.slane %v2151_v25, 4 }
 0x180   : > { %v2162_v48 = vrot.slane %v2161_v55, 4  ;;  %v2166_v63 = vrot.slane %v2164_v7, 5  ;;  %v2875_v2 = vshrl.u32 %v2497_v52, 16  ;;  %v2213_v59 = vunpack.c.l.b16 %v2133_v51  ;;  %v7127_v57 = vld [vmem:[#allocation2 + $0xe4] sm:$0xff]  ;;  %v3542_v7 = vld [vmem:[#allocation2 + $0x14] sm:$0xf] }
 0x181   : > { %v3042_v18 = vpop.f32.mrf.mxu3  ;;  %2370 = vmatmul.bf16.gmra.mxu2 %v2230_v44  ;;  %v2849_v44 = vor.u32 %v2847_v19, %v2846_v29  ;;  %v2861_v35 = vshrl.u32 %v2495_v50, 16  ;;  %v2878_v55 = vshll.u32 %v2497_v52, 16  ;;  %v3623_v51 = vshrl.u32 %v3542_v7, 16 }
 0x182   : > { %v3109_v37 = vadd.f32 %v3042_v18, %v2395_v5  ;;  %v1584_v38 = vpop.f32.mrf.mxu1  ;;  %v2143_v5 = vsel %vm7936_vm5, %v2138_v24, %v2142_v12  ;;  %v2868_v18 = vrot.slane %v2866_v11, 7  ;;  %v2167_v25 = vsel %vm7936_vm5, %v2162_v48, %v2166_v63 }
 0x183   : > { %v2214_v19 = vunpack.c.l.b16 %v2143_v5  ;;  %v2850_v6 = vsel %vm7565_vm2, %v6667_v45, %v2849_v44  ;;  %v3543_v45 = vld [vmem:[#allocation2 + $0x18] sm:$0xf]  ;;  %v8290_v52 = vunpack.c.l.b16 %v2167_v25  ;;  %v6668_v63 = vrot.slane %v2861_v35, 11 }
 0x184   : > { %v2331_v23 = vpop.f32.mrf.mxu2  ;;  %v8274_v10 = vadd.f32 %v3420_v58, %v3109_v37  ;;  %v1648_v58 = vadd.f32 %v1584_v38, %v8050_v13  ;;  %v2157_v37 = vsel %vm7936_vm5, %v2152_v41, %v8260_v9  ;;  %v3626_v13 = vshll.u32 %v3542_v7, 16  ;;  %v4290_v41 = vld [vmem:[#allocation2 + $0x24] sm:$0xf] }
 0x185   : > { %v2396_v36 = vadd.f32 %v2331_v23, %v1647_v21  ;;  %v2859_v21 = vsel %vm7565_vm2, %v2851_v56, %v2858_v1  ;;  %v2877_v23 = vrot.slane %v2875_v2, 7  ;;  %v3632_v38 = vshll.u32 %v3543_v45, 16  ;;  %v4291_v2 = vld [vmem:[#allocation2 + $0x28] sm:$0xf] }
 0x186   : > { %8994 = vst [vmem:[#allocation11_spill] sm:$0xff] %v8274_v10  ;;  %3084 = vmatmul.bf16.gmra.mxu3 %v2944_v26  ;;  %v3423_v42 = vpop.f32.mrf.mxu0  ;;  %v2869_v26 = vshll.u32 %v2496_v53, 16  ;;  %v2231_v56 = vpack.c.b16 %v2214_v19, %v2213_v59  ;;  %v2927_v53 = vunpack.c.l.b16 %v2850_v6  ;;  %v3636_v1 = vshrl.u32 %v3543_v45, 16  ;;  %v3544_v6 = vld [vmem:[#allocation2 + $0x1c] sm:$0x1] }
 0x187   : > { %v2928_v11 = vunpack.c.l.b16 %v2859_v21  ;;  %v3625_v9 = vrot.slane %v3623_v51, 4  ;;  %v8288_v48 = vunpack.c.l.b16 %v2157_v37  ;;  %v2873_v7 = vrot.slane %v2868_v18, 4 }
 0x188   : > { %v2871_v50 = vor.u32 %v2869_v26, %v2868_v18  ;;  %v2880_v59 = vor.u32 %v2878_v55, %v2877_v23  ;;  %v8292_v19 = vrot.slane %v3632_v38, 5  ;;  %v4375_v21 = vshrl.u32 %v4290_v41, 16 }
 0x189   : > { %v3045_v29 = vpop.f32.mrf.mxu3  ;;  %3462 = vmatmul.bf16.gmra.mxu0 %v7166_v3  ;;  %v3628_v3 = vrot.slane %v3626_v13, 5  ;;  %v2945_v45 = vpack.c.b16 %v2928_v11, %v2927_v53  ;;  %v4384_v51 = vshrl.u32 %v4291_v2, 16  ;;  %v3642_v38 = vshll.u32 %v3544_v6, 16 }
 0x18a   : > { %v3110_v24 = vadd.f32 %v3045_v29, %v2396_v36  ;;  %v1587_v12 = vpop.f32.mrf.mxu1  ;;  %v2872_v18 = vsel %vm7565_vm2, %v6668_v63, %v2871_v50  ;;  %v2881_v23 = vsel %vm7565_vm2, %v2873_v7, %v2880_v59  ;;  %v4378_v11 = vshll.u32 %v4290_v41, 16  ;;  %v7167_v63 = vld [vmem:[#allocation2 + $0xf4] sm:$0xff] }
 0x18b   : > { %v3629_v37 = vor.u32 %v3628_v3, %v3625_v9  ;;  %v1649_v55 = vadd.f32 %v1587_v12, %v8060_v49  ;;  %v4386_v35 = vrot.slane %v4384_v51, 7  ;;  %v2929_v59 = vunpack.c.l.b16 %v2872_v18 }
 0x18c   : > { %v2333_v44 = vpop.f32.mrf.mxu2  ;;  %v8286_v36 = vadd.f32 %v3423_v42, %v3110_v24  ;;  %v5381_v42 = vld [vmem:[#allocation2 + $0x24] sm:$0xf]  ;;  %v2930_v6 = vunpack.c.l.b16 %v2881_v23 }
 0x18d   : > { %v2397_v5 = vadd.f32 %v2333_v44, %v1648_v58  ;;  %1626 = vmatmul.bf16.gmra.mxu1 %v7127_v57  ;;  %v3638_v58 = vrot.slane %v3636_v1, 4  ;;  %v4289_v57 = vld [vmem:[#allocation2 + $0x20] sm:$0x8]  ;;  %v5462_v26 = vshrl.u32 %v5381_v42, 16  ;;  %v5465_v9 = vshll.u32 %v5381_v42, 16 }
 0x18e   : > { %8995 = vst [vmem:[#allocation12_spill] sm:$0xff] %v8286_v36  ;;  %v3425_v29 = vpop.f32.mrf.mxu0  ;;  %v4370_v44 = vshrl.u32 %v4289_v57, 16  ;;  %v4387_v36 = vshll.u32 %v4291_v2, 16  ;;  %v3644_v57 = vrot.slane %v3642_v38, 5  ;;  %v5481_v38 = vshll.u32 %v5383_v22, 16 }
 0x18f   : > { %v3639_v1 = vor.u32 %v3638_v58, %v8292_v19  ;;  %v5464_v50 = vrot.slane %v5462_v26, 4  ;;  %v5467_v49 = vrot.slane %v5465_v9, 5  ;;  %v2946_v9 = vpack.c.b16 %v2930_v6, %v2929_v59 }
 0x190   : > { %v6877_v41 = vrot.slane %v4370_v44, 11  ;;  %v3545_v44 = vld [vmem:[#allocation2 + $0x24] sm:$0xf] }
 0x191   : > { %v3047_v24 = vpop.f32.mrf.mxu3  ;;  %2375 = vmatmul.bf16.gmra.mxu2 %v2231_v56  ;;  %v5382_v56 = vld [vmem:[#allocation2 + $0x28] sm:$0xf]  ;;  %v3640_v58 = vrot.slane %v3639_v1, 4  ;;  %v3650_v1 = vshll.u32 %v3545_v44, 16 }
 0x192   : > { %v3111_v25 = vadd.f32 %v3047_v24, %v2397_v5  ;;  %v1589_v13 = vpop.f32.mrf.mxu1  ;;  %v4377_v5 = vrot.slane %v4375_v21, 7  ;;  %v3630_v24 = vrot.slane %v3629_v37, 4  ;;  %v5471_v12 = vshll.u32 %v5382_v56, 16 }
 0x193   : > { %v5475_v10 = vshrl.u32 %v5382_v56, 16  ;;  %v1650_v2 = vadd.f32 %v1589_v13, %v8076_v20  ;;  %v3546_v56 = vld [vmem:[#allocation2 + $0x28] sm:$0xf] }
 0x194   : > { %v2336_v53 = vpop.f32.mrf.mxu2  ;;  %v8302_v39 = vadd.f32 %v3425_v29, %v3111_v25  ;;  %v8304_v42 = vrot.slane %v5471_v12, 5  ;;  %v3635_v51 = vsel %vm7936_vm5, %v3630_v24, %v8292_v19  ;;  %v4380_v26 = vor.u32 %v4378_v11, %v4377_v5  ;;  %v4293_v24 = vld [vmem:[#allocation2 + $0x34] sm:$0xf]  ;;  %v3547_v12 = vld [vmem:[#allocation2 + $0x2c] sm:$0x1] }
 0x195   : > { %v2398_v3 = vadd.f32 %v2336_v53, %v1649_v55  ;;  %v5477_v21 = vrot.slane %v5475_v10, 4  ;;  %v4382_v18 = vrot.slane %v4377_v5, 4  ;;  %v4389_v29 = vor.u32 %v4387_v36, %v4386_v35 }
 0x196   : > { %3089 = vmatmul.bf16.gmra.mxu3 %v2945_v45  ;;  %v3428_v7 = vpop.f32.mrf.mxu0  ;;  %8996 = vst [vmem:[#allocation13_spill] sm:$0xff] %v8302_v39  ;;  %v7128_v45 = vld [vmem:[#allocation2 + $0xf4] sm:$0xff]  ;;  %v5468_v25 = vor.u32 %v5467_v49, %v5464_v50  ;;  %v3647_v53 = vshrl.u32 %v3545_v44, 16  ;;  %v3656_v20 = vshll.u32 %v3546_v56, 16  ;;  %v3645_v19 = vsel %vm7936_vm5, %v3640_v58, %v3644_v57 }
 0x197   : > { %v5478_v10 = vor.u32 %v5477_v21, %v8304_v42  ;;  %v3660_v11 = vshrl.u32 %v3546_v56, 16  ;;  %v8315_v36 = vunpack.c.l.b16 %v3635_v51  ;;  %v3652_v35 = vrot.slane %v3650_v1, 5  ;;  %v5384_v56 = vld [vmem:[#allocation2 + $0x34] sm:$0xf] }
 0x198   : > { %v3649_v22 = vrot.slane %v3647_v53, 4  ;;  %v4381_v50 = vsel %vm7565_vm2, %v6877_v41, %v4380_v26  ;;  %v4390_v49 = vsel %vm7565_vm2, %v4382_v18, %v4389_v29  ;;  %v8321_v59 = vrot.slane %v3656_v20, 5 }
 0x199   : > { %v3050_v37 = vpop.f32.mrf.mxu3  ;;  %3467 = vmatmul.bf16.gmra.mxu0 %v7167_v63  ;;  %v4294_v63 = vld [vmem:[#allocation2 + $0x38] sm:$0xf]  ;;  %v3662_v6 = vrot.slane %v3660_v11, 4  ;;  %v5469_v58 = vrot.slane %v5468_v25, 4  ;;  %v5479_v21 = vrot.slane %v5478_v10, 4  ;;  %v8998_v41 = vpack.c.b16 %v8290_v52, %v8288_v48 }
 0x19a   : > { %v3112_v55 = vadd.f32 %v3050_v37, %v2398_v3  ;;  %v1592_v23 = vpop.f32.mrf.mxu1  ;;  %v5483_v37 = vrot.slane %v5481_v38, 5  ;;  %v4406_v44 = vshrl.u32 %v4294_v63, 16  ;;  %v4024_v26 = vunpack.c.l.b16 %v3645_v19 }
 0x19b   : > { %v4738_v18 = vunpack.c.l.b16 %v4381_v50  ;;  %v3663_v29 = vor.u32 %v3662_v6, %v8321_v59  ;;  %v4400_v1 = vshll.u32 %v4293_v24, 16  ;;  %v4739_v10 = vunpack.c.l.b16 %v4390_v49 }
 0x19c   : > { %v2338_v13 = vpop.f32.mrf.mxu2  ;;  %v8313_v5 = vadd.f32 %v3428_v7, %v3112_v55  ;;  %v4292_v7 = vld [vmem:[#allocation2 + $0x30] sm:$0x8]  ;;  %v4397_v55 = vshrl.u32 %v4293_v24, 16  ;;  %v1651_v11 = vadd.f32 %v1592_v23, %v8091_v17  ;;  %v5486_v48 = vshrl.u32 %v5384_v56, 16  ;;  %v7168_v17 = vld [vmem:[#allocation2 + $0x104] sm:$0xff] }
 0x19d   : > { %v2399_v3 = vadd.f32 %v2338_v13, %v1650_v2  ;;  %1631 = vmatmul.bf16.gmra.mxu1 %v7128_v45  ;;  %v3653_v2 = vor.u32 %v3652_v35, %v3649_v22  ;;  %v3666_v45 = vshll.u32 %v3547_v12, 16  ;;  %v4392_v51 = vshrl.u32 %v4292_v7, 16  ;;  %v5385_v12 = vld [vmem:[#allocation2 + $0x38] sm:$0xf] }
 0x19e   : > { %8997 = vst [vmem:[#allocation14_spill] sm:$0xff] %v8313_v5  ;;  %v3430_v57 = vpop.f32.mrf.mxu0  ;;  %v4399_v38 = vrot.slane %v4397_v55, 7  ;;  %v4408_v13 = vrot.slane %v4406_v44, 7  ;;  %v5474_v22 = vsel %vm7936_vm5, %v5469_v58, %v8304_v42  ;;  %v4409_v35 = vshll.u32 %v4294_v63, 16 }
 0x19f   : > { %v5484_v19 = vsel %vm7936_vm5, %v5479_v21, %v5483_v37  ;;  %v3654_v50 = vrot.slane %v3653_v2, 4  ;;  %v3668_v24 = vrot.slane %v3666_v45, 5  ;;  %v3664_v49 = vrot.slane %v3663_v29, 4  ;;  %v5386_v29 = vld [vmem:[#allocation2 + $0x3c] sm:$0x1] }
 0x1a0   : > { %v4402_v7 = vor.u32 %v4400_v1, %v4399_v38  ;;  %v4404_v55 = vrot.slane %v4399_v38, 4  ;;  %v4411_v23 = vor.u32 %v4409_v35, %v4408_v13  ;;  %v5489_v44 = vshll.u32 %v5384_v56, 16  ;;  %v3549_v38 = vld [vmem:[#allocation2 + $0x38] sm:$0xf] }
 0x1a1   : > { %v3052_v53 = vpop.f32.mrf.mxu3  ;;  %2380 = vmatmul.bf16.gmra.mxu2 %v8998_v41  ;;  %v5499_v42 = vshrl.u32 %v5385_v12, 16  ;;  %v4055_v58 = vpack.c.b16 %v4024_v26, %v8315_v36  ;;  %v4770_v41 = vpack.c.b16 %v4739_v10, %v4738_v18  ;;  %v5488_v5 = vrot.slane %v5486_v48, 4  ;;  %v4296_v48 = vld [vmem:[#allocation2 + $0x44] sm:$0xf] }
 0x1a2   : > { %v3113_v20 = vadd.f32 %v3052_v53, %v2399_v3  ;;  %v1594_v25 = vpop.f32.mrf.mxu1  ;;  %v6878_v3 = vrot.slane %v4392_v51, 11  ;;  %v5495_v53 = vshll.u32 %v5385_v12, 16  ;;  %v8334_v39 = vunpack.c.l.b16 %v5474_v22 }
 0x1a3   : > { %v5491_v21 = vrot.slane %v5489_v44, 5  ;;  %v5501_v2 = vrot.slane %v5499_v42, 4  ;;  %v1652_v51 = vadd.f32 %v1594_v25, %v8110_v60  ;;  %v3659_v56 = vsel %vm7936_vm5, %v3654_v50, %v8321_v59  ;;  %v3548_v25 = vld [vmem:[#allocation2 + $0x34] sm:$0xf] }
 0x1a4   : > { %v2341_v52 = vpop.f32.mrf.mxu2  ;;  %v8336_v37 = vrot.slane %v5495_v53, 5  ;;  %v8344_v1 = vadd.f32 %v3430_v57, %v3113_v20  ;;  %v3669_v18 = vsel %vm7936_vm5, %v3664_v49, %v3668_v24  ;;  %v4403_v10 = vsel %vm7565_vm2, %v6878_v3, %v4402_v7  ;;  %v3550_v7 = vld [vmem:[#allocation2 + $0x3c] sm:$0x1] }
 0x1a5   : > { %v2400_v6 = vadd.f32 %v2341_v52, %v1651_v11  ;;  %v4412_v60 = vsel %vm7565_vm2, %v4404_v55, %v4411_v23  ;;  %v5492_v13 = vor.u32 %v5491_v21, %v5488_v5  ;;  %v3671_v11 = vshrl.u32 %v3548_v25, 16 }
 0x1a6   : > { %3094 = vmatmul.bf16.gmra.mxu3 %v2946_v9  ;;  %v3433_v63 = vpop.f32.mrf.mxu0  ;;  %v8339_v9 = vunpack.c.l.b16 %v5484_v19  ;;  %v3674_v59 = vshll.u32 %v3548_v25, 16  ;;  %v3680_v22 = vshll.u32 %v3549_v38, 16  ;;  %v5502_v20 = vor.u32 %v5501_v2, %v8336_v37 }
 0x1a7   : > { %v5505_v35 = vshll.u32 %v5386_v29, 16  ;;  %v3684_v12 = vshrl.u32 %v3549_v38, 16  ;;  %v3673_v50 = vrot.slane %v3671_v11, 4  ;;  %v8357_v49 = vunpack.c.l.b16 %v3659_v56  ;;  %v7193_v38 = vld [vmem:[#allocation2 + $0x24] sm:$0xff] }
 0x1a8   : > { %v3676_v24 = vrot.slane %v3674_v59, 5  ;;  %v8355_v3 = vrot.slane %v3680_v22, 5  ;;  %v8359_v5 = vunpack.c.l.b16 %v3669_v18  ;;  %v4419_v23 = vshrl.u32 %v4296_v48, 16  ;;  %v5387_v59 = vld [vmem:[#allocation2 + $0x44] sm:$0xf] }
 0x1a9   : > { %v3055_v45 = vpop.f32.mrf.mxu3  ;;  %3472 = vmatmul.bf16.gmra.mxu0 %v7168_v17  ;;  %v3686_v55 = vrot.slane %v3684_v12, 4  ;;  %v4295_v17 = vld [vmem:[#allocation2 + $0x40] sm:$0x8]  ;;  %v4740_v53 = vunpack.c.l.b16 %v4403_v10  ;;  %v4741_v42 = vunpack.c.l.b16 %v4412_v60  ;;  %v5503_v2 = vrot.slane %v5502_v20, 4 }
 0x1aa   : > { %v3114_v36 = vadd.f32 %v3055_v45, %v2400_v6  ;;  %v1597_v26 = vpop.f32.mrf.mxu1  ;;  %v4297_v6 = vld [vmem:[#allocation2 + $0x48] sm:$0xf]  ;;  %v3677_v21 = vor.u32 %v3676_v24, %v3673_v50  ;;  %v3690_v45 = vshll.u32 %v3550_v7, 16  ;;  %v5894_v56 = vpack.c.b16 %v8339_v9, %v8334_v39 }
 0x1ab   : > { %v3687_v29 = vor.u32 %v3686_v55, %v8355_v3  ;;  %v4428_v18 = vshrl.u32 %v4297_v6, 16  ;;  %v4056_v10 = vpack.c.b16 %v8359_v5, %v8357_v49  ;;  %v4421_v60 = vrot.slane %v4419_v23, 7  ;;  %v5388_v9 = vld [vmem:[#allocation2 + $0x48] sm:$0xf] }
 0x1ac   : > { %v2343_v57 = vpop.f32.mrf.mxu2  ;;  %v8353_v52 = vadd.f32 %v3433_v63, %v3114_v36  ;;  %v5493_v63 = vrot.slane %v5492_v13, 4  ;;  %v4414_v36 = vshrl.u32 %v4295_v17, 16  ;;  %v4422_v13 = vshll.u32 %v4296_v48, 16 }
 0x1ad   : > { %v2401_v19 = vadd.f32 %v2343_v57, %v1652_v51  ;;  %4143 = vmatmul.bf16.vlgmr.msra.gmra.mxu1 %v4055_v58  ;;  %v5507_v58 = vrot.slane %v5505_v35, 5  ;;  %v1653_v22 = vadd.f32 %v1597_v26, %v8018_v30  ;;  %v8367_v57 = vpack.c.b16 %v4741_v42, %v4740_v53 }
 0x1ae   : > { %v3435_v44 = vpop.f32.mrf.mxu0  ;;  %v5498_v39 = vsel %vm7936_vm5, %v5493_v63, %v8336_v37  ;;  %v3692_v12 = vrot.slane %v3690_v45, 5  ;;  %v4431_v50 = vshll.u32 %v4297_v6, 16  ;;  %v3688_v48 = vrot.slane %v3687_v29, 4  ;;  %v5389_v63 = vld [vmem:[#allocation2 + $0x4c] sm:$0x1] }
 0x1af   : > { %v5508_v35 = vsel %vm7936_vm5, %v5503_v2, %v5507_v58  ;;  %v6879_v49 = vrot.slane %v4414_v36, 11  ;;  %v5510_v5 = vshrl.u32 %v5387_v59, 16  ;;  %v4424_v30 = vor.u32 %v4422_v13, %v4421_v60  ;;  %v3551_v13 = vld [vmem:[#allocation2 + $0x44] sm:$0xf] }
 0x1b0   : > { %v5513_v26 = vshll.u32 %v5387_v59, 16  ;;  %v5519_v7 = vshll.u32 %v5388_v9, 16  ;;  %v5523_v55 = vshrl.u32 %v5388_v9, 16  ;;  %v4426_v23 = vrot.slane %v4421_v60, 4  ;;  %v3552_v59 = vld [vmem:[#allocation2 + $0x48] sm:$0xf] }
 0x1b1   : > { %v3057_v51 = vpop.f32.mrf.mxu3  ;;  %4858 = vmatmul.bf16.vlgmr.msra.gmra.mxu2 %v4770_v41  ;;  %v3678_v41 = vrot.slane %v3677_v21, 4  ;;  %v5512_v53 = vrot.slane %v5510_v5, 4  ;;  %v8384_v29 = vunpack.c.l.b16 %v5498_v39  ;;  %v8386_v36 = vunpack.c.l.b16 %v5508_v35 }
 0x1b2   : > { %v3115_v25 = vadd.f32 %v3057_v51, %v2401_v19  ;;  %v1599_v11 = vpop.f32.mrf.mxu1  ;;  %v4430_v19 = vrot.slane %v4428_v18, 7  ;;  %v5515_v21 = vrot.slane %v5513_v26, 5  ;;  %v8381_v2 = vrot.slane %v5519_v7, 5  ;;  %v3553_v26 = vld [vmem:[#allocation2 + $0x4c] sm:$0x1] }
 0x1b3   : > { %v3683_v37 = vsel %vm7936_vm5, %v3678_v41, %v8355_v3  ;;  %v5525_v58 = vrot.slane %v5523_v55, 4  ;;  %v1654_v51 = vadd.f32 %v1599_v11, %v8026_v47  ;;  %v3693_v3 = vsel %vm7936_vm5, %v3688_v48, %v3692_v12  ;;  %v4299_v12 = vld [vmem:[#allocation2 + $0x54] sm:$0xf]  ;;  %v4300_v48 = vld [vmem:[#allocation2 + $0x58] sm:$0xf] }
 0x1b4   : > { %v2346_v20 = vpop.f32.mrf.mxu2  ;;  %v8379_v42 = vadd.f32 %v3435_v44, %v3115_v25  ;;  %v4433_v6 = vor.u32 %v4431_v50, %v4430_v19  ;;  %v8392_v25 = vunpack.c.l.b16 %v3683_v37  ;;  %v5516_v60 = vor.u32 %v5515_v21, %v5512_v53  ;;  %v4298_v37 = vld [vmem:[#allocation2 + $0x50] sm:$0x8] }
 0x1b5   : > { %v2402_v24 = vadd.f32 %v2346_v20, %v1653_v22  ;;  %v5526_v47 = vor.u32 %v5525_v58, %v8381_v2  ;;  %v5529_v11 = vshll.u32 %v5389_v63, 16  ;;  %v3695_v22 = vshrl.u32 %v3551_v13, 16 }
 0x1b6   : > { %5236 = vmatmul.bf16.vlgmr.msra.gmra.mxu3 %v7193_v38  ;;  %v8374_v17 = vpop.f32.mrf.mxu0  ;;  %v4425_v38 = vsel %vm7565_vm2, %v6879_v49, %v4424_v30  ;;  %v3698_v39 = vshll.u32 %v3551_v13, 16  ;;  %v5517_v9 = vrot.slane %v5516_v60, 4  ;;  %v3704_v20 = vshll.u32 %v3552_v59, 16 }
 0x1b7   : > { %v3708_v35 = vshrl.u32 %v3552_v59, 16  ;;  %v3697_v50 = vrot.slane %v3695_v22, 4  ;;  %v4441_v49 = vshrl.u32 %v4299_v12, 16  ;;  %v8399_v5 = vunpack.c.l.b16 %v3693_v3  ;;  %v7194_v59 = vld [vmem:[#allocation2 + $0x34] sm:$0xff] }
 0x1b8   : > { %v4742_v30 = vunpack.c.l.b16 %v4425_v38  ;;  %v3706_v7 = vrot.slane %v3704_v20, 5  ;;  %v5895_v58 = vpack.c.b16 %v8386_v36, %v8384_v29  ;;  %v4436_v38 = vshrl.u32 %v4298_v37, 16  ;;  %v5390_v29 = vld [vmem:[#allocation2 + $0x54] sm:$0xf] }
 0x1b9   : > { %v3060_v45 = vpop.f32.mrf.mxu3  ;;  %5982 = vmatmul.bf16.vlgmr.msra.gmra.mxu0 %v5894_v56  ;;  %v4434_v56 = vsel %vm7565_vm2, %v4426_v23, %v4433_v6  ;;  %v3710_v55 = vrot.slane %v3708_v35, 4  ;;  %v5527_v23 = vrot.slane %v5526_v47, 4  ;;  %v5531_v6 = vrot.slane %v5529_v11, 5 }
 0x1ba   : > { %v8390_v18 = vadd.f32 %v3060_v45, %v2402_v24  ;;  %v1602_v44 = vpop.f32.mrf.mxu1  ;;  %v3700_v24 = vrot.slane %v3698_v39, 5  ;;  %v4743_v63 = vunpack.c.l.b16 %v4434_v56  ;;  %v4450_v60 = vshrl.u32 %v4300_v48, 16  ;;  %v5391_v56 = vld [vmem:[#allocation2 + $0x58] sm:$0xf] }
 0x1bb   : > { %v3711_v3 = vor.u32 %v3710_v55, %v3706_v7  ;;  %v4057_v47 = vpack.c.b16 %v8399_v5, %v8392_v25  ;;  %v4443_v11 = vrot.slane %v4441_v49, 7  ;;  %v4444_v39 = vshll.u32 %v4299_v12, 16 }
 0x1bc   : > { %v2348_v41 = vpop.f32.mrf.mxu2  ;;  %v3701_v21 = vor.u32 %v3700_v24, %v3697_v50  ;;  %v1655_v36 = vadd.f32 %v1602_v44, %v8052_v15  ;;  %v4453_v50 = vshll.u32 %v4300_v48, 16  ;;  %v6880_v49 = vrot.slane %v4436_v38, 11 }
 0x1bd   : > { %v2403_v19 = vadd.f32 %v2348_v41, %v1654_v51  ;;  %4148 = vmatmul.bf16.gmra.mxu1 %v4056_v10  ;;  %v3714_v10 = vshll.u32 %v3553_v26, 16  ;;  %v5522_v51 = vsel %vm7936_vm5, %v5517_v9, %v8381_v2  ;;  %v8410_v41 = vpack.c.b16 %v4743_v63, %v4742_v30 }
 0x1be   : > { %v3440_v53 = vpop.f32.mrf.mxu0  ;;  %v3702_v2 = vrot.slane %v3701_v21, 4  ;;  %v8414_v20 = vunpack.c.l.b16 %v5522_v51  ;;  %v3712_v25 = vrot.slane %v3711_v3, 4  ;;  %v5534_v12 = vshrl.u32 %v5390_v29, 16 }
 0x1bf   : > { %v3716_v35 = vrot.slane %v3714_v10, 5  ;;  %v4446_v5 = vor.u32 %v4444_v39, %v4443_v11  ;;  %v5537_v15 = vshll.u32 %v5390_v29, 16  ;;  %v5543_v44 = vshll.u32 %v5391_v56, 16  ;;  %v3554_v29 = vld [vmem:[#allocation2 + $0x54] sm:$0xf] }
 0x1c0   : > { %v5547_v30 = vshrl.u32 %v5391_v56, 16  ;;  %v3707_v55 = vsel %vm7936_vm5, %v3702_v2, %v3706_v7  ;;  %v4448_v37 = vrot.slane %v4443_v11, 4  ;;  %v5536_v63 = vrot.slane %v5534_v12, 4 }
 0x1c1   : > { %v3062_v45 = vpop.f32.mrf.mxu3  ;;  %4863 = vmatmul.bf16.gmra.mxu2 %v8367_v57  ;;  %v5532_v57 = vsel %vm7936_vm5, %v5527_v23, %v5531_v6  ;;  %v8422_v23 = vadd.f32 %v8374_v17, %v8390_v18  ;;  %v5392_v6 = vld [vmem:[#allocation2 + $0x5c] sm:$0x1]  ;;  %v5539_v21 = vrot.slane %v5537_v15, 5  ;;  %v8424_v10 = vrot.slane %v5543_v44, 5 }
 0x1c2   : > { %v3117_v13 = vadd.f32 %v3062_v45, %v2403_v19  ;;  %v1604_v22 = vpop.f32.mrf.mxu1  ;;  %v4452_v19 = vrot.slane %v4450_v60, 7  ;;  %v5549_v45 = vrot.slane %v5547_v30, 4  ;;  %v8427_v38 = vunpack.c.l.b16 %v5532_v57  ;;  %v3556_v15 = vld [vmem:[#allocation2 + $0x5c] sm:$0x1] }
 0x1c3   : > { %v1656_v3 = vadd.f32 %v1604_v22, %v8058_v43  ;;  %v3717_v7 = vsel %vm7936_vm5, %v3712_v25, %v3716_v35  ;;  %v8435_v18 = vunpack.c.l.b16 %v3707_v55  ;;  %v4447_v11 = vsel %vm7565_vm2, %v6880_v49, %v4446_v5  ;;  %v4302_v35 = vld [vmem:[#allocation2 + $0x64] sm:$0xf]  ;;  %v4303_v25 = vld [vmem:[#allocation2 + $0x68] sm:$0xf]  ;;  %v4301_v55 = vld [vmem:[#allocation2 + $0x60] sm:$0x8] }
 0x1c4   : > { %v2351_v9 = vpop.f32.mrf.mxu2  ;;  %v4455_v48 = vor.u32 %v4453_v50, %v4452_v19  ;;  %v8431_v60 = vadd.f32 %v3440_v53, %v3117_v13  ;;  %v5540_v39 = vor.u32 %v5539_v21, %v5536_v63  ;;  %v5550_v43 = vor.u32 %v5549_v45, %v8424_v10 }
 0x1c5   : > { %v2404_v24 = vadd.f32 %v2351_v9, %v1655_v36  ;;  %v3555_v36 = vld [vmem:[#allocation2 + $0x58] sm:$0xf]  ;;  %v5553_v22 = vshll.u32 %v5392_v6, 16  ;;  %v3719_v57 = vshrl.u32 %v3554_v29, 16  ;;  %v3722_v2 = vshll.u32 %v3554_v29, 16 }
 0x1c6   : > { %5241 = vmatmul.bf16.gmra.mxu3 %v7194_v59  ;;  %v8416_v26 = vpop.f32.mrf.mxu0  ;;  %v4456_v53 = vsel %vm7565_vm2, %v4448_v37, %v4455_v48  ;;  %v3728_v13 = vshll.u32 %v3555_v36, 16  ;;  %v3732_v9 = vshrl.u32 %v3555_v36, 16  ;;  %v4463_v49 = vshrl.u32 %v4302_v35, 16  ;;  %v7195_v36 = vld [vmem:[#allocation2 + $0x44] sm:$0xff] }
 0x1c7   : > { %v3721_v50 = vrot.slane %v3719_v57, 4  ;;  %v8442_v12 = vunpack.c.l.b16 %v3717_v7  ;;  %v4744_v5 = vunpack.c.l.b16 %v4447_v11  ;;  %v4745_v6 = vunpack.c.l.b16 %v4456_v53  ;;  %v5394_v53 = vld [vmem:[#allocation2 + $0x68] sm:$0xf] }
 0x1c8   : > { %v3730_v44 = vrot.slane %v3728_v13, 5  ;;  %v3734_v30 = vrot.slane %v3732_v9, 4  ;;  %v5551_v37 = vrot.slane %v5550_v43, 4  ;;  %v5555_v48 = vrot.slane %v5553_v22, 5 }
 0x1c9   : > { %v3065_v51 = vpop.f32.mrf.mxu3  ;;  %5987 = vmatmul.bf16.gmra.mxu0 %v5895_v58  ;;  %v5541_v58 = vrot.slane %v5540_v39, 4  ;;  %v5896_v45 = vpack.c.b16 %v8427_v38, %v8414_v20  ;;  %v4458_v11 = vshrl.u32 %v4301_v55, 16  ;;  %v4472_v39 = vshrl.u32 %v4303_v25, 16  ;;  %v5393_v20 = vld [vmem:[#allocation2 + $0x64] sm:$0xf] }
 0x1ca   : > { %v8433_v59 = vadd.f32 %v3065_v51, %v2404_v24  ;;  %v1607_v17 = vpop.f32.mrf.mxu1  ;;  %v3724_v24 = vrot.slane %v3722_v2, 5  ;;  %v3735_v7 = vor.u32 %v3734_v30, %v3730_v44  ;;  %v4058_v43 = vpack.c.b16 %v8442_v12, %v8435_v18 }
 0x1cb   : > { %v4465_v22 = vrot.slane %v4463_v49, 7  ;;  %v4466_v2 = vshll.u32 %v4302_v35, 16  ;;  %v1657_v38 = vadd.f32 %v1607_v17, %v8074_v27  ;;  %v6881_v49 = vrot.slane %v4458_v11, 11 }
 0x1cc   : > { %v2353_v56 = vpop.f32.mrf.mxu2  ;;  %v3725_v21 = vor.u32 %v3724_v24, %v3721_v50  ;;  %v4475_v50 = vshll.u32 %v4303_v25, 16  ;;  %v3736_v18 = vrot.slane %v3735_v7, 4  ;;  %v5558_v35 = vshrl.u32 %v5393_v20, 16 }
 0x1cd   : > { %v2405_v19 = vadd.f32 %v2353_v56, %v1656_v3  ;;  %4153 = vmatmul.bf16.gmra.mxu1 %v4057_v47  ;;  %v3738_v47 = vshll.u32 %v3556_v15, 16  ;;  %v5546_v3 = vsel %vm7936_vm5, %v5541_v58, %v8424_v10  ;;  %v8453_v56 = vpack.c.b16 %v4745_v6, %v4744_v5 }
 0x1ce   : > { %v3445_v63 = vpop.f32.mrf.mxu0  ;;  %v3726_v10 = vrot.slane %v3725_v21, 4  ;;  %v8457_v13 = vunpack.c.l.b16 %v5546_v3  ;;  %v4468_v12 = vor.u32 %v4466_v2, %v4465_v22  ;;  %v5561_v27 = vshll.u32 %v5393_v20, 16  ;;  %v3557_v20 = vld [vmem:[#allocation2 + $0x64] sm:$0xf] }
 0x1cf   : > { %v3740_v9 = vrot.slane %v3738_v47, 5  ;;  %v5567_v17 = vshll.u32 %v5394_v53, 16  ;;  %v5571_v5 = vshrl.u32 %v5394_v53, 16  ;;  %v4470_v55 = vrot.slane %v4465_v22, 4 }
 0x1d0   : > { %v3731_v30 = vsel %vm7936_vm5, %v3726_v10, %v3730_v44  ;;  %v5560_v6 = vrot.slane %v5558_v35, 4  ;;  %v5563_v21 = vrot.slane %v5561_v27, 5  ;;  %v4469_v22 = vsel %vm7565_vm2, %v6881_v49, %v4468_v12  ;;  %v3559_v27 = vld [vmem:[#allocation2 + $0x6c] sm:$0x1] }
 0x1d1   : > { %v3067_v51 = vpop.f32.mrf.mxu3  ;;  %4868 = vmatmul.bf16.gmra.mxu2 %v8410_v41  ;;  %v5556_v41 = vsel %vm7936_vm5, %v5551_v37, %v5555_v48  ;;  %v8465_v37 = vadd.f32 %v8416_v26, %v8433_v59  ;;  %v5395_v48 = vld [vmem:[#allocation2 + $0x6c] sm:$0x1]  ;;  %v8467_v47 = vrot.slane %v5567_v17, 5  ;;  %v3741_v44 = vsel %vm7936_vm5, %v3736_v18, %v3740_v9  ;;  %v4305_v9 = vld [vmem:[#allocation2 + $0x74] sm:$0xf] }
 0x1d2   : > { %v3119_v29 = vadd.f32 %v3067_v51, %v2405_v19  ;;  %v1609_v57 = vpop.f32.mrf.mxu1  ;;  %v4474_v19 = vrot.slane %v4472_v39, 7  ;;  %v5573_v51 = vrot.slane %v5571_v5, 4  ;;  %v8470_v11 = vunpack.c.l.b16 %v5556_v41  ;;  %v4306_v18 = vld [vmem:[#allocation2 + $0x78] sm:$0xf] }
 0x1d3   : > { %v1658_v7 = vadd.f32 %v1609_v57, %v8089_v14  ;;  %v8478_v59 = vunpack.c.l.b16 %v3731_v30  ;;  %v5564_v2 = vor.u32 %v5563_v21, %v5560_v6  ;;  %v5577_v57 = vshll.u32 %v5395_v48, 16  ;;  %v4304_v30 = vld [vmem:[#allocation2 + $0x70] sm:$0x8] }
 0x1d4   : > { %v2356_v58 = vpop.f32.mrf.mxu2  ;;  %v4477_v25 = vor.u32 %v4475_v50, %v4474_v19  ;;  %v8474_v39 = vadd.f32 %v3445_v63, %v3119_v29  ;;  %v5574_v14 = vor.u32 %v5573_v51, %v8467_v47  ;;  %v3743_v41 = vshrl.u32 %v3557_v20, 16 }
 0x1d5   : > { %v2406_v24 = vadd.f32 %v2356_v58, %v1657_v38  ;;  %v3558_v38 = vld [vmem:[#allocation2 + $0x68] sm:$0xf]  ;;  %v3746_v10 = vshll.u32 %v3557_v20, 16  ;;  %v4485_v49 = vshrl.u32 %v4305_v9, 16  ;;  %v8485_v35 = vunpack.c.l.b16 %v3741_v44 }
 0x1d6   : > { %5246 = vmatmul.bf16.gmra.mxu3 %v7195_v36  ;;  %v8459_v15 = vpop.f32.mrf.mxu0  ;;  %v4478_v63 = vsel %vm7565_vm2, %v4470_v55, %v4477_v25  ;;  %v3752_v29 = vshll.u32 %v3558_v38, 16  ;;  %v3756_v58 = vshrl.u32 %v3558_v38, 16  ;;  %v3745_v50 = vrot.slane %v3743_v41, 4  ;;  %v7196_v38 = vld [vmem:[#allocation2 + $0x54] sm:$0xff] }
 0x1d7   : > { %v4746_v12 = vunpack.c.l.b16 %v4469_v22  ;;  %v4747_v48 = vunpack.c.l.b16 %v4478_v63  ;;  %v5575_v55 = vrot.slane %v5574_v14, 4  ;;  %v5579_v25 = vrot.slane %v5577_v57, 5  ;;  %v5397_v63 = vld [vmem:[#allocation2 + $0x78] sm:$0xf] }
 0x1d8   : > { %v3754_v17 = vrot.slane %v3752_v29, 5  ;;  %v3758_v5 = vrot.slane %v3756_v58, 4  ;;  %v5897_v51 = vpack.c.b16 %v8470_v11, %v8457_v13  ;;  %v4480_v22 = vshrl.u32 %v4304_v30, 16  ;;  %v5396_v13 = vld [vmem:[#allocation2 + $0x74] sm:$0xf] }
 0x1d9   : > { %v3070_v3 = vpop.f32.mrf.mxu3  ;;  %5992 = vmatmul.bf16.gmra.mxu0 %v5896_v45  ;;  %v5565_v45 = vrot.slane %v5564_v2, 4  ;;  %v4494_v2 = vshrl.u32 %v4306_v18, 16  ;;  %v4059_v14 = vpack.c.b16 %v8485_v35, %v8478_v59  ;;  %v4487_v57 = vrot.slane %v4485_v49, 7 }
 0x1da   : > { %v8476_v36 = vadd.f32 %v3070_v3, %v2406_v24  ;;  %v1612_v26 = vpop.f32.mrf.mxu1  ;;  %v3748_v24 = vrot.slane %v3746_v10, 5  ;;  %v3759_v44 = vor.u32 %v3758_v5, %v3754_v17  ;;  %v4488_v10 = vshll.u32 %v4305_v9, 16 }
 0x1db   : > { %v1659_v11 = vadd.f32 %v1612_v26, %v8112_v62  ;;  %v6882_v49 = vrot.slane %v4480_v22, 11  ;;  %v5582_v9 = vshrl.u32 %v5396_v13, 16  ;;  %v5585_v62 = vshll.u32 %v5396_v13, 16  ;;  %v3560_v13 = vld [vmem:[#allocation2 + $0x74] sm:$0xf] }
 0x1dc   : > { %v2358_v53 = vpop.f32.mrf.mxu2  ;;  %v3749_v21 = vor.u32 %v3748_v24, %v3745_v50  ;;  %v4497_v50 = vshll.u32 %v4306_v18, 16  ;;  %v3760_v59 = vrot.slane %v3759_v44, 4  ;;  %v4490_v35 = vor.u32 %v4488_v10, %v4487_v57 }
 0x1dd   : > { %v2407_v19 = vadd.f32 %v2358_v53, %v1658_v7  ;;  %4158 = vmatmul.bf16.gmra.mxu1 %v4058_v43  ;;  %v3762_v43 = vshll.u32 %v3559_v27, 16  ;;  %v5570_v7 = vsel %vm7936_vm5, %v5565_v45, %v8467_v47  ;;  %v8496_v53 = vpack.c.b16 %v4747_v48, %v4746_v12 }
 0x1de   : > { %v3450_v6 = vpop.f32.mrf.mxu0  ;;  %v3750_v47 = vrot.slane %v3749_v21, 4  ;;  %v8500_v29 = vunpack.c.l.b16 %v5570_v7  ;;  %v5591_v26 = vshll.u32 %v5397_v63, 16  ;;  %v5595_v12 = vshrl.u32 %v5397_v63, 16 }
 0x1df   : > { %v3764_v58 = vrot.slane %v3762_v43, 5  ;;  %v4492_v30 = vrot.slane %v4487_v57, 4  ;;  %v5584_v48 = vrot.slane %v5582_v9, 4  ;;  %v5587_v21 = vrot.slane %v5585_v62, 5  ;;  %v3562_v62 = vld [vmem:[#allocation2 + $0x7c] sm:$0x1] }
 0x1e0   : > { %v3755_v5 = vsel %vm7936_vm5, %v3750_v47, %v3754_v17  ;;  %v8510_v43 = vrot.slane %v5591_v26, 5  ;;  %v4491_v57 = vsel %vm7565_vm2, %v6882_v49, %v4490_v35  ;;  %v3770_v47 = vshll.u32 %v3560_v13, 16 }
 0x1e1   : > { %v3072_v3 = vpop.f32.mrf.mxu3  ;;  %4873 = vmatmul.bf16.gmra.mxu2 %v8453_v56  ;;  %v5580_v56 = vsel %vm7936_vm5, %v5575_v55, %v5579_v25  ;;  %v8508_v55 = vadd.f32 %v8459_v15, %v8476_v36  ;;  %v5398_v25 = vld [vmem:[#allocation2 + $0x7c] sm:$0x1]  ;;  %v3765_v17 = vsel %vm7936_vm5, %v3760_v59, %v3764_v58  ;;  %v8521_v36 = vunpack.c.l.b16 %v3755_v5  ;;  %v4308_v58 = vld [vmem:[#allocation2 + $0x84] sm:$0xf]  ;;  %v4309_v59 = vld [vmem:[#allocation2 + $0x88] sm:$0xf] }
 0x1e2   : > { %v3121_v20 = vadd.f32 %v3072_v3, %v2407_v19  ;;  %v1614_v41 = vpop.f32.mrf.mxu1  ;;  %v4496_v19 = vrot.slane %v4494_v2, 7  ;;  %v5597_v3 = vrot.slane %v5595_v12, 4  ;;  %v8513_v22 = vunpack.c.l.b16 %v5580_v56  ;;  %v4307_v5 = vld [vmem:[#allocation2 + $0x80] sm:$0x8] }
 0x1e3   : > { %v1660_v44 = vadd.f32 %v1614_v41, %v8126_v0  ;;  %v5588_v10 = vor.u32 %v5587_v21, %v5584_v48  ;;  %v5601_v41 = vshll.u32 %v5398_v25, 16  ;;  %v3767_v56 = vshrl.u32 %v3560_v13, 16 }
 0x1e4   : > { %v2361_v45 = vpop.f32.mrf.mxu2  ;;  %v4499_v18 = vor.u32 %v4497_v50, %v4496_v19  ;;  %v8517_v2 = vadd.f32 %v3450_v6, %v3121_v20  ;;  %v5598_v0 = vor.u32 %v5597_v3, %v8510_v43  ;;  %v4507_v49 = vshrl.u32 %v4308_v58, 16 }
 0x1e5   : > { %v2408_v24 = vadd.f32 %v2361_v45, %v1659_v11  ;;  %v3561_v11 = vld [vmem:[#allocation2 + $0x78] sm:$0xf]  ;;  %v3769_v50 = vrot.slane %v3767_v56, 4  ;;  %v8528_v9 = vunpack.c.l.b16 %v3765_v17  ;;  %v4748_v35 = vunpack.c.l.b16 %v4491_v57 }
 0x1e6   : > { %5251 = vmatmul.bf16.gmra.mxu3 %v7196_v38  ;;  %v8502_v27 = vpop.f32.mrf.mxu0  ;;  %v4500_v6 = vsel %vm7565_vm2, %v4492_v30, %v4499_v18  ;;  %v3776_v20 = vshll.u32 %v3561_v11, 16  ;;  %v3780_v45 = vshrl.u32 %v3561_v11, 16  ;;  %v5599_v30 = vrot.slane %v5598_v0, 4  ;;  %v7197_v11 = vld [vmem:[#allocation2 + $0x64] sm:$0xff] }
 0x1e7   : > { %v4749_v25 = vunpack.c.l.b16 %v4500_v6  ;;  %v5603_v18 = vrot.slane %v5601_v41, 5  ;;  %v5898_v3 = vpack.c.b16 %v8513_v22, %v8500_v29  ;;  %v4502_v57 = vshrl.u32 %v4307_v5, 16  ;;  %v5399_v29 = vld [vmem:[#allocation2 + $0x84] sm:$0xf]  ;;  %v5400_v6 = vld [vmem:[#allocation2 + $0x88] sm:$0xf] }
 0x1e8   : > { %v3778_v26 = vrot.slane %v3776_v20, 5  ;;  %v3782_v12 = vrot.slane %v3780_v45, 4  ;;  %v4060_v0 = vpack.c.b16 %v8528_v9, %v8521_v36  ;;  %v4509_v41 = vrot.slane %v4507_v49, 7 }
 0x1e9   : > { %v3075_v7 = vpop.f32.mrf.mxu3  ;;  %5997 = vmatmul.bf16.gmra.mxu0 %v5897_v51  ;;  %v5589_v51 = vrot.slane %v5588_v10, 4  ;;  %v4516_v10 = vshrl.u32 %v4309_v59, 16  ;;  %v6883_v49 = vrot.slane %v4502_v57, 11 }
 0x1ea   : > { %v8519_v38 = vadd.f32 %v3075_v7, %v2408_v24  ;;  %v1617_v15 = vpop.f32.mrf.mxu1  ;;  %v3772_v24 = vrot.slane %v3770_v47, 5  ;;  %v3783_v17 = vor.u32 %v3782_v12, %v3778_v26  ;;  %v4510_v47 = vshll.u32 %v4308_v58, 16 }
 0x1eb   : > { %v1661_v22 = vadd.f32 %v1617_v15, %v8020_v34  ;;  %v5606_v58 = vshrl.u32 %v5399_v29, 16  ;;  %v5609_v34 = vshll.u32 %v5399_v29, 16  ;;  %v5615_v15 = vshll.u32 %v5400_v6, 16  ;;  %v3563_v29 = vld [vmem:[#allocation2 + $0x84] sm:$0xf] }
 0x1ec   : > { %v2363_v63 = vpop.f32.mrf.mxu2  ;;  %v3773_v21 = vor.u32 %v3772_v24, %v3769_v50  ;;  %v4519_v50 = vshll.u32 %v4309_v59, 16  ;;  %v3784_v36 = vrot.slane %v3783_v17, 4  ;;  %v4512_v9 = vor.u32 %v4510_v47, %v4509_v41 }
 0x1ed   : > { %v2409_v19 = vadd.f32 %v2363_v63, %v1660_v44  ;;  %4163 = vmatmul.bf16.gmra.mxu1 %v4059_v14  ;;  %v3786_v14 = vshll.u32 %v3562_v62, 16  ;;  %v5594_v44 = vsel %vm7936_vm5, %v5589_v51, %v8510_v43  ;;  %v8539_v63 = vpack.c.b16 %v4749_v25, %v4748_v35 }
 0x1ee   : > { %v3455_v48 = vpop.f32.mrf.mxu0  ;;  %v3774_v43 = vrot.slane %v3773_v21, 4  ;;  %v8543_v20 = vunpack.c.l.b16 %v5594_v44  ;;  %v5619_v35 = vshrl.u32 %v5400_v6, 16  ;;  %v4514_v5 = vrot.slane %v4509_v41, 4 }
 0x1ef   : > { %v3788_v45 = vrot.slane %v3786_v14, 5  ;;  %v5608_v25 = vrot.slane %v5606_v58, 4  ;;  %v5611_v21 = vrot.slane %v5609_v34, 5  ;;  %v8553_v14 = vrot.slane %v5615_v15, 5  ;;  %v3565_v34 = vld [vmem:[#allocation2 + $0x8c] sm:$0x1] }
 0x1f0   : > { %v3779_v12 = vsel %vm7936_vm5, %v3774_v43, %v3778_v26  ;;  %v4513_v41 = vsel %vm7565_vm2, %v6883_v49, %v4512_v9  ;;  %v3794_v43 = vshll.u32 %v3563_v29, 16 }
 0x1f1   : > { %v3077_v7 = vpop.f32.mrf.mxu3  ;;  %4878 = vmatmul.bf16.gmra.mxu2 %v8496_v53  ;;  %v5604_v53 = vsel %vm7936_vm5, %v5599_v30, %v5603_v18  ;;  %v8551_v30 = vadd.f32 %v8502_v27, %v8519_v38  ;;  %v5401_v18 = vld [vmem:[#allocation2 + $0x8c] sm:$0x1]  ;;  %v3789_v26 = vsel %vm7936_vm5, %v3784_v36, %v3788_v45  ;;  %v8564_v38 = vunpack.c.l.b16 %v3779_v12  ;;  %v4311_v45 = vld [vmem:[#allocation2 + $0x94] sm:$0xf]  ;;  %v4312_v36 = vld [vmem:[#allocation2 + $0x98] sm:$0xf] }
 0x1f2   : > { %v3123_v13 = vadd.f32 %v3077_v7, %v2409_v19  ;;  %v1619_v56 = vpop.f32.mrf.mxu1  ;;  %v4518_v19 = vrot.slane %v4516_v10, 7  ;;  %v5621_v7 = vrot.slane %v5619_v35, 4  ;;  %v8556_v57 = vunpack.c.l.b16 %v5604_v53  ;;  %v4310_v12 = vld [vmem:[#allocation2 + $0x90] sm:$0x8] }
 0x1f3   : > { %v1662_v17 = vadd.f32 %v1619_v56, %v8035_v61  ;;  %v5612_v47 = vor.u32 %v5611_v21, %v5608_v25  ;;  %v5625_v56 = vshll.u32 %v5401_v18, 16  ;;  %v3791_v53 = vshrl.u32 %v3563_v29, 16 }
 0x1f4   : > { %v2366_v51 = vpop.f32.mrf.mxu2  ;;  %v4521_v59 = vor.u32 %v4519_v50, %v4518_v19  ;;  %v8560_v10 = vadd.f32 %v3455_v48, %v3123_v13  ;;  %v5622_v61 = vor.u32 %v5621_v7, %v8553_v14  ;;  %v4529_v49 = vshrl.u32 %v4311_v45, 16 }
 0x1f5   : > { %v2410_v24 = vadd.f32 %v2366_v51, %v1661_v22  ;;  %v3564_v22 = vld [vmem:[#allocation2 + $0x88] sm:$0xf]  ;;  %v3793_v50 = vrot.slane %v3791_v53, 4  ;;  %v8571_v58 = vunpack.c.l.b16 %v3789_v26  ;;  %v4750_v9 = vunpack.c.l.b16 %v4513_v41 }
 0x1f6   : > { %5256 = vmatmul.bf16.gmra.mxu3 %v7197_v11  ;;  %v8545_v62 = vpop.f32.mrf.mxu0  ;;  %v4522_v48 = vsel %vm7565_vm2, %v4514_v5, %v4521_v59  ;;  %v3800_v13 = vshll.u32 %v3564_v22, 16  ;;  %v3804_v51 = vshrl.u32 %v3564_v22, 16  ;;  %v5623_v5 = vrot.slane %v5622_v61, 4  ;;  %v7198_v22 = vld [vmem:[#allocation2 + $0x74] sm:$0xff] }
 0x1f7   : > { %v4751_v18 = vunpack.c.l.b16 %v4522_v48  ;;  %v5627_v59 = vrot.slane %v5625_v56, 5  ;;  %v5899_v7 = vpack.c.b16 %v8556_v57, %v8543_v20  ;;  %v4524_v41 = vshrl.u32 %v4310_v12, 16  ;;  %v5402_v20 = vld [vmem:[#allocation2 + $0x94] sm:$0xf]  ;;  %v5403_v48 = vld [vmem:[#allocation2 + $0x98] sm:$0xf] }
 0x1f8   : > { %v3802_v15 = vrot.slane %v3800_v13, 5  ;;  %v3806_v35 = vrot.slane %v3804_v51, 4  ;;  %v4061_v61 = vpack.c.b16 %v8571_v58, %v8564_v38  ;;  %v4531_v56 = vrot.slane %v4529_v49, 7 }
 0x1f9   : > { %v3080_v44 = vpop.f32.mrf.mxu3  ;;  %6002 = vmatmul.bf16.gmra.mxu0 %v5898_v3  ;;  %v5613_v3 = vrot.slane %v5612_v47, 4  ;;  %v4538_v47 = vshrl.u32 %v4312_v36, 16  ;;  %v6884_v49 = vrot.slane %v4524_v41, 11 }
 0x1fa   : > { %v8562_v11 = vadd.f32 %v3080_v44, %v2410_v24  ;;  %v1622_v27 = vpop.f32.mrf.mxu1  ;;  %v3796_v24 = vrot.slane %v3794_v43, 5  ;;  %v3807_v26 = vor.u32 %v3806_v35, %v3802_v15  ;;  %v4532_v43 = vshll.u32 %v4311_v45, 16 }
 0x1fb   : > { %v1663_v57 = vadd.f32 %v1622_v27, %v8056_v31  ;;  %v5630_v45 = vshrl.u32 %v5402_v20, 16  ;;  %v5633_v31 = vshll.u32 %v5402_v20, 16  ;;  %v5639_v27 = vshll.u32 %v5403_v48, 16  ;;  %v3566_v20 = vld [vmem:[#allocation2 + $0x94] sm:$0xf] }
 0x1fc   : > { %v2368_v6 = vpop.f32.mrf.mxu2  ;;  %v3797_v21 = vor.u32 %v3796_v24, %v3793_v50  ;;  %v4541_v50 = vshll.u32 %v4312_v36, 16  ;;  %v3808_v38 = vrot.slane %v3807_v26, 4  ;;  %v4534_v58 = vor.u32 %v4532_v43, %v4531_v56 }
 0x1fd   : > { %v2411_v19 = vadd.f32 %v2368_v6, %v1662_v17  ;;  %4168 = vmatmul.bf16.gmra.mxu1 %v4060_v0  ;;  %v3810_v0 = vshll.u32 %v3565_v34, 16  ;;  %v5618_v17 = vsel %vm7936_vm5, %v5613_v3, %v8553_v14  ;;  %v8582_v6 = vpack.c.b16 %v4751_v18, %v4750_v9 }
 0x1fe   : > { %v3460_v25 = vpop.f32.mrf.mxu0  ;;  %v3798_v14 = vrot.slane %v3797_v21, 4  ;;  %v8586_v13 = vunpack.c.l.b16 %v5618_v17  ;;  %v5643_v9 = vshrl.u32 %v5403_v48, 16  ;;  %v4536_v12 = vrot.slane %v4531_v56, 4 }
 0x1ff   : > { %v3812_v51 = vrot.slane %v3810_v0, 5  ;;  %v5632_v18 = vrot.slane %v5630_v45, 4  ;;  %v5635_v21 = vrot.slane %v5633_v31, 5  ;;  %v5641_v0 = vrot.slane %v5639_v27, 5  ;;  %v3568_v31 = vld [vmem:[#allocation2 + $0x9c] sm:$0x1] }
 0x200   : > { %v3803_v35 = vsel %vm7936_vm5, %v3798_v14, %v3802_v15  ;;  %v4535_v56 = vsel %vm7565_vm2, %v6884_v49, %v4534_v58  ;;  %v3818_v14 = vshll.u32 %v3566_v20, 16 }
 0x201   : > { %v3082_v44 = vpop.f32.mrf.mxu3  ;;  %4883 = vmatmul.bf16.gmra.mxu2 %v8539_v63  ;;  %v5628_v63 = vsel %vm7936_vm5, %v5623_v5, %v5627_v59  ;;  %v8594_v5 = vadd.f32 %v8545_v62, %v8562_v11  ;;  %v5404_v59 = vld [vmem:[#allocation2 + $0x9c] sm:$0x1]  ;;  %v8605_v11 = vunpack.c.l.b16 %v3803_v35  ;;  %v5636_v43 = vor.u32 %v5635_v21, %v5632_v18  ;;  %v4313_v35 = vld [vmem:[#allocation2 + $0xa0] sm:$0x8] }
 0x202   : > { %v3125_v29 = vadd.f32 %v3082_v44, %v2411_v19  ;;  %v1624_v53 = vpop.f32.mrf.mxu1  ;;  %v4540_v19 = vrot.slane %v4538_v47, 7  ;;  %v5645_v44 = vrot.slane %v5643_v9, 4  ;;  %v8597_v41 = vunpack.c.l.b16 %v5628_v63 }
 0x203   : > { %v1664_v26 = vadd.f32 %v1624_v53, %v8068_v33  ;;  %v3813_v47 = vsel %vm7936_vm5, %v3808_v38, %v3812_v51  ;;  %v5649_v53 = vshll.u32 %v5404_v59, 16  ;;  %v3815_v63 = vshrl.u32 %v3566_v20, 16  ;;  %v4314_v51 = vld [vmem:[#allocation2 + $0xa4] sm:$0xf]  ;;  %v4315_v38 = vld [vmem:[#allocation2 + $0xa8] sm:$0xf] }
 0x204   : > { %v2371_v3 = vpop.f32.mrf.mxu2  ;;  %v4543_v36 = vor.u32 %v4541_v50, %v4540_v19  ;;  %v8601_v15 = vadd.f32 %v3460_v25, %v3125_v29  ;;  %v5646_v33 = vor.u32 %v5645_v44, %v5641_v0  ;;  %v4551_v49 = vshrl.u32 %v4314_v51, 16 }
 0x205   : > { %v2412_v24 = vadd.f32 %v2371_v3, %v1663_v57  ;;  %v3567_v57 = vld [vmem:[#allocation2 + $0x98] sm:$0xf]  ;;  %v3817_v50 = vrot.slane %v3815_v63, 4  ;;  %v8611_v45 = vunpack.c.l.b16 %v3813_v47  ;;  %v4752_v58 = vunpack.c.l.b16 %v4535_v56 }
 0x206   : > { %5261 = vmatmul.bf16.gmra.mxu3 %v7198_v22  ;;  %v8588_v34 = vpop.f32.mrf.mxu0  ;;  %v4544_v25 = vsel %vm7565_vm2, %v4536_v12, %v4543_v36  ;;  %v3824_v29 = vshll.u32 %v3567_v57, 16  ;;  %v3828_v3 = vshrl.u32 %v3567_v57, 16  ;;  %v5647_v12 = vrot.slane %v5646_v33, 4 }
 0x207   : > { %v4753_v59 = vunpack.c.l.b16 %v4544_v25  ;;  %v5651_v36 = vrot.slane %v5649_v53, 5  ;;  %v4553_v56 = vrot.slane %v4551_v49, 7  ;;  %v4554_v20 = vshll.u32 %v4314_v51, 16  ;;  %v5405_v25 = vld [vmem:[#allocation2 + $0xa4] sm:$0xf] }
 0x208   : > { %v3826_v27 = vrot.slane %v3824_v29, 5  ;;  %v3830_v9 = vrot.slane %v3828_v3, 4  ;;  %v4560_v57 = vshrl.u32 %v4315_v38, 16  ;;  %v5900_v33 = vpack.c.b16 %v8597_v41, %v8586_v13  ;;  %v5406_v51 = vld [vmem:[#allocation2 + $0xa8] sm:$0xf] }
 0x209   : > { %v3085_v17 = vpop.f32.mrf.mxu3  ;;  %6007 = vmatmul.bf16.gmra.mxu0 %v5899_v7  ;;  %v5637_v7 = vrot.slane %v5636_v43, 4  ;;  %v5407_v13 = vld [vmem:[#allocation2 + $0xac] sm:$0x1]  ;;  %v4556_v49 = vor.u32 %v4554_v20, %v4553_v56 }
 0x20a   : > { %v8603_v22 = vadd.f32 %v3085_v17, %v2412_v24  ;;  %v1627_v62 = vpop.f32.mrf.mxu1  ;;  %v3820_v24 = vrot.slane %v3818_v14, 5  ;;  %v3834_v17 = vshll.u32 %v3568_v31, 16  ;;  %v4562_v3 = vrot.slane %v4560_v57, 7 }
 0x20b   : > { %v5642_v44 = vsel %vm7936_vm5, %v5637_v7, %v5641_v0  ;;  %v1665_v14 = vadd.f32 %v1627_v62, %v8084_v8  ;;  %v4062_v0 = vpack.c.b16 %v8611_v45, %v8605_v11  ;;  %v8621_v7 = vpack.c.b16 %v4753_v59, %v4752_v58 }
 0x20c   : > { %v2373_v48 = vpop.f32.mrf.mxu2  ;;  %v3821_v21 = vor.u32 %v3820_v24, %v3817_v50  ;;  %v8625_v29 = vunpack.c.l.b16 %v5642_v44  ;;  %v3836_v62 = vrot.slane %v3834_v17, 5  ;;  %v4563_v24 = vshll.u32 %v4315_v38, 16 }
 0x20d   : > { %v2413_v19 = vadd.f32 %v2373_v48, %v1664_v26  ;;  %4173 = vmatmul.bf16.gmra.mxu1 %v4061_v61  ;;  %v3831_v61 = vor.u32 %v3830_v9, %v3826_v27  ;;  %v4546_v26 = vshrl.u32 %v4313_v35, 16  ;;  %v7199_v48 = vld [vmem:[#allocation2 + $0x84] sm:$0xff]  ;;  %v5654_v45 = vshrl.u32 %v5405_v25, 16 }
 0x20e   : > { %v3465_v18 = vpop.f32.mrf.mxu0  ;;  %v3822_v47 = vrot.slane %v3821_v21, 4  ;;  %v4558_v58 = vrot.slane %v4553_v56, 4  ;;  %v5657_v31 = vshll.u32 %v5405_v25, 16  ;;  %v5663_v9 = vshll.u32 %v5406_v51, 16  ;;  %v3569_v25 = vld [vmem:[#allocation2 + $0xa4] sm:$0xf] }
 0x20f   : > { %v3832_v8 = vrot.slane %v3831_v61, 4  ;;  %v6885_v50 = vrot.slane %v4546_v26, 11  ;;  %v5667_v35 = vshrl.u32 %v5406_v51, 16  ;;  %v5673_v21 = vshll.u32 %v5407_v13, 16 }
 0x210   : > { %v3827_v11 = vsel %vm7936_vm5, %v3822_v47, %v3826_v27  ;;  %v8633_v38 = vadd.f32 %v8588_v34, %v8603_v22  ;;  %v5659_v61 = vrot.slane %v5657_v31, 5  ;;  %v5665_v27 = vrot.slane %v5663_v9, 5 }
 0x211   : > { %v3087_v43 = vpop.f32.mrf.mxu3  ;;  %4888 = vmatmul.bf16.gmra.mxu2 %v8582_v6  ;;  %v5652_v6 = vsel %vm7936_vm5, %v5647_v12, %v5651_v36  ;;  %v4565_v12 = vor.u32 %v4563_v24, %v4562_v3  ;;  %v5656_v36 = vrot.slane %v5654_v45, 4  ;;  %v5669_v17 = vrot.slane %v5667_v35, 4  ;;  %v8652_v45 = vld [vmem:[#allocation2 + $0xb8] sm:$0xf]  ;;  %v4316_v35 = vld [vmem:[#allocation2 + $0xb0] sm:$0x8] }
 0x212   : > { %v3127_v63 = vadd.f32 %v3087_v43, %v2413_v19  ;;  %v1629_v53 = vpop.f32.mrf.mxu1  ;;  %v8635_v44 = vunpack.c.l.b16 %v5652_v6  ;;  %v3837_v47 = vsel %vm7936_vm5, %v3832_v8, %v3836_v62  ;;  %v8640_v56 = vunpack.c.l.b16 %v3827_v11  ;;  %v3570_v6 = vld [vmem:[#allocation2 + $0xa8] sm:$0xf]  ;;  %v4317_v62 = vld [vmem:[#allocation2 + $0xb4] sm:$0xf] }
 0x213   : > { %v1666_v43 = vadd.f32 %v1629_v53, %v8105_v40  ;;  %v5660_v22 = vor.u32 %v5659_v61, %v5656_v36  ;;  %v4557_v3 = vsel %vm7565_vm2, %v6885_v50, %v4556_v49  ;;  %v4566_v40 = vsel %vm7565_vm2, %v4558_v58, %v4565_v12  ;;  %v3571_v58 = vld [vmem:[#allocation2 + $0xac] sm:$0x1] }
 0x214   : > { %v2376_v19 = vpop.f32.mrf.mxu2  ;;  %v8642_v20 = vadd.f32 %v3465_v18, %v3127_v63  ;;  %v3839_v53 = vshrl.u32 %v3569_v25, 16  ;;  %v3842_v51 = vshll.u32 %v3569_v25, 16  ;;  %v3852_v8 = vshrl.u32 %v3570_v6, 16  ;;  %v7200_v25 = vld [vmem:[#allocation2 + $0x94] sm:$0xff] }
 0x215   : > { %v2414_v41 = vadd.f32 %v2376_v19, %v1665_v14  ;;  %v5670_v14 = vor.u32 %v5669_v17, %v5665_v27  ;;  %v5661_v18 = vrot.slane %v5660_v22, 4  ;;  %v8650_v13 = vunpack.c.l.b16 %v3837_v47 }
 0x216   : > { %5266 = vmatmul.bf16.gmra.mxu3 %v7199_v48  ;;  %v8629_v59 = vpop.f32.mrf.mxu0  ;;  %v5675_v48 = vrot.slane %v5673_v21, 5  ;;  %v3844_v11 = vrot.slane %v3842_v51, 5  ;;  %v3854_v9 = vrot.slane %v3852_v8, 4  ;;  %v4754_v36 = vunpack.c.l.b16 %v4557_v3  ;;  %v8999_v51 = vld [vmem:[#allocation4_spill] sm:$0xff] }
 0x217   : > { %v5671_v63 = vrot.slane %v5670_v14, 4  ;;  %v5666_v50 = vsel %vm7936_vm5, %v5661_v18, %v5665_v27  ;;  %v4573_v61 = vshrl.u32 %v4317_v62, 16  ;;  %v3858_v27 = vshll.u32 %v3571_v58, 16 }
 0x218   : > { %v8660_v21 = vunpack.c.l.b16 %v5666_v50  ;;  %v4568_v22 = vshrl.u32 %v4316_v35, 16  ;;  %v4582_v14 = vshrl.u32 %v8652_v45, 16 }
 0x219   : > { %v3090_v26 = vpop.f32.mrf.mxu3  ;;  %6012 = vmatmul.bf16.gmra.mxu0 %v5900_v33  ;;  %v3848_v33 = vshll.u32 %v3570_v6, 16  ;;  %v5676_v49 = vsel %vm7936_vm5, %v5671_v63, %v5675_v48  ;;  %v5901_v6 = vpack.c.b16 %v8635_v44, %v8625_v29  ;;  %v4575_v63 = vrot.slane %v4573_v61, 7  ;;  %v5410_v44 = vld [vmem:[#allocation2 + $0xbc] sm:$0x1] }
 0x21a   : > { %v8644_v57 = vadd.f32 %v3090_v26, %v2414_v41  ;;  %v1632_v34 = vpop.f32.mrf.mxu1  ;;  %v3841_v41 = vrot.slane %v3839_v53, 4  ;;  %v8662_v17 = vunpack.c.l.b16 %v5676_v49  ;;  %v5408_v53 = vld [vmem:[#allocation2 + $0xb4] sm:$0xf]  ;;  %v8678_v29 = vrot.slane %v3858_v27, 5 }
 0x21b   : > { %v8658_v31 = vrot.slane %v3848_v33, 5  ;;  %v4576_v33 = vshll.u32 %v4317_v62, 16  ;;  %v4585_v49 = vshll.u32 %v8652_v45, 16  ;;  %v5681_v62 = vshll.u32 %v5408_v53, 16 }
 0x21c   : > { %v2378_v19 = vpop.f32.mrf.mxu2  ;;  %v3845_v26 = vor.u32 %v3844_v11, %v3841_v41  ;;  %v5697_v61 = vshll.u32 %v5410_v44, 16 }
 0x21d   : > { %v2415_v24 = vadd.f32 %v2378_v19, %v1666_v43  ;;  %4178 = vmatmul.bf16.gmra.mxu1 %v4062_v0  ;;  %v4755_v0 = vunpack.c.l.b16 %v4566_v40  ;;  %v3855_v43 = vor.u32 %v3854_v9, %v8658_v31  ;;  %v4063_v40 = vpack.c.b16 %v8650_v13, %v8640_v56 }
 0x21e   : > { %v3470_v12 = vpop.f32.mrf.mxu0  ;;  %v1667_v19 = vadd.f32 %v1632_v34, %v8999_v51  ;;  %v3846_v41 = vrot.slane %v3845_v26, 4  ;;  %v8680_v56 = vrot.slane %v4568_v22, 11  ;;  %v4584_v13 = vrot.slane %v4582_v14, 7  ;;  %v9000_v14 = vld [vmem:[#allocation5_spill] sm:$0xff] }
 0x21f   : > { %v8672_v18 = vpack.c.b16 %v4755_v0, %v4754_v36  ;;  %v8676_v11 = vrot.slane %v3855_v43, 4  ;;  %v5678_v34 = vshrl.u32 %v5408_v53, 16  ;;  %v4578_v36 = vor.u32 %v4576_v33, %v4575_v63 }
 0x220   : > { %v8687_v26 = vadd.f32 %v8629_v59, %v8644_v57  ;;  %v3851_v43 = vsel %vm7936_vm5, %v3846_v41, %v8658_v31  ;;  %v5683_v27 = vrot.slane %v5681_v62, 5  ;;  %v4580_v51 = vrot.slane %v4575_v63, 4  ;;  %v3573_v41 = vld [vmem:[#allocation2 + $0xb8] sm:$0xf] }
 0x221   : > { %v3092_v47 = vpop.f32.mrf.mxu3  ;;  %4893 = vmatmul.bf16.gmra.mxu2 %v8621_v7  ;;  %v5409_v7 = vld [vmem:[#allocation2 + $0xb8] sm:$0xf]  ;;  %v5680_v0 = vrot.slane %v5678_v34, 4  ;;  %v3861_v53 = vsel %vm7936_vm5, %v8676_v11, %v8678_v29  ;;  %v4587_v33 = vor.u32 %v4585_v49, %v4584_v13  ;;  %v8701_v44 = vunpack.c.l.b16 %v3851_v43  ;;  %v4321_v13 = vld [vmem:[#allocation2 + $0xc8] sm:$0xf] }
 0x222   : > { %v3129_v48 = vadd.f32 %v3092_v47, %v2415_v24  ;;  %v1634_v3 = vpop.f32.mrf.mxu1  ;;  %v5687_v58 = vshll.u32 %v5409_v7, 16  ;;  %v5691_v9 = vshrl.u32 %v5409_v7, 16  ;;  %v3872_v63 = vshll.u32 %v3573_v41, 16  ;;  %v3574_v43 = vld [vmem:[#allocation2 + $0xbc] sm:$0x1] }
 0x223   : > { %v5684_v31 = vor.u32 %v5683_v27, %v5680_v0  ;;  %v4579_v0 = vsel %vm7565_vm2, %v8680_v56, %v4578_v36 }
 0x224   : > { %v2381_v8 = vpop.f32.mrf.mxu2  ;;  %v5689_v47 = vrot.slane %v5687_v58, 5  ;;  %v5693_v22 = vrot.slane %v5691_v9, 4  ;;  %v3874_v27 = vrot.slane %v3872_v63, 5 }
 0x225   : > { %v2416_v50 = vadd.f32 %v2381_v8, %v1667_v19  ;;  %v8697_v19 = vadd.f32 %v3470_v12, %v3129_v48  ;;  %v3572_v8 = vld [vmem:[#allocation2 + $0xb4] sm:$0xf]  ;;  %v5685_v9 = vrot.slane %v5684_v31, 4  ;;  %v3876_v12 = vshrl.u32 %v3573_v41, 16  ;;  %v4320_v48 = vld [vmem:[#allocation2 + $0xc4] sm:$0xf] }
 0x226   : > { %5271 = vmatmul.bf16.gmra.mxu3 %v7200_v25  ;;  %v8683_v35 = vpop.f32.mrf.mxu0  ;;  %v1668_v25 = vadd.f32 %v1634_v3, %v9000_v14  ;;  %v5694_v7 = vor.u32 %v5693_v22, %v5689_v47  ;;  %v5699_v3 = vrot.slane %v5697_v61, 5  ;;  %v3863_v34 = vshrl.u32 %v3572_v8, 16 }
 0x227   : > { %v3866_v62 = vshll.u32 %v3572_v8, 16  ;;  %v4595_v49 = vshrl.u32 %v4320_v48, 16  ;;  %v4588_v61 = vsel %vm7565_vm2, %v4580_v51, %v4587_v33  ;;  %v3878_v22 = vrot.slane %v3876_v12, 4  ;;  %v7201_v12 = vld [vmem:[#allocation2 + $0xa4] sm:$0xff] }
 0x228   : > { %v5695_v11 = vrot.slane %v5694_v7, 4  ;;  %v3865_v29 = vrot.slane %v3863_v34, 4  ;;  %v3882_v7 = vshll.u32 %v3574_v43, 16  ;;  %v4598_v56 = vshll.u32 %v4320_v48, 16 }
 0x229   : > { %v3095_v45 = vpop.f32.mrf.mxu3  ;;  %6017 = vmatmul.bf16.gmra.mxu0 %v5901_v6  ;;  %v3879_v8 = vor.u32 %v3878_v22, %v3874_v27  ;;  %v4597_v34 = vrot.slane %v4595_v49, 7  ;;  %v8713_v51 = vunpack.c.l.b16 %v3861_v53  ;;  %v4757_v24 = vunpack.c.l.b16 %v4588_v61 }
 0x22a   : > { %v8699_v59 = vadd.f32 %v3095_v45, %v2416_v50  ;;  %v4144_v57 = vpop.f32.mrf.mxu1  ;;  %v3868_v50 = vrot.slane %v3866_v62, 5  ;;  %v4319_v45 = vld [vmem:[#allocation2 + $0xc0] sm:$0x8]  ;;  %v3884_v62 = vrot.slane %v3882_v7, 5 }
 0x22b   : > { %v4590_v41 = vshrl.u32 %v4319_v45, 16  ;;  %v4607_v45 = vshll.u32 %v4321_v13, 16  ;;  %v4602_v61 = vrot.slane %v4597_v34, 4 }
 0x22c   : > { %v2383_v58 = vpop.f32.mrf.mxu2  ;;  %v3869_v31 = vor.u32 %v3868_v50, %v3865_v29  ;;  %v4224_v29 = vadd.f32 %v4144_v57, %v8152_v54 }
 0x22d   : > { %v2417_v6 = vadd.f32 %v2383_v58, %v1668_v25  ;;  %4183 = vmatmul.bf16.gmra.mxu1 %v4063_v40  ;;  %v5690_v25 = vsel %vm7936_vm5, %v5685_v9, %v5689_v47  ;;  %v5700_v40 = vsel %vm7936_vm5, %v5695_v11, %v5699_v3  ;;  %v4604_v58 = vshrl.u32 %v4321_v13, 16  ;;  %v5411_v11 = vld [vmem:[#allocation2 + $0xc4] sm:$0xf] }
 0x22e   : > { %v3475_v14 = vpop.f32.mrf.mxu0  ;;  %v3870_v33 = vrot.slane %v3869_v31, 4  ;;  %v4756_v9 = vunpack.c.l.b16 %v4579_v0  ;;  %v3880_v3 = vrot.slane %v3879_v8, 4  ;;  %v8716_v50 = vunpack.c.l.b16 %v5690_v25 }
 0x22f   : > { %v8718_v48 = vunpack.c.l.b16 %v5700_v40  ;;  %v4606_v49 = vrot.slane %v4604_v58, 7  ;;  %v6887_v22 = vrot.slane %v4590_v41, 11  ;;  %v5702_v7 = vshrl.u32 %v5411_v11, 16 }
 0x230   : > { %v3875_v43 = vsel %vm7936_vm5, %v3870_v33, %v3874_v27  ;;  %v3885_v0 = vsel %vm7936_vm5, %v3880_v3, %v3884_v62  ;;  %v5705_v57 = vshll.u32 %v5411_v11, 16  ;;  %v5413_v27 = vld [vmem:[#allocation2 + $0xcc] sm:$0x1]  ;;  %v8730_v13 = vadd.f32 %v8683_v35, %v8699_v59 }
 0x231   : > { %v3097_v36 = vpop.f32.mrf.mxu3  ;;  %4898 = vmatmul.bf16.gmra.mxu2 %v8672_v18  ;;  %v5412_v18 = vld [vmem:[#allocation2 + $0xc8] sm:$0xf]  ;;  %v4609_v54 = vor.u32 %v4607_v45, %v4606_v49  ;;  %v8726_v58 = vunpack.c.l.b16 %v3875_v43  ;;  %v5704_v41 = vrot.slane %v5702_v7, 4  ;;  %v4779_v3 = vpack.c.b16 %v4757_v24, %v4756_v9  ;;  %v3575_v24 = vld [vmem:[#allocation2 + $0xc4] sm:$0xf] }
 0x232   : > { %v3131_v63 = vadd.f32 %v3097_v36, %v2417_v6  ;;  %v4146_v47 = vpop.f32.mrf.mxu1  ;;  %v4600_v6 = vor.u32 %v4598_v56, %v4597_v34  ;;  %v5711_v25 = vshll.u32 %v5412_v18, 16  ;;  %v5715_v40 = vshrl.u32 %v5412_v18, 16  ;;  %v3576_v9 = vld [vmem:[#allocation2 + $0xc8] sm:$0xf] }
 0x233   : > { %v4064_v36 = vpack.c.b16 %v8713_v51, %v8701_v44  ;;  %v8732_v56 = vunpack.c.l.b16 %v3885_v0  ;;  %v5707_v34 = vrot.slane %v5705_v57, 5  ;;  %v4610_v44 = vsel %vm7565_vm2, %v4602_v61, %v4609_v54  ;;  %v4323_v0 = vld [vmem:[#allocation2 + $0xd4] sm:$0xf] }
 0x234   : > { %v4859_v53 = vpop.f32.mrf.mxu2  ;;  %v8734_v33 = vrot.slane %v5711_v25, 5  ;;  %v5717_v62 = vrot.slane %v5715_v40, 4  ;;  %v4601_v11 = vsel %vm7565_vm2, %v6887_v22, %v4600_v6  ;;  %v8740_v51 = vadd.f32 %v3475_v14, %v3131_v63  ;;  %v4324_v25 = vld [vmem:[#allocation2 + $0xd8] sm:$0xf] }
 0x235   : > { %v4939_v31 = vadd.f32 %v4859_v53, %v4224_v29  ;;  %v9001_v35 = vpack.c.b16 %v8662_v17, %v8660_v21  ;;  %v5903_v49 = vpack.c.b16 %v8718_v48, %v8716_v50  ;;  %v5708_v18 = vor.u32 %v5707_v34, %v5704_v41  ;;  %v4322_v34 = vld [vmem:[#allocation2 + $0xd0] sm:$0x8] }
 0x236   : > { %5276 = vmatmul.bf16.gmra.mxu3 %v7201_v12  ;;  %v5983_v8 = vpop.f32.mrf.mxu0  ;;  %v5721_v53 = vshll.u32 %v5413_v27, 16  ;;  %v4225_v43 = vadd.f32 %v4146_v47, %v8160_v46  ;;  %v5718_v22 = vor.u32 %v5717_v62, %v8734_v33  ;;  %v3887_v6 = vshrl.u32 %v3575_v24, 16  ;;  %v3577_v27 = vld [vmem:[#allocation2 + $0xcc] sm:$0x1] }
 0x237   : > { %v3890_v14 = vshll.u32 %v3575_v24, 16  ;;  %v4065_v21 = vpack.c.b16 %v8732_v56, %v8726_v58  ;;  %v4758_v17 = vunpack.c.l.b16 %v4601_v11  ;;  %v4759_v45 = vunpack.c.l.b16 %v4610_v44 }
 0x238   : > { %v5709_v61 = vrot.slane %v5708_v18, 4  ;;  %v3889_v7 = vrot.slane %v3887_v6, 4  ;;  %v3900_v57 = vshrl.u32 %v3576_v9, 16  ;;  %v5723_v47 = vrot.slane %v5721_v53, 5 }
 0x239   : > { %v5237_v12 = vpop.f32.mrf.mxu3  ;;  %6022 = vmatmul.bf16.gmra.mxu0 %v9001_v35  ;;  %v3892_v54 = vrot.slane %v3890_v14, 5  ;;  %v5719_v11 = vrot.slane %v5718_v22, 4  ;;  %v3906_v24 = vshll.u32 %v3577_v27, 16  ;;  %v4617_v18 = vshrl.u32 %v4323_v0, 16 }
 0x23a   : > { %v5317_v59 = vadd.f32 %v5237_v12, %v4939_v31  ;;  %v4149_v29 = vpop.f32.mrf.mxu1  ;;  %v3896_v31 = vshll.u32 %v3576_v9, 16  ;;  %v3902_v35 = vrot.slane %v3900_v57, 4  ;;  %v4620_v6 = vshll.u32 %v4323_v0, 16 }
 0x23b   : > { %v4226_v12 = vadd.f32 %v4149_v29, %v8169_v4  ;;  %v3893_v44 = vor.u32 %v3892_v54, %v3889_v7  ;;  %v4626_v9 = vshrl.u32 %v4324_v25, 16  ;;  %v7202_v29 = vld [vmem:[#allocation2 + $0xb4] sm:$0xff]  ;;  %v3908_v54 = vrot.slane %v3906_v24, 5 }
 0x23c   : > { %v4861_v63 = vpop.f32.mrf.mxu2  ;;  %v6063_v40 = vadd.f32 %v5983_v8, %v5317_v59  ;;  %v8751_v41 = vrot.slane %v3896_v31, 5  ;;  %v5714_v8 = vsel %vm7936_vm5, %v5709_v61, %v8734_v33  ;;  %v4619_v31 = vrot.slane %v4617_v18, 7  ;;  %v5414_v7 = vld [vmem:[#allocation2 + $0xd4] sm:$0xf]  ;;  %v5416_v18 = vld [vmem:[#allocation2 + $0xdc] sm:$0x1] }
 0x23d   : > { %4188 = vmatmul.bf16.gmra.mxu1 %v4064_v36  ;;  %v4940_v46 = vadd.f32 %v4861_v63, %v4225_v43  ;;  %v4612_v36 = vshrl.u32 %v4322_v34, 16  ;;  %v3894_v59 = vrot.slane %v3893_v44, 4  ;;  %v8758_v63 = vpack.c.b16 %v4759_v45, %v4758_v17 }
 0x23e   : > { %v5985_v62 = vpop.f32.mrf.mxu0  ;;  %v3903_v53 = vor.u32 %v3902_v35, %v8751_v41  ;;  %v6261_v43 = vmul.f32 %v6063_v40, %v6063_v40  ;;  %v4628_v57 = vrot.slane %v4626_v9, 7  ;;  %v8762_v27 = vunpack.c.l.b16 %v5714_v8 }
 0x23f   : > { %v6888_v34 = vrot.slane %v4612_v36, 11  ;;  %v4622_v44 = vor.u32 %v4620_v6, %v4619_v31  ;;  %v3899_v17 = vsel %vm7936_vm5, %v3894_v59, %v8751_v41  ;;  %v4624_v45 = vrot.slane %v4619_v31, 4 }
 0x240   : > { %v3904_v0 = vrot.slane %v3903_v53, 4  ;;  %v5729_v9 = vshll.u32 %v5414_v7, 16 }
 0x241   : > { %v5239_v14 = vpop.f32.mrf.mxu3  ;;  %4903 = vmatmul.bf16.gmra.mxu2 %v4779_v3  ;;  %v5724_v3 = vsel %vm7936_vm5, %v5719_v11, %v5723_v47  ;;  %v5415_v47 = vld [vmem:[#allocation2 + $0xd8] sm:$0xf] }
 0x242   : > { %v5318_v4 = vadd.f32 %v5239_v14, %v4940_v46  ;;  %v4151_v22 = vpop.f32.mrf.mxu1  ;;  %v4629_v46 = vshll.u32 %v4324_v25, 16  ;;  %v3909_v14 = vsel %vm7936_vm5, %v3904_v0, %v3908_v54  ;;  %v8777_v59 = vunpack.c.l.b16 %v5724_v3 }
 0x243   : > { %v4623_v25 = vsel %vm7565_vm2, %v6888_v34, %v4622_v44  ;;  %v5739_v31 = vshrl.u32 %v5415_v47, 16  ;;  %v8785_v54 = vunpack.c.l.b16 %v3899_v17 }
 0x244   : > { %v6064_v33 = vadd.f32 %v5985_v62, %v5318_v4  ;;  %v4864_v61 = vpop.f32.mrf.mxu2  ;;  %v5726_v62 = vshrl.u32 %v5414_v7, 16  ;;  %v4631_v8 = vor.u32 %v4629_v46, %v4628_v57  ;;  %v5735_v4 = vshll.u32 %v5415_v47, 16  ;;  %v3578_v57 = vld [vmem:[#allocation2 + $0xd4] sm:$0xf] }
 0x245   : > { %v4941_v36 = vadd.f32 %v4864_v61, %v4226_v12  ;;  %v5731_v12 = vrot.slane %v5729_v9, 5  ;;  %v3579_v61 = vld [vmem:[#allocation2 + $0xd8] sm:$0xf]  ;;  %v5741_v44 = vrot.slane %v5739_v31, 4  ;;  %v3911_v48 = vshrl.u32 %v3578_v57, 16 }
 0x246   : > { %v7292_v11 = vpack.c.bf16 %v6064_v33, %v6063_v40  ;;  %v6223_v35 = vadd.f32 %v6064_v33, %v6063_v40  ;;  %v6262_v24 = vmul.f32 %v6064_v33, %v6064_v33  ;;  %5281 = vmatmul.bf16.gmra.mxu3 %v7202_v29  ;;  %v5988_v6 = vpop.f32.mrf.mxu0  ;;  %v5728_v53 = vrot.slane %v5726_v62, 4 }
 0x247   : > { %v4227_v29 = vadd.f32 %v4151_v22, %v8172_v16  ;;  %v5745_v33 = vshll.u32 %v5416_v18, 16  ;;  %v5737_v3 = vrot.slane %v5735_v4, 5  ;;  %v4632_v34 = vsel %vm7565_vm2, %v4624_v45, %v4631_v8 }
 0x248   : > { %7293 = vst [vmem:[%s8769_s20] sm:$0xff] %v7292_v11   ;;  %v6293_v41 = vadd.f32 %v6262_v24, %v6261_v43  ;;  %v8787_v43 = vunpack.c.l.b16 %v3909_v14  ;;  %v4760_v16 = vunpack.c.l.b16 %v4623_v25  ;;  %v5732_v22 = vor.u32 %v5731_v12, %v5728_v53  ;;  %v4325_v53 = vld [vmem:[#allocation2 + $0xe0] sm:$0x8] }
 0x249   : > { %v5242_v40 = vpop.f32.mrf.mxu3  ;;  %6027 = vmatmul.bf16.gmra.mxu0 %v5903_v49  ;;  %v5747_v50 = vrot.slane %v5745_v33, 5  ;;  %v3914_v49 = vshll.u32 %v3578_v57, 16  ;;  %v5742_v11 = vor.u32 %v5741_v44, %v5737_v3  ;;  %v3920_v24 = vshll.u32 %v3579_v61, 16 }
 0x24a   : > { %v5319_v0 = vadd.f32 %v5242_v40, %v4941_v36  ;;  %v4154_v7 = vpop.f32.mrf.mxu1  ;;  %v5733_v17 = vrot.slane %v5732_v22, 4  ;;  %v4326_v36 = vld [vmem:[#allocation2 + $0xe4] sm:$0xf]  ;;  %v3913_v14 = vrot.slane %v3911_v48, 4  ;;  %v4761_v25 = vunpack.c.l.b16 %v4632_v34  ;;  %v9002_v34 = vld [vmem:[#allocation6_spill] sm:$0xff] }
 0x24b   : > { %v3916_v8 = vrot.slane %v3914_v49, 5  ;;  %v5743_v4 = vrot.slane %v5742_v11, 4  ;;  %v3922_v40 = vrot.slane %v3920_v24, 5  ;;  %v4639_v57 = vshrl.u32 %v4326_v36, 16 }
 0x24c   : > { %v8791_v46 = vadd.f32 %v5988_v6, %v5319_v0  ;;  %v4866_v47 = vpop.f32.mrf.mxu2  ;;  %v3580_v6 = vld [vmem:[#allocation2 + $0xdc] sm:$0x1]  ;;  %v5738_v56 = vsel %vm7936_vm5, %v5733_v17, %v5737_v3  ;;  %v4634_v0 = vshrl.u32 %v4325_v53, 16  ;;  %v4228_v44 = vadd.f32 %v4154_v7, %v9002_v34  ;;  %v4327_v7 = vld [vmem:[#allocation2 + $0xe8] sm:$0xf] }
 0x24d   : > { %v4942_v62 = vadd.f32 %v4866_v47, %v4227_v29  ;;  %4193 = vmatmul.bf16.gmra.mxu1 %v4065_v21  ;;  %v3924_v29 = vshrl.u32 %v3579_v61, 16  ;;  %v3917_v21 = vor.u32 %v3916_v8, %v3913_v14  ;;  %v3930_v12 = vshll.u32 %v3580_v6, 16  ;;  %v7203_v47 = vld [vmem:[#allocation2 + $0xc4] sm:$0xff] }
 0x24e   : > { %v6224_v45 = vadd.f32 %v6223_v35, %v8791_v46  ;;  %v6263_v18 = vmul.f32 %v8791_v46, %v8791_v46  ;;  %v5990_v9 = vpop.f32.mrf.mxu0  ;;  %v5748_v35 = vsel %vm7936_vm5, %v5743_v4, %v5747_v50  ;;  %v4066_v3 = vpack.c.b16 %v8787_v43, %v8785_v54  ;;  %v5417_v6 = vld [vmem:[#allocation2 + $0xe4] sm:$0xf]  ;;  %v9003_v4 = vld [vmem:[#allocation7_spill] sm:$0xff] }
 0x24f   : > { %v3926_v33 = vrot.slane %v3924_v29, 4  ;;  %v8809_v48 = vpack.c.b16 %v4761_v25, %v4760_v16  ;;  %v4641_v50 = vrot.slane %v4639_v57, 7  ;;  %v8813_v24 = vunpack.c.l.b16 %v5748_v35  ;;  %v5418_v25 = vld [vmem:[#allocation2 + $0xe8] sm:$0xf] }
 0x250   : > { %v6294_v58 = vadd.f32 %v6293_v41, %v6263_v18  ;;  %v5904_v41 = vpack.c.b16 %v8777_v59, %v8762_v27  ;;  %v4642_v18 = vshll.u32 %v4326_v36, 16  ;;  %v3932_v14 = vrot.slane %v3930_v12, 5 }
 0x251   : > { %v5244_v31 = vpop.f32.mrf.mxu3  ;;  %4908 = vmatmul.bf16.gmra.mxu2 %v8758_v63  ;;  %v8811_v63 = vunpack.c.l.b16 %v5738_v56  ;;  %v3927_v49 = vor.u32 %v3926_v33, %v3922_v40  ;;  %v6889_v8 = vrot.slane %v4634_v0, 11  ;;  %v4648_v56 = vshrl.u32 %v4327_v7, 16  ;;  %v5419_v33 = vld [vmem:[#allocation2 + $0xec] sm:$0x1] }
 0x252   : > { %v5320_v22 = vadd.f32 %v5244_v31, %v4942_v62  ;;  %v4156_v61 = vpop.f32.mrf.mxu1  ;;  %v3918_v62 = vrot.slane %v3917_v21, 4  ;;  %v4644_v53 = vor.u32 %v4642_v18, %v4641_v50  ;;  %v4651_v21 = vshll.u32 %v4327_v7, 16 }
 0x253   : > { %v3928_v59 = vrot.slane %v3927_v49, 4  ;;  %v4229_v29 = vadd.f32 %v4156_v61, %v9003_v4  ;;  %v5750_v31 = vshrl.u32 %v5417_v6, 16  ;;  %v4646_v12 = vrot.slane %v4641_v50, 4 }
 0x254   : > { %v6066_v17 = vadd.f32 %v5990_v9, %v5320_v22  ;;  %v4869_v11 = vpop.f32.mrf.mxu2  ;;  %v3923_v35 = vsel %vm7936_vm5, %v3918_v62, %v3922_v40  ;;  %v5753_v0 = vshll.u32 %v5417_v6, 16  ;;  %v4650_v57 = vrot.slane %v4648_v56, 7 }
 0x255   : > { %v4943_v27 = vadd.f32 %v4869_v11, %v4228_v44  ;;  %v5752_v22 = vrot.slane %v5750_v31, 4  ;;  %v5759_v34 = vshll.u32 %v5418_v25, 16  ;;  %v4645_v61 = vsel %vm7565_vm2, %v6889_v8, %v4644_v53 }
 0x256   : > { %v7297_v54 = vpack.c.bf16 %v6066_v17, %v8791_v46  ;;  %v6225_v43 = vadd.f32 %v6224_v45, %v6066_v17  ;;  %v6264_v16 = vmul.f32 %v6066_v17, %v6066_v17  ;;  %5286 = vmatmul.bf16.gmra.mxu3 %v7203_v47  ;;  %v5993_v9 = vpop.f32.mrf.mxu0  ;;  %v3933_v45 = vsel %vm7936_vm5, %v3928_v59, %v3932_v14  ;;  %v3581_v17 = vld [vmem:[#allocation2 + $0xe4] sm:$0xf]  ;;  %v3582_v14 = vld [vmem:[#allocation2 + $0xe8] sm:$0xf] }
 0x257   : > { %v5763_v49 = vshrl.u32 %v5418_v25, 16  ;;  %v8824_v40 = vunpack.c.l.b16 %v3923_v35  ;;  %v4653_v50 = vor.u32 %v4651_v21, %v4650_v57  ;;  %v5761_v11 = vrot.slane %v5759_v34, 5 }
 0x258   : > { %7384 = vst [vmem:[%s8769_s20 + $0x8] sm:$0xff] %v7297_v54   ;;  %v6295_v36 = vadd.f32 %v6294_v58, %v6264_v16  ;;  %v5755_v58 = vrot.slane %v5753_v0, 5  ;;  %v5769_v62 = vshll.u32 %v5419_v33, 16  ;;  %v3935_v54 = vshrl.u32 %v3581_v17, 16 }
 0x259   : > { %v5247_v46 = vpop.f32.mrf.mxu3  ;;  %6032 = vmatmul.bf16.gmra.mxu0 %v5904_v41  ;;  %v5765_v59 = vrot.slane %v5763_v49, 4  ;;  %v8826_v41 = vunpack.c.l.b16 %v3933_v45  ;;  %v4762_v8 = vunpack.c.l.b16 %v4645_v61  ;;  %v3938_v16 = vshll.u32 %v3581_v17, 16  ;;  %v4329_v45 = vld [vmem:[#allocation2 + $0xf4] sm:$0xf]  ;;  %v3583_v49 = vld [vmem:[#allocation2 + $0xec] sm:$0x1] }
 0x25a   : > { %v5321_v44 = vadd.f32 %v5247_v46, %v4943_v27  ;;  %v4159_v47 = vpop.f32.mrf.mxu1  ;;  %v5756_v6 = vor.u32 %v5755_v58, %v5752_v22  ;;  %v4654_v27 = vsel %vm7565_vm2, %v4646_v12, %v4653_v50  ;;  %v3944_v33 = vshll.u32 %v3582_v14, 16 }
 0x25b   : > { %v5766_v31 = vor.u32 %v5765_v59, %v5761_v11  ;;  %v3940_v35 = vrot.slane %v3938_v16, 5  ;;  %v4763_v46 = vunpack.c.l.b16 %v4654_v27  ;;  %v5771_v57 = vrot.slane %v5769_v62, 5 }
 0x25c   : > { %v6067_v7 = vadd.f32 %v5993_v9, %v5321_v44  ;;  %v4871_v18 = vpop.f32.mrf.mxu2  ;;  %v5757_v56 = vrot.slane %v5756_v6, 4  ;;  %v3937_v9 = vrot.slane %v3935_v54, 4  ;;  %v4067_v17 = vpack.c.b16 %v8826_v41, %v8824_v40  ;;  %v9004_v6 = vld [vmem:[#allocation8_spill] sm:$0xff]  ;;  %v5420_v41 = vld [vmem:[#allocation2 + $0xf4] sm:$0xf] }
 0x25d   : > { %4198 = vmatmul.bf16.gmra.mxu1 %v4066_v3  ;;  %v4944_v4 = vadd.f32 %v4871_v18, %v4229_v29  ;;  %v3948_v3 = vshrl.u32 %v3582_v14, 16  ;;  %v5767_v12 = vrot.slane %v5766_v31, 4  ;;  %v5905_v29 = vpack.c.b16 %v8813_v24, %v8811_v63  ;;  %v4330_v24 = vld [vmem:[#allocation2 + $0xf8] sm:$0xf] }
 0x25e   : > { %v6226_v53 = vadd.f32 %v6225_v43, %v6067_v7  ;;  %v6265_v25 = vmul.f32 %v6067_v7, %v6067_v7  ;;  %v5995_v21 = vpop.f32.mrf.mxu0  ;;  %v3941_v34 = vor.u32 %v3940_v35, %v3937_v9  ;;  %v7204_v43 = vld [vmem:[#allocation2 + $0xd4] sm:$0xff]  ;;  %v5762_v58 = vsel %vm7936_vm5, %v5757_v56, %v5761_v11 }
 0x25f   : > { %v8837_v50 = vrot.slane %v3944_v33, 5  ;;  %v3950_v62 = vrot.slane %v3948_v3, 4  ;;  %v4230_v59 = vadd.f32 %v4159_v47, %v9004_v6  ;;  %v8840_v54 = vpack.c.b16 %v4763_v46, %v4762_v8  ;;  %v5421_v47 = vld [vmem:[#allocation2 + $0xf8] sm:$0xf] }
 0x260   : > { %v6296_v0 = vadd.f32 %v6295_v36, %v6265_v25  ;;  %v4328_v36 = vld [vmem:[#allocation2 + $0xf0] sm:$0x8]  ;;  %v5772_v63 = vsel %vm7936_vm5, %v5767_v12, %v5771_v57  ;;  %v8844_v11 = vunpack.c.l.b16 %v5762_v58  ;;  %v3942_v27 = vrot.slane %v3941_v34, 4  ;;  %v9005_v34 = vld [vmem:[#allocation9_spill] sm:$0xff] }
 0x261   : > { %v5249_v22 = vpop.f32.mrf.mxu3  ;;  %4913 = vmatmul.bf16.gmra.mxu2 %v8809_v48  ;;  %v4661_v48 = vshrl.u32 %v4329_v45, 16  ;;  %v3954_v16 = vshll.u32 %v3583_v49, 16  ;;  %v4656_v40 = vshrl.u32 %v4328_v36, 16  ;;  %v8846_v8 = vunpack.c.l.b16 %v5772_v63 }
 0x262   : > { %v5322_v44 = vadd.f32 %v5249_v22, %v4944_v4  ;;  %v4161_v61 = vpop.f32.mrf.mxu1  ;;  %v3951_v9 = vor.u32 %v3950_v62, %v8837_v50  ;;  %v4664_v33 = vshll.u32 %v4329_v45, 16  ;;  %v4670_v57 = vshrl.u32 %v4330_v24, 16  ;;  %v5422_v45 = vld [vmem:[#allocation2 + $0xfc] sm:$0x1] }
 0x263   : > { %v4663_v35 = vrot.slane %v4661_v48, 7  ;;  %v4673_v3 = vshll.u32 %v4330_v24, 16  ;;  %v5774_v22 = vshrl.u32 %v5420_v41, 16  ;;  %v3947_v36 = vsel %vm7936_vm5, %v3942_v27, %v8837_v50  ;;  %v3585_v27 = vld [vmem:[#allocation2 + $0xf8] sm:$0xf] }
 0x264   : > { %v6068_v18 = vadd.f32 %v5995_v21, %v5322_v44  ;;  %v4874_v14 = vpop.f32.mrf.mxu2  ;;  %v5777_v44 = vshll.u32 %v5420_v41, 16  ;;  %v4672_v62 = vrot.slane %v4670_v57, 7  ;;  %v5906_v24 = vpack.c.b16 %v8846_v8, %v8844_v11 }
 0x265   : > { %v4945_v21 = vadd.f32 %v4874_v14, %v4230_v59  ;;  %v5776_v48 = vrot.slane %v5774_v22, 4  ;;  %v4666_v6 = vor.u32 %v4664_v33, %v4663_v35  ;;  %v3584_v14 = vld [vmem:[#allocation2 + $0xf4] sm:$0xf]  ;;  %v5787_v50 = vshrl.u32 %v5421_v47, 16 }
 0x266   : > { %v7302_v25 = vpack.c.bf16 %v6068_v18, %v6067_v7  ;;  %v6227_v4 = vadd.f32 %v6226_v53, %v6068_v18  ;;  %v6266_v56 = vmul.f32 %v6068_v18, %v6068_v18  ;;  %5291 = vmatmul.bf16.gmra.mxu3 %v7204_v43  ;;  %v5998_v31 = vpop.f32.mrf.mxu0  ;;  %v4231_v7 = vadd.f32 %v4161_v61, %v9005_v34 }
 0x267   : > { %v3956_v53 = vrot.slane %v3954_v16, 5  ;;  %v5783_v43 = vshll.u32 %v5421_v47, 16  ;;  %v6890_v18 = vrot.slane %v4656_v40, 11  ;;  %v5779_v59 = vrot.slane %v5777_v44, 5 }
 0x268   : > { %7385 = vst [vmem:[%s8769_s20 + $0x10] sm:$0xff] %v7302_v25   ;;  %v6297_v46 = vadd.f32 %v6296_v0, %v6266_v56  ;;  %v3952_v0 = vrot.slane %v3951_v9, 4  ;;  %v4675_v16 = vor.u32 %v4673_v3, %v4672_v62  ;;  %v5793_v40 = vshll.u32 %v5422_v45, 16  ;;  %v7205_v62 = vld [vmem:[#allocation2 + $0xe4] sm:$0xff] }
 0x269   : > { %v5252_v12 = vpop.f32.mrf.mxu3  ;;  %6037 = vmatmul.bf16.gmra.mxu0 %v5905_v29  ;;  %v4668_v29 = vrot.slane %v4663_v35, 4  ;;  %v5780_v25 = vor.u32 %v5779_v59, %v5776_v48  ;;  %v8856_v56 = vrot.slane %v5783_v43, 5  ;;  %v3959_v33 = vshrl.u32 %v3584_v14, 16 }
 0x26a   : > { %v5323_v58 = vadd.f32 %v5252_v12, %v4945_v21  ;;  %v4164_v49 = vpop.f32.mrf.mxu1  ;;  %v8860_v22 = vunpack.c.l.b16 %v3947_v36  ;;  %v4667_v35 = vsel %vm7565_vm2, %v6890_v18, %v4666_v6  ;;  %v5789_v3 = vrot.slane %v5787_v50, 4  ;;  %v9006_v6 = vld [vmem:[#allocation10_spill] sm:$0xff] }
 0x26b   : > { %v4676_v12 = vsel %vm7565_vm2, %v4668_v29, %v4675_v16  ;;  %v3962_v47 = vshll.u32 %v3584_v14, 16  ;;  %v3968_v34 = vshll.u32 %v3585_v27, 16  ;;  %v3961_v43 = vrot.slane %v3959_v33, 4 }
 0x26c   : > { %v6069_v63 = vadd.f32 %v5998_v31, %v5323_v58  ;;  %v4876_v61 = vpop.f32.mrf.mxu2  ;;  %v3957_v31 = vsel %vm7936_vm5, %v3952_v0, %v3956_v53  ;;  %v5790_v44 = vor.u32 %v5789_v3, %v8856_v56  ;;  %v3972_v53 = vshrl.u32 %v3585_v27, 16  ;;  %v4332_v58 = vld [vmem:[#allocation2 + $0x104] sm:$0xf]  ;;  %v4333_v3 = vld [vmem:[#allocation2 + $0x108] sm:$0xf] }
 0x26d   : > { %v4946_v41 = vadd.f32 %v4876_v61, %v4231_v7  ;;  %4203 = vmatmul.bf16.gmra.mxu1 %v4067_v17  ;;  %v5781_v7 = vrot.slane %v5780_v25, 4  ;;  %v4050_v48 = vunpack.c.l.b16 %v3957_v31  ;;  %v5795_v0 = vrot.slane %v5793_v40, 5 }
 0x26e   : > { %v6228_v21 = vadd.f32 %v6227_v4, %v6069_v63  ;;  %v6267_v9 = vmul.f32 %v6069_v63, %v6069_v63  ;;  %v6000_v57 = vpop.f32.mrf.mxu0  ;;  %v3964_v18 = vrot.slane %v3962_v47, 5  ;;  %v4232_v59 = vadd.f32 %v4164_v49, %v9006_v6 }
 0x26f   : > { %v5791_v14 = vrot.slane %v5790_v44, 4  ;;  %v8869_v61 = vrot.slane %v3968_v34, 5  ;;  %v3974_v29 = vrot.slane %v3972_v53, 4  ;;  %v4764_v25 = vunpack.c.l.b16 %v4667_v35 }
 0x270   : > { %v6298_v17 = vadd.f32 %v6297_v46, %v6267_v9  ;;  %v3586_v46 = vld [vmem:[#allocation2 + $0xfc] sm:$0x1]  ;;  %v4765_v50 = vunpack.c.l.b16 %v4676_v12  ;;  %v4331_v9 = vld [vmem:[#allocation2 + $0x100] sm:$0x8]  ;;  %v4683_v27 = vshrl.u32 %v4332_v58, 16  ;;  %v5786_v40 = vsel %vm7936_vm5, %v5781_v7, %v8856_v56 }
 0x271   : > { %v5254_v4 = vpop.f32.mrf.mxu3  ;;  %4918 = vmatmul.bf16.gmra.mxu2 %v8840_v54  ;;  %v3965_v33 = vor.u32 %v3964_v18, %v3961_v43  ;;  %v3978_v31 = vshll.u32 %v3586_v46, 16  ;;  %v4068_v12 = vpack.c.b16 %v4050_v48, %v8860_v22  ;;  %v4678_v44 = vshrl.u32 %v4331_v9, 16  ;;  %v5423_v43 = vld [vmem:[#allocation2 + $0x104] sm:$0xf] }
 0x272   : > { %v5324_v36 = vadd.f32 %v5254_v4, %v4946_v41  ;;  %v4166_v45 = vpop.f32.mrf.mxu1  ;;  %v3975_v4 = vor.u32 %v3974_v29, %v8869_v61  ;;  %v4686_v56 = vshll.u32 %v4332_v58, 16  ;;  %v4692_v7 = vshrl.u32 %v4333_v3, 16 }
 0x273   : > { %v4783_v18 = vpack.c.b16 %v4765_v50, %v4764_v25  ;;  %v4695_v58 = vshll.u32 %v4333_v3, 16  ;;  %v6891_v50 = vrot.slane %v4678_v44, 11 }
 0x274   : > { %v6070_v54 = vadd.f32 %v6000_v57, %v5324_v36  ;;  %v4879_v16 = vpop.f32.mrf.mxu2  ;;  %v5796_v57 = vsel %vm7936_vm5, %v5791_v14, %v5795_v0  ;;  %v4685_v36 = vrot.slane %v4683_v27, 7  ;;  %v5424_v0 = vld [vmem:[#allocation2 + $0x108] sm:$0xf]  ;;  %v3976_v14 = vrot.slane %v3975_v4, 4 }
 0x275   : > { %v4947_v41 = vadd.f32 %v4879_v16, %v4232_v59  ;;  %v8882_v6 = vunpack.c.l.b16 %v5796_v57  ;;  %v3980_v59 = vrot.slane %v3978_v31, 5  ;;  %v4694_v29 = vrot.slane %v4692_v7, 7  ;;  %v5425_v7 = vld [vmem:[#allocation2 + $0x10c] sm:$0x1] }
 0x276   : > { %v7307_v49 = vpack.c.bf16 %v6070_v54, %v6069_v63  ;;  %v6229_v47 = vadd.f32 %v6228_v21, %v6070_v54  ;;  %v6268_v34 = vmul.f32 %v6070_v54, %v6070_v54  ;;  %5296 = vmatmul.bf16.gmra.mxu3 %v7205_v62  ;;  %v6003_v35 = vpop.f32.mrf.mxu0  ;;  %v9007_v63 = vld [vmem:[#allocation11_spill] sm:$0xff]  ;;  %v8880_v62 = vunpack.c.l.b16 %v5786_v40  ;;  %v3587_v40 = vld [vmem:[#allocation2 + $0x104] sm:$0xf] }
 0x277   : > { %v4233_v21 = vadd.f32 %v4166_v45, %v9007_v63  ;;  %v5798_v54 = vshrl.u32 %v5423_v43, 16  ;;  %v5801_v16 = vshll.u32 %v5423_v43, 16  ;;  %v4688_v9 = vor.u32 %v4686_v56, %v4685_v36 }
 0x278   : > { %7386 = vst [vmem:[%s8769_s20 + $0x18] sm:$0xff] %v7307_v49   ;;  %v6299_v53 = vadd.f32 %v6298_v17, %v6268_v34  ;;  %v3966_v17 = vrot.slane %v3965_v33, 4  ;;  %v5807_v27 = vshll.u32 %v5424_v0, 16  ;;  %v5907_v11 = vpack.c.b16 %v8882_v6, %v8880_v62  ;;  %v3588_v34 = vld [vmem:[#allocation2 + $0x108] sm:$0xf] }
 0x279   : > { %v5257_v46 = vpop.f32.mrf.mxu3  ;;  %6042 = vmatmul.bf16.gmra.mxu0 %v5906_v24  ;;  %v4690_v8 = vrot.slane %v4685_v36, 4  ;;  %v5800_v24 = vrot.slane %v5798_v54, 4  ;;  %v4697_v31 = vor.u32 %v4695_v58, %v4694_v29  ;;  %v5803_v3 = vrot.slane %v5801_v16, 5  ;;  %v5427_v62 = vld [vmem:[#allocation2 + $0x118] sm:$0xf] }
 0x27a   : > { %v5325_v22 = vadd.f32 %v5257_v46, %v4947_v41  ;;  %v4169_v48 = vpop.f32.mrf.mxu1  ;;  %v8897_v4 = vrot.slane %v5807_v27, 5  ;;  %v3983_v44 = vshrl.u32 %v3587_v40, 16  ;;  %v3981_v36 = vsel %vm7936_vm5, %v3976_v14, %v3980_v59 }
 0x27b   : > { %v3986_v43 = vshll.u32 %v3587_v40, 16  ;;  %v5804_v63 = vor.u32 %v5803_v3, %v5800_v24  ;;  %v3992_v58 = vshll.u32 %v3588_v34, 16  ;;  %v5817_v14 = vshll.u32 %v5425_v7, 16 }
 0x27c   : > { %v8887_v45 = vadd.f32 %v6003_v35, %v5325_v22  ;;  %v4881_v25 = vpop.f32.mrf.mxu2  ;;  %v3971_v35 = vsel %vm7936_vm5, %v3966_v17, %v8869_v61  ;;  %v3985_v22 = vrot.slane %v3983_v44, 4  ;;  %v7206_v17 = vld [vmem:[#allocation2 + $0xf4] sm:$0xff]  ;;  %v4052_v40 = vunpack.c.l.b16 %v3981_v36 }
 0x27d   : > { %v4948_v49 = vadd.f32 %v4881_v25, %v4233_v21  ;;  %4208 = vmatmul.bf16.gmra.mxu1 %v4068_v12  ;;  %v5811_v12 = vshrl.u32 %v5424_v0, 16  ;;  %v4051_v0 = vunpack.c.l.b16 %v3971_v35  ;;  %v3988_v54 = vrot.slane %v3986_v43, 5 }
 0x27e   : > { %v6230_v41 = vadd.f32 %v6229_v47, %v8887_v45  ;;  %v6269_v33 = vmul.f32 %v8887_v45, %v8887_v45  ;;  %v6005_v57 = vpop.f32.mrf.mxu0  ;;  %v4689_v47 = vsel %vm7565_vm2, %v6891_v50, %v4688_v9  ;;  %v8906_v16 = vrot.slane %v3992_v58, 5  ;;  %v4334_v58 = vld [vmem:[#allocation2 + $0x110] sm:$0x8] }
 0x27f   : > { %v5813_v21 = vrot.slane %v5811_v12, 4  ;;  %v3996_v25 = vshrl.u32 %v3588_v34, 16  ;;  %v4766_v24 = vunpack.c.l.b16 %v4689_v47  ;;  %v5805_v3 = vrot.slane %v5804_v63, 4  ;;  %v4336_v47 = vld [vmem:[#allocation2 + $0x118] sm:$0xf] }
 0x280   : > { %v6300_v56 = vadd.f32 %v6299_v53, %v6269_v33  ;;  %v4698_v53 = vsel %vm7565_vm2, %v4690_v8, %v4697_v31  ;;  %v3989_v35 = vor.u32 %v3988_v54, %v3985_v22  ;;  %v4335_v8 = vld [vmem:[#allocation2 + $0x114] sm:$0xf] }
 0x281   : > { %v5259_v46 = vpop.f32.mrf.mxu3  ;;  %4923 = vmatmul.bf16.gmra.mxu2 %v4783_v18  ;;  %v5814_v59 = vor.u32 %v5813_v21, %v8897_v4  ;;  %v9008_v18 = vld [vmem:[#allocation12_spill] sm:$0xff]  ;;  %v4767_v33 = vunpack.c.l.b16 %v4698_v53  ;;  %v3998_v12 = vrot.slane %v3996_v25, 4  ;;  %v4705_v63 = vshrl.u32 %v4335_v8, 16 }
 0x282   : > { %v5326_v61 = vadd.f32 %v5259_v46, %v4948_v49  ;;  %v4171_v29 = vpop.f32.mrf.mxu1  ;;  %v4234_v9 = vadd.f32 %v4169_v48, %v9008_v18  ;;  %v3589_v49 = vld [vmem:[#allocation2 + $0x10c] sm:$0x1]  ;;  %v5819_v46 = vrot.slane %v5817_v14, 5  ;;  %v3990_v14 = vrot.slane %v3989_v35, 4 }
 0x283   : > { %v3999_v48 = vor.u32 %v3998_v12, %v8906_v16  ;;  %v4002_v36 = vshll.u32 %v3589_v49, 16  ;;  %v4784_v53 = vpack.c.b16 %v4767_v33, %v4766_v24  ;;  %v4714_v25 = vshrl.u32 %v4336_v47, 16 }
 0x284   : > { %v6072_v50 = vadd.f32 %v6005_v57, %v5326_v61  ;;  %v4884_v27 = vpop.f32.mrf.mxu2  ;;  %v5815_v57 = vrot.slane %v5814_v59, 4  ;;  %v4069_v61 = vpack.c.b16 %v4052_v40, %v4051_v0  ;;  %v4707_v24 = vrot.slane %v4705_v63, 7 }
 0x285   : > { %v4949_v43 = vadd.f32 %v4884_v27, %v4234_v9  ;;  %v4000_v0 = vrot.slane %v3999_v48, 4  ;;  %v4004_v18 = vrot.slane %v4002_v36, 5  ;;  %v4700_v9 = vshrl.u32 %v4334_v58, 16 }
 0x286   : > { %v7312_v31 = vpack.c.bf16 %v6072_v50, %v8887_v45  ;;  %v6231_v44 = vadd.f32 %v6230_v41, %v6072_v50  ;;  %v6270_v7 = vmul.f32 %v6072_v50, %v6072_v50  ;;  %5301 = vmatmul.bf16.gmra.mxu3 %v7206_v17  ;;  %v6008_v34 = vpop.f32.mrf.mxu0  ;;  %v5810_v45 = vsel %vm7936_vm5, %v5805_v3, %v8897_v4  ;;  %v9009_v17 = vld [vmem:[#allocation13_spill] sm:$0xff] }
 0x287   : > { %v4235_v54 = vadd.f32 %v4171_v29, %v9009_v17  ;;  %v5820_v50 = vsel %vm7936_vm5, %v5815_v57, %v5819_v46  ;;  %v5890_v4 = vunpack.c.l.b16 %v5810_v45  ;;  %v4708_v49 = vshll.u32 %v4335_v8, 16 }
 0x288   : > { %7387 = vst [vmem:[%s8769_s20 + $0x20] sm:$0xff] %v7312_v31   ;;  %v6301_v21 = vadd.f32 %v6300_v56, %v6270_v7  ;;  %v5426_v56 = vld [vmem:[#allocation2 + $0x114] sm:$0xf]  ;;  %v4716_v6 = vrot.slane %v4714_v25, 7  ;;  %v5891_v31 = vunpack.c.l.b16 %v5820_v50  ;;  %v6892_v57 = vrot.slane %v4700_v9, 11 }
 0x289   : > { %v5262_v22 = vpop.f32.mrf.mxu3  ;;  %6047 = vmatmul.bf16.gmra.mxu0 %v5907_v11  ;;  %v4717_v11 = vshll.u32 %v4336_v47, 16  ;;  %v5822_v29 = vshrl.u32 %v5426_v56, 16  ;;  %v5825_v33 = vshll.u32 %v5426_v56, 16  ;;  %v5831_v8 = vshll.u32 %v5427_v62, 16  ;;  %v9010_v50 = vld [vmem:[#allocation14_spill] sm:$0xff] }
 0x28a   : > { %v5327_v41 = vadd.f32 %v5262_v22, %v4949_v43  ;;  %v4174_v59 = vpop.f32.mrf.mxu1  ;;  %v3995_v43 = vsel %vm7936_vm5, %v3990_v14, %v8906_v16  ;;  %v4710_v48 = vor.u32 %v4708_v49, %v4707_v24  ;;  %v4712_v36 = vrot.slane %v4707_v24, 4 }
 0x28b   : > { %v5835_v47 = vshrl.u32 %v5427_v62, 16  ;;  %v5824_v63 = vrot.slane %v5822_v29, 4  ;;  %v5827_v22 = vrot.slane %v5825_v33, 5  ;;  %v5908_v14 = vpack.c.b16 %v5891_v31, %v5890_v4 }
 0x28c   : > { %v6073_v27 = vadd.f32 %v6008_v34, %v5327_v41  ;;  %v4886_v40 = vpop.f32.mrf.mxu2  ;;  %v4005_v34 = vsel %vm7936_vm5, %v4000_v0, %v4004_v18  ;;  %v7207_v41 = vld [vmem:[#allocation2 + $0x104] sm:$0xff]  ;;  %v4053_v25 = vunpack.c.l.b16 %v3995_v43 }
 0x28d   : > { %4213 = vmatmul.bf16.gmra.mxu1 %v4069_v61  ;;  %v4950_v12 = vadd.f32 %v4886_v40, %v4235_v54  ;;  %v5833_v61 = vrot.slane %v5831_v8, 5  ;;  %v5428_v54 = vld [vmem:[#allocation2 + $0x11c] sm:$0x1]  ;;  %v5837_v16 = vrot.slane %v5835_v47, 4  ;;  %v4054_v18 = vunpack.c.l.b16 %v4005_v34 }
 0x28e   : > { %v6232_v3 = vadd.f32 %v6231_v44, %v6073_v27  ;;  %v6271_v35 = vmul.f32 %v6073_v27, %v6073_v27  ;;  %v6010_v7 = vpop.f32.mrf.mxu0  ;;  %v4719_v44 = vor.u32 %v4717_v11, %v4716_v6  ;;  %v5828_v40 = vor.u32 %v5827_v22, %v5824_v63 }
 0x28f   : > { %v5838_v24 = vor.u32 %v5837_v16, %v5833_v61  ;;  %v5841_v49 = vshll.u32 %v5428_v54, 16 }
 0x290   : > { %v6302_v46 = vadd.f32 %v6301_v21, %v6271_v35  ;;  %v4236_v21 = vadd.f32 %v4174_v59, %v9010_v50  ;;  %v4720_v9 = vsel %vm7565_vm2, %v4712_v36, %v4719_v44  ;;  %v4070_v35 = vpack.c.b16 %v4054_v18, %v4053_v25 }
 0x291   : > { %v5264_v58 = vpop.f32.mrf.mxu3  ;;  %4928 = vmatmul.bf16.gmra.mxu2 %v4784_v53  ;;  %v4711_v53 = vsel %vm7565_vm2, %v6892_v57, %v4710_v48  ;;  %v4769_v31 = vunpack.c.l.b16 %v4720_v9  ;;  %v5839_v34 = vrot.slane %v5838_v24, 4  ;;  %v5843_v57 = vrot.slane %v5841_v49, 5 }
 0x292   : > { %v5328_v45 = vadd.f32 %v5264_v58, %v4950_v12  ;;  %v4176_v17 = vpop.f32.mrf.mxu1  ;;  %v4768_v12 = vunpack.c.l.b16 %v4711_v53 }
 0x293   : > { %v5844_v44 = vsel %vm7936_vm5, %v5839_v34, %v5843_v57 }
 0x294   : > { %v6074_v56 = vadd.f32 %v6010_v7, %v5328_v45  ;;  %v4889_v0 = vpop.f32.mrf.mxu2  ;;  %v5829_v7 = vrot.slane %v5828_v40, 4  ;;  %v4785_v48 = vpack.c.b16 %v4769_v31, %v4768_v12  ;;  %v5893_v54 = vunpack.c.l.b16 %v5844_v44 }
 0x295   : > { %v4951_v4 = vadd.f32 %v4889_v0, %v4236_v21 }
 0x296   : > { %v7317_v62 = vpack.c.bf16 %v6074_v56, %v6073_v27  ;;  %v6233_v6 = vadd.f32 %v6232_v3, %v6074_v56  ;;  %v6272_v11 = vmul.f32 %v6074_v56, %v6074_v56  ;;  %5306 = vmatmul.bf16.gmra.mxu3 %v7207_v41  ;;  %v6013_v29 = vpop.f32.mrf.mxu0  ;;  %v4237_v27 = vadd.f32 %v4176_v17, %v8344_v1  ;;  %v7208_v17 = vld [vmem:[#allocation2 + $0x114] sm:$0xff] }
 0x297   : > { %v5834_v36 = vsel %vm7936_vm5, %v5829_v7, %v5833_v61 }
 0x298   : > { %7388 = vst [vmem:[%s8769_s20 + $0x28] sm:$0xff] %v7317_v62   ;;  %v6303_v33 = vadd.f32 %v6302_v46, %v6272_v11  ;;  %v5892_v41 = vunpack.c.l.b16 %v5834_v36 }
 0x299   : > { %v5267_v59 = vpop.f32.mrf.mxu3  ;;  %6052 = vmatmul.bf16.gmra.mxu0 %v5908_v14 }
 0x29a   : > { %v5329_v43 = vadd.f32 %v5267_v59, %v4951_v4  ;;  %v4179_v32 = vpop.f32.mrf.mxu1  ;;  %v5909_v56 = vpack.c.b16 %v5893_v54, %v5892_v41 }
 0x29b   : > { %v4238_v25 = vadd.f32 %v4179_v32, %v8353_v52 }
 0x29c   : > { %v6075_v8 = vadd.f32 %v6013_v29, %v5329_v43  ;;  %v4891_v3 = vpop.f32.mrf.mxu2 }
 0x29d   : > { %4218 = vmatmul.bf16.gmra.mxu1 %v4070_v35  ;;  %v4952_v58 = vadd.f32 %v4891_v3, %v4237_v27 }
 0x29e   : > { %v6234_v46 = vadd.f32 %v6233_v6, %v6075_v8  ;;  %v6273_v47 = vmul.f32 %v6075_v8, %v6075_v8  ;;  %v6015_v63 = vpop.f32.mrf.mxu0 }
 0x2a0   : > { %v6304_v22 = vadd.f32 %v6303_v33, %v6273_v47 }
 0x2a1   : > { %v5269_v45 = vpop.f32.mrf.mxu3  ;;  %4933 = vmatmul.bf16.gmra.mxu2 %v4785_v48 }
 0x2a2   : > { %v5330_v1 = vadd.f32 %v5269_v45, %v4952_v58  ;;  %v4181_v16 = vpop.f32.mrf.mxu1 }
 0x2a3   : > { %v4239_v62 = vadd.f32 %v4181_v16, %v8379_v42 }
 0x2a4   : > { %v6076_v14 = vadd.f32 %v6015_v63, %v5330_v1  ;;  %v4894_v61 = vpop.f32.mrf.mxu2 }
 0x2a5   : > { %v4953_v28 = vadd.f32 %v4894_v61, %v4238_v25 }
 0x2a6   : > { %v7322_v50 = vpack.c.bf16 %v6076_v14, %v6075_v8  ;;  %v6235_v21 = vadd.f32 %v6234_v46, %v6076_v14  ;;  %v6274_v0 = vmul.f32 %v6076_v14, %v6076_v14  ;;  %5311 = vmatmul.bf16.gmra.mxu3 %v7208_v17  ;;  %v6018_v18 = vpop.f32.mrf.mxu0 }
 0x2a8   : > { %7389 = vst [vmem:[%s8769_s20 + $0x30] sm:$0xff] %v7322_v50   ;;  %v6305_v53 = vadd.f32 %v6304_v22, %v6274_v0 }
 0x2a9   : > { %v5272_v9 = vpop.f32.mrf.mxu3  ;;  %6057 = vmatmul.bf16.gmra.mxu0 %v5909_v56 }
 0x2aa   : > { %v5331_v40 = vadd.f32 %v5272_v9, %v4953_v28  ;;  %v4184_v24 = vpop.f32.mrf.mxu1 }
 0x2ab   : > { %v4240_v7 = vadd.f32 %v4184_v24, %v8422_v23 }
 0x2ac   : > { %v6077_v49 = vadd.f32 %v6018_v18, %v5331_v40  ;;  %v4896_v6 = vpop.f32.mrf.mxu2 }
 0x2ad   : > { %v4954_v4 = vadd.f32 %v4896_v6, %v4239_v62 }
 0x2ae   : > { %v6236_v11 = vadd.f32 %v6235_v21, %v6077_v49  ;;  %v6275_v52 = vmul.f32 %v6077_v49, %v6077_v49  ;;  %v6020_v29 = vpop.f32.mrf.mxu0 }
 0x2b0   : > { %v6306_v33 = vadd.f32 %v6305_v53, %v6275_v52 }
 0x2b1   : > { %v5274_v59 = vpop.f32.mrf.mxu3 }
 0x2b2   : > { %v5332_v35 = vadd.f32 %v5274_v59, %v4954_v4  ;;  %v4186_v12 = vpop.f32.mrf.mxu1 }
 0x2b3   : > { %v4241_v47 = vadd.f32 %v4186_v12, %v8431_v60 }
 0x2b4   : > { %v6078_v31 = vadd.f32 %v6020_v29, %v5332_v35  ;;  %v4899_v43 = vpop.f32.mrf.mxu2 }
 0x2b5   : > { %v4955_v8 = vadd.f32 %v4899_v43, %v4240_v7 }
 0x2b6   : > { %v7327_v32 = vpack.c.bf16 %v6078_v31, %v6077_v49  ;;  %v6237_v34 = vadd.f32 %v6236_v11, %v6078_v31  ;;  %v6276_v57 = vmul.f32 %v6078_v31, %v6078_v31  ;;  %v6023_v27 = vpop.f32.mrf.mxu0 }
 0x2b8   : > { %7390 = vst [vmem:[%s8769_s20 + $0x38] sm:$0xff] %v7327_v32   ;;  %v6307_v42 = vadd.f32 %v6306_v33, %v6276_v57 }
 0x2b9   : > { %v5277_v3 = vpop.f32.mrf.mxu3 }
 0x2ba   : > { %v5333_v48 = vadd.f32 %v5277_v3, %v4955_v8  ;;  %v4189_v36 = vpop.f32.mrf.mxu1 }
 0x2bb   : > { %v4242_v16 = vadd.f32 %v4189_v36, %v8465_v37 }
 0x2bc   : > { %v6079_v46 = vadd.f32 %v6023_v27, %v5333_v48  ;;  %v4901_v58 = vpop.f32.mrf.mxu2 }
 0x2bd   : > { %v4956_v22 = vadd.f32 %v4901_v58, %v4241_v47 }
 0x2be   : > { %v6238_v44 = vadd.f32 %v6237_v34, %v6079_v46  ;;  %v6277_v63 = vmul.f32 %v6079_v46, %v6079_v46  ;;  %v6025_v23 = vpop.f32.mrf.mxu0 }
 0x2c0   : > { %v6308_v45 = vadd.f32 %v6307_v42, %v6277_v63 }
 0x2c1   : > { %v5279_v41 = vpop.f32.mrf.mxu3 }
 0x2c2   : > { %v5334_v54 = vadd.f32 %v5279_v41, %v4956_v22  ;;  %v4191_v1 = vpop.f32.mrf.mxu1 }
 0x2c3   : > { %v4243_v9 = vadd.f32 %v4191_v1, %v8474_v39 }
 0x2c4   : > { %v6080_v17 = vadd.f32 %v6025_v23, %v5334_v54  ;;  %v4904_v14 = vpop.f32.mrf.mxu2 }
 0x2c5   : > { %v4957_v50 = vadd.f32 %v4904_v14, %v4242_v16 }
 0x2c6   : > { %v7332_v25 = vpack.c.bf16 %v6080_v17, %v6079_v46  ;;  %v6239_v61 = vadd.f32 %v6238_v44, %v6080_v17  ;;  %v6278_v56 = vmul.f32 %v6080_v17, %v6080_v17  ;;  %v6028_v21 = vpop.f32.mrf.mxu0 }
 0x2c8   : > { %7391 = vst [vmem:[%s8769_s20 + $0x40] sm:$0xff] %v7332_v25   ;;  %v6309_v60 = vadd.f32 %v6308_v45, %v6278_v56 }
 0x2c9   : > { %v5282_v0 = vpop.f32.mrf.mxu3 }
 0x2ca   : > { %v5335_v28 = vadd.f32 %v5282_v0, %v4957_v50  ;;  %v4194_v18 = vpop.f32.mrf.mxu1 }
 0x2cb   : > { %v4244_v33 = vadd.f32 %v4194_v18, %v8508_v55 }
 0x2cc   : > { %v6081_v53 = vadd.f32 %v6028_v21, %v5335_v28  ;;  %v4906_v40 = vpop.f32.mrf.mxu2 }
 0x2cd   : > { %v4958_v62 = vadd.f32 %v4906_v40, %v4243_v9 }
 0x2ce   : > { %v6240_v24 = vadd.f32 %v6239_v61, %v6081_v53  ;;  %v6279_v49 = vmul.f32 %v6081_v53, %v6081_v53  ;;  %v6030_v37 = vpop.f32.mrf.mxu0 }
 0x2d0   : > { %v6310_v6 = vadd.f32 %v6309_v60, %v6279_v49 }
 0x2d1   : > { %v5284_v11 = vpop.f32.mrf.mxu3 }
 0x2d2   : > { %v5336_v52 = vadd.f32 %v5284_v11, %v4958_v62  ;;  %v4196_v4 = vpop.f32.mrf.mxu1 }
 0x2d3   : > { %v4245_v27 = vadd.f32 %v4196_v4, %v8517_v2 }
 0x2d4   : > { %v6082_v29 = vadd.f32 %v6030_v37, %v5336_v52  ;;  %v4909_v59 = vpop.f32.mrf.mxu2 }
 0x2d5   : > { %v4959_v7 = vadd.f32 %v4909_v59, %v4244_v33 }
 0x2d6   : > { %v7337_v35 = vpack.c.bf16 %v6082_v29, %v6081_v53  ;;  %v6241_v12 = vadd.f32 %v6240_v24, %v6082_v29  ;;  %v6280_v31 = vmul.f32 %v6082_v29, %v6082_v29  ;;  %v6033_v43 = vpop.f32.mrf.mxu0 }
 0x2d8   : > { %7392 = vst [vmem:[%s8769_s20 + $0x48] sm:$0xff] %v7337_v35   ;;  %v6311_v39 = vadd.f32 %v6310_v6, %v6280_v31 }
 0x2d9   : > { %v5287_v32 = vpop.f32.mrf.mxu3 }
 0x2da   : > { %v5337_v34 = vadd.f32 %v5287_v32, %v4959_v7  ;;  %v4199_v57 = vpop.f32.mrf.mxu1 }
 0x2db   : > { %v4246_v22 = vadd.f32 %v4199_v57, %v8551_v30 }
 0x2dc   : > { %v6083_v8 = vadd.f32 %v6033_v43, %v5337_v34  ;;  %v4911_v42 = vpop.f32.mrf.mxu2 }
 0x2dd   : > { %v4960_v36 = vadd.f32 %v4911_v42, %v4245_v27 }
 0x2de   : > { %v6242_v3 = vadd.f32 %v6241_v12, %v6083_v8  ;;  %v6281_v48 = vmul.f32 %v6083_v8, %v6083_v8  ;;  %v6035_v55 = vpop.f32.mrf.mxu0 }
 0x2e0   : > { %v6312_v46 = vadd.f32 %v6311_v39, %v6281_v48 }
 0x2e1   : > { %v5289_v47 = vpop.f32.mrf.mxu3 }
 0x2e2   : > { %v5338_v58 = vadd.f32 %v5289_v47, %v4960_v36  ;;  %v4201_v44 = vpop.f32.mrf.mxu1 }
 0x2e3   : > { %v4247_v56 = vadd.f32 %v4201_v44, %v8560_v10 }
 0x2e4   : > { %v6084_v63 = vadd.f32 %v6035_v55, %v5338_v58  ;;  %v4914_v23 = vpop.f32.mrf.mxu2 }
 0x2e5   : > { %v4961_v1 = vadd.f32 %v4914_v23, %v4246_v22 }
 0x2e6   : > { %v7342_v45 = vpack.c.bf16 %v6084_v63, %v6083_v8  ;;  %v6243_v41 = vadd.f32 %v6242_v3, %v6084_v63  ;;  %v6282_v54 = vmul.f32 %v6084_v63, %v6084_v63  ;;  %v6038_v17 = vpop.f32.mrf.mxu0 }
 0x2e8   : > { %7393 = vst [vmem:[%s8769_s20 + $0x50] sm:$0xff] %v7342_v45   ;;  %v6313_v2 = vadd.f32 %v6312_v46, %v6282_v54 }
 0x2e9   : > { %v5292_v16 = vpop.f32.mrf.mxu3 }
 0x2ea   : > { %v5339_v14 = vadd.f32 %v5292_v16, %v4961_v1  ;;  %v4204_v25 = vpop.f32.mrf.mxu1 }
 0x2eb   : > { %v4248_v24 = vadd.f32 %v4204_v25, %v8594_v5 }
 0x2ec   : > { %v6085_v61 = vadd.f32 %v6038_v17, %v5339_v14  ;;  %v4916_v50 = vpop.f32.mrf.mxu2 }
 0x2ed   : > { %v4962_v0 = vadd.f32 %v4916_v50, %v4247_v56 }
 0x2ee   : > { %v6244_v21 = vadd.f32 %v6243_v41, %v6085_v61  ;;  %v6283_v60 = vmul.f32 %v6085_v61, %v6085_v61  ;;  %v6040_v30 = vpop.f32.mrf.mxu0 }
 0x2f0   : > { %v6314_v28 = vadd.f32 %v6313_v2, %v6283_v60 }
 0x2f1   : > { %v5294_v18 = vpop.f32.mrf.mxu3 }
 0x2f2   : > { %v5340_v53 = vadd.f32 %v5294_v18, %v4962_v0  ;;  %v4206_v9 = vpop.f32.mrf.mxu1 }
 0x2f3   : > { %v4249_v35 = vadd.f32 %v4206_v9, %v8601_v15 }
 0x2f4   : > { %v6086_v40 = vadd.f32 %v6040_v30, %v5340_v53  ;;  %v4919_v49 = vpop.f32.mrf.mxu2 }
 0x2f5   : > { %v4963_v11 = vadd.f32 %v4919_v49, %v4248_v24 }
 0x2f6   : > { %v7347_v62 = vpack.c.bf16 %v6086_v40, %v6085_v61  ;;  %v6245_v37 = vadd.f32 %v6244_v21, %v6086_v40  ;;  %v6284_v6 = vmul.f32 %v6086_v40, %v6086_v40  ;;  %v6043_v52 = vpop.f32.mrf.mxu0 }
 0x2f8   : > { %7394 = vst [vmem:[%s8769_s20 + $0x58] sm:$0xff] %v7347_v62   ;;  %v6315_v10 = vadd.f32 %v6314_v28, %v6284_v6 }
 0x2f9   : > { %v5297_v4 = vpop.f32.mrf.mxu3 }
 0x2fa   : > { %v5341_v29 = vadd.f32 %v5297_v4, %v4963_v11  ;;  %v4209_v33 = vpop.f32.mrf.mxu1 }
 0x2fb   : > { %v4250_v27 = vadd.f32 %v4209_v33, %v8633_v38 }
 0x2fc   : > { %v6087_v59 = vadd.f32 %v6043_v52, %v5341_v29  ;;  %v4921_v12 = vpop.f32.mrf.mxu2 }
 0x2fd   : > { %v4964_v43 = vadd.f32 %v4921_v12, %v4249_v35 }
 0x2fe   : > { %v6246_v31 = vadd.f32 %v6245_v37, %v6087_v59  ;;  %v6285_v7 = vmul.f32 %v6087_v59, %v6087_v59  ;;  %v6045_v5 = vpop.f32.mrf.mxu0 }
 0x300   : > { %v6316_v39 = vadd.f32 %v6315_v10, %v6285_v7 }
 0x301   : > { %v5299_v32 = vpop.f32.mrf.mxu3 }
 0x302   : > { %v5342_v34 = vadd.f32 %v5299_v32, %v4964_v43  ;;  %v4211_v57 = vpop.f32.mrf.mxu1 }
 0x303   : > { %v4251_v22 = vadd.f32 %v4211_v57, %v8642_v20 }
 0x304   : > { %v6088_v8 = vadd.f32 %v6045_v5, %v5342_v34  ;;  %v4924_v42 = vpop.f32.mrf.mxu2 }
 0x305   : > { %v4965_v55 = vadd.f32 %v4924_v42, %v4250_v27 }
 0x306   : > { %v7352_v3 = vpack.c.bf16 %v6088_v8, %v6087_v59  ;;  %v6247_v48 = vadd.f32 %v6246_v31, %v6088_v8  ;;  %v6286_v36 = vmul.f32 %v6088_v8, %v6088_v8  ;;  %v6048_v46 = vpop.f32.mrf.mxu0 }
 0x308   : > { %7395 = vst [vmem:[%s8769_s20 + $0x60] sm:$0xff] %v7352_v3   ;;  %v6317_v15 = vadd.f32 %v6316_v39, %v6286_v36 }
 0x309   : > { %v5302_v47 = vpop.f32.mrf.mxu3 }
 0x30a   : > { %v5343_v58 = vadd.f32 %v5302_v47, %v4965_v55  ;;  %v4214_v44 = vpop.f32.mrf.mxu1 }
 0x30b   : > { %v4252_v14 = vadd.f32 %v4214_v44, %v8687_v26 }
 0x30c   : > { %v6089_v63 = vadd.f32 %v6048_v46, %v5343_v58  ;;  %v4926_v23 = vpop.f32.mrf.mxu2 }
 0x30d   : > { %v4966_v54 = vadd.f32 %v4926_v23, %v4251_v22 }
 0x30e   : > { %v6248_v45 = vadd.f32 %v6247_v48, %v6089_v63  ;;  %v6287_v41 = vmul.f32 %v6089_v63, %v6089_v63  ;;  %v6050_v38 = vpop.f32.mrf.mxu0 }
 0x310   : > { %v6318_v1 = vadd.f32 %v6317_v15, %v6287_v41 }
 0x311   : > { %v5304_v17 = vpop.f32.mrf.mxu3 }
 0x312   : > { %v5344_v2 = vadd.f32 %v5304_v17, %v4966_v54  ;;  %v4216_v61 = vpop.f32.mrf.mxu1 }
 0x313   : > { %v4253_v53 = vadd.f32 %v4216_v61, %v8697_v19 }
 0x314   : > { %v6090_v16 = vadd.f32 %v6050_v38, %v5344_v2  ;;  %v4929_v25 = vpop.f32.mrf.mxu2 }
 0x315   : > { %v4967_v60 = vadd.f32 %v4929_v25, %v4252_v14 }
 0x316   : > { %v7357_v56 = vpack.c.bf16 %v6090_v16, %v6089_v63  ;;  %v6249_v50 = vadd.f32 %v6248_v45, %v6090_v16  ;;  %v6288_v21 = vmul.f32 %v6090_v16, %v6090_v16  ;;  %v6053_v0 = vpop.f32.mrf.mxu0 }
 0x318   : > { %7396 = vst [vmem:[%s8769_s20 + $0x68] sm:$0xff] %v7357_v56   ;;  %v6319_v20 = vadd.f32 %v6318_v1, %v6288_v21 }
 0x319   : > { %v5307_v30 = vpop.f32.mrf.mxu3 }
 0x31a   : > { %v5345_v28 = vadd.f32 %v5307_v30, %v4967_v60  ;;  %v4219_v26 = vpop.f32.mrf.mxu1 }
 0x31b   : > { %v4254_v10 = vadd.f32 %v4219_v26, %v8730_v13 }
 0x31c   : > { %v6091_v18 = vadd.f32 %v6053_v0, %v5345_v28  ;;  %v4931_v9 = vpop.f32.mrf.mxu2 }
 0x31d   : > { %v4968_v49 = vadd.f32 %v4931_v9, %v4253_v53 }
 0x31e   : > { %v6250_v40 = vadd.f32 %v6249_v50, %v6091_v18  ;;  %v6289_v24 = vmul.f32 %v6091_v18, %v6091_v18  ;;  %v6055_v62 = vpop.f32.mrf.mxu0 }
 0x320   : > { %v6320_v37 = vadd.f32 %v6319_v20, %v6289_v24 }
 0x321   : > { %v5309_v6 = vpop.f32.mrf.mxu3 }
 0x322   : > { %v5346_v11 = vadd.f32 %v5309_v6, %v4968_v49  ;;  %v4221_v12 = vpop.f32.mrf.mxu1 }
 0x323   : > { %v4255_v39 = vadd.f32 %v4221_v12, %v8740_v51 }
 0x324   : > { %v6092_v52 = vadd.f32 %v6055_v62, %v5346_v11  ;;  %v4934_v4 = vpop.f32.mrf.mxu2 }
 0x325   : > { %v4969_v35 = vadd.f32 %v4934_v4, %v4254_v10 }
 0x326   : > { %v7362_v29 = vpack.c.bf16 %v6092_v52, %v6091_v18  ;;  %v6251_v33 = vadd.f32 %v6250_v40, %v6092_v52  ;;  %v6290_v59 = vmul.f32 %v6092_v52, %v6092_v52  ;;  %v6058_v31 = vpop.f32.mrf.mxu0 }
 0x328   : > { %7397 = vst [vmem:[%s8769_s20 + $0x70] sm:$0xff] %v7362_v29   ;;  %v6321_v19 = vadd.f32 %v6320_v37, %v6290_v59 }
 0x329   : > { %v5312_v7 = vpop.f32.mrf.mxu3 }
 0x32a   : > { %v5347_v43 = vadd.f32 %v5312_v7, %v4969_v35 }
 0x32c   : > { %v6093_v5 = vadd.f32 %v6058_v31, %v5347_v43  ;;  %v4936_v32 = vpop.f32.mrf.mxu2 }
 0x32d   : > { %v4970_v8 = vadd.f32 %v4936_v32, %v4255_v39 }
 0x32e   : > { %v6252_v34 = vadd.f32 %v6251_v33, %v6093_v5  ;;  %v6291_v57 = vmul.f32 %v6093_v5, %v6093_v5  ;;  %v6060_v3 = vpop.f32.mrf.mxu0 }
 0x330   : > { %v6322_v13 = vadd.f32 %v6321_v19, %v6291_v57 }
 0x331   : > { %v5314_v27 = vpop.f32.mrf.mxu3 }
 0x332   : > { %v5348_v42 = vadd.f32 %v5314_v27, %v4970_v8 }
 0x334   : > { %v6094_v48 = vadd.f32 %v6060_v3, %v5348_v42 }
 0x336   : > { %v7367_v36 = vpack.c.bf16 %v6094_v48, %v6093_v5  ;;  %v6253_v55 = vadd.f32 %v6252_v34, %v6094_v48  ;;  %v6292_v46 = vmul.f32 %v6094_v48, %v6094_v48 }
 0x338   : > { %7398 = vst [vmem:[%s8769_s20 + $0x78] sm:$0xff] %v7367_v36   ;;  %v6254_v15 = vrot.slane %v6253_v55, 4  ;;  %v6323_v47 = vadd.f32 %v6322_v13, %v6292_v46 }
 0x33a   : > { %v6255_v58 = vadd.f32 %v6254_v15, %v6253_v55  ;;  %v6324_v44 = vrot.slane %v6323_v47, 4 }
 0x33c   : > { %v6256_v51 = vrot.slane %v6255_v58, 2  ;;  %v6325_v63 = vadd.f32 %v6324_v44, %v6323_v47 }
 0x33e   : > { %v6257_v22 = vadd.f32 %v6256_v51, %v6255_v58  ;;  %v6326_v23 = vrot.slane %v6325_v63, 2 }
 0x340   : > { %v6258_v45 = vrot.slane %v6257_v22, 1  ;;  %v6327_v41 = vadd.f32 %v6326_v23, %v6325_v63 }
 0x342   : > { %v6259_v54 = vadd.f32 %v6258_v45, %v6257_v22  ;;  %v6328_v38 = vrot.slane %v6327_v41, 1 }
 0x344   : > { %6260 = vst [vmem:[%s265_s24] sm:$0x1] %v6259_v54  ;;  %v6329_v1 = vadd.f32 %v6328_v38, %v6327_v41 }
 0x346   : > { %6330 = vst [vmem:[%s268_s28] sm:$0x1] %v6329_v1 }
 0x347 PF: > { %s17_s21 = sadd.s32 1, %s7444_s21  }
 0x348   : > { %p14_p4 = scmp.ge.s32.totalorder %s17_s21, 4  }
 0x34a   :  { %16 = sbr.rel (!%p14_p4) target bundleno = 1 (0x1), region = 100 }

</bundles_post_ra>
